<compile_context>
chip_gen: v7x
topology: tpu7x:2x2x1
jax: 0.10.0
libtpu: 0.0.40
codegen_flags: <defaults>
</compile_context>

<pallas_src>
import functools

import jax
import jax.numpy as jnp
import numpy as np
from jax import lax
from jax.experimental import pallas as pl
from jax.experimental.pallas import tpu as pltpu


# ----------------------------- Pallas kernel --------------------------------

def _gauss_level_kernel(w_ref, ph_ref, o_ref):
    """One pyramid level for one sample (3x3 conv, stride 2, zero pad 1).

    w_ref : SMEM (C*C*9,)             flattened conv weights w[co, ci, kh, kw]
    ph_ref: VMEM (1, 4*C, OH+1, OW+1) stride-2 phase planes of the zero-padded input;
                                      channel index = (ph*2 + pw)*C + ci, where
                                      plane[i, j] == xpad[2*i + ph, 2*j + pw]
    o_ref : VMEM (1, C, OH, OW)       NCHW output block

    tap(kh, kw)[oh, ow] = xpad[2*oh + kh, 2*ow + kw]
                        = phase[kh%2, kw%2][oh + kh//2, ow + kw//2]
    so every tap is a *contiguous* slice of a resident phase plane — no strided
    loads, no HBM taps tensor.
    """
    _, C, OH, OW = o_ref.shape
    acc = [jnp.zeros((OH, OW), jnp.float32) for _ in range(C)]

    for ci in range(C):
        for p in range(4):                       # parity phase (ph, pw)
            ph, pw = p // 2, p % 2
            plane = ph_ref[0, p * C + ci].astype(jnp.float32)   # (OH+1, OW+1)
            for kh in range(ph, 3, 2):           # kernel rows with kh % 2 == ph
                dh = kh // 2
                for kw in range(pw, 3, 2):       # kernel cols with kw % 2 == pw
                    dw = kw // 2
                    tap = plane[dh:dh + OH, dw:dw + OW]          # (OH, OW)
                    for co in range(C):
                        w = w_ref[((co * C + ci) * 3 + kh) * 3 + kw]   # SMEM scalar
                        acc[co] = acc[co] + w * tap

    for co in range(C):
        o_ref[0, co, :, :] = acc[co].astype(o_ref.dtype)


# ------------------------------ one pyramid level ----------------------------

def _downsample(x, w_flat, taps_dtype=None):
    """conv2d(x, kernel, stride=2, padding=1) on an NCHW image, NCHW out."""
    N, C, H, W = x.shape
    OH, OW = (H + 1) // 2, (W + 1) // 2

    # XLA glue: zero pad + de-interleave into 4 stride-2 parity planes with a one-row/
    # one-col halo (~1.1x image bytes, vs. the old 2.25x taps materialisation).
    xpad = jnp.pad(x, ((0, 0), (0, 0), (1, 1), (1, 1)))
    views = []
    for ph in (0, 1):
        for pw in (0, 1):
            v = xpad[:, :, ph::2, pw::2][:, :, :OH + 1, :OW + 1]
            pr, pc = OH + 1 - v.shape[2], OW + 1 - v.shape[3]
            if pr or pc:                         # unused halo entries, zero-filled
                v = jnp.pad(v, ((0, 0), (0, 0), (0, pr), (0, pc)))
            views.append(v)
    phases = jnp.stack(views, axis=1).reshape(N, 4 * C, OH + 1, OW + 1)
    if taps_dtype is not None:                   # optional bf16 streaming (review #7)
        phases = phases.astype(taps_dtype)

    return pl.pallas_call(
        _gauss_level_kernel,
        out_shape=jax.ShapeDtypeStruct((N, C, OH, OW), x.dtype),
        grid=(N,),
        in_specs=[
            pl.BlockSpec(memory_space=pltpu.MemorySpace.SMEM),            # weights
            pl.BlockSpec((1, 4 * C, OH + 1, OW + 1), lambda n: (n, 0, 0, 0)),
        ],
        out_specs=pl.BlockSpec((1, C, OH, OW), lambda n: (n, 0, 0, 0)),
        compiler_params=pltpu.CompilerParams(
            dimension_semantics=("parallel",),
            vmem_limit_bytes=32 * 1024 * 1024,
        ),
    )(w_flat, phases)


# ------------------------------- forward pass --------------------------------

@functools.partial(jax.jit, static_argnames=("levels", "taps_dtype"))
def gaussian_pyramid(x, kernel, levels=5, taps_dtype=None):
    """Equivalent of GaussianPyramid.forward. x: (N, C, H, W); kernel: (C, C, 3, 3)."""
    N, C, H, W = x.shape
    w_flat = kernel.reshape(C * C * 9).astype(jnp.float32)   # [co, ci, kh, kw] flat

    feature_maps = [x]                       # level 0: the input itself (NCHW)
    img = x
    for _ in range(levels - 1):
        img = _downsample(img, w_flat, taps_dtype=taps_dtype)
        feature_maps.append(img)             # already NCHW, no per-level transpose
    return feature_maps[::-1]


# ---------------------- pure-lax reference (for checking) --------------------

def _reference_pyramid(x, kernel, levels):
    dn = ('NCHW', 'OIHW', 'NCHW')
    feature_maps = [x]
    img = x
    for _ in range(levels - 1):
        img = lax.conv_general_dilated(img, kernel, window_strides=(2, 2),
                                       padding=((1, 1), (1, 1)), dimension_numbers=dn)
        feature_maps.append(img)
    return feature_maps[::-1]


# ----------------------------------- main ------------------------------------

if __name__ == "__main__":
    key = jax.random.PRNGKey(0)
    N, C, H, W = 2, 4, 16, 16
    levels = 5                      # num_pyramids in the PyTorch module
    x = jax.random.normal(key, (N, C, H, W), dtype=jnp.float32)

    # Deterministic (C, C, 3, 3) pyramid kernel: per-channel [1,2,1]x[1,2,1]/16 Gaussian
    # plus a small deterministic cross-channel mix to exercise the channel contraction.
    g1 = jnp.array([1.0, 2.0, 1.0], dtype=jnp.float32)
    g2 = jnp.outer(g1, g1) / 16.0
    eye = jnp.eye(C, dtype=jnp.float32)
    mix = (jnp.arange(C * C, dtype=jnp.float32).reshape(C, C) % 3 - 1.0) * 0.01
    kernel = (eye + mix)[:, :, None, None] * g2[None, None, :, :]

    outs = jax.block_until_ready(gaussian_pyramid(x, kernel, levels=levels))
    refs = _reference_pyramid(x, kernel, levels)

    assert len(outs) == levels
    for o, r in zip(outs, refs):
        assert o.shape == r.shape, (o.shape, r.shape)
        np.testing.assert_allclose(np.asarray(o), np.asarray(r), rtol=1e-4, atol=1e-4)

    print("KERNEL_OK")
</pallas_src>

<mosaic_0001>
module attributes {stable_mosaic.version = 11 : i64} {
  func.func @_gauss_level_kernel(%arg0: i32, %arg1: memref<144xf32, #tpu.memory_space<smem>>, %arg2: memref<1x16x9x9xf32, #tpu.memory_space<vmem>>, %arg3: memref<1x4x8x8xf32, #tpu.memory_space<vmem>>) attributes {dimension_semantics = [#tpu.dimension_semantics<parallel>], iteration_bounds = array<i64: 2>, scalar_prefetch = 0 : i64, scratch_operands = 0 : i64, tpu.core_type = #tpu.core_type<tc>, window_params = [{transform_indices = @transform_0, window_bounds = array<i64: 144>}, {transform_indices = @transform_1, window_bounds = array<i64: 1, 16, 9, 9>}, {transform_indices = @transform_2, window_bounds = array<i64: 1, 4, 8, 8>}]} {
    %cst = arith.constant 0.000000e+00 : f32
    %0 = vector.broadcast %cst : f32 to vector<8x8xf32>
    %cst_0 = arith.constant 0.000000e+00 : f32
    %1 = vector.broadcast %cst_0 : f32 to vector<8x8xf32>
    %cst_1 = arith.constant 0.000000e+00 : f32
    %2 = vector.broadcast %cst_1 : f32 to vector<8x8xf32>
    %cst_2 = arith.constant 0.000000e+00 : f32
    %3 = vector.broadcast %cst_2 : f32 to vector<8x8xf32>
    %c0 = arith.constant 0 : index
    %c0_3 = arith.constant 0 : index
    %c0_4 = arith.constant 0 : index
    %c0_5 = arith.constant 0 : index
    %4 = vector.load %arg2[%c0, %c0_3, %c0_4, %c0_5] : memref<1x16x9x9xf32, #tpu.memory_space<vmem>>, vector<1x1x9x9xf32>
    %5 = vector.shape_cast %4 : vector<1x1x9x9xf32> to vector<9x9xf32>
    %6 = vector.extract_strided_slice %5 {offsets = [0, 0], sizes = [8, 8], strides = [1, 1]} : vector<9x9xf32> to vector<8x8xf32>
    %c0_6 = arith.constant 0 : index
    %7 = memref.load %arg1[%c0_6] : memref<144xf32, #tpu.memory_space<smem>>
    %8 = vector.broadcast %7 : f32 to vector<8x8xf32>
    %9 = arith.mulf %8, %6 : vector<8x8xf32>
    %10 = arith.addf %0, %9 : vector<8x8xf32>
    %c36 = arith.constant 36 : index
    %11 = memref.load %arg1[%c36] : memref<144xf32, #tpu.memory_space<smem>>
    %12 = vector.broadcast %11 : f32 to vector<8x8xf32>
    %13 = arith.mulf %12, %6 : vector<8x8xf32>
    %14 = arith.addf %1, %13 : vector<8x8xf32>
    %c72 = arith.constant 72 : index
    %15 = memref.load %arg1[%c72] : memref<144xf32, #tpu.memory_space<smem>>
    %16 = vector.broadcast %15 : f32 to vector<8x8xf32>
    %17 = arith.mulf %16, %6 : vector<8x8xf32>
    %18 = arith.addf %2, %17 : vector<8x8xf32>
    %c108 = arith.constant 108 : index
    %19 = memref.load %arg1[%c108] : memref<144xf32, #tpu.memory_space<smem>>
    %20 = vector.broadcast %19 : f32 to vector<8x8xf32>
    %21 = arith.mulf %20, %6 : vector<8x8xf32>
    %22 = arith.addf %3, %21 : vector<8x8xf32>
    %23 = vector.extract_strided_slice %5 {offsets = [0, 1], sizes = [8, 8], strides = [1, 1]} : vector<9x9xf32> to vector<8x8xf32>
    %c2 = arith.constant 2 : index
    %24 = memref.load %arg1[%c2] : memref<144xf32, #tpu.memory_space<smem>>
    %25 = vector.broadcast %24 : f32 to vector<8x8xf32>
    %26 = arith.mulf %25, %23 : vector<8x8xf32>
    %27 = arith.addf %10, %26 : vector<8x8xf32>
    %c38 = arith.constant 38 : index
    %28 = memref.load %arg1[%c38] : memref<144xf32, #tpu.memory_space<smem>>
    %29 = vector.broadcast %28 : f32 to vector<8x8xf32>
    %30 = arith.mulf %29, %23 : vector<8x8xf32>
    %31 = arith.addf %14, %30 : vector<8x8xf32>
    %c74 = arith.constant 74 : index
    %32 = memref.load %arg1[%c74] : memref<144xf32, #tpu.memory_space<smem>>
    %33 = vector.broadcast %32 : f32 to vector<8x8xf32>
    %34 = arith.mulf %33, %23 : vector<8x8xf32>
    %35 = arith.addf %18, %34 : vector<8x8xf32>
    %c110 = arith.constant 110 : index
    %36 = memref.load %arg1[%c110] : memref<144xf32, #tpu.memory_space<smem>>
    %37 = vector.broadcast %36 : f32 to vector<8x8xf32>
    %38 = arith.mulf %37, %23 : vector<8x8xf32>
    %39 = arith.addf %22, %38 : vector<8x8xf32>
    %40 = vector.extract_strided_slice %5 {offsets = [1, 0], sizes = [8, 8], strides = [1, 1]} : vector<9x9xf32> to vector<8x8xf32>
    %c6 = arith.constant 6 : index
    %41 = memref.load %arg1[%c6] : memref<144xf32, #tpu.memory_space<smem>>
    %42 = vector.broadcast %41 : f32 to vector<8x8xf32>
    %43 = arith.mulf %42, %40 : vector<8x8xf32>
    %44 = arith.addf %27, %43 : vector<8x8xf32>
    %c42 = arith.constant 42 : index
    %45 = memref.load %arg1[%c42] : memref<144xf32, #tpu.memory_space<smem>>
    %46 = vector.broadcast %45 : f32 to vector<8x8xf32>
    %47 = arith.mulf %46, %40 : vector<8x8xf32>
    %48 = arith.addf %31, %47 : vector<8x8xf32>
    %c78 = arith.constant 78 : index
    %49 = memref.load %arg1[%c78] : memref<144xf32, #tpu.memory_space<smem>>
    %50 = vector.broadcast %49 : f32 to vector<8x8xf32>
    %51 = arith.mulf %50, %40 : vector<8x8xf32>
    %52 = arith.addf %35, %51 : vector<8x8xf32>
    %c114 = arith.constant 114 : index
    %53 = memref.load %arg1[%c114] : memref<144xf32, #tpu.memory_space<smem>>
    %54 = vector.broadcast %53 : f32 to vector<8x8xf32>
    %55 = arith.mulf %54, %40 : vector<8x8xf32>
    %56 = arith.addf %39, %55 : vector<8x8xf32>
    %57 = vector.extract_strided_slice %5 {offsets = [1, 1], sizes = [8, 8], strides = [1, 1]} : vector<9x9xf32> to vector<8x8xf32>
    %c8 = arith.constant 8 : index
    %58 = memref.load %arg1[%c8] : memref<144xf32, #tpu.memory_space<smem>>
    %59 = vector.broadcast %58 : f32 to vector<8x8xf32>
    %60 = arith.mulf %59, %57 : vector<8x8xf32>
    %61 = arith.addf %44, %60 : vector<8x8xf32>
    %c44 = arith.constant 44 : index
    %62 = memref.load %arg1[%c44] : memref<144xf32, #tpu.memory_space<smem>>
    %63 = vector.broadcast %62 : f32 to vector<8x8xf32>
    %64 = arith.mulf %63, %57 : vector<8x8xf32>
    %65 = arith.addf %48, %64 : vector<8x8xf32>
    %c80 = arith.constant 80 : index
    %66 = memref.load %arg1[%c80] : memref<144xf32, #tpu.memory_space<smem>>
    %67 = vector.broadcast %66 : f32 to vector<8x8xf32>
    %68 = arith.mulf %67, %57 : vector<8x8xf32>
    %69 = arith.addf %52, %68 : vector<8x8xf32>
    %c116 = arith.constant 116 : index
    %70 = memref.load %arg1[%c116] : memref<144xf32, #tpu.memory_space<smem>>
    %71 = vector.broadcast %70 : f32 to vector<8x8xf32>
    %72 = arith.mulf %71, %57 : vector<8x8xf32>
    %73 = arith.addf %56, %72 : vector<8x8xf32>
    %c0_7 = arith.constant 0 : index
    %c4 = arith.constant 4 : index
    %c0_8 = arith.constant 0 : index
    %c0_9 = arith.constant 0 : index
    %74 = vector.load %arg2[%c0_7, %c4, %c0_8, %c0_9] : memref<1x16x9x9xf32, #tpu.memory_space<vmem>>, vector<1x1x9x9xf32>
    %75 = vector.shape_cast %74 : vector<1x1x9x9xf32> to vector<9x9xf32>
    %76 = vector.extract_strided_slice %75 {offsets = [0, 0], sizes = [8, 8], strides = [1, 1]} : vector<9x9xf32> to vector<8x8xf32>
    %c1 = arith.constant 1 : index
    %77 = memref.load %arg1[%c1] : memref<144xf32, #tpu.memory_space<smem>>
    %78 = vector.broadcast %77 : f32 to vector<8x8xf32>
    %79 = arith.mulf %78, %76 : vector<8x8xf32>
    %80 = arith.addf %61, %79 : vector<8x8xf32>
    %c37 = arith.constant 37 : index
    %81 = memref.load %arg1[%c37] : memref<144xf32, #tpu.memory_space<smem>>
    %82 = vector.broadcast %81 : f32 to vector<8x8xf32>
    %83 = arith.mulf %82, %76 : vector<8x8xf32>
    %84 = arith.addf %65, %83 : vector<8x8xf32>
    %c73 = arith.constant 73 : index
    %85 = memref.load %arg1[%c73] : memref<144xf32, #tpu.memory_space<smem>>
    %86 = vector.broadcast %85 : f32 to vector<8x8xf32>
    %87 = arith.mulf %86, %76 : vector<8x8xf32>
    %88 = arith.addf %69, %87 : vector<8x8xf32>
    %c109 = arith.constant 109 : index
    %89 = memref.load %arg1[%c109] : memref<144xf32, #tpu.memory_space<smem>>
    %90 = vector.broadcast %89 : f32 to vector<8x8xf32>
    %91 = arith.mulf %90, %76 : vector<8x8xf32>
    %92 = arith.addf %73, %91 : vector<8x8xf32>
    %93 = vector.extract_strided_slice %75 {offsets = [1, 0], sizes = [8, 8], strides = [1, 1]} : vector<9x9xf32> to vector<8x8xf32>
    %c7 = arith.constant 7 : index
    %94 = memref.load %arg1[%c7] : memref<144xf32, #tpu.memory_space<smem>>
    %95 = vector.broadcast %94 : f32 to vector<8x8xf32>
    %96 = arith.mulf %95, %93 : vector<8x8xf32>
    %97 = arith.addf %80, %96 : vector<8x8xf32>
    %c43 = arith.constant 43 : index
    %98 = memref.load %arg1[%c43] : memref<144xf32, #tpu.memory_space<smem>>
    %99 = vector.broadcast %98 : f32 to vector<8x8xf32>
    %100 = arith.mulf %99, %93 : vector<8x8xf32>
    %101 = arith.addf %84, %100 : vector<8x8xf32>
    %c79 = arith.constant 79 : index
    %102 = memref.load %arg1[%c79] : memref<144xf32, #tpu.memory_space<smem>>
    %103 = vector.broadcast %102 : f32 to vector<8x8xf32>
    %104 = arith.mulf %103, %93 : vector<8x8xf32>
    %105 = arith.addf %88, %104 : vector<8x8xf32>
    %c115 = arith.constant 115 : index
    %106 = memref.load %arg1[%c115] : memref<144xf32, #tpu.memory_space<smem>>
    %107 = vector.broadcast %106 : f32 to vector<8x8xf32>
    %108 = arith.mulf %107, %93 : vector<8x8xf32>
    %109 = arith.addf %92, %108 : vector<8x8xf32>
    %c0_10 = arith.constant 0 : index
    %c8_11 = arith.constant 8 : index
    %c0_12 = arith.constant 0 : index
    %c0_13 = arith.constant 0 : index
    %110 = vector.load %arg2[%c0_10, %c8_11, %c0_12, %c0_13] : memref<1x16x9x9xf32, #tpu.memory_space<vmem>>, vector<1x1x9x9xf32>
    %111 = vector.shape_cast %110 : vector<1x1x9x9xf32> to vector<9x9xf32>
    %112 = vector.extract_strided_slice %111 {offsets = [0, 0], sizes = [8, 8], strides = [1, 1]} : vector<9x9xf32> to vector<8x8xf32>
    %c3 = arith.constant 3 : index
    %113 = memref.load %arg1[%c3] : memref<144xf32, #tpu.memory_space<smem>>
    %114 = vector.broadcast %113 : f32 to vector<8x8xf32>
    %115 = arith.mulf %114, %112 : vector<8x8xf32>
    %116 = arith.addf %97, %115 : vector<8x8xf32>
    %c39 = arith.constant 39 : index
    %117 = memref.load %arg1[%c39] : memref<144xf32, #tpu.memory_space<smem>>
    %118 = vector.broadcast %117 : f32 to vector<8x8xf32>
    %119 = arith.mulf %118, %112 : vector<8x8xf32>
    %120 = arith.addf %101, %119 : vector<8x8xf32>
    %c75 = arith.constant 75 : index
    %121 = memref.load %arg1[%c75] : memref<144xf32, #tpu.memory_space<smem>>
    %122 = vector.broadcast %121 : f32 to vector<8x8xf32>
    %123 = arith.mulf %122, %112 : vector<8x8xf32>
    %124 = arith.addf %105, %123 : vector<8x8xf32>
    %c111 = arith.constant 111 : index
    %125 = memref.load %arg1[%c111] : memref<144xf32, #tpu.memory_space<smem>>
    %126 = vector.broadcast %125 : f32 to vector<8x8xf32>
    %127 = arith.mulf %126, %112 : vector<8x8xf32>
    %128 = arith.addf %109, %127 : vector<8x8xf32>
    %129 = vector.extract_strided_slice %111 {offsets = [0, 1], sizes = [8, 8], strides = [1, 1]} : vector<9x9xf32> to vector<8x8xf32>
    %c5 = arith.constant 5 : index
    %130 = memref.load %arg1[%c5] : memref<144xf32, #tpu.memory_space<smem>>
    %131 = vector.broadcast %130 : f32 to vector<8x8xf32>
    %132 = arith.mulf %131, %129 : vector<8x8xf32>
    %133 = arith.addf %116, %132 : vector<8x8xf32>
    %c41 = arith.constant 41 : index
    %134 = memref.load %arg1[%c41] : memref<144xf32, #tpu.memory_space<smem>>
    %135 = vector.broadcast %134 : f32 to vector<8x8xf32>
    %136 = arith.mulf %135, %129 : vector<8x8xf32>
    %137 = arith.addf %120, %136 : vector<8x8xf32>
    %c77 = arith.constant 77 : index
    %138 = memref.load %arg1[%c77] : memref<144xf32, #tpu.memory_space<smem>>
    %139 = vector.broadcast %138 : f32 to vector<8x8xf32>
    %140 = arith.mulf %139, %129 : vector<8x8xf32>
    %141 = arith.addf %124, %140 : vector<8x8xf32>
    %c113 = arith.constant 113 : index
    %142 = memref.load %arg1[%c113] : memref<144xf32, #tpu.memory_space<smem>>
    %143 = vector.broadcast %142 : f32 to vector<8x8xf32>
    %144 = arith.mulf %143, %129 : vector<8x8xf32>
    %145 = arith.addf %128, %144 : vector<8x8xf32>
    %c0_14 = arith.constant 0 : index
    %c12 = arith.constant 12 : index
    %c0_15 = arith.constant 0 : index
    %c0_16 = arith.constant 0 : index
    %146 = vector.load %arg2[%c0_14, %c12, %c0_15, %c0_16] : memref<1x16x9x9xf32, #tpu.memory_space<vmem>>, vector<1x1x9x9xf32>
    %147 = vector.shape_cast %146 : vector<1x1x9x9xf32> to vector<9x9xf32>
    %148 = vector.extract_strided_slice %147 {offsets = [0, 0], sizes = [8, 8], strides = [1, 1]} : vector<9x9xf32> to vector<8x8xf32>
    %c4_17 = arith.constant 4 : index
    %149 = memref.load %arg1[%c4_17] : memref<144xf32, #tpu.memory_space<smem>>
    %150 = vector.broadcast %149 : f32 to vector<8x8xf32>
    %151 = arith.mulf %150, %148 : vector<8x8xf32>
    %152 = arith.addf %133, %151 : vector<8x8xf32>
    %c40 = arith.constant 40 : index
    %153 = memref.load %arg1[%c40] : memref<144xf32, #tpu.memory_space<smem>>
    %154 = vector.broadcast %153 : f32 to vector<8x8xf32>
    %155 = arith.mulf %154, %148 : vector<8x8xf32>
    %156 = arith.addf %137, %155 : vector<8x8xf32>
    %c76 = arith.constant 76 : index
    %157 = memref.load %arg1[%c76] : memref<144xf32, #tpu.memory_space<smem>>
    %158 = vector.broadcast %157 : f32 to vector<8x8xf32>
    %159 = arith.mulf %158, %148 : vector<8x8xf32>
    %160 = arith.addf %141, %159 : vector<8x8xf32>
    %c112 = arith.constant 112 : index
    %161 = memref.load %arg1[%c112] : memref<144xf32, #tpu.memory_space<smem>>
    %162 = vector.broadcast %161 : f32 to vector<8x8xf32>
    %163 = arith.mulf %162, %148 : vector<8x8xf32>
    %164 = arith.addf %145, %163 : vector<8x8xf32>
    %c0_18 = arith.constant 0 : index
    %c1_19 = arith.constant 1 : index
    %c0_20 = arith.constant 0 : index
    %c0_21 = arith.constant 0 : index
    %165 = vector.load %arg2[%c0_18, %c1_19, %c0_20, %c0_21] : memref<1x16x9x9xf32, #tpu.memory_space<vmem>>, vector<1x1x9x9xf32>
    %166 = vector.shape_cast %165 : vector<1x1x9x9xf32> to vector<9x9xf32>
    %167 = vector.extract_strided_slice %166 {offsets = [0, 0], sizes = [8, 8], strides = [1, 1]} : vector<9x9xf32> to vector<8x8xf32>
    %c9 = arith.constant 9 : index
    %168 = memref.load %arg1[%c9] : memref<144xf32, #tpu.memory_space<smem>>
    %169 = vector.broadcast %168 : f32 to vector<8x8xf32>
    %170 = arith.mulf %169, %167 : vector<8x8xf32>
    %171 = arith.addf %152, %170 : vector<8x8xf32>
    %c45 = arith.constant 45 : index
    %172 = memref.load %arg1[%c45] : memref<144xf32, #tpu.memory_space<smem>>
    %173 = vector.broadcast %172 : f32 to vector<8x8xf32>
    %174 = arith.mulf %173, %167 : vector<8x8xf32>
    %175 = arith.addf %156, %174 : vector<8x8xf32>
    %c81 = arith.constant 81 : index
    %176 = memref.load %arg1[%c81] : memref<144xf32, #tpu.memory_space<smem>>
    %177 = vector.broadcast %176 : f32 to vector<8x8xf32>
    %178 = arith.mulf %177, %167 : vector<8x8xf32>
    %179 = arith.addf %160, %178 : vector<8x8xf32>
    %c117 = arith.constant 117 : index
    %180 = memref.load %arg1[%c117] : memref<144xf32, #tpu.memory_space<smem>>
    %181 = vector.broadcast %180 : f32 to vector<8x8xf32>
    %182 = arith.mulf %181, %167 : vector<8x8xf32>
    %183 = arith.addf %164, %182 : vector<8x8xf32>
    %184 = vector.extract_strided_slice %166 {offsets = [0, 1], sizes = [8, 8], strides = [1, 1]} : vector<9x9xf32> to vector<8x8xf32>
    %c11 = arith.constant 11 : index
    %185 = memref.load %arg1[%c11] : memref<144xf32, #tpu.memory_space<smem>>
    %186 = vector.broadcast %185 : f32 to vector<8x8xf32>
    %187 = arith.mulf %186, %184 : vector<8x8xf32>
    %188 = arith.addf %171, %187 : vector<8x8xf32>
    %c47 = arith.constant 47 : index
    %189 = memref.load %arg1[%c47] : memref<144xf32, #tpu.memory_space<smem>>
    %190 = vector.broadcast %189 : f32 to vector<8x8xf32>
    %191 = arith.mulf %190, %184 : vector<8x8xf32>
    %192 = arith.addf %175, %191 : vector<8x8xf32>
    %c83 = arith.constant 83 : index
    %193 = memref.load %arg1[%c83] : memref<144xf32, #tpu.memory_space<smem>>
    %194 = vector.broadcast %193 : f32 to vector<8x8xf32>
    %195 = arith.mulf %194, %184 : vector<8x8xf32>
    %196 = arith.addf %179, %195 : vector<8x8xf32>
    %c119 = arith.constant 119 : index
    %197 = memref.load %arg1[%c119] : memref<144xf32, #tpu.memory_space<smem>>
    %198 = vector.broadcast %197 : f32 to vector<8x8xf32>
    %199 = arith.mulf %198, %184 : vector<8x8xf32>
    %200 = arith.addf %183, %199 : vector<8x8xf32>
    %201 = vector.extract_strided_slice %166 {offsets = [1, 0], sizes = [8, 8], strides = [1, 1]} : vector<9x9xf32> to vector<8x8xf32>
    %c15 = arith.constant 15 : index
    %202 = memref.load %arg1[%c15] : memref<144xf32, #tpu.memory_space<smem>>
    %203 = vector.broadcast %202 : f32 to vector<8x8xf32>
    %204 = arith.mulf %203, %201 : vector<8x8xf32>
    %205 = arith.addf %188, %204 : vector<8x8xf32>
    %c51 = arith.constant 51 : index
    %206 = memref.load %arg1[%c51] : memref<144xf32, #tpu.memory_space<smem>>
    %207 = vector.broadcast %206 : f32 to vector<8x8xf32>
    %208 = arith.mulf %207, %201 : vector<8x8xf32>
    %209 = arith.addf %192, %208 : vector<8x8xf32>
    %c87 = arith.constant 87 : index
    %210 = memref.load %arg1[%c87] : memref<144xf32, #tpu.memory_space<smem>>
    %211 = vector.broadcast %210 : f32 to vector<8x8xf32>
    %212 = arith.mulf %211, %201 : vector<8x8xf32>
    %213 = arith.addf %196, %212 : vector<8x8xf32>
    %c123 = arith.constant 123 : index
    %214 = memref.load %arg1[%c123] : memref<144xf32, #tpu.memory_space<smem>>
    %215 = vector.broadcast %214 : f32 to vector<8x8xf32>
    %216 = arith.mulf %215, %201 : vector<8x8xf32>
    %217 = arith.addf %200, %216 : vector<8x8xf32>
    %218 = vector.extract_strided_slice %166 {offsets = [1, 1], sizes = [8, 8], strides = [1, 1]} : vector<9x9xf32> to vector<8x8xf32>
    %c17 = arith.constant 17 : index
    %219 = memref.load %arg1[%c17] : memref<144xf32, #tpu.memory_space<smem>>
    %220 = vector.broadcast %219 : f32 to vector<8x8xf32>
    %221 = arith.mulf %220, %218 : vector<8x8xf32>
    %222 = arith.addf %205, %221 : vector<8x8xf32>
    %c53 = arith.constant 53 : index
    %223 = memref.load %arg1[%c53] : memref<144xf32, #tpu.memory_space<smem>>
    %224 = vector.broadcast %223 : f32 to vector<8x8xf32>
    %225 = arith.mulf %224, %218 : vector<8x8xf32>
    %226 = arith.addf %209, %225 : vector<8x8xf32>
    %c89 = arith.constant 89 : index
    %227 = memref.load %arg1[%c89] : memref<144xf32, #tpu.memory_space<smem>>
    %228 = vector.broadcast %227 : f32 to vector<8x8xf32>
    %229 = arith.mulf %228, %218 : vector<8x8xf32>
    %230 = arith.addf %213, %229 : vector<8x8xf32>
    %c125 = arith.constant 125 : index
    %231 = memref.load %arg1[%c125] : memref<144xf32, #tpu.memory_space<smem>>
    %232 = vector.broadcast %231 : f32 to vector<8x8xf32>
    %233 = arith.mulf %232, %218 : vector<8x8xf32>
    %234 = arith.addf %217, %233 : vector<8x8xf32>
    %c0_22 = arith.constant 0 : index
    %c5_23 = arith.constant 5 : index
    %c0_24 = arith.constant 0 : index
    %c0_25 = arith.constant 0 : index
    %235 = vector.load %arg2[%c0_22, %c5_23, %c0_24, %c0_25] : memref<1x16x9x9xf32, #tpu.memory_space<vmem>>, vector<1x1x9x9xf32>
    %236 = vector.shape_cast %235 : vector<1x1x9x9xf32> to vector<9x9xf32>
    %237 = vector.extract_strided_slice %236 {offsets = [0, 0], sizes = [8, 8], strides = [1, 1]} : vector<9x9xf32> to vector<8x8xf32>
    %c10 = arith.constant 10 : index
    %238 = memref.load %arg1[%c10] : memref<144xf32, #tpu.memory_space<smem>>
    %239 = vector.broadcast %238 : f32 to vector<8x8xf32>
    %240 = arith.mulf %239, %237 : vector<8x8xf32>
    %241 = arith.addf %222, %240 : vector<8x8xf32>
    %c46 = arith.constant 46 : index
    %242 = memref.load %arg1[%c46] : memref<144xf32, #tpu.memory_space<smem>>
    %243 = vector.broadcast %242 : f32 to vector<8x8xf32>
    %244 = arith.mulf %243, %237 : vector<8x8xf32>
    %245 = arith.addf %226, %244 : vector<8x8xf32>
    %c82 = arith.constant 82 : index
    %246 = memref.load %arg1[%c82] : memref<144xf32, #tpu.memory_space<smem>>
    %247 = vector.broadcast %246 : f32 to vector<8x8xf32>
    %248 = arith.mulf %247, %237 : vector<8x8xf32>
    %249 = arith.addf %230, %248 : vector<8x8xf32>
    %c118 = arith.constant 118 : index
    %250 = memref.load %arg1[%c118] : memref<144xf32, #tpu.memory_space<smem>>
    %251 = vector.broadcast %250 : f32 to vector<8x8xf32>
    %252 = arith.mulf %251, %237 : vector<8x8xf32>
    %253 = arith.addf %234, %252 : vector<8x8xf32>
    %254 = vector.extract_strided_slice %236 {offsets = [1, 0], sizes = [8, 8], strides = [1, 1]} : vector<9x9xf32> to vector<8x8xf32>
    %c16 = arith.constant 16 : index
    %255 = memref.load %arg1[%c16] : memref<144xf32, #tpu.memory_space<smem>>
    %256 = vector.broadcast %255 : f32 to vector<8x8xf32>
    %257 = arith.mulf %256, %254 : vector<8x8xf32>
    %258 = arith.addf %241, %257 : vector<8x8xf32>
    %c52 = arith.constant 52 : index
    %259 = memref.load %arg1[%c52] : memref<144xf32, #tpu.memory_space<smem>>
    %260 = vector.broadcast %259 : f32 to vector<8x8xf32>
    %261 = arith.mulf %260, %254 : vector<8x8xf32>
    %262 = arith.addf %245, %261 : vector<8x8xf32>
    %c88 = arith.constant 88 : index
    %263 = memref.load %arg1[%c88] : memref<144xf32, #tpu.memory_space<smem>>
    %264 = vector.broadcast %263 : f32 to vector<8x8xf32>
    %265 = arith.mulf %264, %254 : vector<8x8xf32>
    %266 = arith.addf %249, %265 : vector<8x8xf32>
    %c124 = arith.constant 124 : index
    %267 = memref.load %arg1[%c124] : memref<144xf32, #tpu.memory_space<smem>>
    %268 = vector.broadcast %267 : f32 to vector<8x8xf32>
    %269 = arith.mulf %268, %254 : vector<8x8xf32>
    %270 = arith.addf %253, %269 : vector<8x8xf32>
    %c0_26 = arith.constant 0 : index
    %c9_27 = arith.constant 9 : index
    %c0_28 = arith.constant 0 : index
    %c0_29 = arith.constant 0 : index
    %271 = vector.load %arg2[%c0_26, %c9_27, %c0_28, %c0_29] : memref<1x16x9x9xf32, #tpu.memory_space<vmem>>, vector<1x1x9x9xf32>
    %272 = vector.shape_cast %271 : vector<1x1x9x9xf32> to vector<9x9xf32>
    %273 = vector.extract_strided_slice %272 {offsets = [0, 0], sizes = [8, 8], strides = [1, 1]} : vector<9x9xf32> to vector<8x8xf32>
    %c12_30 = arith.constant 12 : index
    %274 = memref.load %arg1[%c12_30] : memref<144xf32, #tpu.memory_space<smem>>
    %275 = vector.broadcast %274 : f32 to vector<8x8xf32>
    %276 = arith.mulf %275, %273 : vector<8x8xf32>
    %277 = arith.addf %258, %276 : vector<8x8xf32>
    %c48 = arith.constant 48 : index
    %278 = memref.load %arg1[%c48] : memref<144xf32, #tpu.memory_space<smem>>
    %279 = vector.broadcast %278 : f32 to vector<8x8xf32>
    %280 = arith.mulf %279, %273 : vector<8x8xf32>
    %281 = arith.addf %262, %280 : vector<8x8xf32>
    %c84 = arith.constant 84 : index
    %282 = memref.load %arg1[%c84] : memref<144xf32, #tpu.memory_space<smem>>
    %283 = vector.broadcast %282 : f32 to vector<8x8xf32>
    %284 = arith.mulf %283, %273 : vector<8x8xf32>
    %285 = arith.addf %266, %284 : vector<8x8xf32>
    %c120 = arith.constant 120 : index
    %286 = memref.load %arg1[%c120] : memref<144xf32, #tpu.memory_space<smem>>
    %287 = vector.broadcast %286 : f32 to vector<8x8xf32>
    %288 = arith.mulf %287, %273 : vector<8x8xf32>
    %289 = arith.addf %270, %288 : vector<8x8xf32>
    %290 = vector.extract_strided_slice %272 {offsets = [0, 1], sizes = [8, 8], strides = [1, 1]} : vector<9x9xf32> to vector<8x8xf32>
    %c14 = arith.constant 14 : index
    %291 = memref.load %arg1[%c14] : memref<144xf32, #tpu.memory_space<smem>>
    %292 = vector.broadcast %291 : f32 to vector<8x8xf32>
    %293 = arith.mulf %292, %290 : vector<8x8xf32>
    %294 = arith.addf %277, %293 : vector<8x8xf32>
    %c50 = arith.constant 50 : index
    %295 = memref.load %arg1[%c50] : memref<144xf32, #tpu.memory_space<smem>>
    %296 = vector.broadcast %295 : f32 to vector<8x8xf32>
    %297 = arith.mulf %296, %290 : vector<8x8xf32>
    %298 = arith.addf %281, %297 : vector<8x8xf32>
    %c86 = arith.constant 86 : index
    %299 = memref.load %arg1[%c86] : memref<144xf32, #tpu.memory_space<smem>>
    %300 = vector.broadcast %299 : f32 to vector<8x8xf32>
    %301 = arith.mulf %300, %290 : vector<8x8xf32>
    %302 = arith.addf %285, %301 : vector<8x8xf32>
    %c122 = arith.constant 122 : index
    %303 = memref.load %arg1[%c122] : memref<144xf32, #tpu.memory_space<smem>>
    %304 = vector.broadcast %303 : f32 to vector<8x8xf32>
    %305 = arith.mulf %304, %290 : vector<8x8xf32>
    %306 = arith.addf %289, %305 : vector<8x8xf32>
    %c0_31 = arith.constant 0 : index
    %c13 = arith.constant 13 : index
    %c0_32 = arith.constant 0 : index
    %c0_33 = arith.constant 0 : index
    %307 = vector.load %arg2[%c0_31, %c13, %c0_32, %c0_33] : memref<1x16x9x9xf32, #tpu.memory_space<vmem>>, vector<1x1x9x9xf32>
    %308 = vector.shape_cast %307 : vector<1x1x9x9xf32> to vector<9x9xf32>
    %309 = vector.extract_strided_slice %308 {offsets = [0, 0], sizes = [8, 8], strides = [1, 1]} : vector<9x9xf32> to vector<8x8xf32>
    %c13_34 = arith.constant 13 : index
    %310 = memref.load %arg1[%c13_34] : memref<144xf32, #tpu.memory_space<smem>>
    %311 = vector.broadcast %310 : f32 to vector<8x8xf32>
    %312 = arith.mulf %311, %309 : vector<8x8xf32>
    %313 = arith.addf %294, %312 : vector<8x8xf32>
    %c49 = arith.constant 49 : index
    %314 = memref.load %arg1[%c49] : memref<144xf32, #tpu.memory_space<smem>>
    %315 = vector.broadcast %314 : f32 to vector<8x8xf32>
    %316 = arith.mulf %315, %309 : vector<8x8xf32>
    %317 = arith.addf %298, %316 : vector<8x8xf32>
    %c85 = arith.constant 85 : index
    %318 = memref.load %arg1[%c85] : memref<144xf32, #tpu.memory_space<smem>>
    %319 = vector.broadcast %318 : f32 to vector<8x8xf32>
    %320 = arith.mulf %319, %309 : vector<8x8xf32>
    %321 = arith.addf %302, %320 : vector<8x8xf32>
    %c121 = arith.constant 121 : index
    %322 = memref.load %arg1[%c121] : memref<144xf32, #tpu.memory_space<smem>>
    %323 = vector.broadcast %322 : f32 to vector<8x8xf32>
    %324 = arith.mulf %323, %309 : vector<8x8xf32>
    %325 = arith.addf %306, %324 : vector<8x8xf32>
    %c0_35 = arith.constant 0 : index
    %c2_36 = arith.constant 2 : index
    %c0_37 = arith.constant 0 : index
    %c0_38 = arith.constant 0 : index
    %326 = vector.load %arg2[%c0_35, %c2_36, %c0_37, %c0_38] : memref<1x16x9x9xf32, #tpu.memory_space<vmem>>, vector<1x1x9x9xf32>
    %327 = vector.shape_cast %326 : vector<1x1x9x9xf32> to vector<9x9xf32>
    %328 = vector.extract_strided_slice %327 {offsets = [0, 0], sizes = [8, 8], strides = [1, 1]} : vector<9x9xf32> to vector<8x8xf32>
    %c18 = arith.constant 18 : index
    %329 = memref.load %arg1[%c18] : memref<144xf32, #tpu.memory_space<smem>>
    %330 = vector.broadcast %329 : f32 to vector<8x8xf32>
    %331 = arith.mulf %330, %328 : vector<8x8xf32>
    %332 = arith.addf %313, %331 : vector<8x8xf32>
    %c54 = arith.constant 54 : index
    %333 = memref.load %arg1[%c54] : memref<144xf32, #tpu.memory_space<smem>>
    %334 = vector.broadcast %333 : f32 to vector<8x8xf32>
    %335 = arith.mulf %334, %328 : vector<8x8xf32>
    %336 = arith.addf %317, %335 : vector<8x8xf32>
    %c90 = arith.constant 90 : index
    %337 = memref.load %arg1[%c90] : memref<144xf32, #tpu.memory_space<smem>>
    %338 = vector.broadcast %337 : f32 to vector<8x8xf32>
    %339 = arith.mulf %338, %328 : vector<8x8xf32>
    %340 = arith.addf %321, %339 : vector<8x8xf32>
    %c126 = arith.constant 126 : index
    %341 = memref.load %arg1[%c126] : memref<144xf32, #tpu.memory_space<smem>>
    %342 = vector.broadcast %341 : f32 to vector<8x8xf32>
    %343 = arith.mulf %342, %328 : vector<8x8xf32>
    %344 = arith.addf %325, %343 : vector<8x8xf32>
    %345 = vector.extract_strided_slice %327 {offsets = [0, 1], sizes = [8, 8], strides = [1, 1]} : vector<9x9xf32> to vector<8x8xf32>
    %c20 = arith.constant 20 : index
    %346 = memref.load %arg1[%c20] : memref<144xf32, #tpu.memory_space<smem>>
    %347 = vector.broadcast %346 : f32 to vector<8x8xf32>
    %348 = arith.mulf %347, %345 : vector<8x8xf32>
    %349 = arith.addf %332, %348 : vector<8x8xf32>
    %c56 = arith.constant 56 : index
    %350 = memref.load %arg1[%c56] : memref<144xf32, #tpu.memory_space<smem>>
    %351 = vector.broadcast %350 : f32 to vector<8x8xf32>
    %352 = arith.mulf %351, %345 : vector<8x8xf32>
    %353 = arith.addf %336, %352 : vector<8x8xf32>
    %c92 = arith.constant 92 : index
    %354 = memref.load %arg1[%c92] : memref<144xf32, #tpu.memory_space<smem>>
    %355 = vector.broadcast %354 : f32 to vector<8x8xf32>
    %356 = arith.mulf %355, %345 : vector<8x8xf32>
    %357 = arith.addf %340, %356 : vector<8x8xf32>
    %c128 = arith.constant 128 : index
    %358 = memref.load %arg1[%c128] : memref<144xf32, #tpu.memory_space<smem>>
    %359 = vector.broadcast %358 : f32 to vector<8x8xf32>
    %360 = arith.mulf %359, %345 : vector<8x8xf32>
    %361 = arith.addf %344, %360 : vector<8x8xf32>
    %362 = vector.extract_strided_slice %327 {offsets = [1, 0], sizes = [8, 8], strides = [1, 1]} : vector<9x9xf32> to vector<8x8xf32>
    %c24 = arith.constant 24 : index
    %363 = memref.load %arg1[%c24] : memref<144xf32, #tpu.memory_space<smem>>
    %364 = vector.broadcast %363 : f32 to vector<8x8xf32>
    %365 = arith.mulf %364, %362 : vector<8x8xf32>
    %366 = arith.addf %349, %365 : vector<8x8xf32>
    %c60 = arith.constant 60 : index
    %367 = memref.load %arg1[%c60] : memref<144xf32, #tpu.memory_space<smem>>
    %368 = vector.broadcast %367 : f32 to vector<8x8xf32>
    %369 = arith.mulf %368, %362 : vector<8x8xf32>
    %370 = arith.addf %353, %369 : vector<8x8xf32>
    %c96 = arith.constant 96 : index
    %371 = memref.load %arg1[%c96] : memref<144xf32, #tpu.memory_space<smem>>
    %372 = vector.broadcast %371 : f32 to vector<8x8xf32>
    %373 = arith.mulf %372, %362 : vector<8x8xf32>
    %374 = arith.addf %357, %373 : vector<8x8xf32>
    %c132 = arith.constant 132 : index
    %375 = memref.load %arg1[%c132] : memref<144xf32, #tpu.memory_space<smem>>
    %376 = vector.broadcast %375 : f32 to vector<8x8xf32>
    %377 = arith.mulf %376, %362 : vector<8x8xf32>
    %378 = arith.addf %361, %377 : vector<8x8xf32>
    %379 = vector.extract_strided_slice %327 {offsets = [1, 1], sizes = [8, 8], strides = [1, 1]} : vector<9x9xf32> to vector<8x8xf32>
    %c26 = arith.constant 26 : index
    %380 = memref.load %arg1[%c26] : memref<144xf32, #tpu.memory_space<smem>>
    %381 = vector.broadcast %380 : f32 to vector<8x8xf32>
    %382 = arith.mulf %381, %379 : vector<8x8xf32>
    %383 = arith.addf %366, %382 : vector<8x8xf32>
    %c62 = arith.constant 62 : index
    %384 = memref.load %arg1[%c62] : memref<144xf32, #tpu.memory_space<smem>>
    %385 = vector.broadcast %384 : f32 to vector<8x8xf32>
    %386 = arith.mulf %385, %379 : vector<8x8xf32>
    %387 = arith.addf %370, %386 : vector<8x8xf32>
    %c98 = arith.constant 98 : index
    %388 = memref.load %arg1[%c98] : memref<144xf32, #tpu.memory_space<smem>>
    %389 = vector.broadcast %388 : f32 to vector<8x8xf32>
    %390 = arith.mulf %389, %379 : vector<8x8xf32>
    %391 = arith.addf %374, %390 : vector<8x8xf32>
    %c134 = arith.constant 134 : index
    %392 = memref.load %arg1[%c134] : memref<144xf32, #tpu.memory_space<smem>>
    %393 = vector.broadcast %392 : f32 to vector<8x8xf32>
    %394 = arith.mulf %393, %379 : vector<8x8xf32>
    %395 = arith.addf %378, %394 : vector<8x8xf32>
    %c0_39 = arith.constant 0 : index
    %c6_40 = arith.constant 6 : index
    %c0_41 = arith.constant 0 : index
    %c0_42 = arith.constant 0 : index
    %396 = vector.load %arg2[%c0_39, %c6_40, %c0_41, %c0_42] : memref<1x16x9x9xf32, #tpu.memory_space<vmem>>, vector<1x1x9x9xf32>
    %397 = vector.shape_cast %396 : vector<1x1x9x9xf32> to vector<9x9xf32>
    %398 = vector.extract_strided_slice %397 {offsets = [0, 0], sizes = [8, 8], strides = [1, 1]} : vector<9x9xf32> to vector<8x8xf32>
    %c19 = arith.constant 19 : index
    %399 = memref.load %arg1[%c19] : memref<144xf32, #tpu.memory_space<smem>>
    %400 = vector.broadcast %399 : f32 to vector<8x8xf32>
    %401 = arith.mulf %400, %398 : vector<8x8xf32>
    %402 = arith.addf %383, %401 : vector<8x8xf32>
    %c55 = arith.constant 55 : index
    %403 = memref.load %arg1[%c55] : memref<144xf32, #tpu.memory_space<smem>>
    %404 = vector.broadcast %403 : f32 to vector<8x8xf32>
    %405 = arith.mulf %404, %398 : vector<8x8xf32>
    %406 = arith.addf %387, %405 : vector<8x8xf32>
    %c91 = arith.constant 91 : index
    %407 = memref.load %arg1[%c91] : memref<144xf32, #tpu.memory_space<smem>>
    %408 = vector.broadcast %407 : f32 to vector<8x8xf32>
    %409 = arith.mulf %408, %398 : vector<8x8xf32>
    %410 = arith.addf %391, %409 : vector<8x8xf32>
    %c127 = arith.constant 127 : index
    %411 = memref.load %arg1[%c127] : memref<144xf32, #tpu.memory_space<smem>>
    %412 = vector.broadcast %411 : f32 to vector<8x8xf32>
    %413 = arith.mulf %412, %398 : vector<8x8xf32>
    %414 = arith.addf %395, %413 : vector<8x8xf32>
    %415 = vector.extract_strided_slice %397 {offsets = [1, 0], sizes = [8, 8], strides = [1, 1]} : vector<9x9xf32> to vector<8x8xf32>
    %c25 = arith.constant 25 : index
    %416 = memref.load %arg1[%c25] : memref<144xf32, #tpu.memory_space<smem>>
    %417 = vector.broadcast %416 : f32 to vector<8x8xf32>
    %418 = arith.mulf %417, %415 : vector<8x8xf32>
    %419 = arith.addf %402, %418 : vector<8x8xf32>
    %c61 = arith.constant 61 : index
    %420 = memref.load %arg1[%c61] : memref<144xf32, #tpu.memory_space<smem>>
    %421 = vector.broadcast %420 : f32 to vector<8x8xf32>
    %422 = arith.mulf %421, %415 : vector<8x8xf32>
    %423 = arith.addf %406, %422 : vector<8x8xf32>
    %c97 = arith.constant 97 : index
    %424 = memref.load %arg1[%c97] : memref<144xf32, #tpu.memory_space<smem>>
    %425 = vector.broadcast %424 : f32 to vector<8x8xf32>
    %426 = arith.mulf %425, %415 : vector<8x8xf32>
    %427 = arith.addf %410, %426 : vector<8x8xf32>
    %c133 = arith.constant 133 : index
    %428 = memref.load %arg1[%c133] : memref<144xf32, #tpu.memory_space<smem>>
    %429 = vector.broadcast %428 : f32 to vector<8x8xf32>
    %430 = arith.mulf %429, %415 : vector<8x8xf32>
    %431 = arith.addf %414, %430 : vector<8x8xf32>
    %c0_43 = arith.constant 0 : index
    %c10_44 = arith.constant 10 : index
    %c0_45 = arith.constant 0 : index
    %c0_46 = arith.constant 0 : index
    %432 = vector.load %arg2[%c0_43, %c10_44, %c0_45, %c0_46] : memref<1x16x9x9xf32, #tpu.memory_space<vmem>>, vector<1x1x9x9xf32>
    %433 = vector.shape_cast %432 : vector<1x1x9x9xf32> to vector<9x9xf32>
    %434 = vector.extract_strided_slice %433 {offsets = [0, 0], sizes = [8, 8], strides = [1, 1]} : vector<9x9xf32> to vector<8x8xf32>
    %c21 = arith.constant 21 : index
    %435 = memref.load %arg1[%c21] : memref<144xf32, #tpu.memory_space<smem>>
    %436 = vector.broadcast %435 : f32 to vector<8x8xf32>
    %437 = arith.mulf %436, %434 : vector<8x8xf32>
    %438 = arith.addf %419, %437 : vector<8x8xf32>
    %c57 = arith.constant 57 : index
    %439 = memref.load %arg1[%c57] : memref<144xf32, #tpu.memory_space<smem>>
    %440 = vector.broadcast %439 : f32 to vector<8x8xf32>
    %441 = arith.mulf %440, %434 : vector<8x8xf32>
    %442 = arith.addf %423, %441 : vector<8x8xf32>
    %c93 = arith.constant 93 : index
    %443 = memref.load %arg1[%c93] : memref<144xf32, #tpu.memory_space<smem>>
    %444 = vector.broadcast %443 : f32 to vector<8x8xf32>
    %445 = arith.mulf %444, %434 : vector<8x8xf32>
    %446 = arith.addf %427, %445 : vector<8x8xf32>
    %c129 = arith.constant 129 : index
    %447 = memref.load %arg1[%c129] : memref<144xf32, #tpu.memory_space<smem>>
    %448 = vector.broadcast %447 : f32 to vector<8x8xf32>
    %449 = arith.mulf %448, %434 : vector<8x8xf32>
    %450 = arith.addf %431, %449 : vector<8x8xf32>
    %451 = vector.extract_strided_slice %433 {offsets = [0, 1], sizes = [8, 8], strides = [1, 1]} : vector<9x9xf32> to vector<8x8xf32>
    %c23 = arith.constant 23 : index
    %452 = memref.load %arg1[%c23] : memref<144xf32, #tpu.memory_space<smem>>
    %453 = vector.broadcast %452 : f32 to vector<8x8xf32>
    %454 = arith.mulf %453, %451 : vector<8x8xf32>
    %455 = arith.addf %438, %454 : vector<8x8xf32>
    %c59 = arith.constant 59 : index
    %456 = memref.load %arg1[%c59] : memref<144xf32, #tpu.memory_space<smem>>
    %457 = vector.broadcast %456 : f32 to vector<8x8xf32>
    %458 = arith.mulf %457, %451 : vector<8x8xf32>
    %459 = arith.addf %442, %458 : vector<8x8xf32>
    %c95 = arith.constant 95 : index
    %460 = memref.load %arg1[%c95] : memref<144xf32, #tpu.memory_space<smem>>
    %461 = vector.broadcast %460 : f32 to vector<8x8xf32>
    %462 = arith.mulf %461, %451 : vector<8x8xf32>
    %463 = arith.addf %446, %462 : vector<8x8xf32>
    %c131 = arith.constant 131 : index
    %464 = memref.load %arg1[%c131] : memref<144xf32, #tpu.memory_space<smem>>
    %465 = vector.broadcast %464 : f32 to vector<8x8xf32>
    %466 = arith.mulf %465, %451 : vector<8x8xf32>
    %467 = arith.addf %450, %466 : vector<8x8xf32>
    %c0_47 = arith.constant 0 : index
    %c14_48 = arith.constant 14 : index
    %c0_49 = arith.constant 0 : index
    %c0_50 = arith.constant 0 : index
    %468 = vector.load %arg2[%c0_47, %c14_48, %c0_49, %c0_50] : memref<1x16x9x9xf32, #tpu.memory_space<vmem>>, vector<1x1x9x9xf32>
    %469 = vector.shape_cast %468 : vector<1x1x9x9xf32> to vector<9x9xf32>
    %470 = vector.extract_strided_slice %469 {offsets = [0, 0], sizes = [8, 8], strides = [1, 1]} : vector<9x9xf32> to vector<8x8xf32>
    %c22 = arith.constant 22 : index
    %471 = memref.load %arg1[%c22] : memref<144xf32, #tpu.memory_space<smem>>
    %472 = vector.broadcast %471 : f32 to vector<8x8xf32>
    %473 = arith.mulf %472, %470 : vector<8x8xf32>
    %474 = arith.addf %455, %473 : vector<8x8xf32>
    %c58 = arith.constant 58 : index
    %475 = memref.load %arg1[%c58] : memref<144xf32, #tpu.memory_space<smem>>
    %476 = vector.broadcast %475 : f32 to vector<8x8xf32>
    %477 = arith.mulf %476, %470 : vector<8x8xf32>
    %478 = arith.addf %459, %477 : vector<8x8xf32>
    %c94 = arith.constant 94 : index
    %479 = memref.load %arg1[%c94] : memref<144xf32, #tpu.memory_space<smem>>
    %480 = vector.broadcast %479 : f32 to vector<8x8xf32>
    %481 = arith.mulf %480, %470 : vector<8x8xf32>
    %482 = arith.addf %463, %481 : vector<8x8xf32>
    %c130 = arith.constant 130 : index
    %483 = memref.load %arg1[%c130] : memref<144xf32, #tpu.memory_space<smem>>
    %484 = vector.broadcast %483 : f32 to vector<8x8xf32>
    %485 = arith.mulf %484, %470 : vector<8x8xf32>
    %486 = arith.addf %467, %485 : vector<8x8xf32>
    %c0_51 = arith.constant 0 : index
    %c3_52 = arith.constant 3 : index
    %c0_53 = arith.constant 0 : index
    %c0_54 = arith.constant 0 : index
    %487 = vector.load %arg2[%c0_51, %c3_52, %c0_53, %c0_54] : memref<1x16x9x9xf32, #tpu.memory_space<vmem>>, vector<1x1x9x9xf32>
    %488 = vector.shape_cast %487 : vector<1x1x9x9xf32> to vector<9x9xf32>
    %489 = vector.extract_strided_slice %488 {offsets = [0, 0], sizes = [8, 8], strides = [1, 1]} : vector<9x9xf32> to vector<8x8xf32>
    %c27 = arith.constant 27 : index
    %490 = memref.load %arg1[%c27] : memref<144xf32, #tpu.memory_space<smem>>
    %491 = vector.broadcast %490 : f32 to vector<8x8xf32>
    %492 = arith.mulf %491, %489 : vector<8x8xf32>
    %493 = arith.addf %474, %492 : vector<8x8xf32>
    %c63 = arith.constant 63 : index
    %494 = memref.load %arg1[%c63] : memref<144xf32, #tpu.memory_space<smem>>
    %495 = vector.broadcast %494 : f32 to vector<8x8xf32>
    %496 = arith.mulf %495, %489 : vector<8x8xf32>
    %497 = arith.addf %478, %496 : vector<8x8xf32>
    %c99 = arith.constant 99 : index
    %498 = memref.load %arg1[%c99] : memref<144xf32, #tpu.memory_space<smem>>
    %499 = vector.broadcast %498 : f32 to vector<8x8xf32>
    %500 = arith.mulf %499, %489 : vector<8x8xf32>
    %501 = arith.addf %482, %500 : vector<8x8xf32>
    %c135 = arith.constant 135 : index
    %502 = memref.load %arg1[%c135] : memref<144xf32, #tpu.memory_space<smem>>
    %503 = vector.broadcast %502 : f32 to vector<8x8xf32>
    %504 = arith.mulf %503, %489 : vector<8x8xf32>
    %505 = arith.addf %486, %504 : vector<8x8xf32>
    %506 = vector.extract_strided_slice %488 {offsets = [0, 1], sizes = [8, 8], strides = [1, 1]} : vector<9x9xf32> to vector<8x8xf32>
    %c29 = arith.constant 29 : index
    %507 = memref.load %arg1[%c29] : memref<144xf32, #tpu.memory_space<smem>>
    %508 = vector.broadcast %507 : f32 to vector<8x8xf32>
    %509 = arith.mulf %508, %506 : vector<8x8xf32>
    %510 = arith.addf %493, %509 : vector<8x8xf32>
    %c65 = arith.constant 65 : index
    %511 = memref.load %arg1[%c65] : memref<144xf32, #tpu.memory_space<smem>>
    %512 = vector.broadcast %511 : f32 to vector<8x8xf32>
    %513 = arith.mulf %512, %506 : vector<8x8xf32>
    %514 = arith.addf %497, %513 : vector<8x8xf32>
    %c101 = arith.constant 101 : index
    %515 = memref.load %arg1[%c101] : memref<144xf32, #tpu.memory_space<smem>>
    %516 = vector.broadcast %515 : f32 to vector<8x8xf32>
    %517 = arith.mulf %516, %506 : vector<8x8xf32>
    %518 = arith.addf %501, %517 : vector<8x8xf32>
    %c137 = arith.constant 137 : index
    %519 = memref.load %arg1[%c137] : memref<144xf32, #tpu.memory_space<smem>>
    %520 = vector.broadcast %519 : f32 to vector<8x8xf32>
    %521 = arith.mulf %520, %506 : vector<8x8xf32>
    %522 = arith.addf %505, %521 : vector<8x8xf32>
    %523 = vector.extract_strided_slice %488 {offsets = [1, 0], sizes = [8, 8], strides = [1, 1]} : vector<9x9xf32> to vector<8x8xf32>
    %c33 = arith.constant 33 : index
    %524 = memref.load %arg1[%c33] : memref<144xf32, #tpu.memory_space<smem>>
    %525 = vector.broadcast %524 : f32 to vector<8x8xf32>
    %526 = arith.mulf %525, %523 : vector<8x8xf32>
    %527 = arith.addf %510, %526 : vector<8x8xf32>
    %c69 = arith.constant 69 : index
    %528 = memref.load %arg1[%c69] : memref<144xf32, #tpu.memory_space<smem>>
    %529 = vector.broadcast %528 : f32 to vector<8x8xf32>
    %530 = arith.mulf %529, %523 : vector<8x8xf32>
    %531 = arith.addf %514, %530 : vector<8x8xf32>
    %c105 = arith.constant 105 : index
    %532 = memref.load %arg1[%c105] : memref<144xf32, #tpu.memory_space<smem>>
    %533 = vector.broadcast %532 : f32 to vector<8x8xf32>
    %534 = arith.mulf %533, %523 : vector<8x8xf32>
    %535 = arith.addf %518, %534 : vector<8x8xf32>
    %c141 = arith.constant 141 : index
    %536 = memref.load %arg1[%c141] : memref<144xf32, #tpu.memory_space<smem>>
    %537 = vector.broadcast %536 : f32 to vector<8x8xf32>
    %538 = arith.mulf %537, %523 : vector<8x8xf32>
    %539 = arith.addf %522, %538 : vector<8x8xf32>
    %540 = vector.extract_strided_slice %488 {offsets = [1, 1], sizes = [8, 8], strides = [1, 1]} : vector<9x9xf32> to vector<8x8xf32>
    %c35 = arith.constant 35 : index
    %541 = memref.load %arg1[%c35] : memref<144xf32, #tpu.memory_space<smem>>
    %542 = vector.broadcast %541 : f32 to vector<8x8xf32>
    %543 = arith.mulf %542, %540 : vector<8x8xf32>
    %544 = arith.addf %527, %543 : vector<8x8xf32>
    %c71 = arith.constant 71 : index
    %545 = memref.load %arg1[%c71] : memref<144xf32, #tpu.memory_space<smem>>
    %546 = vector.broadcast %545 : f32 to vector<8x8xf32>
    %547 = arith.mulf %546, %540 : vector<8x8xf32>
    %548 = arith.addf %531, %547 : vector<8x8xf32>
    %c107 = arith.constant 107 : index
    %549 = memref.load %arg1[%c107] : memref<144xf32, #tpu.memory_space<smem>>
    %550 = vector.broadcast %549 : f32 to vector<8x8xf32>
    %551 = arith.mulf %550, %540 : vector<8x8xf32>
    %552 = arith.addf %535, %551 : vector<8x8xf32>
    %c143 = arith.constant 143 : index
    %553 = memref.load %arg1[%c143] : memref<144xf32, #tpu.memory_space<smem>>
    %554 = vector.broadcast %553 : f32 to vector<8x8xf32>
    %555 = arith.mulf %554, %540 : vector<8x8xf32>
    %556 = arith.addf %539, %555 : vector<8x8xf32>
    %c0_55 = arith.constant 0 : index
    %c7_56 = arith.constant 7 : index
    %c0_57 = arith.constant 0 : index
    %c0_58 = arith.constant 0 : index
    %557 = vector.load %arg2[%c0_55, %c7_56, %c0_57, %c0_58] : memref<1x16x9x9xf32, #tpu.memory_space<vmem>>, vector<1x1x9x9xf32>
    %558 = vector.shape_cast %557 : vector<1x1x9x9xf32> to vector<9x9xf32>
    %559 = vector.extract_strided_slice %558 {offsets = [0, 0], sizes = [8, 8], strides = [1, 1]} : vector<9x9xf32> to vector<8x8xf32>
    %c28 = arith.constant 28 : index
    %560 = memref.load %arg1[%c28] : memref<144xf32, #tpu.memory_space<smem>>
    %561 = vector.broadcast %560 : f32 to vector<8x8xf32>
    %562 = arith.mulf %561, %559 : vector<8x8xf32>
    %563 = arith.addf %544, %562 : vector<8x8xf32>
    %c64 = arith.constant 64 : index
    %564 = memref.load %arg1[%c64] : memref<144xf32, #tpu.memory_space<smem>>
    %565 = vector.broadcast %564 : f32 to vector<8x8xf32>
    %566 = arith.mulf %565, %559 : vector<8x8xf32>
    %567 = arith.addf %548, %566 : vector<8x8xf32>
    %c100 = arith.constant 100 : index
    %568 = memref.load %arg1[%c100] : memref<144xf32, #tpu.memory_space<smem>>
    %569 = vector.broadcast %568 : f32 to vector<8x8xf32>
    %570 = arith.mulf %569, %559 : vector<8x8xf32>
    %571 = arith.addf %552, %570 : vector<8x8xf32>
    %c136 = arith.constant 136 : index
    %572 = memref.load %arg1[%c136] : memref<144xf32, #tpu.memory_space<smem>>
    %573 = vector.broadcast %572 : f32 to vector<8x8xf32>
    %574 = arith.mulf %573, %559 : vector<8x8xf32>
    %575 = arith.addf %556, %574 : vector<8x8xf32>
    %576 = vector.extract_strided_slice %558 {offsets = [1, 0], sizes = [8, 8], strides = [1, 1]} : vector<9x9xf32> to vector<8x8xf32>
    %c34 = arith.constant 34 : index
    %577 = memref.load %arg1[%c34] : memref<144xf32, #tpu.memory_space<smem>>
    %578 = vector.broadcast %577 : f32 to vector<8x8xf32>
    %579 = arith.mulf %578, %576 : vector<8x8xf32>
    %580 = arith.addf %563, %579 : vector<8x8xf32>
    %c70 = arith.constant 70 : index
    %581 = memref.load %arg1[%c70] : memref<144xf32, #tpu.memory_space<smem>>
    %582 = vector.broadcast %581 : f32 to vector<8x8xf32>
    %583 = arith.mulf %582, %576 : vector<8x8xf32>
    %584 = arith.addf %567, %583 : vector<8x8xf32>
    %c106 = arith.constant 106 : index
    %585 = memref.load %arg1[%c106] : memref<144xf32, #tpu.memory_space<smem>>
    %586 = vector.broadcast %585 : f32 to vector<8x8xf32>
    %587 = arith.mulf %586, %576 : vector<8x8xf32>
    %588 = arith.addf %571, %587 : vector<8x8xf32>
    %c142 = arith.constant 142 : index
    %589 = memref.load %arg1[%c142] : memref<144xf32, #tpu.memory_space<smem>>
    %590 = vector.broadcast %589 : f32 to vector<8x8xf32>
    %591 = arith.mulf %590, %576 : vector<8x8xf32>
    %592 = arith.addf %575, %591 : vector<8x8xf32>
    %c0_59 = arith.constant 0 : index
    %c11_60 = arith.constant 11 : index
    %c0_61 = arith.constant 0 : index
    %c0_62 = arith.constant 0 : index
    %593 = vector.load %arg2[%c0_59, %c11_60, %c0_61, %c0_62] : memref<1x16x9x9xf32, #tpu.memory_space<vmem>>, vector<1x1x9x9xf32>
    %594 = vector.shape_cast %593 : vector<1x1x9x9xf32> to vector<9x9xf32>
    %595 = vector.extract_strided_slice %594 {offsets = [0, 0], sizes = [8, 8], strides = [1, 1]} : vector<9x9xf32> to vector<8x8xf32>
    %c30 = arith.constant 30 : index
    %596 = memref.load %arg1[%c30] : memref<144xf32, #tpu.memory_space<smem>>
    %597 = vector.broadcast %596 : f32 to vector<8x8xf32>
    %598 = arith.mulf %597, %595 : vector<8x8xf32>
    %599 = arith.addf %580, %598 : vector<8x8xf32>
    %c66 = arith.constant 66 : index
    %600 = memref.load %arg1[%c66] : memref<144xf32, #tpu.memory_space<smem>>
    %601 = vector.broadcast %600 : f32 to vector<8x8xf32>
    %602 = arith.mulf %601, %595 : vector<8x8xf32>
    %603 = arith.addf %584, %602 : vector<8x8xf32>
    %c102 = arith.constant 102 : index
    %604 = memref.load %arg1[%c102] : memref<144xf32, #tpu.memory_space<smem>>
    %605 = vector.broadcast %604 : f32 to vector<8x8xf32>
    %606 = arith.mulf %605, %595 : vector<8x8xf32>
    %607 = arith.addf %588, %606 : vector<8x8xf32>
    %c138 = arith.constant 138 : index
    %608 = memref.load %arg1[%c138] : memref<144xf32, #tpu.memory_space<smem>>
    %609 = vector.broadcast %608 : f32 to vector<8x8xf32>
    %610 = arith.mulf %609, %595 : vector<8x8xf32>
    %611 = arith.addf %592, %610 : vector<8x8xf32>
    %612 = vector.extract_strided_slice %594 {offsets = [0, 1], sizes = [8, 8], strides = [1, 1]} : vector<9x9xf32> to vector<8x8xf32>
    %c32 = arith.constant 32 : index
    %613 = memref.load %arg1[%c32] : memref<144xf32, #tpu.memory_space<smem>>
    %614 = vector.broadcast %613 : f32 to vector<8x8xf32>
    %615 = arith.mulf %614, %612 : vector<8x8xf32>
    %616 = arith.addf %599, %615 : vector<8x8xf32>
    %c68 = arith.constant 68 : index
    %617 = memref.load %arg1[%c68] : memref<144xf32, #tpu.memory_space<smem>>
    %618 = vector.broadcast %617 : f32 to vector<8x8xf32>
    %619 = arith.mulf %618, %612 : vector<8x8xf32>
    %620 = arith.addf %603, %619 : vector<8x8xf32>
    %c104 = arith.constant 104 : index
    %621 = memref.load %arg1[%c104] : memref<144xf32, #tpu.memory_space<smem>>
    %622 = vector.broadcast %621 : f32 to vector<8x8xf32>
    %623 = arith.mulf %622, %612 : vector<8x8xf32>
    %624 = arith.addf %607, %623 : vector<8x8xf32>
    %c140 = arith.constant 140 : index
    %625 = memref.load %arg1[%c140] : memref<144xf32, #tpu.memory_space<smem>>
    %626 = vector.broadcast %625 : f32 to vector<8x8xf32>
    %627 = arith.mulf %626, %612 : vector<8x8xf32>
    %628 = arith.addf %611, %627 : vector<8x8xf32>
    %c0_63 = arith.constant 0 : index
    %c15_64 = arith.constant 15 : index
    %c0_65 = arith.constant 0 : index
    %c0_66 = arith.constant 0 : index
    %629 = vector.load %arg2[%c0_63, %c15_64, %c0_65, %c0_66] : memref<1x16x9x9xf32, #tpu.memory_space<vmem>>, vector<1x1x9x9xf32>
    %630 = vector.shape_cast %629 : vector<1x1x9x9xf32> to vector<9x9xf32>
    %631 = vector.extract_strided_slice %630 {offsets = [0, 0], sizes = [8, 8], strides = [1, 1]} : vector<9x9xf32> to vector<8x8xf32>
    %c31 = arith.constant 31 : index
    %632 = memref.load %arg1[%c31] : memref<144xf32, #tpu.memory_space<smem>>
    %633 = vector.broadcast %632 : f32 to vector<8x8xf32>
    %634 = arith.mulf %633, %631 : vector<8x8xf32>
    %635 = arith.addf %616, %634 : vector<8x8xf32>
    %c67 = arith.constant 67 : index
    %636 = memref.load %arg1[%c67] : memref<144xf32, #tpu.memory_space<smem>>
    %637 = vector.broadcast %636 : f32 to vector<8x8xf32>
    %638 = arith.mulf %637, %631 : vector<8x8xf32>
    %639 = arith.addf %620, %638 : vector<8x8xf32>
    %c103 = arith.constant 103 : index
    %640 = memref.load %arg1[%c103] : memref<144xf32, #tpu.memory_space<smem>>
    %641 = vector.broadcast %640 : f32 to vector<8x8xf32>
    %642 = arith.mulf %641, %631 : vector<8x8xf32>
    %643 = arith.addf %624, %642 : vector<8x8xf32>
    %c139 = arith.constant 139 : index
    %644 = memref.load %arg1[%c139] : memref<144xf32, #tpu.memory_space<smem>>
    %645 = vector.broadcast %644 : f32 to vector<8x8xf32>
    %646 = arith.mulf %645, %631 : vector<8x8xf32>
    %647 = arith.addf %628, %646 : vector<8x8xf32>
    %c0_67 = arith.constant 0 : index
    %c0_68 = arith.constant 0 : index
    %c0_69 = arith.constant 0 : index
    %c0_70 = arith.constant 0 : index
    %648 = vector.load %arg3[%c0_67, %c0_68, %c0_69, %c0_70] : memref<1x4x8x8xf32, #tpu.memory_space<vmem>>, vector<1x1x8x8xf32>
    %649 = vector.shape_cast %648 : vector<1x1x8x8xf32> to vector<8x8xf32>
    %650 = vector.shape_cast %635 : vector<8x8xf32> to vector<1x1x8x8xf32>
    tpu.vector_store %arg3[%c0_67, %c0_68, %c0_69, %c0_70], %650 {strides = array<i32>} : memref<1x4x8x8xf32, #tpu.memory_space<vmem>>, vector<1x1x8x8xf32>,
    %c0_71 = arith.constant 0 : index
    %c1_72 = arith.constant 1 : index
    %c0_73 = arith.constant 0 : index
    %c0_74 = arith.constant 0 : index
    %651 = vector.load %arg3[%c0_71, %c1_72, %c0_73, %c0_74] : memref<1x4x8x8xf32, #tpu.memory_space<vmem>>, vector<1x1x8x8xf32>
    %652 = vector.shape_cast %651 : vector<1x1x8x8xf32> to vector<8x8xf32>
    %653 = vector.shape_cast %639 : vector<8x8xf32> to vector<1x1x8x8xf32>
    tpu.vector_store %arg3[%c0_71, %c1_72, %c0_73, %c0_74], %653 {strides = array<i32>} : memref<1x4x8x8xf32, #tpu.memory_space<vmem>>, vector<1x1x8x8xf32>,
    %c0_75 = arith.constant 0 : index
    %c2_76 = arith.constant 2 : index
    %c0_77 = arith.constant 0 : index
    %c0_78 = arith.constant 0 : index
    %654 = vector.load %arg3[%c0_75, %c2_76, %c0_77, %c0_78] : memref<1x4x8x8xf32, #tpu.memory_space<vmem>>, vector<1x1x8x8xf32>
    %655 = vector.shape_cast %654 : vector<1x1x8x8xf32> to vector<8x8xf32>
    %656 = vector.shape_cast %643 : vector<8x8xf32> to vector<1x1x8x8xf32>
    tpu.vector_store %arg3[%c0_75, %c2_76, %c0_77, %c0_78], %656 {strides = array<i32>} : memref<1x4x8x8xf32, #tpu.memory_space<vmem>>, vector<1x1x8x8xf32>,
    %c0_79 = arith.constant 0 : index
    %c3_80 = arith.constant 3 : index
    %c0_81 = arith.constant 0 : index
    %c0_82 = arith.constant 0 : index
    %657 = vector.load %arg3[%c0_79, %c3_80, %c0_81, %c0_82] : memref<1x4x8x8xf32, #tpu.memory_space<vmem>>, vector<1x1x8x8xf32>
    %658 = vector.shape_cast %657 : vector<1x1x8x8xf32> to vector<8x8xf32>
    %659 = vector.shape_cast %647 : vector<8x8xf32> to vector<1x1x8x8xf32>
    tpu.vector_store %arg3[%c0_79, %c3_80, %c0_81, %c0_82], %659 {strides = array<i32>} : memref<1x4x8x8xf32, #tpu.memory_space<vmem>>, vector<1x1x8x8xf32>,
    return
  }
  func.func @transform_0(%arg0: i32) -> i32 {
    %c0_i32 = arith.constant 0 : i32
    %c0_i32_0 = arith.constant 0 : i32
    return %c0_i32 : i32
  }
  func.func @transform_1(%arg0: i32) -> (i32, i32, i32, i32) {
    %c0_i32 = arith.constant 0 : i32
    %c0_i32_0 = arith.constant 0 : i32
    %c0_i32_1 = arith.constant 0 : i32
    %c0_i32_2 = arith.constant 0 : i32
    return %arg0, %c0_i32, %c0_i32_0, %c0_i32_1 : i32, i32, i32, i32
  }
  func.func @transform_2(%arg0: i32) -> (i32, i32, i32, i32) {
    %c0_i32 = arith.constant 0 : i32
    %c0_i32_0 = arith.constant 0 : i32
    %c0_i32_1 = arith.constant 0 : i32
    %c0_i32_2 = arith.constant 0 : i32
    return %arg0, %c0_i32, %c0_i32_0, %c0_i32_1 : i32, i32, i32, i32
  }
}

module attributes {stable_mosaic.version = 11 : i64} {
  func.func @_gauss_level_kernel(%arg0: i32, %arg1: memref<144xf32, #tpu.memory_space<smem>>, %arg2: memref<1x16x5x5xf32, #tpu.memory_space<vmem>>, %arg3: memref<1x4x4x4xf32, #tpu.memory_space<vmem>>) attributes {dimension_semantics = [#tpu.dimension_semantics<parallel>], iteration_bounds = array<i64: 2>, scalar_prefetch = 0 : i64, scratch_operands = 0 : i64, tpu.core_type = #tpu.core_type<tc>, window_params = [{transform_indices = @transform_0, window_bounds = array<i64: 144>}, {transform_indices = @transform_1, window_bounds = array<i64: 1, 16, 5, 5>}, {transform_indices = @transform_2, window_bounds = array<i64: 1, 4, 4, 4>}]} {
    %cst = arith.constant 0.000000e+00 : f32
    %0 = vector.broadcast %cst : f32 to vector<4x4xf32>
    %cst_0 = arith.constant 0.000000e+00 : f32
    %1 = vector.broadcast %cst_0 : f32 to vector<4x4xf32>
    %cst_1 = arith.constant 0.000000e+00 : f32
    %2 = vector.broadcast %cst_1 : f32 to vector<4x4xf32>
    %cst_2 = arith.constant 0.000000e+00 : f32
    %3 = vector.broadcast %cst_2 : f32 to vector<4x4xf32>
    %c0 = arith.constant 0 : index
    %c0_3 = arith.constant 0 : index
    %c0_4 = arith.constant 0 : index
    %c0_5 = arith.constant 0 : index
    %4 = vector.load %arg2[%c0, %c0_3, %c0_4, %c0_5] : memref<1x16x5x5xf32, #tpu.memory_space<vmem>>, vector<1x1x5x5xf32>
    %5 = vector.shape_cast %4 : vector<1x1x5x5xf32> to vector<5x5xf32>
    %6 = vector.extract_strided_slice %5 {offsets = [0, 0], sizes = [4, 4], strides = [1, 1]} : vector<5x5xf32> to vector<4x4xf32>
    %c0_6 = arith.constant 0 : index
    %7 = memref.load %arg1[%c0_6] : memref<144xf32, #tpu.memory_space<smem>>
    %8 = vector.broadcast %7 : f32 to vector<4x4xf32>
    %9 = arith.mulf %8, %6 : vector<4x4xf32>
    %10 = arith.addf %0, %9 : vector<4x4xf32>
    %c36 = arith.constant 36 : index
    %11 = memref.load %arg1[%c36] : memref<144xf32, #tpu.memory_space<smem>>
    %12 = vector.broadcast %11 : f32 to vector<4x4xf32>
    %13 = arith.mulf %12, %6 : vector<4x4xf32>
    %14 = arith.addf %1, %13 : vector<4x4xf32>
    %c72 = arith.constant 72 : index
    %15 = memref.load %arg1[%c72] : memref<144xf32, #tpu.memory_space<smem>>
    %16 = vector.broadcast %15 : f32 to vector<4x4xf32>
    %17 = arith.mulf %16, %6 : vector<4x4xf32>
    %18 = arith.addf %2, %17 : vector<4x4xf32>
    %c108 = arith.constant 108 : index
    %19 = memref.load %arg1[%c108] : memref<144xf32, #tpu.memory_space<smem>>
    %20 = vector.broadcast %19 : f32 to vector<4x4xf32>
    %21 = arith.mulf %20, %6 : vector<4x4xf32>
    %22 = arith.addf %3, %21 : vector<4x4xf32>
    %23 = vector.extract_strided_slice %5 {offsets = [0, 1], sizes = [4, 4], strides = [1, 1]} : vector<5x5xf32> to vector<4x4xf32>
    %c2 = arith.constant 2 : index
    %24 = memref.load %arg1[%c2] : memref<144xf32, #tpu.memory_space<smem>>
    %25 = vector.broadcast %24 : f32 to vector<4x4xf32>
    %26 = arith.mulf %25, %23 : vector<4x4xf32>
    %27 = arith.addf %10, %26 : vector<4x4xf32>
    %c38 = arith.constant 38 : index
    %28 = memref.load %arg1[%c38] : memref<144xf32, #tpu.memory_space<smem>>
    %29 = vector.broadcast %28 : f32 to vector<4x4xf32>
    %30 = arith.mulf %29, %23 : vector<4x4xf32>
    %31 = arith.addf %14, %30 : vector<4x4xf32>
    %c74 = arith.constant 74 : index
    %32 = memref.load %arg1[%c74] : memref<144xf32, #tpu.memory_space<smem>>
    %33 = vector.broadcast %32 : f32 to vector<4x4xf32>
    %34 = arith.mulf %33, %23 : vector<4x4xf32>
    %35 = arith.addf %18, %34 : vector<4x4xf32>
    %c110 = arith.constant 110 : index
    %36 = memref.load %arg1[%c110] : memref<144xf32, #tpu.memory_space<smem>>
    %37 = vector.broadcast %36 : f32 to vector<4x4xf32>
    %38 = arith.mulf %37, %23 : vector<4x4xf32>
    %39 = arith.addf %22, %38 : vector<4x4xf32>
    %40 = vector.extract_strided_slice %5 {offsets = [1, 0], sizes = [4, 4], strides = [1, 1]} : vector<5x5xf32> to vector<4x4xf32>
    %c6 = arith.constant 6 : index
    %41 = memref.load %arg1[%c6] : memref<144xf32, #tpu.memory_space<smem>>
    %42 = vector.broadcast %41 : f32 to vector<4x4xf32>
    %43 = arith.mulf %42, %40 : vector<4x4xf32>
    %44 = arith.addf %27, %43 : vector<4x4xf32>
    %c42 = arith.constant 42 : index
    %45 = memref.load %arg1[%c42] : memref<144xf32, #tpu.memory_space<smem>>
    %46 = vector.broadcast %45 : f32 to vector<4x4xf32>
    %47 = arith.mulf %46, %40 : vector<4x4xf32>
    %48 = arith.addf %31, %47 : vector<4x4xf32>
    %c78 = arith.constant 78 : index
    %49 = memref.load %arg1[%c78] : memref<144xf32, #tpu.memory_space<smem>>
    %50 = vector.broadcast %49 : f32 to vector<4x4xf32>
    %51 = arith.mulf %50, %40 : vector<4x4xf32>
    %52 = arith.addf %35, %51 : vector<4x4xf32>
    %c114 = arith.constant 114 : index
    %53 = memref.load %arg1[%c114] : memref<144xf32, #tpu.memory_space<smem>>
    %54 = vector.broadcast %53 : f32 to vector<4x4xf32>
    %55 = arith.mulf %54, %40 : vector<4x4xf32>
    %56 = arith.addf %39, %55 : vector<4x4xf32>
    %57 = vector.extract_strided_slice %5 {offsets = [1, 1], sizes = [4, 4], strides = [1, 1]} : vector<5x5xf32> to vector<4x4xf32>
    %c8 = arith.constant 8 : index
    %58 = memref.load %arg1[%c8] : memref<144xf32, #tpu.memory_space<smem>>
    %59 = vector.broadcast %58 : f32 to vector<4x4xf32>
    %60 = arith.mulf %59, %57 : vector<4x4xf32>
    %61 = arith.addf %44, %60 : vector<4x4xf32>
    %c44 = arith.constant 44 : index
    %62 = memref.load %arg1[%c44] : memref<144xf32, #tpu.memory_space<smem>>
    %63 = vector.broadcast %62 : f32 to vector<4x4xf32>
    %64 = arith.mulf %63, %57 : vector<4x4xf32>
    %65 = arith.addf %48, %64 : vector<4x4xf32>
    %c80 = arith.constant 80 : index
    %66 = memref.load %arg1[%c80] : memref<144xf32, #tpu.memory_space<smem>>
    %67 = vector.broadcast %66 : f32 to vector<4x4xf32>
    %68 = arith.mulf %67, %57 : vector<4x4xf32>
    %69 = arith.addf %52, %68 : vector<4x4xf32>
    %c116 = arith.constant 116 : index
    %70 = memref.load %arg1[%c116] : memref<144xf32, #tpu.memory_space<smem>>
    %71 = vector.broadcast %70 : f32 to vector<4x4xf32>
    %72 = arith.mulf %71, %57 : vector<4x4xf32>
    %73 = arith.addf %56, %72 : vector<4x4xf32>
    %c0_7 = arith.constant 0 : index
    %c4 = arith.constant 4 : index
    %c0_8 = arith.constant 0 : index
    %c0_9 = arith.constant 0 : index
    %74 = vector.load %arg2[%c0_7, %c4, %c0_8, %c0_9] : memref<1x16x5x5xf32, #tpu.memory_space<vmem>>, vector<1x1x5x5xf32>
    %75 = vector.shape_cast %74 : vector<1x1x5x5xf32> to vector<5x5xf32>
    %76 = vector.extract_strided_slice %75 {offsets = [0, 0], sizes = [4, 4], strides = [1, 1]} : vector<5x5xf32> to vector<4x4xf32>
    %c1 = arith.constant 1 : index
    %77 = memref.load %arg1[%c1] : memref<144xf32, #tpu.memory_space<smem>>
    %78 = vector.broadcast %77 : f32 to vector<4x4xf32>
    %79 = arith.mulf %78, %76 : vector<4x4xf32>
    %80 = arith.addf %61, %79 : vector<4x4xf32>
    %c37 = arith.constant 37 : index
    %81 = memref.load %arg1[%c37] : memref<144xf32, #tpu.memory_space<smem>>
    %82 = vector.broadcast %81 : f32 to vector<4x4xf32>
    %83 = arith.mulf %82, %76 : vector<4x4xf32>
    %84 = arith.addf %65, %83 : vector<4x4xf32>
    %c73 = arith.constant 73 : index
    %85 = memref.load %arg1[%c73] : memref<144xf32, #tpu.memory_space<smem>>
    %86 = vector.broadcast %85 : f32 to vector<4x4xf32>
    %87 = arith.mulf %86, %76 : vector<4x4xf32>
    %88 = arith.addf %69, %87 : vector<4x4xf32>
    %c109 = arith.constant 109 : index
    %89 = memref.load %arg1[%c109] : memref<144xf32, #tpu.memory_space<smem>>
    %90 = vector.broadcast %89 : f32 to vector<4x4xf32>
    %91 = arith.mulf %90, %76 : vector<4x4xf32>
    %92 = arith.addf %73, %91 : vector<4x4xf32>
    %93 = vector.extract_strided_slice %75 {offsets = [1, 0], sizes = [4, 4], strides = [1, 1]} : vector<5x5xf32> to vector<4x4xf32>
    %c7 = arith.constant 7 : index
    %94 = memref.load %arg1[%c7] : memref<144xf32, #tpu.memory_space<smem>>
    %95 = vector.broadcast %94 : f32 to vector<4x4xf32>
    %96 = arith.mulf %95, %93 : vector<4x4xf32>
    %97 = arith.addf %80, %96 : vector<4x4xf32>
    %c43 = arith.constant 43 : index
    %98 = memref.load %arg1[%c43] : memref<144xf32, #tpu.memory_space<smem>>
    %99 = vector.broadcast %98 : f32 to vector<4x4xf32>
    %100 = arith.mulf %99, %93 : vector<4x4xf32>
    %101 = arith.addf %84, %100 : vector<4x4xf32>
    %c79 = arith.constant 79 : index
    %102 = memref.load %arg1[%c79] : memref<144xf32, #tpu.memory_space<smem>>
    %103 = vector.broadcast %102 : f32 to vector<4x4xf32>
    %104 = arith.mulf %103, %93 : vector<4x4xf32>
    %105 = arith.addf %88, %104 : vector<4x4xf32>
    %c115 = arith.constant 115 : index
    %106 = memref.load %arg1[%c115] : memref<144xf32, #tpu.memory_space<smem>>
    %107 = vector.broadcast %106 : f32 to vector<4x4xf32>
    %108 = arith.mulf %107, %93 : vector<4x4xf32>
    %109 = arith.addf %92, %108 : vector<4x4xf32>
    %c0_10 = arith.constant 0 : index
    %c8_11 = arith.constant 8 : index
    %c0_12 = arith.constant 0 : index
    %c0_13 = arith.constant 0 : index
    %110 = vector.load %arg2[%c0_10, %c8_11, %c0_12, %c0_13] : memref<1x16x5x5xf32, #tpu.memory_space<vmem>>, vector<1x1x5x5xf32>
    %111 = vector.shape_cast %110 : vector<1x1x5x5xf32> to vector<5x5xf32>
    %112 = vector.extract_strided_slice %111 {offsets = [0, 0], sizes = [4, 4], strides = [1, 1]} : vector<5x5xf32> to vector<4x4xf32>
    %c3 = arith.constant 3 : index
    %113 = memref.load %arg1[%c3] : memref<144xf32, #tpu.memory_space<smem>>
    %114 = vector.broadcast %113 : f32 to vector<4x4xf32>
    %115 = arith.mulf %114, %112 : vector<4x4xf32>
    %116 = arith.addf %97, %115 : vector<4x4xf32>
    %c39 = arith.constant 39 : index
    %117 = memref.load %arg1[%c39] : memref<144xf32, #tpu.memory_space<smem>>
    %118 = vector.broadcast %117 : f32 to vector<4x4xf32>
    %119 = arith.mulf %118, %112 : vector<4x4xf32>
    %120 = arith.addf %101, %119 : vector<4x4xf32>
    %c75 = arith.constant 75 : index
    %121 = memref.load %arg1[%c75] : memref<144xf32, #tpu.memory_space<smem>>
    %122 = vector.broadcast %121 : f32 to vector<4x4xf32>
    %123 = arith.mulf %122, %112 : vector<4x4xf32>
    %124 = arith.addf %105, %123 : vector<4x4xf32>
    %c111 = arith.constant 111 : index
    %125 = memref.load %arg1[%c111] : memref<144xf32, #tpu.memory_space<smem>>
    %126 = vector.broadcast %125 : f32 to vector<4x4xf32>
    %127 = arith.mulf %126, %112 : vector<4x4xf32>
    %128 = arith.addf %109, %127 : vector<4x4xf32>
    %129 = vector.extract_strided_slice %111 {offsets = [0, 1], sizes = [4, 4], strides = [1, 1]} : vector<5x5xf32> to vector<4x4xf32>
    %c5 = arith.constant 5 : index
    %130 = memref.load %arg1[%c5] : memref<144xf32, #tpu.memory_space<smem>>
    %131 = vector.broadcast %130 : f32 to vector<4x4xf32>
    %132 = arith.mulf %131, %129 : vector<4x4xf32>
    %133 = arith.addf %116, %132 : vector<4x4xf32>
    %c41 = arith.constant 41 : index
    %134 = memref.load %arg1[%c41] : memref<144xf32, #tpu.memory_space<smem>>
    %135 = vector.broadcast %134 : f32 to vector<4x4xf32>
    %136 = arith.mulf %135, %129 : vector<4x4xf32>
    %137 = arith.addf %120, %136 : vector<4x4xf32>
    %c77 = arith.constant 77 : index
    %138 = memref.load %arg1[%c77] : memref<144xf32, #tpu.memory_space<smem>>
    %139 = vector.broadcast %138 : f32 to vector<4x4xf32>
    %140 = arith.mulf %139, %129 : vector<4x4xf32>
    %141 = arith.addf %124, %140 : vector<4x4xf32>
    %c113 = arith.constant 113 : index
    %142 = memref.load %arg1[%c113] : memref<144xf32, #tpu.memory_space<smem>>
    %143 = vector.broadcast %142 : f32 to vector<4x4xf32>
    %144 = arith.mulf %143, %129 : vector<4x4xf32>
    %145 = arith.addf %128, %144 : vector<4x4xf32>
    %c0_14 = arith.constant 0 : index
    %c12 = arith.constant 12 : index
    %c0_15 = arith.constant 0 : index
    %c0_16 = arith.constant 0 : index
    %146 = vector.load %arg2[%c0_14, %c12, %c0_15, %c0_16] : memref<1x16x5x5xf32, #tpu.memory_space<vmem>>, vector<1x1x5x5xf32>
    %147 = vector.shape_cast %146 : vector<1x1x5x5xf32> to vector<5x5xf32>
    %148 = vector.extract_strided_slice %147 {offsets = [0, 0], sizes = [4, 4], strides = [1, 1]} : vector<5x5xf32> to vector<4x4xf32>
    %c4_17 = arith.constant 4 : index
    %149 = memref.load %arg1[%c4_17] : memref<144xf32, #tpu.memory_space<smem>>
    %150 = vector.broadcast %149 : f32 to vector<4x4xf32>
    %151 = arith.mulf %150, %148 : vector<4x4xf32>
    %152 = arith.addf %133, %151 : vector<4x4xf32>
    %c40 = arith.constant 40 : index
    %153 = memref.load %arg1[%c40] : memref<144xf32, #tpu.memory_space<smem>>
    %154 = vector.broadcast %153 : f32 to vector<4x4xf32>
    %155 = arith.mulf %154, %148 : vector<4x4xf32>
    %156 = arith.addf %137, %155 : vector<4x4xf32>
    %c76 = arith.constant 76 : index
    %157 = memref.load %arg1[%c76] : memref<144xf32, #tpu.memory_space<smem>>
    %158 = vector.broadcast %157 : f32 to vector<4x4xf32>
    %159 = arith.mulf %158, %148 : vector<4x4xf32>
    %160 = arith.addf %141, %159 : vector<4x4xf32>
    %c112 = arith.constant 112 : index
    %161 = memref.load %arg1[%c112] : memref<144xf32, #tpu.memory_space<smem>>
    %162 = vector.broadcast %161 : f32 to vector<4x4xf32>
    %163 = arith.mulf %162, %148 : vector<4x4xf32>
    %164 = arith.addf %145, %163 : vector<4x4xf32>
    %c0_18 = arith.constant 0 : index
    %c1_19 = arith.constant 1 : index
    %c0_20 = arith.constant 0 : index
    %c0_21 = arith.constant 0 : index
    %165 = vector.load %arg2[%c0_18, %c1_19, %c0_20, %c0_21] : memref<1x16x5x5xf32, #tpu.memory_space<vmem>>, vector<1x1x5x5xf32>
    %166 = vector.shape_cast %165 : vector<1x1x5x5xf32> to vector<5x5xf32>
    %167 = vector.extract_strided_slice %166 {offsets = [0, 0], sizes = [4, 4], strides = [1, 1]} : vector<5x5xf32> to vector<4x4xf32>
    %c9 = arith.constant 9 : index
    %168 = memref.load %arg1[%c9] : memref<144xf32, #tpu.memory_space<smem>>
    %169 = vector.broadcast %168 : f32 to vector<4x4xf32>
    %170 = arith.mulf %169, %167 : vector<4x4xf32>
    %171 = arith.addf %152, %170 : vector<4x4xf32>
    %c45 = arith.constant 45 : index
    %172 = memref.load %arg1[%c45] : memref<144xf32, #tpu.memory_space<smem>>
    %173 = vector.broadcast %172 : f32 to vector<4x4xf32>
    %174 = arith.mulf %173, %167 : vector<4x4xf32>
    %175 = arith.addf %156, %174 : vector<4x4xf32>
    %c81 = arith.constant 81 : index
    %176 = memref.load %arg1[%c81] : memref<144xf32, #tpu.memory_space<smem>>
    %177 = vector.broadcast %176 : f32 to vector<4x4xf32>
    %178 = arith.mulf %177, %167 : vector<4x4xf32>
    %179 = arith.addf %160, %178 : vector<4x4xf32>
    %c117 = arith.constant 117 : index
    %180 = memref.load %arg1[%c117] : memref<144xf32, #tpu.memory_space<smem>>
    %181 = vector.broadcast %180 : f32 to vector<4x4xf32>
    %182 = arith.mulf %181, %167 : vector<4x4xf32>
    %183 = arith.addf %164, %182 : vector<4x4xf32>
    %184 = vector.extract_strided_slice %166 {offsets = [0, 1], sizes = [4, 4], strides = [1, 1]} : vector<5x5xf32> to vector<4x4xf32>
    %c11 = arith.constant 11 : index
    %185 = memref.load %arg1[%c11] : memref<144xf32, #tpu.memory_space<smem>>
    %186 = vector.broadcast %185 : f32 to vector<4x4xf32>
    %187 = arith.mulf %186, %184 : vector<4x4xf32>
    %188 = arith.addf %171, %187 : vector<4x4xf32>
    %c47 = arith.constant 47 : index
    %189 = memref.load %arg1[%c47] : memref<144xf32, #tpu.memory_space<smem>>
    %190 = vector.broadcast %189 : f32 to vector<4x4xf32>
    %191 = arith.mulf %190, %184 : vector<4x4xf32>
    %192 = arith.addf %175, %191 : vector<4x4xf32>
    %c83 = arith.constant 83 : index
    %193 = memref.load %arg1[%c83] : memref<144xf32, #tpu.memory_space<smem>>
    %194 = vector.broadcast %193 : f32 to vector<4x4xf32>
    %195 = arith.mulf %194, %184 : vector<4x4xf32>
    %196 = arith.addf %179, %195 : vector<4x4xf32>
    %c119 = arith.constant 119 : index
    %197 = memref.load %arg1[%c119] : memref<144xf32, #tpu.memory_space<smem>>
    %198 = vector.broadcast %197 : f32 to vector<4x4xf32>
    %199 = arith.mulf %198, %184 : vector<4x4xf32>
    %200 = arith.addf %183, %199 : vector<4x4xf32>
    %201 = vector.extract_strided_slice %166 {offsets = [1, 0], sizes = [4, 4], strides = [1, 1]} : vector<5x5xf32> to vector<4x4xf32>
    %c15 = arith.constant 15 : index
    %202 = memref.load %arg1[%c15] : memref<144xf32, #tpu.memory_space<smem>>
    %203 = vector.broadcast %202 : f32 to vector<4x4xf32>
    %204 = arith.mulf %203, %201 : vector<4x4xf32>
    %205 = arith.addf %188, %204 : vector<4x4xf32>
    %c51 = arith.constant 51 : index
    %206 = memref.load %arg1[%c51] : memref<144xf32, #tpu.memory_space<smem>>
    %207 = vector.broadcast %206 : f32 to vector<4x4xf32>
    %208 = arith.mulf %207, %201 : vector<4x4xf32>
    %209 = arith.addf %192, %208 : vector<4x4xf32>
    %c87 = arith.constant 87 : index
    %210 = memref.load %arg1[%c87] : memref<144xf32, #tpu.memory_space<smem>>
    %211 = vector.broadcast %210 : f32 to vector<4x4xf32>
    %212 = arith.mulf %211, %201 : vector<4x4xf32>
    %213 = arith.addf %196, %212 : vector<4x4xf32>
    %c123 = arith.constant 123 : index
    %214 = memref.load %arg1[%c123] : memref<144xf32, #tpu.memory_space<smem>>
    %215 = vector.broadcast %214 : f32 to vector<4x4xf32>
    %216 = arith.mulf %215, %201 : vector<4x4xf32>
    %217 = arith.addf %200, %216 : vector<4x4xf32>
    %218 = vector.extract_strided_slice %166 {offsets = [1, 1], sizes = [4, 4], strides = [1, 1]} : vector<5x5xf32> to vector<4x4xf32>
    %c17 = arith.constant 17 : index
    %219 = memref.load %arg1[%c17] : memref<144xf32, #tpu.memory_space<smem>>
    %220 = vector.broadcast %219 : f32 to vector<4x4xf32>
    %221 = arith.mulf %220, %218 : vector<4x4xf32>
    %222 = arith.addf %205, %221 : vector<4x4xf32>
    %c53 = arith.constant 53 : index
    %223 = memref.load %arg1[%c53] : memref<144xf32, #tpu.memory_space<smem>>
    %224 = vector.broadcast %223 : f32 to vector<4x4xf32>
    %225 = arith.mulf %224, %218 : vector<4x4xf32>
    %226 = arith.addf %209, %225 : vector<4x4xf32>
    %c89 = arith.constant 89 : index
    %227 = memref.load %arg1[%c89] : memref<144xf32, #tpu.memory_space<smem>>
    %228 = vector.broadcast %227 : f32 to vector<4x4xf32>
    %229 = arith.mulf %228, %218 : vector<4x4xf32>
    %230 = arith.addf %213, %229 : vector<4x4xf32>
    %c125 = arith.constant 125 : index
    %231 = memref.load %arg1[%c125] : memref<144xf32, #tpu.memory_space<smem>>
    %232 = vector.broadcast %231 : f32 to vector<4x4xf32>
    %233 = arith.mulf %232, %218 : vector<4x4xf32>
    %234 = arith.addf %217, %233 : vector<4x4xf32>
    %c0_22 = arith.constant 0 : index
    %c5_23 = arith.constant 5 : index
    %c0_24 = arith.constant 0 : index
    %c0_25 = arith.constant 0 : index
    %235 = vector.load %arg2[%c0_22, %c5_23, %c0_24, %c0_25] : memref<1x16x5x5xf32, #tpu.memory_space<vmem>>, vector<1x1x5x5xf32>
    %236 = vector.shape_cast %235 : vector<1x1x5x5xf32> to vector<5x5xf32>
    %237 = vector.extract_strided_slice %236 {offsets = [0, 0], sizes = [4, 4], strides = [1, 1]} : vector<5x5xf32> to vector<4x4xf32>
    %c10 = arith.constant 10 : index
    %238 = memref.load %arg1[%c10] : memref<144xf32, #tpu.memory_space<smem>>
    %239 = vector.broadcast %238 : f32 to vector<4x4xf32>
    %240 = arith.mulf %239, %237 : vector<4x4xf32>
    %241 = arith.addf %222, %240 : vector<4x4xf32>
    %c46 = arith.constant 46 : index
    %242 = memref.load %arg1[%c46] : memref<144xf32, #tpu.memory_space<smem>>
    %243 = vector.broadcast %242 : f32 to vector<4x4xf32>
    %244 = arith.mulf %243, %237 : vector<4x4xf32>
    %245 = arith.addf %226, %244 : vector<4x4xf32>
    %c82 = arith.constant 82 : index
    %246 = memref.load %arg1[%c82] : memref<144xf32, #tpu.memory_space<smem>>
    %247 = vector.broadcast %246 : f32 to vector<4x4xf32>
    %248 = arith.mulf %247, %237 : vector<4x4xf32>
    %249 = arith.addf %230, %248 : vector<4x4xf32>
    %c118 = arith.constant 118 : index
    %250 = memref.load %arg1[%c118] : memref<144xf32, #tpu.memory_space<smem>>
    %251 = vector.broadcast %250 : f32 to vector<4x4xf32>
    %252 = arith.mulf %251, %237 : vector<4x4xf32>
    %253 = arith.addf %234, %252 : vector<4x4xf32>
    %254 = vector.extract_strided_slice %236 {offsets = [1, 0], sizes = [4, 4], strides = [1, 1]} : vector<5x5xf32> to vector<4x4xf32>
    %c16 = arith.constant 16 : index
    %255 = memref.load %arg1[%c16] : memref<144xf32, #tpu.memory_space<smem>>
    %256 = vector.broadcast %255 : f32 to vector<4x4xf32>
    %257 = arith.mulf %256, %254 : vector<4x4xf32>
    %258 = arith.addf %241, %257 : vector<4x4xf32>
    %c52 = arith.constant 52 : index
    %259 = memref.load %arg1[%c52] : memref<144xf32, #tpu.memory_space<smem>>
    %260 = vector.broadcast %259 : f32 to vector<4x4xf32>
    %261 = arith.mulf %260, %254 : vector<4x4xf32>
    %262 = arith.addf %245, %261 : vector<4x4xf32>
    %c88 = arith.constant 88 : index
    %263 = memref.load %arg1[%c88] : memref<144xf32, #tpu.memory_space<smem>>
    %264 = vector.broadcast %263 : f32 to vector<4x4xf32>
    %265 = arith.mulf %264, %254 : vector<4x4xf32>
    %266 = arith.addf %249, %265 : vector<4x4xf32>
    %c124 = arith.constant 124 : index
    %267 = memref.load %arg1[%c124] : memref<144xf32, #tpu.memory_space<smem>>
    %268 = vector.broadcast %267 : f32 to vector<4x4xf32>
    %269 = arith.mulf %268, %254 : vector<4x4xf32>
    %270 = arith.addf %253, %269 : vector<4x4xf32>
    %c0_26 = arith.constant 0 : index
    %c9_27 = arith.constant 9 : index
    %c0_28 = arith.constant 0 : index
    %c0_29 = arith.constant 0 : index
    %271 = vector.load %arg2[%c0_26, %c9_27, %c0_28, %c0_29] : memref<1x16x5x5xf32, #tpu.memory_space<vmem>>, vector<1x1x5x5xf32>
    %272 = vector.shape_cast %271 : vector<1x1x5x5xf32> to vector<5x5xf32>
    %273 = vector.extract_strided_slice %272 {offsets = [0, 0], sizes = [4, 4], strides = [1, 1]} : vector<5x5xf32> to vector<4x4xf32>
    %c12_30 = arith.constant 12 : index
    %274 = memref.load %arg1[%c12_30] : memref<144xf32, #tpu.memory_space<smem>>
    %275 = vector.broadcast %274 : f32 to vector<4x4xf32>
    %276 = arith.mulf %275, %273 : vector<4x4xf32>
    %277 = arith.addf %258, %276 : vector<4x4xf32>
    %c48 = arith.constant 48 : index
    %278 = memref.load %arg1[%c48] : memref<144xf32, #tpu.memory_space<smem>>
    %279 = vector.broadcast %278 : f32 to vector<4x4xf32>
    %280 = arith.mulf %279, %273 : vector<4x4xf32>
    %281 = arith.addf %262, %280 : vector<4x4xf32>
    %c84 = arith.constant 84 : index
    %282 = memref.load %arg1[%c84] : memref<144xf32, #tpu.memory_space<smem>>
    %283 = vector.broadcast %282 : f32 to vector<4x4xf32>
    %284 = arith.mulf %283, %273 : vector<4x4xf32>
    %285 = arith.addf %266, %284 : vector<4x4xf32>
    %c120 = arith.constant 120 : index
    %286 = memref.load %arg1[%c120] : memref<144xf32, #tpu.memory_space<smem>>
    %287 = vector.broadcast %286 : f32 to vector<4x4xf32>
    %288 = arith.mulf %287, %273 : vector<4x4xf32>
    %289 = arith.addf %270, %288 : vector<4x4xf32>
    %290 = vector.extract_strided_slice %272 {offsets = [0, 1], sizes = [4, 4], strides = [1, 1]} : vector<5x5xf32> to vector<4x4xf32>
    %c14 = arith.constant 14 : index
    %291 = memref.load %arg1[%c14] : memref<144xf32, #tpu.memory_space<smem>>
    %292 = vector.broadcast %291 : f32 to vector<4x4xf32>
    %293 = arith.mulf %292, %290 : vector<4x4xf32>
    %294 = arith.addf %277, %293 : vector<4x4xf32>
    %c50 = arith.constant 50 : index
    %295 = memref.load %arg1[%c50] : memref<144xf32, #tpu.memory_space<smem>>
    %296 = vector.broadcast %295 : f32 to vector<4x4xf32>
    %297 = arith.mulf %296, %290 : vector<4x4xf32>
    %298 = arith.addf %281, %297 : vector<4x4xf32>
    %c86 = arith.constant 86 : index
    %299 = memref.load %arg1[%c86] : memref<144xf32, #tpu.memory_space<smem>>
    %300 = vector.broadcast %299 : f32 to vector<4x4xf32>
    %301 = arith.mulf %300, %290 : vector<4x4xf32>
    %302 = arith.addf %285, %301 : vector<4x4xf32>
    %c122 = arith.constant 122 : index
    %303 = memref.load %arg1[%c122] : memref<144xf32, #tpu.memory_space<smem>>
    %304 = vector.broadcast %303 : f32 to vector<4x4xf32>
    %305 = arith.mulf %304, %290 : vector<4x4xf32>
    %306 = arith.addf %289, %305 : vector<4x4xf32>
    %c0_31 = arith.constant 0 : index
    %c13 = arith.constant 13 : index
    %c0_32 = arith.constant 0 : index
    %c0_33 = arith.constant 0 : index
    %307 = vector.load %arg2[%c0_31, %c13, %c0_32, %c0_33] : memref<1x16x5x5xf32, #tpu.memory_space<vmem>>, vector<1x1x5x5xf32>
    %308 = vector.shape_cast %307 : vector<1x1x5x5xf32> to vector<5x5xf32>
    %309 = vector.extract_strided_slice %308 {offsets = [0, 0], sizes = [4, 4], strides = [1, 1]} : vector<5x5xf32> to vector<4x4xf32>
    %c13_34 = arith.constant 13 : index
    %310 = memref.load %arg1[%c13_34] : memref<144xf32, #tpu.memory_space<smem>>
    %311 = vector.broadcast %310 : f32 to vector<4x4xf32>
    %312 = arith.mulf %311, %309 : vector<4x4xf32>
    %313 = arith.addf %294, %312 : vector<4x4xf32>
    %c49 = arith.constant 49 : index
    %314 = memref.load %arg1[%c49] : memref<144xf32, #tpu.memory_space<smem>>
    %315 = vector.broadcast %314 : f32 to vector<4x4xf32>
    %316 = arith.mulf %315, %309 : vector<4x4xf32>
    %317 = arith.addf %298, %316 : vector<4x4xf32>
    %c85 = arith.constant 85 : index
    %318 = memref.load %arg1[%c85] : memref<144xf32, #tpu.memory_space<smem>>
    %319 = vector.broadcast %318 : f32 to vector<4x4xf32>
    %320 = arith.mulf %319, %309 : vector<4x4xf32>
    %321 = arith.addf %302, %320 : vector<4x4xf32>
    %c121 = arith.constant 121 : index
    %322 = memref.load %arg1[%c121] : memref<144xf32, #tpu.memory_space<smem>>
    %323 = vector.broadcast %322 : f32 to vector<4x4xf32>
    %324 = arith.mulf %323, %309 : vector<4x4xf32>
    %325 = arith.addf %306, %324 : vector<4x4xf32>
    %c0_35 = arith.constant 0 : index
    %c2_36 = arith.constant 2 : index
    %c0_37 = arith.constant 0 : index
    %c0_38 = arith.constant 0 : index
    %326 = vector.load %arg2[%c0_35, %c2_36, %c0_37, %c0_38] : memref<1x16x5x5xf32, #tpu.memory_space<vmem>>, vector<1x1x5x5xf32>
    %327 = vector.shape_cast %326 : vector<1x1x5x5xf32> to vector<5x5xf32>
    %328 = vector.extract_strided_slice %327 {offsets = [0, 0], sizes = [4, 4], strides = [1, 1]} : vector<5x5xf32> to vector<4x4xf32>
    %c18 = arith.constant 18 : index
    %329 = memref.load %arg1[%c18] : memref<144xf32, #tpu.memory_space<smem>>
    %330 = vector.broadcast %329 : f32 to vector<4x4xf32>
    %331 = arith.mulf %330, %328 : vector<4x4xf32>
    %332 = arith.addf %313, %331 : vector<4x4xf32>
    %c54 = arith.constant 54 : index
    %333 = memref.load %arg1[%c54] : memref<144xf32, #tpu.memory_space<smem>>
    %334 = vector.broadcast %333 : f32 to vector<4x4xf32>
    %335 = arith.mulf %334, %328 : vector<4x4xf32>
    %336 = arith.addf %317, %335 : vector<4x4xf32>
    %c90 = arith.constant 90 : index
    %337 = memref.load %arg1[%c90] : memref<144xf32, #tpu.memory_space<smem>>
    %338 = vector.broadcast %337 : f32 to vector<4x4xf32>
    %339 = arith.mulf %338, %328 : vector<4x4xf32>
    %340 = arith.addf %321, %339 : vector<4x4xf32>
    %c126 = arith.constant 126 : index
    %341 = memref.load %arg1[%c126] : memref<144xf32, #tpu.memory_space<smem>>
    %342 = vector.broadcast %341 : f32 to vector<4x4xf32>
    %343 = arith.mulf %342, %328 : vector<4x4xf32>
    %344 = arith.addf %325, %343 : vector<4x4xf32>
    %345 = vector.extract_strided_slice %327 {offsets = [0, 1], sizes = [4, 4], strides = [1, 1]} : vector<5x5xf32> to vector<4x4xf32>
    %c20 = arith.constant 20 : index
    %346 = memref.load %arg1[%c20] : memref<144xf32, #tpu.memory_space<smem>>
    %347 = vector.broadcast %346 : f32 to vector<4x4xf32>
    %348 = arith.mulf %347, %345 : vector<4x4xf32>
    %349 = arith.addf %332, %348 : vector<4x4xf32>
    %c56 = arith.constant 56 : index
    %350 = memref.load %arg1[%c56] : memref<144xf32, #tpu.memory_space<smem>>
    %351 = vector.broadcast %350 : f32 to vector<4x4xf32>
    %352 = arith.mulf %351, %345 : vector<4x4xf32>
    %353 = arith.addf %336, %352 : vector<4x4xf32>
    %c92 = arith.constant 92 : index
    %354 = memref.load %arg1[%c92] : memref<144xf32, #tpu.memory_space<smem>>
    %355 = vector.broadcast %354 : f32 to vector<4x4xf32>
    %356 = arith.mulf %355, %345 : vector<4x4xf32>
    %357 = arith.addf %340, %356 : vector<4x4xf32>
    %c128 = arith.constant 128 : index
    %358 = memref.load %arg1[%c128] : memref<144xf32, #tpu.memory_space<smem>>
    %359 = vector.broadcast %358 : f32 to vector<4x4xf32>
    %360 = arith.mulf %359, %345 : vector<4x4xf32>
    %361 = arith.addf %344, %360 : vector<4x4xf32>
    %362 = vector.extract_strided_slice %327 {offsets = [1, 0], sizes = [4, 4], strides = [1, 1]} : vector<5x5xf32> to vector<4x4xf32>
    %c24 = arith.constant 24 : index
    %363 = memref.load %arg1[%c24] : memref<144xf32, #tpu.memory_space<smem>>
    %364 = vector.broadcast %363 : f32 to vector<4x4xf32>
    %365 = arith.mulf %364, %362 : vector<4x4xf32>
    %366 = arith.addf %349, %365 : vector<4x4xf32>
    %c60 = arith.constant 60 : index
    %367 = memref.load %arg1[%c60] : memref<144xf32, #tpu.memory_space<smem>>
    %368 = vector.broadcast %367 : f32 to vector<4x4xf32>
    %369 = arith.mulf %368, %362 : vector<4x4xf32>
    %370 = arith.addf %353, %369 : vector<4x4xf32>
    %c96 = arith.constant 96 : index
    %371 = memref.load %arg1[%c96] : memref<144xf32, #tpu.memory_space<smem>>
    %372 = vector.broadcast %371 : f32 to vector<4x4xf32>
    %373 = arith.mulf %372, %362 : vector<4x4xf32>
    %374 = arith.addf %357, %373 : vector<4x4xf32>
    %c132 = arith.constant 132 : index
    %375 = memref.load %arg1[%c132] : memref<144xf32, #tpu.memory_space<smem>>
    %376 = vector.broadcast %375 : f32 to vector<4x4xf32>
    %377 = arith.mulf %376, %362 : vector<4x4xf32>
    %378 = arith.addf %361, %377 : vector<4x4xf32>
    %379 = vector.extract_strided_slice %327 {offsets = [1, 1], sizes = [4, 4], strides = [1, 1]} : vector<5x5xf32> to vector<4x4xf32>
    %c26 = arith.constant 26 : index
    %380 = memref.load %arg1[%c26] : memref<144xf32, #tpu.memory_space<smem>>
    %381 = vector.broadcast %380 : f32 to vector<4x4xf32>
    %382 = arith.mulf %381, %379 : vector<4x4xf32>
    %383 = arith.addf %366, %382 : vector<4x4xf32>
    %c62 = arith.constant 62 : index
    %384 = memref.load %arg1[%c62] : memref<144xf32, #tpu.memory_space<smem>>
    %385 = vector.broadcast %384 : f32 to vector<4x4xf32>
    %386 = arith.mulf %385, %379 : vector<4x4xf32>
    %387 = arith.addf %370, %386 : vector<4x4xf32>
    %c98 = arith.constant 98 : index
    %388 = memref.load %arg1[%c98] : memref<144xf32, #tpu.memory_space<smem>>
    %389 = vector.broadcast %388 : f32 to vector<4x4xf32>
    %390 = arith.mulf %389, %379 : vector<4x4xf32>
    %391 = arith.addf %374, %390 : vector<4x4xf32>
    %c134 = arith.constant 134 : index
    %392 = memref.load %arg1[%c134] : memref<144xf32, #tpu.memory_space<smem>>
    %393 = vector.broadcast %392 : f32 to vector<4x4xf32>
    %394 = arith.mulf %393, %379 : vector<4x4xf32>
    %395 = arith.addf %378, %394 : vector<4x4xf32>
    %c0_39 = arith.constant 0 : index
    %c6_40 = arith.constant 6 : index
    %c0_41 = arith.constant 0 : index
    %c0_42 = arith.constant 0 : index
    %396 = vector.load %arg2[%c0_39, %c6_40, %c0_41, %c0_42] : memref<1x16x5x5xf32, #tpu.memory_space<vmem>>, vector<1x1x5x5xf32>
    %397 = vector.shape_cast %396 : vector<1x1x5x5xf32> to vector<5x5xf32>
    %398 = vector.extract_strided_slice %397 {offsets = [0, 0], sizes = [4, 4], strides = [1, 1]} : vector<5x5xf32> to vector<4x4xf32>
    %c19 = arith.constant 19 : index
    %399 = memref.load %arg1[%c19] : memref<144xf32, #tpu.memory_space<smem>>
    %400 = vector.broadcast %399 : f32 to vector<4x4xf32>
    %401 = arith.mulf %400, %398 : vector<4x4xf32>
    %402 = arith.addf %383, %401 : vector<4x4xf32>
    %c55 = arith.constant 55 : index
    %403 = memref.load %arg1[%c55] : memref<144xf32, #tpu.memory_space<smem>>
    %404 = vector.broadcast %403 : f32 to vector<4x4xf32>
    %405 = arith.mulf %404, %398 : vector<4x4xf32>
    %406 = arith.addf %387, %405 : vector<4x4xf32>
    %c91 = arith.constant 91 : index
    %407 = memref.load %arg1[%c91] : memref<144xf32, #tpu.memory_space<smem>>
    %408 = vector.broadcast %407 : f32 to vector<4x4xf32>
    %409 = arith.mulf %408, %398 : vector<4x4xf32>
    %410 = arith.addf %391, %409 : vector<4x4xf32>
    %c127 = arith.constant 127 : index
    %411 = memref.load %arg1[%c127] : memref<144xf32, #tpu.memory_space<smem>>
    %412 = vector.broadcast %411 : f32 to vector<4x4xf32>
    %413 = arith.mulf %412, %398 : vector<4x4xf32>
    %414 = arith.addf %395, %413 : vector<4x4xf32>
    %415 = vector.extract_strided_slice %397 {offsets = [1, 0], sizes = [4, 4], strides = [1, 1]} : vector<5x5xf32> to vector<4x4xf32>
    %c25 = arith.constant 25 : index
    %416 = memref.load %arg1[%c25] : memref<144xf32, #tpu.memory_space<smem>>
    %417 = vector.broadcast %416 : f32 to vector<4x4xf32>
    %418 = arith.mulf %417, %415 : vector<4x4xf32>
    %419 = arith.addf %402, %418 : vector<4x4xf32>
    %c61 = arith.constant 61 : index
    %420 = memref.load %arg1[%c61] : memref<144xf32, #tpu.memory_space<smem>>
    %421 = vector.broadcast %420 : f32 to vector<4x4xf32>
    %422 = arith.mulf %421, %415 : vector<4x4xf32>
    %423 = arith.addf %406, %422 : vector<4x4xf32>
    %c97 = arith.constant 97 : index
    %424 = memref.load %arg1[%c97] : memref<144xf32, #tpu.memory_space<smem>>
    %425 = vector.broadcast %424 : f32 to vector<4x4xf32>
    %426 = arith.mulf %425, %415 : vector<4x4xf32>
    %427 = arith.addf %410, %426 : vector<4x4xf32>
    %c133 = arith.constant 133 : index
    %428 = memref.load %arg1[%c133] : memref<144xf32, #tpu.memory_space<smem>>
    %429 = vector.broadcast %428 : f32 to vector<4x4xf32>
    %430 = arith.mulf %429, %415 : vector<4x4xf32>
    %431 = arith.addf %414, %430 : vector<4x4xf32>
    %c0_43 = arith.constant 0 : index
    %c10_44 = arith.constant 10 : index
    %c0_45 = arith.constant 0 : index
    %c0_46 = arith.constant 0 : index
    %432 = vector.load %arg2[%c0_43, %c10_44, %c0_45, %c0_46] : memref<1x16x5x5xf32, #tpu.memory_space<vmem>>, vector<1x1x5x5xf32>
    %433 = vector.shape_cast %432 : vector<1x1x5x5xf32> to vector<5x5xf32>
    %434 = vector.extract_strided_slice %433 {offsets = [0, 0], sizes = [4, 4], strides = [1, 1]} : vector<5x5xf32> to vector<4x4xf32>
    %c21 = arith.constant 21 : index
    %435 = memref.load %arg1[%c21] : memref<144xf32, #tpu.memory_space<smem>>
    %436 = vector.broadcast %435 : f32 to vector<4x4xf32>
    %437 = arith.mulf %436, %434 : vector<4x4xf32>
    %438 = arith.addf %419, %437 : vector<4x4xf32>
    %c57 = arith.constant 57 : index
    %439 = memref.load %arg1[%c57] : memref<144xf32, #tpu.memory_space<smem>>
    %440 = vector.broadcast %439 : f32 to vector<4x4xf32>
    %441 = arith.mulf %440, %434 : vector<4x4xf32>
    %442 = arith.addf %423, %441 : vector<4x4xf32>
    %c93 = arith.constant 93 : index
    %443 = memref.load %arg1[%c93] : memref<144xf32, #tpu.memory_space<smem>>
    %444 = vector.broadcast %443 : f32 to vector<4x4xf32>
    %445 = arith.mulf %444, %434 : vector<4x4xf32>
    %446 = arith.addf %427, %445 : vector<4x4xf32>
    %c129 = arith.constant 129 : index
    %447 = memref.load %arg1[%c129] : memref<144xf32, #tpu.memory_space<smem>>
    %448 = vector.broadcast %447 : f32 to vector<4x4xf32>
    %449 = arith.mulf %448, %434 : vector<4x4xf32>
    %450 = arith.addf %431, %449 : vector<4x4xf32>
    %451 = vector.extract_strided_slice %433 {offsets = [0, 1], sizes = [4, 4], strides = [1, 1]} : vector<5x5xf32> to vector<4x4xf32>
    %c23 = arith.constant 23 : index
    %452 = memref.load %arg1[%c23] : memref<144xf32, #tpu.memory_space<smem>>
    %453 = vector.broadcast %452 : f32 to vector<4x4xf32>
    %454 = arith.mulf %453, %451 : vector<4x4xf32>
    %455 = arith.addf %438, %454 : vector<4x4xf32>
    %c59 = arith.constant 59 : index
    %456 = memref.load %arg1[%c59] : memref<144xf32, #tpu.memory_space<smem>>
    %457 = vector.broadcast %456 : f32 to vector<4x4xf32>
    %458 = arith.mulf %457, %451 : vector<4x4xf32>
    %459 = arith.addf %442, %458 : vector<4x4xf32>
    %c95 = arith.constant 95 : index
    %460 = memref.load %arg1[%c95] : memref<144xf32, #tpu.memory_space<smem>>
    %461 = vector.broadcast %460 : f32 to vector<4x4xf32>
    %462 = arith.mulf %461, %451 : vector<4x4xf32>
    %463 = arith.addf %446, %462 : vector<4x4xf32>
    %c131 = arith.constant 131 : index
    %464 = memref.load %arg1[%c131] : memref<144xf32, #tpu.memory_space<smem>>
    %465 = vector.broadcast %464 : f32 to vector<4x4xf32>
    %466 = arith.mulf %465, %451 : vector<4x4xf32>
    %467 = arith.addf %450, %466 : vector<4x4xf32>
    %c0_47 = arith.constant 0 : index
    %c14_48 = arith.constant 14 : index
    %c0_49 = arith.constant 0 : index
    %c0_50 = arith.constant 0 : index
    %468 = vector.load %arg2[%c0_47, %c14_48, %c0_49, %c0_50] : memref<1x16x5x5xf32, #tpu.memory_space<vmem>>, vector<1x1x5x5xf32>
    %469 = vector.shape_cast %468 : vector<1x1x5x5xf32> to vector<5x5xf32>
    %470 = vector.extract_strided_slice %469 {offsets = [0, 0], sizes = [4, 4], strides = [1, 1]} : vector<5x5xf32> to vector<4x4xf32>
    %c22 = arith.constant 22 : index
    %471 = memref.load %arg1[%c22] : memref<144xf32, #tpu.memory_space<smem>>
    %472 = vector.broadcast %471 : f32 to vector<4x4xf32>
    %473 = arith.mulf %472, %470 : vector<4x4xf32>
    %474 = arith.addf %455, %473 : vector<4x4xf32>
    %c58 = arith.constant 58 : index
    %475 = memref.load %arg1[%c58] : memref<144xf32, #tpu.memory_space<smem>>
    %476 = vector.broadcast %475 : f32 to vector<4x4xf32>
    %477 = arith.mulf %476, %470 : vector<4x4xf32>
    %478 = arith.addf %459, %477 : vector<4x4xf32>
    %c94 = arith.constant 94 : index
    %479 = memref.load %arg1[%c94] : memref<144xf32, #tpu.memory_space<smem>>
    %480 = vector.broadcast %479 : f32 to vector<4x4xf32>
    %481 = arith.mulf %480, %470 : vector<4x4xf32>
    %482 = arith.addf %463, %481 : vector<4x4xf32>
    %c130 = arith.constant 130 : index
    %483 = memref.load %arg1[%c130] : memref<144xf32, #tpu.memory_space<smem>>
    %484 = vector.broadcast %483 : f32 to vector<4x4xf32>
    %485 = arith.mulf %484, %470 : vector<4x4xf32>
    %486 = arith.addf %467, %485 : vector<4x4xf32>
    %c0_51 = arith.constant 0 : index
    %c3_52 = arith.constant 3 : index
    %c0_53 = arith.constant 0 : index
    %c0_54 = arith.constant 0 : index
    %487 = vector.load %arg2[%c0_51, %c3_52, %c0_53, %c0_54] : memref<1x16x5x5xf32, #tpu.memory_space<vmem>>, vector<1x1x5x5xf32>
    %488 = vector.shape_cast %487 : vector<1x1x5x5xf32> to vector<5x5xf32>
    %489 = vector.extract_strided_slice %488 {offsets = [0, 0], sizes = [4, 4], strides = [1, 1]} : vector<5x5xf32> to vector<4x4xf32>
    %c27 = arith.constant 27 : index
    %490 = memref.load %arg1[%c27] : memref<144xf32, #tpu.memory_space<smem>>
    %491 = vector.broadcast %490 : f32 to vector<4x4xf32>
    %492 = arith.mulf %491, %489 : vector<4x4xf32>
    %493 = arith.addf %474, %492 : vector<4x4xf32>
    %c63 = arith.constant 63 : index
    %494 = memref.load %arg1[%c63] : memref<144xf32, #tpu.memory_space<smem>>
    %495 = vector.broadcast %494 : f32 to vector<4x4xf32>
    %496 = arith.mulf %495, %489 : vector<4x4xf32>
    %497 = arith.addf %478, %496 : vector<4x4xf32>
    %c99 = arith.constant 99 : index
    %498 = memref.load %arg1[%c99] : memref<144xf32, #tpu.memory_space<smem>>
    %499 = vector.broadcast %498 : f32 to vector<4x4xf32>
    %500 = arith.mulf %499, %489 : vector<4x4xf32>
    %501 = arith.addf %482, %500 : vector<4x4xf32>
    %c135 = arith.constant 135 : index
    %502 = memref.load %arg1[%c135] : memref<144xf32, #tpu.memory_space<smem>>
    %503 = vector.broadcast %502 : f32 to vector<4x4xf32>
    %504 = arith.mulf %503, %489 : vector<4x4xf32>
    %505 = arith.addf %486, %504 : vector<4x4xf32>
    %506 = vector.extract_strided_slice %488 {offsets = [0, 1], sizes = [4, 4], strides = [1, 1]} : vector<5x5xf32> to vector<4x4xf32>
    %c29 = arith.constant 29 : index
    %507 = memref.load %arg1[%c29] : memref<144xf32, #tpu.memory_space<smem>>
    %508 = vector.broadcast %507 : f32 to vector<4x4xf32>
    %509 = arith.mulf %508, %506 : vector<4x4xf32>
    %510 = arith.addf %493, %509 : vector<4x4xf32>
    %c65 = arith.constant 65 : index
    %511 = memref.load %arg1[%c65] : memref<144xf32, #tpu.memory_space<smem>>
    %512 = vector.broadcast %511 : f32 to vector<4x4xf32>
    %513 = arith.mulf %512, %506 : vector<4x4xf32>
    %514 = arith.addf %497, %513 : vector<4x4xf32>
    %c101 = arith.constant 101 : index
    %515 = memref.load %arg1[%c101] : memref<144xf32, #tpu.memory_space<smem>>
    %516 = vector.broadcast %515 : f32 to vector<4x4xf32>
    %517 = arith.mulf %516, %506 : vector<4x4xf32>
    %518 = arith.addf %501, %517 : vector<4x4xf32>
    %c137 = arith.constant 137 : index
    %519 = memref.load %arg1[%c137] : memref<144xf32, #tpu.memory_space<smem>>
    %520 = vector.broadcast %519 : f32 to vector<4x4xf32>
    %521 = arith.mulf %520, %506 : vector<4x4xf32>
    %522 = arith.addf %505, %521 : vector<4x4xf32>
    %523 = vector.extract_strided_slice %488 {offsets = [1, 0], sizes = [4, 4], strides = [1, 1]} : vector<5x5xf32> to vector<4x4xf32>
    %c33 = arith.constant 33 : index
    %524 = memref.load %arg1[%c33] : memref<144xf32, #tpu.memory_space<smem>>
    %525 = vector.broadcast %524 : f32 to vector<4x4xf32>
    %526 = arith.mulf %525, %523 : vector<4x4xf32>
    %527 = arith.addf %510, %526 : vector<4x4xf32>
    %c69 = arith.constant 69 : index
    %528 = memref.load %arg1[%c69] : memref<144xf32, #tpu.memory_space<smem>>
    %529 = vector.broadcast %528 : f32 to vector<4x4xf32>
    %530 = arith.mulf %529, %523 : vector<4x4xf32>
    %531 = arith.addf %514, %530 : vector<4x4xf32>
    %c105 = arith.constant 105 : index
    %532 = memref.load %arg1[%c105] : memref<144xf32, #tpu.memory_space<smem>>
    %533 = vector.broadcast %532 : f32 to vector<4x4xf32>
    %534 = arith.mulf %533, %523 : vector<4x4xf32>
    %535 = arith.addf %518, %534 : vector<4x4xf32>
    %c141 = arith.constant 141 : index
    %536 = memref.load %arg1[%c141] : memref<144xf32, #tpu.memory_space<smem>>
    %537 = vector.broadcast %536 : f32 to vector<4x4xf32>
    %538 = arith.mulf %537, %523 : vector<4x4xf32>
    %539 = arith.addf %522, %538 : vector<4x4xf32>
    %540 = vector.extract_strided_slice %488 {offsets = [1, 1], sizes = [4, 4], strides = [1, 1]} : vector<5x5xf32> to vector<4x4xf32>
    %c35 = arith.constant 35 : index
    %541 = memref.load %arg1[%c35] : memref<144xf32, #tpu.memory_space<smem>>
    %542 = vector.broadcast %541 : f32 to vector<4x4xf32>
    %543 = arith.mulf %542, %540 : vector<4x4xf32>
    %544 = arith.addf %527, %543 : vector<4x4xf32>
    %c71 = arith.constant 71 : index
    %545 = memref.load %arg1[%c71] : memref<144xf32, #tpu.memory_space<smem>>
    %546 = vector.broadcast %545 : f32 to vector<4x4xf32>
    %547 = arith.mulf %546, %540 : vector<4x4xf32>
    %548 = arith.addf %531, %547 : vector<4x4xf32>
    %c107 = arith.constant 107 : index
    %549 = memref.load %arg1[%c107] : memref<144xf32, #tpu.memory_space<smem>>
    %550 = vector.broadcast %549 : f32 to vector<4x4xf32>
    %551 = arith.mulf %550, %540 : vector<4x4xf32>
    %552 = arith.addf %535, %551 : vector<4x4xf32>
    %c143 = arith.constant 143 : index
    %553 = memref.load %arg1[%c143] : memref<144xf32, #tpu.memory_space<smem>>
    %554 = vector.broadcast %553 : f32 to vector<4x4xf32>
    %555 = arith.mulf %554, %540 : vector<4x4xf32>
    %556 = arith.addf %539, %555 : vector<4x4xf32>
    %c0_55 = arith.constant 0 : index
    %c7_56 = arith.constant 7 : index
    %c0_57 = arith.constant 0 : index
    %c0_58 = arith.constant 0 : index
    %557 = vector.load %arg2[%c0_55, %c7_56, %c0_57, %c0_58] : memref<1x16x5x5xf32, #tpu.memory_space<vmem>>, vector<1x1x5x5xf32>
    %558 = vector.shape_cast %557 : vector<1x1x5x5xf32> to vector<5x5xf32>
    %559 = vector.extract_strided_slice %558 {offsets = [0, 0], sizes = [4, 4], strides = [1, 1]} : vector<5x5xf32> to vector<4x4xf32>
    %c28 = arith.constant 28 : index
    %560 = memref.load %arg1[%c28] : memref<144xf32, #tpu.memory_space<smem>>
    %561 = vector.broadcast %560 : f32 to vector<4x4xf32>
    %562 = arith.mulf %561, %559 : vector<4x4xf32>
    %563 = arith.addf %544, %562 : vector<4x4xf32>
    %c64 = arith.constant 64 : index
    %564 = memref.load %arg1[%c64] : memref<144xf32, #tpu.memory_space<smem>>
    %565 = vector.broadcast %564 : f32 to vector<4x4xf32>
    %566 = arith.mulf %565, %559 : vector<4x4xf32>
    %567 = arith.addf %548, %566 : vector<4x4xf32>
    %c100 = arith.constant 100 : index
    %568 = memref.load %arg1[%c100] : memref<144xf32, #tpu.memory_space<smem>>
    %569 = vector.broadcast %568 : f32 to vector<4x4xf32>
    %570 = arith.mulf %569, %559 : vector<4x4xf32>
    %571 = arith.addf %552, %570 : vector<4x4xf32>
    %c136 = arith.constant 136 : index
    %572 = memref.load %arg1[%c136] : memref<144xf32, #tpu.memory_space<smem>>
    %573 = vector.broadcast %572 : f32 to vector<4x4xf32>
    %574 = arith.mulf %573, %559 : vector<4x4xf32>
    %575 = arith.addf %556, %574 : vector<4x4xf32>
    %576 = vector.extract_strided_slice %558 {offsets = [1, 0], sizes = [4, 4], strides = [1, 1]} : vector<5x5xf32> to vector<4x4xf32>
    %c34 = arith.constant 34 : index
    %577 = memref.load %arg1[%c34] : memref<144xf32, #tpu.memory_space<smem>>
    %578 = vector.broadcast %577 : f32 to vector<4x4xf32>
    %579 = arith.mulf %578, %576 : vector<4x4xf32>
    %580 = arith.addf %563, %579 : vector<4x4xf32>
    %c70 = arith.constant 70 : index
    %581 = memref.load %arg1[%c70] : memref<144xf32, #tpu.memory_space<smem>>
    %582 = vector.broadcast %581 : f32 to vector<4x4xf32>
    %583 = arith.mulf %582, %576 : vector<4x4xf32>
    %584 = arith.addf %567, %583 : vector<4x4xf32>
    %c106 = arith.constant 106 : index
    %585 = memref.load %arg1[%c106] : memref<144xf32, #tpu.memory_space<smem>>
    %586 = vector.broadcast %585 : f32 to vector<4x4xf32>
    %587 = arith.mulf %586, %576 : vector<4x4xf32>
    %588 = arith.addf %571, %587 : vector<4x4xf32>
    %c142 = arith.constant 142 : index
    %589 = memref.load %arg1[%c142] : memref<144xf32, #tpu.memory_space<smem>>
    %590 = vector.broadcast %589 : f32 to vector<4x4xf32>
    %591 = arith.mulf %590, %576 : vector<4x4xf32>
    %592 = arith.addf %575, %591 : vector<4x4xf32>
    %c0_59 = arith.constant 0 : index
    %c11_60 = arith.constant 11 : index
    %c0_61 = arith.constant 0 : index
    %c0_62 = arith.constant 0 : index
    %593 = vector.load %arg2[%c0_59, %c11_60, %c0_61, %c0_62] : memref<1x16x5x5xf32, #tpu.memory_space<vmem>>, vector<1x1x5x5xf32>
    %594 = vector.shape_cast %593 : vector<1x1x5x5xf32> to vector<5x5xf32>
    %595 = vector.extract_strided_slice %594 {offsets = [0, 0], sizes = [4, 4], strides = [1, 1]} : vector<5x5xf32> to vector<4x4xf32>
    %c30 = arith.constant 30 : index
    %596 = memref.load %arg1[%c30] : memref<144xf32, #tpu.memory_space<smem>>
    %597 = vector.broadcast %596 : f32 to vector<4x4xf32>
    %598 = arith.mulf %597, %595 : vector<4x4xf32>
    %599 = arith.addf %580, %598 : vector<4x4xf32>
    %c66 = arith.constant 66 : index
    %600 = memref.load %arg1[%c66] : memref<144xf32, #tpu.memory_space<smem>>
    %601 = vector.broadcast %600 : f32 to vector<4x4xf32>
    %602 = arith.mulf %601, %595 : vector<4x4xf32>
    %603 = arith.addf %584, %602 : vector<4x4xf32>
    %c102 = arith.constant 102 : index
    %604 = memref.load %arg1[%c102] : memref<144xf32, #tpu.memory_space<smem>>
    %605 = vector.broadcast %604 : f32 to vector<4x4xf32>
    %606 = arith.mulf %605, %595 : vector<4x4xf32>
    %607 = arith.addf %588, %606 : vector<4x4xf32>
    %c138 = arith.constant 138 : index
    %608 = memref.load %arg1[%c138] : memref<144xf32, #tpu.memory_space<smem>>
    %609 = vector.broadcast %608 : f32 to vector<4x4xf32>
    %610 = arith.mulf %609, %595 : vector<4x4xf32>
    %611 = arith.addf %592, %610 : vector<4x4xf32>
    %612 = vector.extract_strided_slice %594 {offsets = [0, 1], sizes = [4, 4], strides = [1, 1]} : vector<5x5xf32> to vector<4x4xf32>
    %c32 = arith.constant 32 : index
    %613 = memref.load %arg1[%c32] : memref<144xf32, #tpu.memory_space<smem>>
    %614 = vector.broadcast %613 : f32 to vector<4x4xf32>
    %615 = arith.mulf %614, %612 : vector<4x4xf32>
    %616 = arith.addf %599, %615 : vector<4x4xf32>
    %c68 = arith.constant 68 : index
    %617 = memref.load %arg1[%c68] : memref<144xf32, #tpu.memory_space<smem>>
    %618 = vector.broadcast %617 : f32 to vector<4x4xf32>
    %619 = arith.mulf %618, %612 : vector<4x4xf32>
    %620 = arith.addf %603, %619 : vector<4x4xf32>
    %c104 = arith.constant 104 : index
    %621 = memref.load %arg1[%c104] : memref<144xf32, #tpu.memory_space<smem>>
    %622 = vector.broadcast %621 : f32 to vector<4x4xf32>
    %623 = arith.mulf %622, %612 : vector<4x4xf32>
    %624 = arith.addf %607, %623 : vector<4x4xf32>
    %c140 = arith.constant 140 : index
    %625 = memref.load %arg1[%c140] : memref<144xf32, #tpu.memory_space<smem>>
    %626 = vector.broadcast %625 : f32 to vector<4x4xf32>
    %627 = arith.mulf %626, %612 : vector<4x4xf32>
    %628 = arith.addf %611, %627 : vector<4x4xf32>
    %c0_63 = arith.constant 0 : index
    %c15_64 = arith.constant 15 : index
    %c0_65 = arith.constant 0 : index
    %c0_66 = arith.constant 0 : index
    %629 = vector.load %arg2[%c0_63, %c15_64, %c0_65, %c0_66] : memref<1x16x5x5xf32, #tpu.memory_space<vmem>>, vector<1x1x5x5xf32>
    %630 = vector.shape_cast %629 : vector<1x1x5x5xf32> to vector<5x5xf32>
    %631 = vector.extract_strided_slice %630 {offsets = [0, 0], sizes = [4, 4], strides = [1, 1]} : vector<5x5xf32> to vector<4x4xf32>
    %c31 = arith.constant 31 : index
    %632 = memref.load %arg1[%c31] : memref<144xf32, #tpu.memory_space<smem>>
    %633 = vector.broadcast %632 : f32 to vector<4x4xf32>
    %634 = arith.mulf %633, %631 : vector<4x4xf32>
    %635 = arith.addf %616, %634 : vector<4x4xf32>
    %c67 = arith.constant 67 : index
    %636 = memref.load %arg1[%c67] : memref<144xf32, #tpu.memory_space<smem>>
    %637 = vector.broadcast %636 : f32 to vector<4x4xf32>
    %638 = arith.mulf %637, %631 : vector<4x4xf32>
    %639 = arith.addf %620, %638 : vector<4x4xf32>
    %c103 = arith.constant 103 : index
    %640 = memref.load %arg1[%c103] : memref<144xf32, #tpu.memory_space<smem>>
    %641 = vector.broadcast %640 : f32 to vector<4x4xf32>
    %642 = arith.mulf %641, %631 : vector<4x4xf32>
    %643 = arith.addf %624, %642 : vector<4x4xf32>
    %c139 = arith.constant 139 : index
    %644 = memref.load %arg1[%c139] : memref<144xf32, #tpu.memory_space<smem>>
    %645 = vector.broadcast %644 : f32 to vector<4x4xf32>
    %646 = arith.mulf %645, %631 : vector<4x4xf32>
    %647 = arith.addf %628, %646 : vector<4x4xf32>
    %c0_67 = arith.constant 0 : index
    %c0_68 = arith.constant 0 : index
    %c0_69 = arith.constant 0 : index
    %c0_70 = arith.constant 0 : index
    %648 = vector.load %arg3[%c0_67, %c0_68, %c0_69, %c0_70] : memref<1x4x4x4xf32, #tpu.memory_space<vmem>>, vector<1x1x4x4xf32>
    %649 = vector.shape_cast %648 : vector<1x1x4x4xf32> to vector<4x4xf32>
    %650 = vector.shape_cast %635 : vector<4x4xf32> to vector<1x1x4x4xf32>
    tpu.vector_store %arg3[%c0_67, %c0_68, %c0_69, %c0_70], %650 {strides = array<i32>} : memref<1x4x4x4xf32, #tpu.memory_space<vmem>>, vector<1x1x4x4xf32>,
    %c0_71 = arith.constant 0 : index
    %c1_72 = arith.constant 1 : index
    %c0_73 = arith.constant 0 : index
    %c0_74 = arith.constant 0 : index
    %651 = vector.load %arg3[%c0_71, %c1_72, %c0_73, %c0_74] : memref<1x4x4x4xf32, #tpu.memory_space<vmem>>, vector<1x1x4x4xf32>
    %652 = vector.shape_cast %651 : vector<1x1x4x4xf32> to vector<4x4xf32>
    %653 = vector.shape_cast %639 : vector<4x4xf32> to vector<1x1x4x4xf32>
    tpu.vector_store %arg3[%c0_71, %c1_72, %c0_73, %c0_74], %653 {strides = array<i32>} : memref<1x4x4x4xf32, #tpu.memory_space<vmem>>, vector<1x1x4x4xf32>,
    %c0_75 = arith.constant 0 : index
    %c2_76 = arith.constant 2 : index
    %c0_77 = arith.constant 0 : index
    %c0_78 = arith.constant 0 : index
    %654 = vector.load %arg3[%c0_75, %c2_76, %c0_77, %c0_78] : memref<1x4x4x4xf32, #tpu.memory_space<vmem>>, vector<1x1x4x4xf32>
    %655 = vector.shape_cast %654 : vector<1x1x4x4xf32> to vector<4x4xf32>
    %656 = vector.shape_cast %643 : vector<4x4xf32> to vector<1x1x4x4xf32>
    tpu.vector_store %arg3[%c0_75, %c2_76, %c0_77, %c0_78], %656 {strides = array<i32>} : memref<1x4x4x4xf32, #tpu.memory_space<vmem>>, vector<1x1x4x4xf32>,
    %c0_79 = arith.constant 0 : index
    %c3_80 = arith.constant 3 : index
    %c0_81 = arith.constant 0 : index
    %c0_82 = arith.constant 0 : index
    %657 = vector.load %arg3[%c0_79, %c3_80, %c0_81, %c0_82] : memref<1x4x4x4xf32, #tpu.memory_space<vmem>>, vector<1x1x4x4xf32>
    %658 = vector.shape_cast %657 : vector<1x1x4x4xf32> to vector<4x4xf32>
    %659 = vector.shape_cast %647 : vector<4x4xf32> to vector<1x1x4x4xf32>
    tpu.vector_store %arg3[%c0_79, %c3_80, %c0_81, %c0_82], %659 {strides = array<i32>} : memref<1x4x4x4xf32, #tpu.memory_space<vmem>>, vector<1x1x4x4xf32>,
    return
  }
  func.func @transform_0(%arg0: i32) -> i32 {
    %c0_i32 = arith.constant 0 : i32
    %c0_i32_0 = arith.constant 0 : i32
    return %c0_i32 : i32
  }
  func.func @transform_1(%arg0: i32) -> (i32, i32, i32, i32) {
    %c0_i32 = arith.constant 0 : i32
    %c0_i32_0 = arith.constant 0 : i32
    %c0_i32_1 = arith.constant 0 : i32
    %c0_i32_2 = arith.constant 0 : i32
    return %arg0, %c0_i32, %c0_i32_0, %c0_i32_1 : i32, i32, i32, i32
  }
  func.func @transform_2(%arg0: i32) -> (i32, i32, i32, i32) {
    %c0_i32 = arith.constant 0 : i32
    %c0_i32_0 = arith.constant 0 : i32
    %c0_i32_1 = arith.constant 0 : i32
    %c0_i32_2 = arith.constant 0 : i32
    return %arg0, %c0_i32, %c0_i32_0, %c0_i32_1 : i32, i32, i32, i32
  }
}

module attributes {stable_mosaic.version = 11 : i64} {
  func.func @_gauss_level_kernel(%arg0: i32, %arg1: memref<144xf32, #tpu.memory_space<smem>>, %arg2: memref<1x16x3x3xf32, #tpu.memory_space<vmem>>, %arg3: memref<1x4x2x2xf32, #tpu.memory_space<vmem>>) attributes {dimension_semantics = [#tpu.dimension_semantics<parallel>], iteration_bounds = array<i64: 2>, scalar_prefetch = 0 : i64, scratch_operands = 0 : i64, tpu.core_type = #tpu.core_type<tc>, window_params = [{transform_indices = @transform_0, window_bounds = array<i64: 144>}, {transform_indices = @transform_1, window_bounds = array<i64: 1, 16, 3, 3>}, {transform_indices = @transform_2, window_bounds = array<i64: 1, 4, 2, 2>}]} {
    %cst = arith.constant 0.000000e+00 : f32
    %0 = vector.broadcast %cst : f32 to vector<2x2xf32>
    %cst_0 = arith.constant 0.000000e+00 : f32
    %1 = vector.broadcast %cst_0 : f32 to vector<2x2xf32>
    %cst_1 = arith.constant 0.000000e+00 : f32
    %2 = vector.broadcast %cst_1 : f32 to vector<2x2xf32>
    %cst_2 = arith.constant 0.000000e+00 : f32
    %3 = vector.broadcast %cst_2 : f32 to vector<2x2xf32>
    %c0 = arith.constant 0 : index
    %c0_3 = arith.constant 0 : index
    %c0_4 = arith.constant 0 : index
    %c0_5 = arith.constant 0 : index
    %4 = vector.load %arg2[%c0, %c0_3, %c0_4, %c0_5] : memref<1x16x3x3xf32, #tpu.memory_space<vmem>>, vector<1x1x3x3xf32>
    %5 = vector.shape_cast %4 : vector<1x1x3x3xf32> to vector<3x3xf32>
    %6 = vector.extract_strided_slice %5 {offsets = [0, 0], sizes = [2, 2], strides = [1, 1]} : vector<3x3xf32> to vector<2x2xf32>
    %c0_6 = arith.constant 0 : index
    %7 = memref.load %arg1[%c0_6] : memref<144xf32, #tpu.memory_space<smem>>
    %8 = vector.broadcast %7 : f32 to vector<2x2xf32>
    %9 = arith.mulf %8, %6 : vector<2x2xf32>
    %10 = arith.addf %0, %9 : vector<2x2xf32>
    %c36 = arith.constant 36 : index
    %11 = memref.load %arg1[%c36] : memref<144xf32, #tpu.memory_space<smem>>
    %12 = vector.broadcast %11 : f32 to vector<2x2xf32>
    %13 = arith.mulf %12, %6 : vector<2x2xf32>
    %14 = arith.addf %1, %13 : vector<2x2xf32>
    %c72 = arith.constant 72 : index
    %15 = memref.load %arg1[%c72] : memref<144xf32, #tpu.memory_space<smem>>
    %16 = vector.broadcast %15 : f32 to vector<2x2xf32>
    %17 = arith.mulf %16, %6 : vector<2x2xf32>
    %18 = arith.addf %2, %17 : vector<2x2xf32>
    %c108 = arith.constant 108 : index
    %19 = memref.load %arg1[%c108] : memref<144xf32, #tpu.memory_space<smem>>
    %20 = vector.broadcast %19 : f32 to vector<2x2xf32>
    %21 = arith.mulf %20, %6 : vector<2x2xf32>
    %22 = arith.addf %3, %21 : vector<2x2xf32>
    %23 = vector.extract_strided_slice %5 {offsets = [0, 1], sizes = [2, 2], strides = [1, 1]} : vector<3x3xf32> to vector<2x2xf32>
    %c2 = arith.constant 2 : index
    %24 = memref.load %arg1[%c2] : memref<144xf32, #tpu.memory_space<smem>>
    %25 = vector.broadcast %24 : f32 to vector<2x2xf32>
    %26 = arith.mulf %25, %23 : vector<2x2xf32>
    %27 = arith.addf %10, %26 : vector<2x2xf32>
    %c38 = arith.constant 38 : index
    %28 = memref.load %arg1[%c38] : memref<144xf32, #tpu.memory_space<smem>>
    %29 = vector.broadcast %28 : f32 to vector<2x2xf32>
    %30 = arith.mulf %29, %23 : vector<2x2xf32>
    %31 = arith.addf %14, %30 : vector<2x2xf32>
    %c74 = arith.constant 74 : index
    %32 = memref.load %arg1[%c74] : memref<144xf32, #tpu.memory_space<smem>>
    %33 = vector.broadcast %32 : f32 to vector<2x2xf32>
    %34 = arith.mulf %33, %23 : vector<2x2xf32>
    %35 = arith.addf %18, %34 : vector<2x2xf32>
    %c110 = arith.constant 110 : index
    %36 = memref.load %arg1[%c110] : memref<144xf32, #tpu.memory_space<smem>>
    %37 = vector.broadcast %36 : f32 to vector<2x2xf32>
    %38 = arith.mulf %37, %23 : vector<2x2xf32>
    %39 = arith.addf %22, %38 : vector<2x2xf32>
    %40 = vector.extract_strided_slice %5 {offsets = [1, 0], sizes = [2, 2], strides = [1, 1]} : vector<3x3xf32> to vector<2x2xf32>
    %c6 = arith.constant 6 : index
    %41 = memref.load %arg1[%c6] : memref<144xf32, #tpu.memory_space<smem>>
    %42 = vector.broadcast %41 : f32 to vector<2x2xf32>
    %43 = arith.mulf %42, %40 : vector<2x2xf32>
    %44 = arith.addf %27, %43 : vector<2x2xf32>
    %c42 = arith.constant 42 : index
    %45 = memref.load %arg1[%c42] : memref<144xf32, #tpu.memory_space<smem>>
    %46 = vector.broadcast %45 : f32 to vector<2x2xf32>
    %47 = arith.mulf %46, %40 : vector<2x2xf32>
    %48 = arith.addf %31, %47 : vector<2x2xf32>
    %c78 = arith.constant 78 : index
    %49 = memref.load %arg1[%c78] : memref<144xf32, #tpu.memory_space<smem>>
    %50 = vector.broadcast %49 : f32 to vector<2x2xf32>
    %51 = arith.mulf %50, %40 : vector<2x2xf32>
    %52 = arith.addf %35, %51 : vector<2x2xf32>
    %c114 = arith.constant 114 : index
    %53 = memref.load %arg1[%c114] : memref<144xf32, #tpu.memory_space<smem>>
    %54 = vector.broadcast %53 : f32 to vector<2x2xf32>
    %55 = arith.mulf %54, %40 : vector<2x2xf32>
    %56 = arith.addf %39, %55 : vector<2x2xf32>
    %57 = vector.extract_strided_slice %5 {offsets = [1, 1], sizes = [2, 2], strides = [1, 1]} : vector<3x3xf32> to vector<2x2xf32>
    %c8 = arith.constant 8 : index
    %58 = memref.load %arg1[%c8] : memref<144xf32, #tpu.memory_space<smem>>
    %59 = vector.broadcast %58 : f32 to vector<2x2xf32>
    %60 = arith.mulf %59, %57 : vector<2x2xf32>
    %61 = arith.addf %44, %60 : vector<2x2xf32>
    %c44 = arith.constant 44 : index
    %62 = memref.load %arg1[%c44] : memref<144xf32, #tpu.memory_space<smem>>
    %63 = vector.broadcast %62 : f32 to vector<2x2xf32>
    %64 = arith.mulf %63, %57 : vector<2x2xf32>
    %65 = arith.addf %48, %64 : vector<2x2xf32>
    %c80 = arith.constant 80 : index
    %66 = memref.load %arg1[%c80] : memref<144xf32, #tpu.memory_space<smem>>
    %67 = vector.broadcast %66 : f32 to vector<2x2xf32>
    %68 = arith.mulf %67, %57 : vector<2x2xf32>
    %69 = arith.addf %52, %68 : vector<2x2xf32>
    %c116 = arith.constant 116 : index
    %70 = memref.load %arg1[%c116] : memref<144xf32, #tpu.memory_space<smem>>
    %71 = vector.broadcast %70 : f32 to vector<2x2xf32>
    %72 = arith.mulf %71, %57 : vector<2x2xf32>
    %73 = arith.addf %56, %72 : vector<2x2xf32>
    %c0_7 = arith.constant 0 : index
    %c4 = arith.constant 4 : index
    %c0_8 = arith.constant 0 : index
    %c0_9 = arith.constant 0 : index
    %74 = vector.load %arg2[%c0_7, %c4, %c0_8, %c0_9] : memref<1x16x3x3xf32, #tpu.memory_space<vmem>>, vector<1x1x3x3xf32>
    %75 = vector.shape_cast %74 : vector<1x1x3x3xf32> to vector<3x3xf32>
    %76 = vector.extract_strided_slice %75 {offsets = [0, 0], sizes = [2, 2], strides = [1, 1]} : vector<3x3xf32> to vector<2x2xf32>
    %c1 = arith.constant 1 : index
    %77 = memref.load %arg1[%c1] : memref<144xf32, #tpu.memory_space<smem>>
    %78 = vector.broadcast %77 : f32 to vector<2x2xf32>
    %79 = arith.mulf %78, %76 : vector<2x2xf32>
    %80 = arith.addf %61, %79 : vector<2x2xf32>
    %c37 = arith.constant 37 : index
    %81 = memref.load %arg1[%c37] : memref<144xf32, #tpu.memory_space<smem>>
    %82 = vector.broadcast %81 : f32 to vector<2x2xf32>
    %83 = arith.mulf %82, %76 : vector<2x2xf32>
    %84 = arith.addf %65, %83 : vector<2x2xf32>
    %c73 = arith.constant 73 : index
    %85 = memref.load %arg1[%c73] : memref<144xf32, #tpu.memory_space<smem>>
    %86 = vector.broadcast %85 : f32 to vector<2x2xf32>
    %87 = arith.mulf %86, %76 : vector<2x2xf32>
    %88 = arith.addf %69, %87 : vector<2x2xf32>
    %c109 = arith.constant 109 : index
    %89 = memref.load %arg1[%c109] : memref<144xf32, #tpu.memory_space<smem>>
    %90 = vector.broadcast %89 : f32 to vector<2x2xf32>
    %91 = arith.mulf %90, %76 : vector<2x2xf32>
    %92 = arith.addf %73, %91 : vector<2x2xf32>
    %93 = vector.extract_strided_slice %75 {offsets = [1, 0], sizes = [2, 2], strides = [1, 1]} : vector<3x3xf32> to vector<2x2xf32>
    %c7 = arith.constant 7 : index
    %94 = memref.load %arg1[%c7] : memref<144xf32, #tpu.memory_space<smem>>
    %95 = vector.broadcast %94 : f32 to vector<2x2xf32>
    %96 = arith.mulf %95, %93 : vector<2x2xf32>
    %97 = arith.addf %80, %96 : vector<2x2xf32>
    %c43 = arith.constant 43 : index
    %98 = memref.load %arg1[%c43] : memref<144xf32, #tpu.memory_space<smem>>
    %99 = vector.broadcast %98 : f32 to vector<2x2xf32>
    %100 = arith.mulf %99, %93 : vector<2x2xf32>
    %101 = arith.addf %84, %100 : vector<2x2xf32>
    %c79 = arith.constant 79 : index
    %102 = memref.load %arg1[%c79] : memref<144xf32, #tpu.memory_space<smem>>
    %103 = vector.broadcast %102 : f32 to vector<2x2xf32>
    %104 = arith.mulf %103, %93 : vector<2x2xf32>
    %105 = arith.addf %88, %104 : vector<2x2xf32>
    %c115 = arith.constant 115 : index
    %106 = memref.load %arg1[%c115] : memref<144xf32, #tpu.memory_space<smem>>
    %107 = vector.broadcast %106 : f32 to vector<2x2xf32>
    %108 = arith.mulf %107, %93 : vector<2x2xf32>
    %109 = arith.addf %92, %108 : vector<2x2xf32>
    %c0_10 = arith.constant 0 : index
    %c8_11 = arith.constant 8 : index
    %c0_12 = arith.constant 0 : index
    %c0_13 = arith.constant 0 : index
    %110 = vector.load %arg2[%c0_10, %c8_11, %c0_12, %c0_13] : memref<1x16x3x3xf32, #tpu.memory_space<vmem>>, vector<1x1x3x3xf32>
    %111 = vector.shape_cast %110 : vector<1x1x3x3xf32> to vector<3x3xf32>
    %112 = vector.extract_strided_slice %111 {offsets = [0, 0], sizes = [2, 2], strides = [1, 1]} : vector<3x3xf32> to vector<2x2xf32>
    %c3 = arith.constant 3 : index
    %113 = memref.load %arg1[%c3] : memref<144xf32, #tpu.memory_space<smem>>
    %114 = vector.broadcast %113 : f32 to vector<2x2xf32>
    %115 = arith.mulf %114, %112 : vector<2x2xf32>
    %116 = arith.addf %97, %115 : vector<2x2xf32>
    %c39 = arith.constant 39 : index
    %117 = memref.load %arg1[%c39] : memref<144xf32, #tpu.memory_space<smem>>
    %118 = vector.broadcast %117 : f32 to vector<2x2xf32>
    %119 = arith.mulf %118, %112 : vector<2x2xf32>
    %120 = arith.addf %101, %119 : vector<2x2xf32>
    %c75 = arith.constant 75 : index
    %121 = memref.load %arg1[%c75] : memref<144xf32, #tpu.memory_space<smem>>
    %122 = vector.broadcast %121 : f32 to vector<2x2xf32>
    %123 = arith.mulf %122, %112 : vector<2x2xf32>
    %124 = arith.addf %105, %123 : vector<2x2xf32>
    %c111 = arith.constant 111 : index
    %125 = memref.load %arg1[%c111] : memref<144xf32, #tpu.memory_space<smem>>
    %126 = vector.broadcast %125 : f32 to vector<2x2xf32>
    %127 = arith.mulf %126, %112 : vector<2x2xf32>
    %128 = arith.addf %109, %127 : vector<2x2xf32>
    %129 = vector.extract_strided_slice %111 {offsets = [0, 1], sizes = [2, 2], strides = [1, 1]} : vector<3x3xf32> to vector<2x2xf32>
    %c5 = arith.constant 5 : index
    %130 = memref.load %arg1[%c5] : memref<144xf32, #tpu.memory_space<smem>>
    %131 = vector.broadcast %130 : f32 to vector<2x2xf32>
    %132 = arith.mulf %131, %129 : vector<2x2xf32>
    %133 = arith.addf %116, %132 : vector<2x2xf32>
    %c41 = arith.constant 41 : index
    %134 = memref.load %arg1[%c41] : memref<144xf32, #tpu.memory_space<smem>>
    %135 = vector.broadcast %134 : f32 to vector<2x2xf32>
    %136 = arith.mulf %135, %129 : vector<2x2xf32>
    %137 = arith.addf %120, %136 : vector<2x2xf32>
    %c77 = arith.constant 77 : index
    %138 = memref.load %arg1[%c77] : memref<144xf32, #tpu.memory_space<smem>>
    %139 = vector.broadcast %138 : f32 to vector<2x2xf32>
    %140 = arith.mulf %139, %129 : vector<2x2xf32>
    %141 = arith.addf %124, %140 : vector<2x2xf32>
    %c113 = arith.constant 113 : index
    %142 = memref.load %arg1[%c113] : memref<144xf32, #tpu.memory_space<smem>>
    %143 = vector.broadcast %142 : f32 to vector<2x2xf32>
    %144 = arith.mulf %143, %129 : vector<2x2xf32>
    %145 = arith.addf %128, %144 : vector<2x2xf32>
    %c0_14 = arith.constant 0 : index
    %c12 = arith.constant 12 : index
    %c0_15 = arith.constant 0 : index
    %c0_16 = arith.constant 0 : index
    %146 = vector.load %arg2[%c0_14, %c12, %c0_15, %c0_16] : memref<1x16x3x3xf32, #tpu.memory_space<vmem>>, vector<1x1x3x3xf32>
    %147 = vector.shape_cast %146 : vector<1x1x3x3xf32> to vector<3x3xf32>
    %148 = vector.extract_strided_slice %147 {offsets = [0, 0], sizes = [2, 2], strides = [1, 1]} : vector<3x3xf32> to vector<2x2xf32>
    %c4_17 = arith.constant 4 : index
    %149 = memref.load %arg1[%c4_17] : memref<144xf32, #tpu.memory_space<smem>>
    %150 = vector.broadcast %149 : f32 to vector<2x2xf32>
    %151 = arith.mulf %150, %148 : vector<2x2xf32>
    %152 = arith.addf %133, %151 : vector<2x2xf32>
    %c40 = arith.constant 40 : index
    %153 = memref.load %arg1[%c40] : memref<144xf32, #tpu.memory_space<smem>>
    %154 = vector.broadcast %153 : f32 to vector<2x2xf32>
    %155 = arith.mulf %154, %148 : vector<2x2xf32>
    %156 = arith.addf %137, %155 : vector<2x2xf32>
    %c76 = arith.constant 76 : index
    %157 = memref.load %arg1[%c76] : memref<144xf32, #tpu.memory_space<smem>>
    %158 = vector.broadcast %157 : f32 to vector<2x2xf32>
    %159 = arith.mulf %158, %148 : vector<2x2xf32>
    %160 = arith.addf %141, %159 : vector<2x2xf32>
    %c112 = arith.constant 112 : index
    %161 = memref.load %arg1[%c112] : memref<144xf32, #tpu.memory_space<smem>>
    %162 = vector.broadcast %161 : f32 to vector<2x2xf32>
    %163 = arith.mulf %162, %148 : vector<2x2xf32>
    %164 = arith.addf %145, %163 : vector<2x2xf32>
    %c0_18 = arith.constant 0 : index
    %c1_19 = arith.constant 1 : index
    %c0_20 = arith.constant 0 : index
    %c0_21 = arith.constant 0 : index
    %165 = vector.load %arg2[%c0_18, %c1_19, %c0_20, %c0_21] : memref<1x16x3x3xf32, #tpu.memory_space<vmem>>, vector<1x1x3x3xf32>
    %166 = vector.shape_cast %165 : vector<1x1x3x3xf32> to vector<3x3xf32>
    %167 = vector.extract_strided_slice %166 {offsets = [0, 0], sizes = [2, 2], strides = [1, 1]} : vector<3x3xf32> to vector<2x2xf32>
    %c9 = arith.constant 9 : index
    %168 = memref.load %arg1[%c9] : memref<144xf32, #tpu.memory_space<smem>>
    %169 = vector.broadcast %168 : f32 to vector<2x2xf32>
    %170 = arith.mulf %169, %167 : vector<2x2xf32>
    %171 = arith.addf %152, %170 : vector<2x2xf32>
    %c45 = arith.constant 45 : index
    %172 = memref.load %arg1[%c45] : memref<144xf32, #tpu.memory_space<smem>>
    %173 = vector.broadcast %172 : f32 to vector<2x2xf32>
    %174 = arith.mulf %173, %167 : vector<2x2xf32>
    %175 = arith.addf %156, %174 : vector<2x2xf32>
    %c81 = arith.constant 81 : index
    %176 = memref.load %arg1[%c81] : memref<144xf32, #tpu.memory_space<smem>>
    %177 = vector.broadcast %176 : f32 to vector<2x2xf32>
    %178 = arith.mulf %177, %167 : vector<2x2xf32>
    %179 = arith.addf %160, %178 : vector<2x2xf32>
    %c117 = arith.constant 117 : index
    %180 = memref.load %arg1[%c117] : memref<144xf32, #tpu.memory_space<smem>>
    %181 = vector.broadcast %180 : f32 to vector<2x2xf32>
    %182 = arith.mulf %181, %167 : vector<2x2xf32>
    %183 = arith.addf %164, %182 : vector<2x2xf32>
    %184 = vector.extract_strided_slice %166 {offsets = [0, 1], sizes = [2, 2], strides = [1, 1]} : vector<3x3xf32> to vector<2x2xf32>
    %c11 = arith.constant 11 : index
    %185 = memref.load %arg1[%c11] : memref<144xf32, #tpu.memory_space<smem>>
    %186 = vector.broadcast %185 : f32 to vector<2x2xf32>
    %187 = arith.mulf %186, %184 : vector<2x2xf32>
    %188 = arith.addf %171, %187 : vector<2x2xf32>
    %c47 = arith.constant 47 : index
    %189 = memref.load %arg1[%c47] : memref<144xf32, #tpu.memory_space<smem>>
    %190 = vector.broadcast %189 : f32 to vector<2x2xf32>
    %191 = arith.mulf %190, %184 : vector<2x2xf32>
    %192 = arith.addf %175, %191 : vector<2x2xf32>
    %c83 = arith.constant 83 : index
    %193 = memref.load %arg1[%c83] : memref<144xf32, #tpu.memory_space<smem>>
    %194 = vector.broadcast %193 : f32 to vector<2x2xf32>
    %195 = arith.mulf %194, %184 : vector<2x2xf32>
    %196 = arith.addf %179, %195 : vector<2x2xf32>
    %c119 = arith.constant 119 : index
    %197 = memref.load %arg1[%c119] : memref<144xf32, #tpu.memory_space<smem>>
    %198 = vector.broadcast %197 : f32 to vector<2x2xf32>
    %199 = arith.mulf %198, %184 : vector<2x2xf32>
    %200 = arith.addf %183, %199 : vector<2x2xf32>
    %201 = vector.extract_strided_slice %166 {offsets = [1, 0], sizes = [2, 2], strides = [1, 1]} : vector<3x3xf32> to vector<2x2xf32>
    %c15 = arith.constant 15 : index
    %202 = memref.load %arg1[%c15] : memref<144xf32, #tpu.memory_space<smem>>
    %203 = vector.broadcast %202 : f32 to vector<2x2xf32>
    %204 = arith.mulf %203, %201 : vector<2x2xf32>
    %205 = arith.addf %188, %204 : vector<2x2xf32>
    %c51 = arith.constant 51 : index
    %206 = memref.load %arg1[%c51] : memref<144xf32, #tpu.memory_space<smem>>
    %207 = vector.broadcast %206 : f32 to vector<2x2xf32>
    %208 = arith.mulf %207, %201 : vector<2x2xf32>
    %209 = arith.addf %192, %208 : vector<2x2xf32>
    %c87 = arith.constant 87 : index
    %210 = memref.load %arg1[%c87] : memref<144xf32, #tpu.memory_space<smem>>
    %211 = vector.broadcast %210 : f32 to vector<2x2xf32>
    %212 = arith.mulf %211, %201 : vector<2x2xf32>
    %213 = arith.addf %196, %212 : vector<2x2xf32>
    %c123 = arith.constant 123 : index
    %214 = memref.load %arg1[%c123] : memref<144xf32, #tpu.memory_space<smem>>
    %215 = vector.broadcast %214 : f32 to vector<2x2xf32>
    %216 = arith.mulf %215, %201 : vector<2x2xf32>
    %217 = arith.addf %200, %216 : vector<2x2xf32>
    %218 = vector.extract_strided_slice %166 {offsets = [1, 1], sizes = [2, 2], strides = [1, 1]} : vector<3x3xf32> to vector<2x2xf32>
    %c17 = arith.constant 17 : index
    %219 = memref.load %arg1[%c17] : memref<144xf32, #tpu.memory_space<smem>>
    %220 = vector.broadcast %219 : f32 to vector<2x2xf32>
    %221 = arith.mulf %220, %218 : vector<2x2xf32>
    %222 = arith.addf %205, %221 : vector<2x2xf32>
    %c53 = arith.constant 53 : index
    %223 = memref.load %arg1[%c53] : memref<144xf32, #tpu.memory_space<smem>>
    %224 = vector.broadcast %223 : f32 to vector<2x2xf32>
    %225 = arith.mulf %224, %218 : vector<2x2xf32>
    %226 = arith.addf %209, %225 : vector<2x2xf32>
    %c89 = arith.constant 89 : index
    %227 = memref.load %arg1[%c89] : memref<144xf32, #tpu.memory_space<smem>>
    %228 = vector.broadcast %227 : f32 to vector<2x2xf32>
    %229 = arith.mulf %228, %218 : vector<2x2xf32>
    %230 = arith.addf %213, %229 : vector<2x2xf32>
    %c125 = arith.constant 125 : index
    %231 = memref.load %arg1[%c125] : memref<144xf32, #tpu.memory_space<smem>>
    %232 = vector.broadcast %231 : f32 to vector<2x2xf32>
    %233 = arith.mulf %232, %218 : vector<2x2xf32>
    %234 = arith.addf %217, %233 : vector<2x2xf32>
    %c0_22 = arith.constant 0 : index
    %c5_23 = arith.constant 5 : index
    %c0_24 = arith.constant 0 : index
    %c0_25 = arith.constant 0 : index
    %235 = vector.load %arg2[%c0_22, %c5_23, %c0_24, %c0_25] : memref<1x16x3x3xf32, #tpu.memory_space<vmem>>, vector<1x1x3x3xf32>
    %236 = vector.shape_cast %235 : vector<1x1x3x3xf32> to vector<3x3xf32>
    %237 = vector.extract_strided_slice %236 {offsets = [0, 0], sizes = [2, 2], strides = [1, 1]} : vector<3x3xf32> to vector<2x2xf32>
    %c10 = arith.constant 10 : index
    %238 = memref.load %arg1[%c10] : memref<144xf32, #tpu.memory_space<smem>>
    %239 = vector.broadcast %238 : f32 to vector<2x2xf32>
    %240 = arith.mulf %239, %237 : vector<2x2xf32>
    %241 = arith.addf %222, %240 : vector<2x2xf32>
    %c46 = arith.constant 46 : index
    %242 = memref.load %arg1[%c46] : memref<144xf32, #tpu.memory_space<smem>>
    %243 = vector.broadcast %242 : f32 to vector<2x2xf32>
    %244 = arith.mulf %243, %237 : vector<2x2xf32>
    %245 = arith.addf %226, %244 : vector<2x2xf32>
    %c82 = arith.constant 82 : index
    %246 = memref.load %arg1[%c82] : memref<144xf32, #tpu.memory_space<smem>>
    %247 = vector.broadcast %246 : f32 to vector<2x2xf32>
    %248 = arith.mulf %247, %237 : vector<2x2xf32>
    %249 = arith.addf %230, %248 : vector<2x2xf32>
    %c118 = arith.constant 118 : index
    %250 = memref.load %arg1[%c118] : memref<144xf32, #tpu.memory_space<smem>>
    %251 = vector.broadcast %250 : f32 to vector<2x2xf32>
    %252 = arith.mulf %251, %237 : vector<2x2xf32>
    %253 = arith.addf %234, %252 : vector<2x2xf32>
    %254 = vector.extract_strided_slice %236 {offsets = [1, 0], sizes = [2, 2], strides = [1, 1]} : vector<3x3xf32> to vector<2x2xf32>
    %c16 = arith.constant 16 : index
    %255 = memref.load %arg1[%c16] : memref<144xf32, #tpu.memory_space<smem>>
    %256 = vector.broadcast %255 : f32 to vector<2x2xf32>
    %257 = arith.mulf %256, %254 : vector<2x2xf32>
    %258 = arith.addf %241, %257 : vector<2x2xf32>
    %c52 = arith.constant 52 : index
    %259 = memref.load %arg1[%c52] : memref<144xf32, #tpu.memory_space<smem>>
    %260 = vector.broadcast %259 : f32 to vector<2x2xf32>
    %261 = arith.mulf %260, %254 : vector<2x2xf32>
    %262 = arith.addf %245, %261 : vector<2x2xf32>
    %c88 = arith.constant 88 : index
    %263 = memref.load %arg1[%c88] : memref<144xf32, #tpu.memory_space<smem>>
    %264 = vector.broadcast %263 : f32 to vector<2x2xf32>
    %265 = arith.mulf %264, %254 : vector<2x2xf32>
    %266 = arith.addf %249, %265 : vector<2x2xf32>
    %c124 = arith.constant 124 : index
    %267 = memref.load %arg1[%c124] : memref<144xf32, #tpu.memory_space<smem>>
    %268 = vector.broadcast %267 : f32 to vector<2x2xf32>
    %269 = arith.mulf %268, %254 : vector<2x2xf32>
    %270 = arith.addf %253, %269 : vector<2x2xf32>
    %c0_26 = arith.constant 0 : index
    %c9_27 = arith.constant 9 : index
    %c0_28 = arith.constant 0 : index
    %c0_29 = arith.constant 0 : index
    %271 = vector.load %arg2[%c0_26, %c9_27, %c0_28, %c0_29] : memref<1x16x3x3xf32, #tpu.memory_space<vmem>>, vector<1x1x3x3xf32>
    %272 = vector.shape_cast %271 : vector<1x1x3x3xf32> to vector<3x3xf32>
    %273 = vector.extract_strided_slice %272 {offsets = [0, 0], sizes = [2, 2], strides = [1, 1]} : vector<3x3xf32> to vector<2x2xf32>
    %c12_30 = arith.constant 12 : index
    %274 = memref.load %arg1[%c12_30] : memref<144xf32, #tpu.memory_space<smem>>
    %275 = vector.broadcast %274 : f32 to vector<2x2xf32>
    %276 = arith.mulf %275, %273 : vector<2x2xf32>
    %277 = arith.addf %258, %276 : vector<2x2xf32>
    %c48 = arith.constant 48 : index
    %278 = memref.load %arg1[%c48] : memref<144xf32, #tpu.memory_space<smem>>
    %279 = vector.broadcast %278 : f32 to vector<2x2xf32>
    %280 = arith.mulf %279, %273 : vector<2x2xf32>
    %281 = arith.addf %262, %280 : vector<2x2xf32>
    %c84 = arith.constant 84 : index
    %282 = memref.load %arg1[%c84] : memref<144xf32, #tpu.memory_space<smem>>
    %283 = vector.broadcast %282 : f32 to vector<2x2xf32>
    %284 = arith.mulf %283, %273 : vector<2x2xf32>
    %285 = arith.addf %266, %284 : vector<2x2xf32>
    %c120 = arith.constant 120 : index
    %286 = memref.load %arg1[%c120] : memref<144xf32, #tpu.memory_space<smem>>
    %287 = vector.broadcast %286 : f32 to vector<2x2xf32>
    %288 = arith.mulf %287, %273 : vector<2x2xf32>
    %289 = arith.addf %270, %288 : vector<2x2xf32>
    %290 = vector.extract_strided_slice %272 {offsets = [0, 1], sizes = [2, 2], strides = [1, 1]} : vector<3x3xf32> to vector<2x2xf32>
    %c14 = arith.constant 14 : index
    %291 = memref.load %arg1[%c14] : memref<144xf32, #tpu.memory_space<smem>>
    %292 = vector.broadcast %291 : f32 to vector<2x2xf32>
    %293 = arith.mulf %292, %290 : vector<2x2xf32>
    %294 = arith.addf %277, %293 : vector<2x2xf32>
    %c50 = arith.constant 50 : index
    %295 = memref.load %arg1[%c50] : memref<144xf32, #tpu.memory_space<smem>>
    %296 = vector.broadcast %295 : f32 to vector<2x2xf32>
    %297 = arith.mulf %296, %290 : vector<2x2xf32>
    %298 = arith.addf %281, %297 : vector<2x2xf32>
    %c86 = arith.constant 86 : index
    %299 = memref.load %arg1[%c86] : memref<144xf32, #tpu.memory_space<smem>>
    %300 = vector.broadcast %299 : f32 to vector<2x2xf32>
    %301 = arith.mulf %300, %290 : vector<2x2xf32>
    %302 = arith.addf %285, %301 : vector<2x2xf32>
    %c122 = arith.constant 122 : index
    %303 = memref.load %arg1[%c122] : memref<144xf32, #tpu.memory_space<smem>>
    %304 = vector.broadcast %303 : f32 to vector<2x2xf32>
    %305 = arith.mulf %304, %290 : vector<2x2xf32>
    %306 = arith.addf %289, %305 : vector<2x2xf32>
    %c0_31 = arith.constant 0 : index
    %c13 = arith.constant 13 : index
    %c0_32 = arith.constant 0 : index
    %c0_33 = arith.constant 0 : index
    %307 = vector.load %arg2[%c0_31, %c13, %c0_32, %c0_33] : memref<1x16x3x3xf32, #tpu.memory_space<vmem>>, vector<1x1x3x3xf32>
    %308 = vector.shape_cast %307 : vector<1x1x3x3xf32> to vector<3x3xf32>
    %309 = vector.extract_strided_slice %308 {offsets = [0, 0], sizes = [2, 2], strides = [1, 1]} : vector<3x3xf32> to vector<2x2xf32>
    %c13_34 = arith.constant 13 : index
    %310 = memref.load %arg1[%c13_34] : memref<144xf32, #tpu.memory_space<smem>>
    %311 = vector.broadcast %310 : f32 to vector<2x2xf32>
    %312 = arith.mulf %311, %309 : vector<2x2xf32>
    %313 = arith.addf %294, %312 : vector<2x2xf32>
    %c49 = arith.constant 49 : index
    %314 = memref.load %arg1[%c49] : memref<144xf32, #tpu.memory_space<smem>>
    %315 = vector.broadcast %314 : f32 to vector<2x2xf32>
    %316 = arith.mulf %315, %309 : vector<2x2xf32>
    %317 = arith.addf %298, %316 : vector<2x2xf32>
    %c85 = arith.constant 85 : index
    %318 = memref.load %arg1[%c85] : memref<144xf32, #tpu.memory_space<smem>>
    %319 = vector.broadcast %318 : f32 to vector<2x2xf32>
    %320 = arith.mulf %319, %309 : vector<2x2xf32>
    %321 = arith.addf %302, %320 : vector<2x2xf32>
    %c121 = arith.constant 121 : index
    %322 = memref.load %arg1[%c121] : memref<144xf32, #tpu.memory_space<smem>>
    %323 = vector.broadcast %322 : f32 to vector<2x2xf32>
    %324 = arith.mulf %323, %309 : vector<2x2xf32>
    %325 = arith.addf %306, %324 : vector<2x2xf32>
    %c0_35 = arith.constant 0 : index
    %c2_36 = arith.constant 2 : index
    %c0_37 = arith.constant 0 : index
    %c0_38 = arith.constant 0 : index
    %326 = vector.load %arg2[%c0_35, %c2_36, %c0_37, %c0_38] : memref<1x16x3x3xf32, #tpu.memory_space<vmem>>, vector<1x1x3x3xf32>
    %327 = vector.shape_cast %326 : vector<1x1x3x3xf32> to vector<3x3xf32>
    %328 = vector.extract_strided_slice %327 {offsets = [0, 0], sizes = [2, 2], strides = [1, 1]} : vector<3x3xf32> to vector<2x2xf32>
    %c18 = arith.constant 18 : index
    %329 = memref.load %arg1[%c18] : memref<144xf32, #tpu.memory_space<smem>>
    %330 = vector.broadcast %329 : f32 to vector<2x2xf32>
    %331 = arith.mulf %330, %328 : vector<2x2xf32>
    %332 = arith.addf %313, %331 : vector<2x2xf32>
    %c54 = arith.constant 54 : index
    %333 = memref.load %arg1[%c54] : memref<144xf32, #tpu.memory_space<smem>>
    %334 = vector.broadcast %333 : f32 to vector<2x2xf32>
    %335 = arith.mulf %334, %328 : vector<2x2xf32>
    %336 = arith.addf %317, %335 : vector<2x2xf32>
    %c90 = arith.constant 90 : index
    %337 = memref.load %arg1[%c90] : memref<144xf32, #tpu.memory_space<smem>>
    %338 = vector.broadcast %337 : f32 to vector<2x2xf32>
    %339 = arith.mulf %338, %328 : vector<2x2xf32>
    %340 = arith.addf %321, %339 : vector<2x2xf32>
    %c126 = arith.constant 126 : index
    %341 = memref.load %arg1[%c126] : memref<144xf32, #tpu.memory_space<smem>>
    %342 = vector.broadcast %341 : f32 to vector<2x2xf32>
    %343 = arith.mulf %342, %328 : vector<2x2xf32>
    %344 = arith.addf %325, %343 : vector<2x2xf32>
    %345 = vector.extract_strided_slice %327 {offsets = [0, 1], sizes = [2, 2], strides = [1, 1]} : vector<3x3xf32> to vector<2x2xf32>
    %c20 = arith.constant 20 : index
    %346 = memref.load %arg1[%c20] : memref<144xf32, #tpu.memory_space<smem>>
    %347 = vector.broadcast %346 : f32 to vector<2x2xf32>
    %348 = arith.mulf %347, %345 : vector<2x2xf32>
    %349 = arith.addf %332, %348 : vector<2x2xf32>
    %c56 = arith.constant 56 : index
    %350 = memref.load %arg1[%c56] : memref<144xf32, #tpu.memory_space<smem>>
    %351 = vector.broadcast %350 : f32 to vector<2x2xf32>
    %352 = arith.mulf %351, %345 : vector<2x2xf32>
    %353 = arith.addf %336, %352 : vector<2x2xf32>
    %c92 = arith.constant 92 : index
    %354 = memref.load %arg1[%c92] : memref<144xf32, #tpu.memory_space<smem>>
    %355 = vector.broadcast %354 : f32 to vector<2x2xf32>
    %356 = arith.mulf %355, %345 : vector<2x2xf32>
    %357 = arith.addf %340, %356 : vector<2x2xf32>
    %c128 = arith.constant 128 : index
    %358 = memref.load %arg1[%c128] : memref<144xf32, #tpu.memory_space<smem>>
    %359 = vector.broadcast %358 : f32 to vector<2x2xf32>
    %360 = arith.mulf %359, %345 : vector<2x2xf32>
    %361 = arith.addf %344, %360 : vector<2x2xf32>
    %362 = vector.extract_strided_slice %327 {offsets = [1, 0], sizes = [2, 2], strides = [1, 1]} : vector<3x3xf32> to vector<2x2xf32>
    %c24 = arith.constant 24 : index
    %363 = memref.load %arg1[%c24] : memref<144xf32, #tpu.memory_space<smem>>
    %364 = vector.broadcast %363 : f32 to vector<2x2xf32>
    %365 = arith.mulf %364, %362 : vector<2x2xf32>
    %366 = arith.addf %349, %365 : vector<2x2xf32>
    %c60 = arith.constant 60 : index
    %367 = memref.load %arg1[%c60] : memref<144xf32, #tpu.memory_space<smem>>
    %368 = vector.broadcast %367 : f32 to vector<2x2xf32>
    %369 = arith.mulf %368, %362 : vector<2x2xf32>
    %370 = arith.addf %353, %369 : vector<2x2xf32>
    %c96 = arith.constant 96 : index
    %371 = memref.load %arg1[%c96] : memref<144xf32, #tpu.memory_space<smem>>
    %372 = vector.broadcast %371 : f32 to vector<2x2xf32>
    %373 = arith.mulf %372, %362 : vector<2x2xf32>
    %374 = arith.addf %357, %373 : vector<2x2xf32>
    %c132 = arith.constant 132 : index
    %375 = memref.load %arg1[%c132] : memref<144xf32, #tpu.memory_space<smem>>
    %376 = vector.broadcast %375 : f32 to vector<2x2xf32>
    %377 = arith.mulf %376, %362 : vector<2x2xf32>
    %378 = arith.addf %361, %377 : vector<2x2xf32>
    %379 = vector.extract_strided_slice %327 {offsets = [1, 1], sizes = [2, 2], strides = [1, 1]} : vector<3x3xf32> to vector<2x2xf32>
    %c26 = arith.constant 26 : index
    %380 = memref.load %arg1[%c26] : memref<144xf32, #tpu.memory_space<smem>>
    %381 = vector.broadcast %380 : f32 to vector<2x2xf32>
    %382 = arith.mulf %381, %379 : vector<2x2xf32>
    %383 = arith.addf %366, %382 : vector<2x2xf32>
    %c62 = arith.constant 62 : index
    %384 = memref.load %arg1[%c62] : memref<144xf32, #tpu.memory_space<smem>>
    %385 = vector.broadcast %384 : f32 to vector<2x2xf32>
    %386 = arith.mulf %385, %379 : vector<2x2xf32>
    %387 = arith.addf %370, %386 : vector<2x2xf32>
    %c98 = arith.constant 98 : index
    %388 = memref.load %arg1[%c98] : memref<144xf32, #tpu.memory_space<smem>>
    %389 = vector.broadcast %388 : f32 to vector<2x2xf32>
    %390 = arith.mulf %389, %379 : vector<2x2xf32>
    %391 = arith.addf %374, %390 : vector<2x2xf32>
    %c134 = arith.constant 134 : index
    %392 = memref.load %arg1[%c134] : memref<144xf32, #tpu.memory_space<smem>>
    %393 = vector.broadcast %392 : f32 to vector<2x2xf32>
    %394 = arith.mulf %393, %379 : vector<2x2xf32>
    %395 = arith.addf %378, %394 : vector<2x2xf32>
    %c0_39 = arith.constant 0 : index
    %c6_40 = arith.constant 6 : index
    %c0_41 = arith.constant 0 : index
    %c0_42 = arith.constant 0 : index
    %396 = vector.load %arg2[%c0_39, %c6_40, %c0_41, %c0_42] : memref<1x16x3x3xf32, #tpu.memory_space<vmem>>, vector<1x1x3x3xf32>
    %397 = vector.shape_cast %396 : vector<1x1x3x3xf32> to vector<3x3xf32>
    %398 = vector.extract_strided_slice %397 {offsets = [0, 0], sizes = [2, 2], strides = [1, 1]} : vector<3x3xf32> to vector<2x2xf32>
    %c19 = arith.constant 19 : index
    %399 = memref.load %arg1[%c19] : memref<144xf32, #tpu.memory_space<smem>>
    %400 = vector.broadcast %399 : f32 to vector<2x2xf32>
    %401 = arith.mulf %400, %398 : vector<2x2xf32>
    %402 = arith.addf %383, %401 : vector<2x2xf32>
    %c55 = arith.constant 55 : index
    %403 = memref.load %arg1[%c55] : memref<144xf32, #tpu.memory_space<smem>>
    %404 = vector.broadcast %403 : f32 to vector<2x2xf32>
    %405 = arith.mulf %404, %398 : vector<2x2xf32>
    %406 = arith.addf %387, %405 : vector<2x2xf32>
    %c91 = arith.constant 91 : index
    %407 = memref.load %arg1[%c91] : memref<144xf32, #tpu.memory_space<smem>>
    %408 = vector.broadcast %407 : f32 to vector<2x2xf32>
    %409 = arith.mulf %408, %398 : vector<2x2xf32>
    %410 = arith.addf %391, %409 : vector<2x2xf32>
    %c127 = arith.constant 127 : index
    %411 = memref.load %arg1[%c127] : memref<144xf32, #tpu.memory_space<smem>>
    %412 = vector.broadcast %411 : f32 to vector<2x2xf32>
    %413 = arith.mulf %412, %398 : vector<2x2xf32>
    %414 = arith.addf %395, %413 : vector<2x2xf32>
    %415 = vector.extract_strided_slice %397 {offsets = [1, 0], sizes = [2, 2], strides = [1, 1]} : vector<3x3xf32> to vector<2x2xf32>
    %c25 = arith.constant 25 : index
    %416 = memref.load %arg1[%c25] : memref<144xf32, #tpu.memory_space<smem>>
    %417 = vector.broadcast %416 : f32 to vector<2x2xf32>
    %418 = arith.mulf %417, %415 : vector<2x2xf32>
    %419 = arith.addf %402, %418 : vector<2x2xf32>
    %c61 = arith.constant 61 : index
    %420 = memref.load %arg1[%c61] : memref<144xf32, #tpu.memory_space<smem>>
    %421 = vector.broadcast %420 : f32 to vector<2x2xf32>
    %422 = arith.mulf %421, %415 : vector<2x2xf32>
    %423 = arith.addf %406, %422 : vector<2x2xf32>
    %c97 = arith.constant 97 : index
    %424 = memref.load %arg1[%c97] : memref<144xf32, #tpu.memory_space<smem>>
    %425 = vector.broadcast %424 : f32 to vector<2x2xf32>
    %426 = arith.mulf %425, %415 : vector<2x2xf32>
    %427 = arith.addf %410, %426 : vector<2x2xf32>
    %c133 = arith.constant 133 : index
    %428 = memref.load %arg1[%c133] : memref<144xf32, #tpu.memory_space<smem>>
    %429 = vector.broadcast %428 : f32 to vector<2x2xf32>
    %430 = arith.mulf %429, %415 : vector<2x2xf32>
    %431 = arith.addf %414, %430 : vector<2x2xf32>
    %c0_43 = arith.constant 0 : index
    %c10_44 = arith.constant 10 : index
    %c0_45 = arith.constant 0 : index
    %c0_46 = arith.constant 0 : index
    %432 = vector.load %arg2[%c0_43, %c10_44, %c0_45, %c0_46] : memref<1x16x3x3xf32, #tpu.memory_space<vmem>>, vector<1x1x3x3xf32>
    %433 = vector.shape_cast %432 : vector<1x1x3x3xf32> to vector<3x3xf32>
    %434 = vector.extract_strided_slice %433 {offsets = [0, 0], sizes = [2, 2], strides = [1, 1]} : vector<3x3xf32> to vector<2x2xf32>
    %c21 = arith.constant 21 : index
    %435 = memref.load %arg1[%c21] : memref<144xf32, #tpu.memory_space<smem>>
    %436 = vector.broadcast %435 : f32 to vector<2x2xf32>
    %437 = arith.mulf %436, %434 : vector<2x2xf32>
    %438 = arith.addf %419, %437 : vector<2x2xf32>
    %c57 = arith.constant 57 : index
    %439 = memref.load %arg1[%c57] : memref<144xf32, #tpu.memory_space<smem>>
    %440 = vector.broadcast %439 : f32 to vector<2x2xf32>
    %441 = arith.mulf %440, %434 : vector<2x2xf32>
    %442 = arith.addf %423, %441 : vector<2x2xf32>
    %c93 = arith.constant 93 : index
    %443 = memref.load %arg1[%c93] : memref<144xf32, #tpu.memory_space<smem>>
    %444 = vector.broadcast %443 : f32 to vector<2x2xf32>
    %445 = arith.mulf %444, %434 : vector<2x2xf32>
    %446 = arith.addf %427, %445 : vector<2x2xf32>
    %c129 = arith.constant 129 : index
    %447 = memref.load %arg1[%c129] : memref<144xf32, #tpu.memory_space<smem>>
    %448 = vector.broadcast %447 : f32 to vector<2x2xf32>
    %449 = arith.mulf %448, %434 : vector<2x2xf32>
    %450 = arith.addf %431, %449 : vector<2x2xf32>
    %451 = vector.extract_strided_slice %433 {offsets = [0, 1], sizes = [2, 2], strides = [1, 1]} : vector<3x3xf32> to vector<2x2xf32>
    %c23 = arith.constant 23 : index
    %452 = memref.load %arg1[%c23] : memref<144xf32, #tpu.memory_space<smem>>
    %453 = vector.broadcast %452 : f32 to vector<2x2xf32>
    %454 = arith.mulf %453, %451 : vector<2x2xf32>
    %455 = arith.addf %438, %454 : vector<2x2xf32>
    %c59 = arith.constant 59 : index
    %456 = memref.load %arg1[%c59] : memref<144xf32, #tpu.memory_space<smem>>
    %457 = vector.broadcast %456 : f32 to vector<2x2xf32>
    %458 = arith.mulf %457, %451 : vector<2x2xf32>
    %459 = arith.addf %442, %458 : vector<2x2xf32>
    %c95 = arith.constant 95 : index
    %460 = memref.load %arg1[%c95] : memref<144xf32, #tpu.memory_space<smem>>
    %461 = vector.broadcast %460 : f32 to vector<2x2xf32>
    %462 = arith.mulf %461, %451 : vector<2x2xf32>
    %463 = arith.addf %446, %462 : vector<2x2xf32>
    %c131 = arith.constant 131 : index
    %464 = memref.load %arg1[%c131] : memref<144xf32, #tpu.memory_space<smem>>
    %465 = vector.broadcast %464 : f32 to vector<2x2xf32>
    %466 = arith.mulf %465, %451 : vector<2x2xf32>
    %467 = arith.addf %450, %466 : vector<2x2xf32>
    %c0_47 = arith.constant 0 : index
    %c14_48 = arith.constant 14 : index
    %c0_49 = arith.constant 0 : index
    %c0_50 = arith.constant 0 : index
    %468 = vector.load %arg2[%c0_47, %c14_48, %c0_49, %c0_50] : memref<1x16x3x3xf32, #tpu.memory_space<vmem>>, vector<1x1x3x3xf32>
    %469 = vector.shape_cast %468 : vector<1x1x3x3xf32> to vector<3x3xf32>
    %470 = vector.extract_strided_slice %469 {offsets = [0, 0], sizes = [2, 2], strides = [1, 1]} : vector<3x3xf32> to vector<2x2xf32>
    %c22 = arith.constant 22 : index
    %471 = memref.load %arg1[%c22] : memref<144xf32, #tpu.memory_space<smem>>
    %472 = vector.broadcast %471 : f32 to vector<2x2xf32>
    %473 = arith.mulf %472, %470 : vector<2x2xf32>
    %474 = arith.addf %455, %473 : vector<2x2xf32>
    %c58 = arith.constant 58 : index
    %475 = memref.load %arg1[%c58] : memref<144xf32, #tpu.memory_space<smem>>
    %476 = vector.broadcast %475 : f32 to vector<2x2xf32>
    %477 = arith.mulf %476, %470 : vector<2x2xf32>
    %478 = arith.addf %459, %477 : vector<2x2xf32>
    %c94 = arith.constant 94 : index
    %479 = memref.load %arg1[%c94] : memref<144xf32, #tpu.memory_space<smem>>
    %480 = vector.broadcast %479 : f32 to vector<2x2xf32>
    %481 = arith.mulf %480, %470 : vector<2x2xf32>
    %482 = arith.addf %463, %481 : vector<2x2xf32>
    %c130 = arith.constant 130 : index
    %483 = memref.load %arg1[%c130] : memref<144xf32, #tpu.memory_space<smem>>
    %484 = vector.broadcast %483 : f32 to vector<2x2xf32>
    %485 = arith.mulf %484, %470 : vector<2x2xf32>
    %486 = arith.addf %467, %485 : vector<2x2xf32>
    %c0_51 = arith.constant 0 : index
    %c3_52 = arith.constant 3 : index
    %c0_53 = arith.constant 0 : index
    %c0_54 = arith.constant 0 : index
    %487 = vector.load %arg2[%c0_51, %c3_52, %c0_53, %c0_54] : memref<1x16x3x3xf32, #tpu.memory_space<vmem>>, vector<1x1x3x3xf32>
    %488 = vector.shape_cast %487 : vector<1x1x3x3xf32> to vector<3x3xf32>
    %489 = vector.extract_strided_slice %488 {offsets = [0, 0], sizes = [2, 2], strides = [1, 1]} : vector<3x3xf32> to vector<2x2xf32>
    %c27 = arith.constant 27 : index
    %490 = memref.load %arg1[%c27] : memref<144xf32, #tpu.memory_space<smem>>
    %491 = vector.broadcast %490 : f32 to vector<2x2xf32>
    %492 = arith.mulf %491, %489 : vector<2x2xf32>
    %493 = arith.addf %474, %492 : vector<2x2xf32>
    %c63 = arith.constant 63 : index
    %494 = memref.load %arg1[%c63] : memref<144xf32, #tpu.memory_space<smem>>
    %495 = vector.broadcast %494 : f32 to vector<2x2xf32>
    %496 = arith.mulf %495, %489 : vector<2x2xf32>
    %497 = arith.addf %478, %496 : vector<2x2xf32>
    %c99 = arith.constant 99 : index
    %498 = memref.load %arg1[%c99] : memref<144xf32, #tpu.memory_space<smem>>
    %499 = vector.broadcast %498 : f32 to vector<2x2xf32>
    %500 = arith.mulf %499, %489 : vector<2x2xf32>
    %501 = arith.addf %482, %500 : vector<2x2xf32>
    %c135 = arith.constant 135 : index
    %502 = memref.load %arg1[%c135] : memref<144xf32, #tpu.memory_space<smem>>
    %503 = vector.broadcast %502 : f32 to vector<2x2xf32>
    %504 = arith.mulf %503, %489 : vector<2x2xf32>
    %505 = arith.addf %486, %504 : vector<2x2xf32>
    %506 = vector.extract_strided_slice %488 {offsets = [0, 1], sizes = [2, 2], strides = [1, 1]} : vector<3x3xf32> to vector<2x2xf32>
    %c29 = arith.constant 29 : index
    %507 = memref.load %arg1[%c29] : memref<144xf32, #tpu.memory_space<smem>>
    %508 = vector.broadcast %507 : f32 to vector<2x2xf32>
    %509 = arith.mulf %508, %506 : vector<2x2xf32>
    %510 = arith.addf %493, %509 : vector<2x2xf32>
    %c65 = arith.constant 65 : index
    %511 = memref.load %arg1[%c65] : memref<144xf32, #tpu.memory_space<smem>>
    %512 = vector.broadcast %511 : f32 to vector<2x2xf32>
    %513 = arith.mulf %512, %506 : vector<2x2xf32>
    %514 = arith.addf %497, %513 : vector<2x2xf32>
    %c101 = arith.constant 101 : index
    %515 = memref.load %arg1[%c101] : memref<144xf32, #tpu.memory_space<smem>>
    %516 = vector.broadcast %515 : f32 to vector<2x2xf32>
    %517 = arith.mulf %516, %506 : vector<2x2xf32>
    %518 = arith.addf %501, %517 : vector<2x2xf32>
    %c137 = arith.constant 137 : index
    %519 = memref.load %arg1[%c137] : memref<144xf32, #tpu.memory_space<smem>>
    %520 = vector.broadcast %519 : f32 to vector<2x2xf32>
    %521 = arith.mulf %520, %506 : vector<2x2xf32>
    %522 = arith.addf %505, %521 : vector<2x2xf32>
    %523 = vector.extract_strided_slice %488 {offsets = [1, 0], sizes = [2, 2], strides = [1, 1]} : vector<3x3xf32> to vector<2x2xf32>
    %c33 = arith.constant 33 : index
    %524 = memref.load %arg1[%c33] : memref<144xf32, #tpu.memory_space<smem>>
    %525 = vector.broadcast %524 : f32 to vector<2x2xf32>
    %526 = arith.mulf %525, %523 : vector<2x2xf32>
    %527 = arith.addf %510, %526 : vector<2x2xf32>
    %c69 = arith.constant 69 : index
    %528 = memref.load %arg1[%c69] : memref<144xf32, #tpu.memory_space<smem>>
    %529 = vector.broadcast %528 : f32 to vector<2x2xf32>
    %530 = arith.mulf %529, %523 : vector<2x2xf32>
    %531 = arith.addf %514, %530 : vector<2x2xf32>
    %c105 = arith.constant 105 : index
    %532 = memref.load %arg1[%c105] : memref<144xf32, #tpu.memory_space<smem>>
    %533 = vector.broadcast %532 : f32 to vector<2x2xf32>
    %534 = arith.mulf %533, %523 : vector<2x2xf32>
    %535 = arith.addf %518, %534 : vector<2x2xf32>
    %c141 = arith.constant 141 : index
    %536 = memref.load %arg1[%c141] : memref<144xf32, #tpu.memory_space<smem>>
    %537 = vector.broadcast %536 : f32 to vector<2x2xf32>
    %538 = arith.mulf %537, %523 : vector<2x2xf32>
    %539 = arith.addf %522, %538 : vector<2x2xf32>
    %540 = vector.extract_strided_slice %488 {offsets = [1, 1], sizes = [2, 2], strides = [1, 1]} : vector<3x3xf32> to vector<2x2xf32>
    %c35 = arith.constant 35 : index
    %541 = memref.load %arg1[%c35] : memref<144xf32, #tpu.memory_space<smem>>
    %542 = vector.broadcast %541 : f32 to vector<2x2xf32>
    %543 = arith.mulf %542, %540 : vector<2x2xf32>
    %544 = arith.addf %527, %543 : vector<2x2xf32>
    %c71 = arith.constant 71 : index
    %545 = memref.load %arg1[%c71] : memref<144xf32, #tpu.memory_space<smem>>
    %546 = vector.broadcast %545 : f32 to vector<2x2xf32>
    %547 = arith.mulf %546, %540 : vector<2x2xf32>
    %548 = arith.addf %531, %547 : vector<2x2xf32>
    %c107 = arith.constant 107 : index
    %549 = memref.load %arg1[%c107] : memref<144xf32, #tpu.memory_space<smem>>
    %550 = vector.broadcast %549 : f32 to vector<2x2xf32>
    %551 = arith.mulf %550, %540 : vector<2x2xf32>
    %552 = arith.addf %535, %551 : vector<2x2xf32>
    %c143 = arith.constant 143 : index
    %553 = memref.load %arg1[%c143] : memref<144xf32, #tpu.memory_space<smem>>
    %554 = vector.broadcast %553 : f32 to vector<2x2xf32>
    %555 = arith.mulf %554, %540 : vector<2x2xf32>
    %556 = arith.addf %539, %555 : vector<2x2xf32>
    %c0_55 = arith.constant 0 : index
    %c7_56 = arith.constant 7 : index
    %c0_57 = arith.constant 0 : index
    %c0_58 = arith.constant 0 : index
    %557 = vector.load %arg2[%c0_55, %c7_56, %c0_57, %c0_58] : memref<1x16x3x3xf32, #tpu.memory_space<vmem>>, vector<1x1x3x3xf32>
    %558 = vector.shape_cast %557 : vector<1x1x3x3xf32> to vector<3x3xf32>
    %559 = vector.extract_strided_slice %558 {offsets = [0, 0], sizes = [2, 2], strides = [1, 1]} : vector<3x3xf32> to vector<2x2xf32>
    %c28 = arith.constant 28 : index
    %560 = memref.load %arg1[%c28] : memref<144xf32, #tpu.memory_space<smem>>
    %561 = vector.broadcast %560 : f32 to vector<2x2xf32>
    %562 = arith.mulf %561, %559 : vector<2x2xf32>
    %563 = arith.addf %544, %562 : vector<2x2xf32>
    %c64 = arith.constant 64 : index
    %564 = memref.load %arg1[%c64] : memref<144xf32, #tpu.memory_space<smem>>
    %565 = vector.broadcast %564 : f32 to vector<2x2xf32>
    %566 = arith.mulf %565, %559 : vector<2x2xf32>
    %567 = arith.addf %548, %566 : vector<2x2xf32>
    %c100 = arith.constant 100 : index
    %568 = memref.load %arg1[%c100] : memref<144xf32, #tpu.memory_space<smem>>
    %569 = vector.broadcast %568 : f32 to vector<2x2xf32>
    %570 = arith.mulf %569, %559 : vector<2x2xf32>
    %571 = arith.addf %552, %570 : vector<2x2xf32>
    %c136 = arith.constant 136 : index
    %572 = memref.load %arg1[%c136] : memref<144xf32, #tpu.memory_space<smem>>
    %573 = vector.broadcast %572 : f32 to vector<2x2xf32>
    %574 = arith.mulf %573, %559 : vector<2x2xf32>
    %575 = arith.addf %556, %574 : vector<2x2xf32>
    %576 = vector.extract_strided_slice %558 {offsets = [1, 0], sizes = [2, 2], strides = [1, 1]} : vector<3x3xf32> to vector<2x2xf32>
    %c34 = arith.constant 34 : index
    %577 = memref.load %arg1[%c34] : memref<144xf32, #tpu.memory_space<smem>>
    %578 = vector.broadcast %577 : f32 to vector<2x2xf32>
    %579 = arith.mulf %578, %576 : vector<2x2xf32>
    %580 = arith.addf %563, %579 : vector<2x2xf32>
    %c70 = arith.constant 70 : index
    %581 = memref.load %arg1[%c70] : memref<144xf32, #tpu.memory_space<smem>>
    %582 = vector.broadcast %581 : f32 to vector<2x2xf32>
    %583 = arith.mulf %582, %576 : vector<2x2xf32>
    %584 = arith.addf %567, %583 : vector<2x2xf32>
    %c106 = arith.constant 106 : index
    %585 = memref.load %arg1[%c106] : memref<144xf32, #tpu.memory_space<smem>>
    %586 = vector.broadcast %585 : f32 to vector<2x2xf32>
    %587 = arith.mulf %586, %576 : vector<2x2xf32>
    %588 = arith.addf %571, %587 : vector<2x2xf32>
    %c142 = arith.constant 142 : index
    %589 = memref.load %arg1[%c142] : memref<144xf32, #tpu.memory_space<smem>>
    %590 = vector.broadcast %589 : f32 to vector<2x2xf32>
    %591 = arith.mulf %590, %576 : vector<2x2xf32>
    %592 = arith.addf %575, %591 : vector<2x2xf32>
    %c0_59 = arith.constant 0 : index
    %c11_60 = arith.constant 11 : index
    %c0_61 = arith.constant 0 : index
    %c0_62 = arith.constant 0 : index
    %593 = vector.load %arg2[%c0_59, %c11_60, %c0_61, %c0_62] : memref<1x16x3x3xf32, #tpu.memory_space<vmem>>, vector<1x1x3x3xf32>
    %594 = vector.shape_cast %593 : vector<1x1x3x3xf32> to vector<3x3xf32>
    %595 = vector.extract_strided_slice %594 {offsets = [0, 0], sizes = [2, 2], strides = [1, 1]} : vector<3x3xf32> to vector<2x2xf32>
    %c30 = arith.constant 30 : index
    %596 = memref.load %arg1[%c30] : memref<144xf32, #tpu.memory_space<smem>>
    %597 = vector.broadcast %596 : f32 to vector<2x2xf32>
    %598 = arith.mulf %597, %595 : vector<2x2xf32>
    %599 = arith.addf %580, %598 : vector<2x2xf32>
    %c66 = arith.constant 66 : index
    %600 = memref.load %arg1[%c66] : memref<144xf32, #tpu.memory_space<smem>>
    %601 = vector.broadcast %600 : f32 to vector<2x2xf32>
    %602 = arith.mulf %601, %595 : vector<2x2xf32>
    %603 = arith.addf %584, %602 : vector<2x2xf32>
    %c102 = arith.constant 102 : index
    %604 = memref.load %arg1[%c102] : memref<144xf32, #tpu.memory_space<smem>>
    %605 = vector.broadcast %604 : f32 to vector<2x2xf32>
    %606 = arith.mulf %605, %595 : vector<2x2xf32>
    %607 = arith.addf %588, %606 : vector<2x2xf32>
    %c138 = arith.constant 138 : index
    %608 = memref.load %arg1[%c138] : memref<144xf32, #tpu.memory_space<smem>>
    %609 = vector.broadcast %608 : f32 to vector<2x2xf32>
    %610 = arith.mulf %609, %595 : vector<2x2xf32>
    %611 = arith.addf %592, %610 : vector<2x2xf32>
    %612 = vector.extract_strided_slice %594 {offsets = [0, 1], sizes = [2, 2], strides = [1, 1]} : vector<3x3xf32> to vector<2x2xf32>
    %c32 = arith.constant 32 : index
    %613 = memref.load %arg1[%c32] : memref<144xf32, #tpu.memory_space<smem>>
    %614 = vector.broadcast %613 : f32 to vector<2x2xf32>
    %615 = arith.mulf %614, %612 : vector<2x2xf32>
    %616 = arith.addf %599, %615 : vector<2x2xf32>
    %c68 = arith.constant 68 : index
    %617 = memref.load %arg1[%c68] : memref<144xf32, #tpu.memory_space<smem>>
    %618 = vector.broadcast %617 : f32 to vector<2x2xf32>
    %619 = arith.mulf %618, %612 : vector<2x2xf32>
    %620 = arith.addf %603, %619 : vector<2x2xf32>
    %c104 = arith.constant 104 : index
    %621 = memref.load %arg1[%c104] : memref<144xf32, #tpu.memory_space<smem>>
    %622 = vector.broadcast %621 : f32 to vector<2x2xf32>
    %623 = arith.mulf %622, %612 : vector<2x2xf32>
    %624 = arith.addf %607, %623 : vector<2x2xf32>
    %c140 = arith.constant 140 : index
    %625 = memref.load %arg1[%c140] : memref<144xf32, #tpu.memory_space<smem>>
    %626 = vector.broadcast %625 : f32 to vector<2x2xf32>
    %627 = arith.mulf %626, %612 : vector<2x2xf32>
    %628 = arith.addf %611, %627 : vector<2x2xf32>
    %c0_63 = arith.constant 0 : index
    %c15_64 = arith.constant 15 : index
    %c0_65 = arith.constant 0 : index
    %c0_66 = arith.constant 0 : index
    %629 = vector.load %arg2[%c0_63, %c15_64, %c0_65, %c0_66] : memref<1x16x3x3xf32, #tpu.memory_space<vmem>>, vector<1x1x3x3xf32>
    %630 = vector.shape_cast %629 : vector<1x1x3x3xf32> to vector<3x3xf32>
    %631 = vector.extract_strided_slice %630 {offsets = [0, 0], sizes = [2, 2], strides = [1, 1]} : vector<3x3xf32> to vector<2x2xf32>
    %c31 = arith.constant 31 : index
    %632 = memref.load %arg1[%c31] : memref<144xf32, #tpu.memory_space<smem>>
    %633 = vector.broadcast %632 : f32 to vector<2x2xf32>
    %634 = arith.mulf %633, %631 : vector<2x2xf32>
    %635 = arith.addf %616, %634 : vector<2x2xf32>
    %c67 = arith.constant 67 : index
    %636 = memref.load %arg1[%c67] : memref<144xf32, #tpu.memory_space<smem>>
    %637 = vector.broadcast %636 : f32 to vector<2x2xf32>
    %638 = arith.mulf %637, %631 : vector<2x2xf32>
    %639 = arith.addf %620, %638 : vector<2x2xf32>
    %c103 = arith.constant 103 : index
    %640 = memref.load %arg1[%c103] : memref<144xf32, #tpu.memory_space<smem>>
    %641 = vector.broadcast %640 : f32 to vector<2x2xf32>
    %642 = arith.mulf %641, %631 : vector<2x2xf32>
    %643 = arith.addf %624, %642 : vector<2x2xf32>
    %c139 = arith.constant 139 : index
    %644 = memref.load %arg1[%c139] : memref<144xf32, #tpu.memory_space<smem>>
    %645 = vector.broadcast %644 : f32 to vector<2x2xf32>
    %646 = arith.mulf %645, %631 : vector<2x2xf32>
    %647 = arith.addf %628, %646 : vector<2x2xf32>
    %c0_67 = arith.constant 0 : index
    %c0_68 = arith.constant 0 : index
    %c0_69 = arith.constant 0 : index
    %c0_70 = arith.constant 0 : index
    %648 = vector.load %arg3[%c0_67, %c0_68, %c0_69, %c0_70] : memref<1x4x2x2xf32, #tpu.memory_space<vmem>>, vector<1x1x2x2xf32>
    %649 = vector.shape_cast %648 : vector<1x1x2x2xf32> to vector<2x2xf32>
    %650 = vector.shape_cast %635 : vector<2x2xf32> to vector<1x1x2x2xf32>
    tpu.vector_store %arg3[%c0_67, %c0_68, %c0_69, %c0_70], %650 {strides = array<i32>} : memref<1x4x2x2xf32, #tpu.memory_space<vmem>>, vector<1x1x2x2xf32>,
    %c0_71 = arith.constant 0 : index
    %c1_72 = arith.constant 1 : index
    %c0_73 = arith.constant 0 : index
    %c0_74 = arith.constant 0 : index
    %651 = vector.load %arg3[%c0_71, %c1_72, %c0_73, %c0_74] : memref<1x4x2x2xf32, #tpu.memory_space<vmem>>, vector<1x1x2x2xf32>
    %652 = vector.shape_cast %651 : vector<1x1x2x2xf32> to vector<2x2xf32>
    %653 = vector.shape_cast %639 : vector<2x2xf32> to vector<1x1x2x2xf32>
    tpu.vector_store %arg3[%c0_71, %c1_72, %c0_73, %c0_74], %653 {strides = array<i32>} : memref<1x4x2x2xf32, #tpu.memory_space<vmem>>, vector<1x1x2x2xf32>,
    %c0_75 = arith.constant 0 : index
    %c2_76 = arith.constant 2 : index
    %c0_77 = arith.constant 0 : index
    %c0_78 = arith.constant 0 : index
    %654 = vector.load %arg3[%c0_75, %c2_76, %c0_77, %c0_78] : memref<1x4x2x2xf32, #tpu.memory_space<vmem>>, vector<1x1x2x2xf32>
    %655 = vector.shape_cast %654 : vector<1x1x2x2xf32> to vector<2x2xf32>
    %656 = vector.shape_cast %643 : vector<2x2xf32> to vector<1x1x2x2xf32>
    tpu.vector_store %arg3[%c0_75, %c2_76, %c0_77, %c0_78], %656 {strides = array<i32>} : memref<1x4x2x2xf32, #tpu.memory_space<vmem>>, vector<1x1x2x2xf32>,
    %c0_79 = arith.constant 0 : index
    %c3_80 = arith.constant 3 : index
    %c0_81 = arith.constant 0 : index
    %c0_82 = arith.constant 0 : index
    %657 = vector.load %arg3[%c0_79, %c3_80, %c0_81, %c0_82] : memref<1x4x2x2xf32, #tpu.memory_space<vmem>>, vector<1x1x2x2xf32>
    %658 = vector.shape_cast %657 : vector<1x1x2x2xf32> to vector<2x2xf32>
    %659 = vector.shape_cast %647 : vector<2x2xf32> to vector<1x1x2x2xf32>
    tpu.vector_store %arg3[%c0_79, %c3_80, %c0_81, %c0_82], %659 {strides = array<i32>} : memref<1x4x2x2xf32, #tpu.memory_space<vmem>>, vector<1x1x2x2xf32>,
    return
  }
  func.func @transform_0(%arg0: i32) -> i32 {
    %c0_i32 = arith.constant 0 : i32
    %c0_i32_0 = arith.constant 0 : i32
    return %c0_i32 : i32
  }
  func.func @transform_1(%arg0: i32) -> (i32, i32, i32, i32) {
    %c0_i32 = arith.constant 0 : i32
    %c0_i32_0 = arith.constant 0 : i32
    %c0_i32_1 = arith.constant 0 : i32
    %c0_i32_2 = arith.constant 0 : i32
    return %arg0, %c0_i32, %c0_i32_0, %c0_i32_1 : i32, i32, i32, i32
  }
  func.func @transform_2(%arg0: i32) -> (i32, i32, i32, i32) {
    %c0_i32 = arith.constant 0 : i32
    %c0_i32_0 = arith.constant 0 : i32
    %c0_i32_1 = arith.constant 0 : i32
    %c0_i32_2 = arith.constant 0 : i32
    return %arg0, %c0_i32, %c0_i32_0, %c0_i32_1 : i32, i32, i32, i32
  }
}

module attributes {stable_mosaic.version = 11 : i64} {
  func.func @_gauss_level_kernel(%arg0: i32, %arg1: memref<144xf32, #tpu.memory_space<smem>>, %arg2: memref<1x16x2x2xf32, #tpu.memory_space<vmem>>, %arg3: memref<1x4x1x1xf32, #tpu.memory_space<vmem>>) attributes {dimension_semantics = [#tpu.dimension_semantics<parallel>], iteration_bounds = array<i64: 2>, scalar_prefetch = 0 : i64, scratch_operands = 0 : i64, tpu.core_type = #tpu.core_type<tc>, window_params = [{transform_indices = @transform_0, window_bounds = array<i64: 144>}, {transform_indices = @transform_1, window_bounds = array<i64: 1, 16, 2, 2>}, {transform_indices = @transform_2, window_bounds = array<i64: 1, 4, 1, 1>}]} {
    %cst = arith.constant 0.000000e+00 : f32
    %0 = vector.broadcast %cst : f32 to vector<1x1xf32>
    %cst_0 = arith.constant 0.000000e+00 : f32
    %1 = vector.broadcast %cst_0 : f32 to vector<1x1xf32>
    %cst_1 = arith.constant 0.000000e+00 : f32
    %2 = vector.broadcast %cst_1 : f32 to vector<1x1xf32>
    %cst_2 = arith.constant 0.000000e+00 : f32
    %3 = vector.broadcast %cst_2 : f32 to vector<1x1xf32>
    %c0 = arith.constant 0 : index
    %c0_3 = arith.constant 0 : index
    %c0_4 = arith.constant 0 : index
    %c0_5 = arith.constant 0 : index
    %4 = vector.load %arg2[%c0, %c0_3, %c0_4, %c0_5] : memref<1x16x2x2xf32, #tpu.memory_space<vmem>>, vector<1x1x2x2xf32>
    %5 = vector.shape_cast %4 : vector<1x1x2x2xf32> to vector<2x2xf32>
    %6 = vector.extract_strided_slice %5 {offsets = [0, 0], sizes = [1, 1], strides = [1, 1]} : vector<2x2xf32> to vector<1x1xf32>
    %c0_6 = arith.constant 0 : index
    %7 = memref.load %arg1[%c0_6] : memref<144xf32, #tpu.memory_space<smem>>
    %8 = vector.broadcast %7 : f32 to vector<1x1xf32>
    %9 = arith.mulf %8, %6 : vector<1x1xf32>
    %10 = arith.addf %0, %9 : vector<1x1xf32>
    %c36 = arith.constant 36 : index
    %11 = memref.load %arg1[%c36] : memref<144xf32, #tpu.memory_space<smem>>
    %12 = vector.broadcast %11 : f32 to vector<1x1xf32>
    %13 = arith.mulf %12, %6 : vector<1x1xf32>
    %14 = arith.addf %1, %13 : vector<1x1xf32>
    %c72 = arith.constant 72 : index
    %15 = memref.load %arg1[%c72] : memref<144xf32, #tpu.memory_space<smem>>
    %16 = vector.broadcast %15 : f32 to vector<1x1xf32>
    %17 = arith.mulf %16, %6 : vector<1x1xf32>
    %18 = arith.addf %2, %17 : vector<1x1xf32>
    %c108 = arith.constant 108 : index
    %19 = memref.load %arg1[%c108] : memref<144xf32, #tpu.memory_space<smem>>
    %20 = vector.broadcast %19 : f32 to vector<1x1xf32>
    %21 = arith.mulf %20, %6 : vector<1x1xf32>
    %22 = arith.addf %3, %21 : vector<1x1xf32>
    %23 = vector.extract_strided_slice %5 {offsets = [0, 1], sizes = [1, 1], strides = [1, 1]} : vector<2x2xf32> to vector<1x1xf32>
    %c2 = arith.constant 2 : index
    %24 = memref.load %arg1[%c2] : memref<144xf32, #tpu.memory_space<smem>>
    %25 = vector.broadcast %24 : f32 to vector<1x1xf32>
    %26 = arith.mulf %25, %23 : vector<1x1xf32>
    %27 = arith.addf %10, %26 : vector<1x1xf32>
    %c38 = arith.constant 38 : index
    %28 = memref.load %arg1[%c38] : memref<144xf32, #tpu.memory_space<smem>>
    %29 = vector.broadcast %28 : f32 to vector<1x1xf32>
    %30 = arith.mulf %29, %23 : vector<1x1xf32>
    %31 = arith.addf %14, %30 : vector<1x1xf32>
    %c74 = arith.constant 74 : index
    %32 = memref.load %arg1[%c74] : memref<144xf32, #tpu.memory_space<smem>>
    %33 = vector.broadcast %32 : f32 to vector<1x1xf32>
    %34 = arith.mulf %33, %23 : vector<1x1xf32>
    %35 = arith.addf %18, %34 : vector<1x1xf32>
    %c110 = arith.constant 110 : index
    %36 = memref.load %arg1[%c110] : memref<144xf32, #tpu.memory_space<smem>>
    %37 = vector.broadcast %36 : f32 to vector<1x1xf32>
    %38 = arith.mulf %37, %23 : vector<1x1xf32>
    %39 = arith.addf %22, %38 : vector<1x1xf32>
    %40 = vector.extract_strided_slice %5 {offsets = [1, 0], sizes = [1, 1], strides = [1, 1]} : vector<2x2xf32> to vector<1x1xf32>
    %c6 = arith.constant 6 : index
    %41 = memref.load %arg1[%c6] : memref<144xf32, #tpu.memory_space<smem>>
    %42 = vector.broadcast %41 : f32 to vector<1x1xf32>
    %43 = arith.mulf %42, %40 : vector<1x1xf32>
    %44 = arith.addf %27, %43 : vector<1x1xf32>
    %c42 = arith.constant 42 : index
    %45 = memref.load %arg1[%c42] : memref<144xf32, #tpu.memory_space<smem>>
    %46 = vector.broadcast %45 : f32 to vector<1x1xf32>
    %47 = arith.mulf %46, %40 : vector<1x1xf32>
    %48 = arith.addf %31, %47 : vector<1x1xf32>
    %c78 = arith.constant 78 : index
    %49 = memref.load %arg1[%c78] : memref<144xf32, #tpu.memory_space<smem>>
    %50 = vector.broadcast %49 : f32 to vector<1x1xf32>
    %51 = arith.mulf %50, %40 : vector<1x1xf32>
    %52 = arith.addf %35, %51 : vector<1x1xf32>
    %c114 = arith.constant 114 : index
    %53 = memref.load %arg1[%c114] : memref<144xf32, #tpu.memory_space<smem>>
    %54 = vector.broadcast %53 : f32 to vector<1x1xf32>
    %55 = arith.mulf %54, %40 : vector<1x1xf32>
    %56 = arith.addf %39, %55 : vector<1x1xf32>
    %57 = vector.extract_strided_slice %5 {offsets = [1, 1], sizes = [1, 1], strides = [1, 1]} : vector<2x2xf32> to vector<1x1xf32>
    %c8 = arith.constant 8 : index
    %58 = memref.load %arg1[%c8] : memref<144xf32, #tpu.memory_space<smem>>
    %59 = vector.broadcast %58 : f32 to vector<1x1xf32>
    %60 = arith.mulf %59, %57 : vector<1x1xf32>
    %61 = arith.addf %44, %60 : vector<1x1xf32>
    %c44 = arith.constant 44 : index
    %62 = memref.load %arg1[%c44] : memref<144xf32, #tpu.memory_space<smem>>
    %63 = vector.broadcast %62 : f32 to vector<1x1xf32>
    %64 = arith.mulf %63, %57 : vector<1x1xf32>
    %65 = arith.addf %48, %64 : vector<1x1xf32>
    %c80 = arith.constant 80 : index
    %66 = memref.load %arg1[%c80] : memref<144xf32, #tpu.memory_space<smem>>
    %67 = vector.broadcast %66 : f32 to vector<1x1xf32>
    %68 = arith.mulf %67, %57 : vector<1x1xf32>
    %69 = arith.addf %52, %68 : vector<1x1xf32>
    %c116 = arith.constant 116 : index
    %70 = memref.load %arg1[%c116] : memref<144xf32, #tpu.memory_space<smem>>
    %71 = vector.broadcast %70 : f32 to vector<1x1xf32>
    %72 = arith.mulf %71, %57 : vector<1x1xf32>
    %73 = arith.addf %56, %72 : vector<1x1xf32>
    %c0_7 = arith.constant 0 : index
    %c4 = arith.constant 4 : index
    %c0_8 = arith.constant 0 : index
    %c0_9 = arith.constant 0 : index
    %74 = vector.load %arg2[%c0_7, %c4, %c0_8, %c0_9] : memref<1x16x2x2xf32, #tpu.memory_space<vmem>>, vector<1x1x2x2xf32>
    %75 = vector.shape_cast %74 : vector<1x1x2x2xf32> to vector<2x2xf32>
    %76 = vector.extract_strided_slice %75 {offsets = [0, 0], sizes = [1, 1], strides = [1, 1]} : vector<2x2xf32> to vector<1x1xf32>
    %c1 = arith.constant 1 : index
    %77 = memref.load %arg1[%c1] : memref<144xf32, #tpu.memory_space<smem>>
    %78 = vector.broadcast %77 : f32 to vector<1x1xf32>
    %79 = arith.mulf %78, %76 : vector<1x1xf32>
    %80 = arith.addf %61, %79 : vector<1x1xf32>
    %c37 = arith.constant 37 : index
    %81 = memref.load %arg1[%c37] : memref<144xf32, #tpu.memory_space<smem>>
    %82 = vector.broadcast %81 : f32 to vector<1x1xf32>
    %83 = arith.mulf %82, %76 : vector<1x1xf32>
    %84 = arith.addf %65, %83 : vector<1x1xf32>
    %c73 = arith.constant 73 : index
    %85 = memref.load %arg1[%c73] : memref<144xf32, #tpu.memory_space<smem>>
    %86 = vector.broadcast %85 : f32 to vector<1x1xf32>
    %87 = arith.mulf %86, %76 : vector<1x1xf32>
    %88 = arith.addf %69, %87 : vector<1x1xf32>
    %c109 = arith.constant 109 : index
    %89 = memref.load %arg1[%c109] : memref<144xf32, #tpu.memory_space<smem>>
    %90 = vector.broadcast %89 : f32 to vector<1x1xf32>
    %91 = arith.mulf %90, %76 : vector<1x1xf32>
    %92 = arith.addf %73, %91 : vector<1x1xf32>
    %93 = vector.extract_strided_slice %75 {offsets = [1, 0], sizes = [1, 1], strides = [1, 1]} : vector<2x2xf32> to vector<1x1xf32>
    %c7 = arith.constant 7 : index
    %94 = memref.load %arg1[%c7] : memref<144xf32, #tpu.memory_space<smem>>
    %95 = vector.broadcast %94 : f32 to vector<1x1xf32>
    %96 = arith.mulf %95, %93 : vector<1x1xf32>
    %97 = arith.addf %80, %96 : vector<1x1xf32>
    %c43 = arith.constant 43 : index
    %98 = memref.load %arg1[%c43] : memref<144xf32, #tpu.memory_space<smem>>
    %99 = vector.broadcast %98 : f32 to vector<1x1xf32>
    %100 = arith.mulf %99, %93 : vector<1x1xf32>
    %101 = arith.addf %84, %100 : vector<1x1xf32>
    %c79 = arith.constant 79 : index
    %102 = memref.load %arg1[%c79] : memref<144xf32, #tpu.memory_space<smem>>
    %103 = vector.broadcast %102 : f32 to vector<1x1xf32>
    %104 = arith.mulf %103, %93 : vector<1x1xf32>
    %105 = arith.addf %88, %104 : vector<1x1xf32>
    %c115 = arith.constant 115 : index
    %106 = memref.load %arg1[%c115] : memref<144xf32, #tpu.memory_space<smem>>
    %107 = vector.broadcast %106 : f32 to vector<1x1xf32>
    %108 = arith.mulf %107, %93 : vector<1x1xf32>
    %109 = arith.addf %92, %108 : vector<1x1xf32>
    %c0_10 = arith.constant 0 : index
    %c8_11 = arith.constant 8 : index
    %c0_12 = arith.constant 0 : index
    %c0_13 = arith.constant 0 : index
    %110 = vector.load %arg2[%c0_10, %c8_11, %c0_12, %c0_13] : memref<1x16x2x2xf32, #tpu.memory_space<vmem>>, vector<1x1x2x2xf32>
    %111 = vector.shape_cast %110 : vector<1x1x2x2xf32> to vector<2x2xf32>
    %112 = vector.extract_strided_slice %111 {offsets = [0, 0], sizes = [1, 1], strides = [1, 1]} : vector<2x2xf32> to vector<1x1xf32>
    %c3 = arith.constant 3 : index
    %113 = memref.load %arg1[%c3] : memref<144xf32, #tpu.memory_space<smem>>
    %114 = vector.broadcast %113 : f32 to vector<1x1xf32>
    %115 = arith.mulf %114, %112 : vector<1x1xf32>
    %116 = arith.addf %97, %115 : vector<1x1xf32>
    %c39 = arith.constant 39 : index
    %117 = memref.load %arg1[%c39] : memref<144xf32, #tpu.memory_space<smem>>
    %118 = vector.broadcast %117 : f32 to vector<1x1xf32>
    %119 = arith.mulf %118, %112 : vector<1x1xf32>
    %120 = arith.addf %101, %119 : vector<1x1xf32>
    %c75 = arith.constant 75 : index
    %121 = memref.load %arg1[%c75] : memref<144xf32, #tpu.memory_space<smem>>
    %122 = vector.broadcast %121 : f32 to vector<1x1xf32>
    %123 = arith.mulf %122, %112 : vector<1x1xf32>
    %124 = arith.addf %105, %123 : vector<1x1xf32>
    %c111 = arith.constant 111 : index
    %125 = memref.load %arg1[%c111] : memref<144xf32, #tpu.memory_space<smem>>
    %126 = vector.broadcast %125 : f32 to vector<1x1xf32>
    %127 = arith.mulf %126, %112 : vector<1x1xf32>
    %128 = arith.addf %109, %127 : vector<1x1xf32>
    %129 = vector.extract_strided_slice %111 {offsets = [0, 1], sizes = [1, 1], strides = [1, 1]} : vector<2x2xf32> to vector<1x1xf32>
    %c5 = arith.constant 5 : index
    %130 = memref.load %arg1[%c5] : memref<144xf32, #tpu.memory_space<smem>>
    %131 = vector.broadcast %130 : f32 to vector<1x1xf32>
    %132 = arith.mulf %131, %129 : vector<1x1xf32>
    %133 = arith.addf %116, %132 : vector<1x1xf32>
    %c41 = arith.constant 41 : index
    %134 = memref.load %arg1[%c41] : memref<144xf32, #tpu.memory_space<smem>>
    %135 = vector.broadcast %134 : f32 to vector<1x1xf32>
    %136 = arith.mulf %135, %129 : vector<1x1xf32>
    %137 = arith.addf %120, %136 : vector<1x1xf32>
    %c77 = arith.constant 77 : index
    %138 = memref.load %arg1[%c77] : memref<144xf32, #tpu.memory_space<smem>>
    %139 = vector.broadcast %138 : f32 to vector<1x1xf32>
    %140 = arith.mulf %139, %129 : vector<1x1xf32>
    %141 = arith.addf %124, %140 : vector<1x1xf32>
    %c113 = arith.constant 113 : index
    %142 = memref.load %arg1[%c113] : memref<144xf32, #tpu.memory_space<smem>>
    %143 = vector.broadcast %142 : f32 to vector<1x1xf32>
    %144 = arith.mulf %143, %129 : vector<1x1xf32>
    %145 = arith.addf %128, %144 : vector<1x1xf32>
    %c0_14 = arith.constant 0 : index
    %c12 = arith.constant 12 : index
    %c0_15 = arith.constant 0 : index
    %c0_16 = arith.constant 0 : index
    %146 = vector.load %arg2[%c0_14, %c12, %c0_15, %c0_16] : memref<1x16x2x2xf32, #tpu.memory_space<vmem>>, vector<1x1x2x2xf32>
    %147 = vector.shape_cast %146 : vector<1x1x2x2xf32> to vector<2x2xf32>
    %148 = vector.extract_strided_slice %147 {offsets = [0, 0], sizes = [1, 1], strides = [1, 1]} : vector<2x2xf32> to vector<1x1xf32>
    %c4_17 = arith.constant 4 : index
    %149 = memref.load %arg1[%c4_17] : memref<144xf32, #tpu.memory_space<smem>>
    %150 = vector.broadcast %149 : f32 to vector<1x1xf32>
    %151 = arith.mulf %150, %148 : vector<1x1xf32>
    %152 = arith.addf %133, %151 : vector<1x1xf32>
    %c40 = arith.constant 40 : index
    %153 = memref.load %arg1[%c40] : memref<144xf32, #tpu.memory_space<smem>>
    %154 = vector.broadcast %153 : f32 to vector<1x1xf32>
    %155 = arith.mulf %154, %148 : vector<1x1xf32>
    %156 = arith.addf %137, %155 : vector<1x1xf32>
    %c76 = arith.constant 76 : index
    %157 = memref.load %arg1[%c76] : memref<144xf32, #tpu.memory_space<smem>>
    %158 = vector.broadcast %157 : f32 to vector<1x1xf32>
    %159 = arith.mulf %158, %148 : vector<1x1xf32>
    %160 = arith.addf %141, %159 : vector<1x1xf32>
    %c112 = arith.constant 112 : index
    %161 = memref.load %arg1[%c112] : memref<144xf32, #tpu.memory_space<smem>>
    %162 = vector.broadcast %161 : f32 to vector<1x1xf32>
    %163 = arith.mulf %162, %148 : vector<1x1xf32>
    %164 = arith.addf %145, %163 : vector<1x1xf32>
    %c0_18 = arith.constant 0 : index
    %c1_19 = arith.constant 1 : index
    %c0_20 = arith.constant 0 : index
    %c0_21 = arith.constant 0 : index
    %165 = vector.load %arg2[%c0_18, %c1_19, %c0_20, %c0_21] : memref<1x16x2x2xf32, #tpu.memory_space<vmem>>, vector<1x1x2x2xf32>
    %166 = vector.shape_cast %165 : vector<1x1x2x2xf32> to vector<2x2xf32>
    %167 = vector.extract_strided_slice %166 {offsets = [0, 0], sizes = [1, 1], strides = [1, 1]} : vector<2x2xf32> to vector<1x1xf32>
    %c9 = arith.constant 9 : index
    %168 = memref.load %arg1[%c9] : memref<144xf32, #tpu.memory_space<smem>>
    %169 = vector.broadcast %168 : f32 to vector<1x1xf32>
    %170 = arith.mulf %169, %167 : vector<1x1xf32>
    %171 = arith.addf %152, %170 : vector<1x1xf32>
    %c45 = arith.constant 45 : index
    %172 = memref.load %arg1[%c45] : memref<144xf32, #tpu.memory_space<smem>>
    %173 = vector.broadcast %172 : f32 to vector<1x1xf32>
    %174 = arith.mulf %173, %167 : vector<1x1xf32>
    %175 = arith.addf %156, %174 : vector<1x1xf32>
    %c81 = arith.constant 81 : index
    %176 = memref.load %arg1[%c81] : memref<144xf32, #tpu.memory_space<smem>>
    %177 = vector.broadcast %176 : f32 to vector<1x1xf32>
    %178 = arith.mulf %177, %167 : vector<1x1xf32>
    %179 = arith.addf %160, %178 : vector<1x1xf32>
    %c117 = arith.constant 117 : index
    %180 = memref.load %arg1[%c117] : memref<144xf32, #tpu.memory_space<smem>>
    %181 = vector.broadcast %180 : f32 to vector<1x1xf32>
    %182 = arith.mulf %181, %167 : vector<1x1xf32>
    %183 = arith.addf %164, %182 : vector<1x1xf32>
    %184 = vector.extract_strided_slice %166 {offsets = [0, 1], sizes = [1, 1], strides = [1, 1]} : vector<2x2xf32> to vector<1x1xf32>
    %c11 = arith.constant 11 : index
    %185 = memref.load %arg1[%c11] : memref<144xf32, #tpu.memory_space<smem>>
    %186 = vector.broadcast %185 : f32 to vector<1x1xf32>
    %187 = arith.mulf %186, %184 : vector<1x1xf32>
    %188 = arith.addf %171, %187 : vector<1x1xf32>
    %c47 = arith.constant 47 : index
    %189 = memref.load %arg1[%c47] : memref<144xf32, #tpu.memory_space<smem>>
    %190 = vector.broadcast %189 : f32 to vector<1x1xf32>
    %191 = arith.mulf %190, %184 : vector<1x1xf32>
    %192 = arith.addf %175, %191 : vector<1x1xf32>
    %c83 = arith.constant 83 : index
    %193 = memref.load %arg1[%c83] : memref<144xf32, #tpu.memory_space<smem>>
    %194 = vector.broadcast %193 : f32 to vector<1x1xf32>
    %195 = arith.mulf %194, %184 : vector<1x1xf32>
    %196 = arith.addf %179, %195 : vector<1x1xf32>
    %c119 = arith.constant 119 : index
    %197 = memref.load %arg1[%c119] : memref<144xf32, #tpu.memory_space<smem>>
    %198 = vector.broadcast %197 : f32 to vector<1x1xf32>
    %199 = arith.mulf %198, %184 : vector<1x1xf32>
    %200 = arith.addf %183, %199 : vector<1x1xf32>
    %201 = vector.extract_strided_slice %166 {offsets = [1, 0], sizes = [1, 1], strides = [1, 1]} : vector<2x2xf32> to vector<1x1xf32>
    %c15 = arith.constant 15 : index
    %202 = memref.load %arg1[%c15] : memref<144xf32, #tpu.memory_space<smem>>
    %203 = vector.broadcast %202 : f32 to vector<1x1xf32>
    %204 = arith.mulf %203, %201 : vector<1x1xf32>
    %205 = arith.addf %188, %204 : vector<1x1xf32>
    %c51 = arith.constant 51 : index
    %206 = memref.load %arg1[%c51] : memref<144xf32, #tpu.memory_space<smem>>
    %207 = vector.broadcast %206 : f32 to vector<1x1xf32>
    %208 = arith.mulf %207, %201 : vector<1x1xf32>
    %209 = arith.addf %192, %208 : vector<1x1xf32>
    %c87 = arith.constant 87 : index
    %210 = memref.load %arg1[%c87] : memref<144xf32, #tpu.memory_space<smem>>
    %211 = vector.broadcast %210 : f32 to vector<1x1xf32>
    %212 = arith.mulf %211, %201 : vector<1x1xf32>
    %213 = arith.addf %196, %212 : vector<1x1xf32>
    %c123 = arith.constant 123 : index
    %214 = memref.load %arg1[%c123] : memref<144xf32, #tpu.memory_space<smem>>
    %215 = vector.broadcast %214 : f32 to vector<1x1xf32>
    %216 = arith.mulf %215, %201 : vector<1x1xf32>
    %217 = arith.addf %200, %216 : vector<1x1xf32>
    %218 = vector.extract_strided_slice %166 {offsets = [1, 1], sizes = [1, 1], strides = [1, 1]} : vector<2x2xf32> to vector<1x1xf32>
    %c17 = arith.constant 17 : index
    %219 = memref.load %arg1[%c17] : memref<144xf32, #tpu.memory_space<smem>>
    %220 = vector.broadcast %219 : f32 to vector<1x1xf32>
    %221 = arith.mulf %220, %218 : vector<1x1xf32>
    %222 = arith.addf %205, %221 : vector<1x1xf32>
    %c53 = arith.constant 53 : index
    %223 = memref.load %arg1[%c53] : memref<144xf32, #tpu.memory_space<smem>>
    %224 = vector.broadcast %223 : f32 to vector<1x1xf32>
    %225 = arith.mulf %224, %218 : vector<1x1xf32>
    %226 = arith.addf %209, %225 : vector<1x1xf32>
    %c89 = arith.constant 89 : index
    %227 = memref.load %arg1[%c89] : memref<144xf32, #tpu.memory_space<smem>>
    %228 = vector.broadcast %227 : f32 to vector<1x1xf32>
    %229 = arith.mulf %228, %218 : vector<1x1xf32>
    %230 = arith.addf %213, %229 : vector<1x1xf32>
    %c125 = arith.constant 125 : index
    %231 = memref.load %arg1[%c125] : memref<144xf32, #tpu.memory_space<smem>>
    %232 = vector.broadcast %231 : f32 to vector<1x1xf32>
    %233 = arith.mulf %232, %218 : vector<1x1xf32>
    %234 = arith.addf %217, %233 : vector<1x1xf32>
    %c0_22 = arith.constant 0 : index
    %c5_23 = arith.constant 5 : index
    %c0_24 = arith.constant 0 : index
    %c0_25 = arith.constant 0 : index
    %235 = vector.load %arg2[%c0_22, %c5_23, %c0_24, %c0_25] : memref<1x16x2x2xf32, #tpu.memory_space<vmem>>, vector<1x1x2x2xf32>
    %236 = vector.shape_cast %235 : vector<1x1x2x2xf32> to vector<2x2xf32>
    %237 = vector.extract_strided_slice %236 {offsets = [0, 0], sizes = [1, 1], strides = [1, 1]} : vector<2x2xf32> to vector<1x1xf32>
    %c10 = arith.constant 10 : index
    %238 = memref.load %arg1[%c10] : memref<144xf32, #tpu.memory_space<smem>>
    %239 = vector.broadcast %238 : f32 to vector<1x1xf32>
    %240 = arith.mulf %239, %237 : vector<1x1xf32>
    %241 = arith.addf %222, %240 : vector<1x1xf32>
    %c46 = arith.constant 46 : index
    %242 = memref.load %arg1[%c46] : memref<144xf32, #tpu.memory_space<smem>>
    %243 = vector.broadcast %242 : f32 to vector<1x1xf32>
    %244 = arith.mulf %243, %237 : vector<1x1xf32>
    %245 = arith.addf %226, %244 : vector<1x1xf32>
    %c82 = arith.constant 82 : index
    %246 = memref.load %arg1[%c82] : memref<144xf32, #tpu.memory_space<smem>>
    %247 = vector.broadcast %246 : f32 to vector<1x1xf32>
    %248 = arith.mulf %247, %237 : vector<1x1xf32>
    %249 = arith.addf %230, %248 : vector<1x1xf32>
    %c118 = arith.constant 118 : index
    %250 = memref.load %arg1[%c118] : memref<144xf32, #tpu.memory_space<smem>>
    %251 = vector.broadcast %250 : f32 to vector<1x1xf32>
    %252 = arith.mulf %251, %237 : vector<1x1xf32>
    %253 = arith.addf %234, %252 : vector<1x1xf32>
    %254 = vector.extract_strided_slice %236 {offsets = [1, 0], sizes = [1, 1], strides = [1, 1]} : vector<2x2xf32> to vector<1x1xf32>
    %c16 = arith.constant 16 : index
    %255 = memref.load %arg1[%c16] : memref<144xf32, #tpu.memory_space<smem>>
    %256 = vector.broadcast %255 : f32 to vector<1x1xf32>
    %257 = arith.mulf %256, %254 : vector<1x1xf32>
    %258 = arith.addf %241, %257 : vector<1x1xf32>
    %c52 = arith.constant 52 : index
    %259 = memref.load %arg1[%c52] : memref<144xf32, #tpu.memory_space<smem>>
    %260 = vector.broadcast %259 : f32 to vector<1x1xf32>
    %261 = arith.mulf %260, %254 : vector<1x1xf32>
    %262 = arith.addf %245, %261 : vector<1x1xf32>
    %c88 = arith.constant 88 : index
    %263 = memref.load %arg1[%c88] : memref<144xf32, #tpu.memory_space<smem>>
    %264 = vector.broadcast %263 : f32 to vector<1x1xf32>
    %265 = arith.mulf %264, %254 : vector<1x1xf32>
    %266 = arith.addf %249, %265 : vector<1x1xf32>
    %c124 = arith.constant 124 : index
    %267 = memref.load %arg1[%c124] : memref<144xf32, #tpu.memory_space<smem>>
    %268 = vector.broadcast %267 : f32 to vector<1x1xf32>
    %269 = arith.mulf %268, %254 : vector<1x1xf32>
    %270 = arith.addf %253, %269 : vector<1x1xf32>
    %c0_26 = arith.constant 0 : index
    %c9_27 = arith.constant 9 : index
    %c0_28 = arith.constant 0 : index
    %c0_29 = arith.constant 0 : index
    %271 = vector.load %arg2[%c0_26, %c9_27, %c0_28, %c0_29] : memref<1x16x2x2xf32, #tpu.memory_space<vmem>>, vector<1x1x2x2xf32>
    %272 = vector.shape_cast %271 : vector<1x1x2x2xf32> to vector<2x2xf32>
    %273 = vector.extract_strided_slice %272 {offsets = [0, 0], sizes = [1, 1], strides = [1, 1]} : vector<2x2xf32> to vector<1x1xf32>
    %c12_30 = arith.constant 12 : index
    %274 = memref.load %arg1[%c12_30] : memref<144xf32, #tpu.memory_space<smem>>
    %275 = vector.broadcast %274 : f32 to vector<1x1xf32>
    %276 = arith.mulf %275, %273 : vector<1x1xf32>
    %277 = arith.addf %258, %276 : vector<1x1xf32>
    %c48 = arith.constant 48 : index
    %278 = memref.load %arg1[%c48] : memref<144xf32, #tpu.memory_space<smem>>
    %279 = vector.broadcast %278 : f32 to vector<1x1xf32>
    %280 = arith.mulf %279, %273 : vector<1x1xf32>
    %281 = arith.addf %262, %280 : vector<1x1xf32>
    %c84 = arith.constant 84 : index
    %282 = memref.load %arg1[%c84] : memref<144xf32, #tpu.memory_space<smem>>
    %283 = vector.broadcast %282 : f32 to vector<1x1xf32>
    %284 = arith.mulf %283, %273 : vector<1x1xf32>
    %285 = arith.addf %266, %284 : vector<1x1xf32>
    %c120 = arith.constant 120 : index
    %286 = memref.load %arg1[%c120] : memref<144xf32, #tpu.memory_space<smem>>
    %287 = vector.broadcast %286 : f32 to vector<1x1xf32>
    %288 = arith.mulf %287, %273 : vector<1x1xf32>
    %289 = arith.addf %270, %288 : vector<1x1xf32>
    %290 = vector.extract_strided_slice %272 {offsets = [0, 1], sizes = [1, 1], strides = [1, 1]} : vector<2x2xf32> to vector<1x1xf32>
    %c14 = arith.constant 14 : index
    %291 = memref.load %arg1[%c14] : memref<144xf32, #tpu.memory_space<smem>>
    %292 = vector.broadcast %291 : f32 to vector<1x1xf32>
    %293 = arith.mulf %292, %290 : vector<1x1xf32>
    %294 = arith.addf %277, %293 : vector<1x1xf32>
    %c50 = arith.constant 50 : index
    %295 = memref.load %arg1[%c50] : memref<144xf32, #tpu.memory_space<smem>>
    %296 = vector.broadcast %295 : f32 to vector<1x1xf32>
    %297 = arith.mulf %296, %290 : vector<1x1xf32>
    %298 = arith.addf %281, %297 : vector<1x1xf32>
    %c86 = arith.constant 86 : index
    %299 = memref.load %arg1[%c86] : memref<144xf32, #tpu.memory_space<smem>>
    %300 = vector.broadcast %299 : f32 to vector<1x1xf32>
    %301 = arith.mulf %300, %290 : vector<1x1xf32>
    %302 = arith.addf %285, %301 : vector<1x1xf32>
    %c122 = arith.constant 122 : index
    %303 = memref.load %arg1[%c122] : memref<144xf32, #tpu.memory_space<smem>>
    %304 = vector.broadcast %303 : f32 to vector<1x1xf32>
    %305 = arith.mulf %304, %290 : vector<1x1xf32>
    %306 = arith.addf %289, %305 : vector<1x1xf32>
    %c0_31 = arith.constant 0 : index
    %c13 = arith.constant 13 : index
    %c0_32 = arith.constant 0 : index
    %c0_33 = arith.constant 0 : index
    %307 = vector.load %arg2[%c0_31, %c13, %c0_32, %c0_33] : memref<1x16x2x2xf32, #tpu.memory_space<vmem>>, vector<1x1x2x2xf32>
    %308 = vector.shape_cast %307 : vector<1x1x2x2xf32> to vector<2x2xf32>
    %309 = vector.extract_strided_slice %308 {offsets = [0, 0], sizes = [1, 1], strides = [1, 1]} : vector<2x2xf32> to vector<1x1xf32>
    %c13_34 = arith.constant 13 : index
    %310 = memref.load %arg1[%c13_34] : memref<144xf32, #tpu.memory_space<smem>>
    %311 = vector.broadcast %310 : f32 to vector<1x1xf32>
    %312 = arith.mulf %311, %309 : vector<1x1xf32>
    %313 = arith.addf %294, %312 : vector<1x1xf32>
    %c49 = arith.constant 49 : index
    %314 = memref.load %arg1[%c49] : memref<144xf32, #tpu.memory_space<smem>>
    %315 = vector.broadcast %314 : f32 to vector<1x1xf32>
    %316 = arith.mulf %315, %309 : vector<1x1xf32>
    %317 = arith.addf %298, %316 : vector<1x1xf32>
    %c85 = arith.constant 85 : index
    %318 = memref.load %arg1[%c85] : memref<144xf32, #tpu.memory_space<smem>>
    %319 = vector.broadcast %318 : f32 to vector<1x1xf32>
    %320 = arith.mulf %319, %309 : vector<1x1xf32>
    %321 = arith.addf %302, %320 : vector<1x1xf32>
    %c121 = arith.constant 121 : index
    %322 = memref.load %arg1[%c121] : memref<144xf32, #tpu.memory_space<smem>>
    %323 = vector.broadcast %322 : f32 to vector<1x1xf32>
    %324 = arith.mulf %323, %309 : vector<1x1xf32>
    %325 = arith.addf %306, %324 : vector<1x1xf32>
    %c0_35 = arith.constant 0 : index
    %c2_36 = arith.constant 2 : index
    %c0_37 = arith.constant 0 : index
    %c0_38 = arith.constant 0 : index
    %326 = vector.load %arg2[%c0_35, %c2_36, %c0_37, %c0_38] : memref<1x16x2x2xf32, #tpu.memory_space<vmem>>, vector<1x1x2x2xf32>
    %327 = vector.shape_cast %326 : vector<1x1x2x2xf32> to vector<2x2xf32>
    %328 = vector.extract_strided_slice %327 {offsets = [0, 0], sizes = [1, 1], strides = [1, 1]} : vector<2x2xf32> to vector<1x1xf32>
    %c18 = arith.constant 18 : index
    %329 = memref.load %arg1[%c18] : memref<144xf32, #tpu.memory_space<smem>>
    %330 = vector.broadcast %329 : f32 to vector<1x1xf32>
    %331 = arith.mulf %330, %328 : vector<1x1xf32>
    %332 = arith.addf %313, %331 : vector<1x1xf32>
    %c54 = arith.constant 54 : index
    %333 = memref.load %arg1[%c54] : memref<144xf32, #tpu.memory_space<smem>>
    %334 = vector.broadcast %333 : f32 to vector<1x1xf32>
    %335 = arith.mulf %334, %328 : vector<1x1xf32>
    %336 = arith.addf %317, %335 : vector<1x1xf32>
    %c90 = arith.constant 90 : index
    %337 = memref.load %arg1[%c90] : memref<144xf32, #tpu.memory_space<smem>>
    %338 = vector.broadcast %337 : f32 to vector<1x1xf32>
    %339 = arith.mulf %338, %328 : vector<1x1xf32>
    %340 = arith.addf %321, %339 : vector<1x1xf32>
    %c126 = arith.constant 126 : index
    %341 = memref.load %arg1[%c126] : memref<144xf32, #tpu.memory_space<smem>>
    %342 = vector.broadcast %341 : f32 to vector<1x1xf32>
    %343 = arith.mulf %342, %328 : vector<1x1xf32>
    %344 = arith.addf %325, %343 : vector<1x1xf32>
    %345 = vector.extract_strided_slice %327 {offsets = [0, 1], sizes = [1, 1], strides = [1, 1]} : vector<2x2xf32> to vector<1x1xf32>
    %c20 = arith.constant 20 : index
    %346 = memref.load %arg1[%c20] : memref<144xf32, #tpu.memory_space<smem>>
    %347 = vector.broadcast %346 : f32 to vector<1x1xf32>
    %348 = arith.mulf %347, %345 : vector<1x1xf32>
    %349 = arith.addf %332, %348 : vector<1x1xf32>
    %c56 = arith.constant 56 : index
    %350 = memref.load %arg1[%c56] : memref<144xf32, #tpu.memory_space<smem>>
    %351 = vector.broadcast %350 : f32 to vector<1x1xf32>
    %352 = arith.mulf %351, %345 : vector<1x1xf32>
    %353 = arith.addf %336, %352 : vector<1x1xf32>
    %c92 = arith.constant 92 : index
    %354 = memref.load %arg1[%c92] : memref<144xf32, #tpu.memory_space<smem>>
    %355 = vector.broadcast %354 : f32 to vector<1x1xf32>
    %356 = arith.mulf %355, %345 : vector<1x1xf32>
    %357 = arith.addf %340, %356 : vector<1x1xf32>
    %c128 = arith.constant 128 : index
    %358 = memref.load %arg1[%c128] : memref<144xf32, #tpu.memory_space<smem>>
    %359 = vector.broadcast %358 : f32 to vector<1x1xf32>
    %360 = arith.mulf %359, %345 : vector<1x1xf32>
    %361 = arith.addf %344, %360 : vector<1x1xf32>
    %362 = vector.extract_strided_slice %327 {offsets = [1, 0], sizes = [1, 1], strides = [1, 1]} : vector<2x2xf32> to vector<1x1xf32>
    %c24 = arith.constant 24 : index
    %363 = memref.load %arg1[%c24] : memref<144xf32, #tpu.memory_space<smem>>
    %364 = vector.broadcast %363 : f32 to vector<1x1xf32>
    %365 = arith.mulf %364, %362 : vector<1x1xf32>
    %366 = arith.addf %349, %365 : vector<1x1xf32>
    %c60 = arith.constant 60 : index
    %367 = memref.load %arg1[%c60] : memref<144xf32, #tpu.memory_space<smem>>
    %368 = vector.broadcast %367 : f32 to vector<1x1xf32>
    %369 = arith.mulf %368, %362 : vector<1x1xf32>
    %370 = arith.addf %353, %369 : vector<1x1xf32>
    %c96 = arith.constant 96 : index
    %371 = memref.load %arg1[%c96] : memref<144xf32, #tpu.memory_space<smem>>
    %372 = vector.broadcast %371 : f32 to vector<1x1xf32>
    %373 = arith.mulf %372, %362 : vector<1x1xf32>
    %374 = arith.addf %357, %373 : vector<1x1xf32>
    %c132 = arith.constant 132 : index
    %375 = memref.load %arg1[%c132] : memref<144xf32, #tpu.memory_space<smem>>
    %376 = vector.broadcast %375 : f32 to vector<1x1xf32>
    %377 = arith.mulf %376, %362 : vector<1x1xf32>
    %378 = arith.addf %361, %377 : vector<1x1xf32>
    %379 = vector.extract_strided_slice %327 {offsets = [1, 1], sizes = [1, 1], strides = [1, 1]} : vector<2x2xf32> to vector<1x1xf32>
    %c26 = arith.constant 26 : index
    %380 = memref.load %arg1[%c26] : memref<144xf32, #tpu.memory_space<smem>>
    %381 = vector.broadcast %380 : f32 to vector<1x1xf32>
    %382 = arith.mulf %381, %379 : vector<1x1xf32>
    %383 = arith.addf %366, %382 : vector<1x1xf32>
    %c62 = arith.constant 62 : index
    %384 = memref.load %arg1[%c62] : memref<144xf32, #tpu.memory_space<smem>>
    %385 = vector.broadcast %384 : f32 to vector<1x1xf32>
    %386 = arith.mulf %385, %379 : vector<1x1xf32>
    %387 = arith.addf %370, %386 : vector<1x1xf32>
    %c98 = arith.constant 98 : index
    %388 = memref.load %arg1[%c98] : memref<144xf32, #tpu.memory_space<smem>>
    %389 = vector.broadcast %388 : f32 to vector<1x1xf32>
    %390 = arith.mulf %389, %379 : vector<1x1xf32>
    %391 = arith.addf %374, %390 : vector<1x1xf32>
    %c134 = arith.constant 134 : index
    %392 = memref.load %arg1[%c134] : memref<144xf32, #tpu.memory_space<smem>>
    %393 = vector.broadcast %392 : f32 to vector<1x1xf32>
    %394 = arith.mulf %393, %379 : vector<1x1xf32>
    %395 = arith.addf %378, %394 : vector<1x1xf32>
    %c0_39 = arith.constant 0 : index
    %c6_40 = arith.constant 6 : index
    %c0_41 = arith.constant 0 : index
    %c0_42 = arith.constant 0 : index
    %396 = vector.load %arg2[%c0_39, %c6_40, %c0_41, %c0_42] : memref<1x16x2x2xf32, #tpu.memory_space<vmem>>, vector<1x1x2x2xf32>
    %397 = vector.shape_cast %396 : vector<1x1x2x2xf32> to vector<2x2xf32>
    %398 = vector.extract_strided_slice %397 {offsets = [0, 0], sizes = [1, 1], strides = [1, 1]} : vector<2x2xf32> to vector<1x1xf32>
    %c19 = arith.constant 19 : index
    %399 = memref.load %arg1[%c19] : memref<144xf32, #tpu.memory_space<smem>>
    %400 = vector.broadcast %399 : f32 to vector<1x1xf32>
    %401 = arith.mulf %400, %398 : vector<1x1xf32>
    %402 = arith.addf %383, %401 : vector<1x1xf32>
    %c55 = arith.constant 55 : index
    %403 = memref.load %arg1[%c55] : memref<144xf32, #tpu.memory_space<smem>>
    %404 = vector.broadcast %403 : f32 to vector<1x1xf32>
    %405 = arith.mulf %404, %398 : vector<1x1xf32>
    %406 = arith.addf %387, %405 : vector<1x1xf32>
    %c91 = arith.constant 91 : index
    %407 = memref.load %arg1[%c91] : memref<144xf32, #tpu.memory_space<smem>>
    %408 = vector.broadcast %407 : f32 to vector<1x1xf32>
    %409 = arith.mulf %408, %398 : vector<1x1xf32>
    %410 = arith.addf %391, %409 : vector<1x1xf32>
    %c127 = arith.constant 127 : index
    %411 = memref.load %arg1[%c127] : memref<144xf32, #tpu.memory_space<smem>>
    %412 = vector.broadcast %411 : f32 to vector<1x1xf32>
    %413 = arith.mulf %412, %398 : vector<1x1xf32>
    %414 = arith.addf %395, %413 : vector<1x1xf32>
    %415 = vector.extract_strided_slice %397 {offsets = [1, 0], sizes = [1, 1], strides = [1, 1]} : vector<2x2xf32> to vector<1x1xf32>
    %c25 = arith.constant 25 : index
    %416 = memref.load %arg1[%c25] : memref<144xf32, #tpu.memory_space<smem>>
    %417 = vector.broadcast %416 : f32 to vector<1x1xf32>
    %418 = arith.mulf %417, %415 : vector<1x1xf32>
    %419 = arith.addf %402, %418 : vector<1x1xf32>
    %c61 = arith.constant 61 : index
    %420 = memref.load %arg1[%c61] : memref<144xf32, #tpu.memory_space<smem>>
    %421 = vector.broadcast %420 : f32 to vector<1x1xf32>
    %422 = arith.mulf %421, %415 : vector<1x1xf32>
    %423 = arith.addf %406, %422 : vector<1x1xf32>
    %c97 = arith.constant 97 : index
    %424 = memref.load %arg1[%c97] : memref<144xf32, #tpu.memory_space<smem>>
    %425 = vector.broadcast %424 : f32 to vector<1x1xf32>
    %426 = arith.mulf %425, %415 : vector<1x1xf32>
    %427 = arith.addf %410, %426 : vector<1x1xf32>
    %c133 = arith.constant 133 : index
    %428 = memref.load %arg1[%c133] : memref<144xf32, #tpu.memory_space<smem>>
    %429 = vector.broadcast %428 : f32 to vector<1x1xf32>
    %430 = arith.mulf %429, %415 : vector<1x1xf32>
    %431 = arith.addf %414, %430 : vector<1x1xf32>
    %c0_43 = arith.constant 0 : index
    %c10_44 = arith.constant 10 : index
    %c0_45 = arith.constant 0 : index
    %c0_46 = arith.constant 0 : index
    %432 = vector.load %arg2[%c0_43, %c10_44, %c0_45, %c0_46] : memref<1x16x2x2xf32, #tpu.memory_space<vmem>>, vector<1x1x2x2xf32>
    %433 = vector.shape_cast %432 : vector<1x1x2x2xf32> to vector<2x2xf32>
    %434 = vector.extract_strided_slice %433 {offsets = [0, 0], sizes = [1, 1], strides = [1, 1]} : vector<2x2xf32> to vector<1x1xf32>
    %c21 = arith.constant 21 : index
    %435 = memref.load %arg1[%c21] : memref<144xf32, #tpu.memory_space<smem>>
    %436 = vector.broadcast %435 : f32 to vector<1x1xf32>
    %437 = arith.mulf %436, %434 : vector<1x1xf32>
    %438 = arith.addf %419, %437 : vector<1x1xf32>
    %c57 = arith.constant 57 : index
    %439 = memref.load %arg1[%c57] : memref<144xf32, #tpu.memory_space<smem>>
    %440 = vector.broadcast %439 : f32 to vector<1x1xf32>
    %441 = arith.mulf %440, %434 : vector<1x1xf32>
    %442 = arith.addf %423, %441 : vector<1x1xf32>
    %c93 = arith.constant 93 : index
    %443 = memref.load %arg1[%c93] : memref<144xf32, #tpu.memory_space<smem>>
    %444 = vector.broadcast %443 : f32 to vector<1x1xf32>
    %445 = arith.mulf %444, %434 : vector<1x1xf32>
    %446 = arith.addf %427, %445 : vector<1x1xf32>
    %c129 = arith.constant 129 : index
    %447 = memref.load %arg1[%c129] : memref<144xf32, #tpu.memory_space<smem>>
    %448 = vector.broadcast %447 : f32 to vector<1x1xf32>
    %449 = arith.mulf %448, %434 : vector<1x1xf32>
    %450 = arith.addf %431, %449 : vector<1x1xf32>
    %451 = vector.extract_strided_slice %433 {offsets = [0, 1], sizes = [1, 1], strides = [1, 1]} : vector<2x2xf32> to vector<1x1xf32>
    %c23 = arith.constant 23 : index
    %452 = memref.load %arg1[%c23] : memref<144xf32, #tpu.memory_space<smem>>
    %453 = vector.broadcast %452 : f32 to vector<1x1xf32>
    %454 = arith.mulf %453, %451 : vector<1x1xf32>
    %455 = arith.addf %438, %454 : vector<1x1xf32>
    %c59 = arith.constant 59 : index
    %456 = memref.load %arg1[%c59] : memref<144xf32, #tpu.memory_space<smem>>
    %457 = vector.broadcast %456 : f32 to vector<1x1xf32>
    %458 = arith.mulf %457, %451 : vector<1x1xf32>
    %459 = arith.addf %442, %458 : vector<1x1xf32>
    %c95 = arith.constant 95 : index
    %460 = memref.load %arg1[%c95] : memref<144xf32, #tpu.memory_space<smem>>
    %461 = vector.broadcast %460 : f32 to vector<1x1xf32>
    %462 = arith.mulf %461, %451 : vector<1x1xf32>
    %463 = arith.addf %446, %462 : vector<1x1xf32>
    %c131 = arith.constant 131 : index
    %464 = memref.load %arg1[%c131] : memref<144xf32, #tpu.memory_space<smem>>
    %465 = vector.broadcast %464 : f32 to vector<1x1xf32>
    %466 = arith.mulf %465, %451 : vector<1x1xf32>
    %467 = arith.addf %450, %466 : vector<1x1xf32>
    %c0_47 = arith.constant 0 : index
    %c14_48 = arith.constant 14 : index
    %c0_49 = arith.constant 0 : index
    %c0_50 = arith.constant 0 : index
    %468 = vector.load %arg2[%c0_47, %c14_48, %c0_49, %c0_50] : memref<1x16x2x2xf32, #tpu.memory_space<vmem>>, vector<1x1x2x2xf32>
    %469 = vector.shape_cast %468 : vector<1x1x2x2xf32> to vector<2x2xf32>
    %470 = vector.extract_strided_slice %469 {offsets = [0, 0], sizes = [1, 1], strides = [1, 1]} : vector<2x2xf32> to vector<1x1xf32>
    %c22 = arith.constant 22 : index
    %471 = memref.load %arg1[%c22] : memref<144xf32, #tpu.memory_space<smem>>
    %472 = vector.broadcast %471 : f32 to vector<1x1xf32>
    %473 = arith.mulf %472, %470 : vector<1x1xf32>
    %474 = arith.addf %455, %473 : vector<1x1xf32>
    %c58 = arith.constant 58 : index
    %475 = memref.load %arg1[%c58] : memref<144xf32, #tpu.memory_space<smem>>
    %476 = vector.broadcast %475 : f32 to vector<1x1xf32>
    %477 = arith.mulf %476, %470 : vector<1x1xf32>
    %478 = arith.addf %459, %477 : vector<1x1xf32>
    %c94 = arith.constant 94 : index
    %479 = memref.load %arg1[%c94] : memref<144xf32, #tpu.memory_space<smem>>
    %480 = vector.broadcast %479 : f32 to vector<1x1xf32>
    %481 = arith.mulf %480, %470 : vector<1x1xf32>
    %482 = arith.addf %463, %481 : vector<1x1xf32>
    %c130 = arith.constant 130 : index
    %483 = memref.load %arg1[%c130] : memref<144xf32, #tpu.memory_space<smem>>
    %484 = vector.broadcast %483 : f32 to vector<1x1xf32>
    %485 = arith.mulf %484, %470 : vector<1x1xf32>
    %486 = arith.addf %467, %485 : vector<1x1xf32>
    %c0_51 = arith.constant 0 : index
    %c3_52 = arith.constant 3 : index
    %c0_53 = arith.constant 0 : index
    %c0_54 = arith.constant 0 : index
    %487 = vector.load %arg2[%c0_51, %c3_52, %c0_53, %c0_54] : memref<1x16x2x2xf32, #tpu.memory_space<vmem>>, vector<1x1x2x2xf32>
    %488 = vector.shape_cast %487 : vector<1x1x2x2xf32> to vector<2x2xf32>
    %489 = vector.extract_strided_slice %488 {offsets = [0, 0], sizes = [1, 1], strides = [1, 1]} : vector<2x2xf32> to vector<1x1xf32>
    %c27 = arith.constant 27 : index
    %490 = memref.load %arg1[%c27] : memref<144xf32, #tpu.memory_space<smem>>
    %491 = vector.broadcast %490 : f32 to vector<1x1xf32>
    %492 = arith.mulf %491, %489 : vector<1x1xf32>
    %493 = arith.addf %474, %492 : vector<1x1xf32>
    %c63 = arith.constant 63 : index
    %494 = memref.load %arg1[%c63] : memref<144xf32, #tpu.memory_space<smem>>
    %495 = vector.broadcast %494 : f32 to vector<1x1xf32>
    %496 = arith.mulf %495, %489 : vector<1x1xf32>
    %497 = arith.addf %478, %496 : vector<1x1xf32>
    %c99 = arith.constant 99 : index
    %498 = memref.load %arg1[%c99] : memref<144xf32, #tpu.memory_space<smem>>
    %499 = vector.broadcast %498 : f32 to vector<1x1xf32>
    %500 = arith.mulf %499, %489 : vector<1x1xf32>
    %501 = arith.addf %482, %500 : vector<1x1xf32>
    %c135 = arith.constant 135 : index
    %502 = memref.load %arg1[%c135] : memref<144xf32, #tpu.memory_space<smem>>
    %503 = vector.broadcast %502 : f32 to vector<1x1xf32>
    %504 = arith.mulf %503, %489 : vector<1x1xf32>
    %505 = arith.addf %486, %504 : vector<1x1xf32>
    %506 = vector.extract_strided_slice %488 {offsets = [0, 1], sizes = [1, 1], strides = [1, 1]} : vector<2x2xf32> to vector<1x1xf32>
    %c29 = arith.constant 29 : index
    %507 = memref.load %arg1[%c29] : memref<144xf32, #tpu.memory_space<smem>>
    %508 = vector.broadcast %507 : f32 to vector<1x1xf32>
    %509 = arith.mulf %508, %506 : vector<1x1xf32>
    %510 = arith.addf %493, %509 : vector<1x1xf32>
    %c65 = arith.constant 65 : index
    %511 = memref.load %arg1[%c65] : memref<144xf32, #tpu.memory_space<smem>>
    %512 = vector.broadcast %511 : f32 to vector<1x1xf32>
    %513 = arith.mulf %512, %506 : vector<1x1xf32>
    %514 = arith.addf %497, %513 : vector<1x1xf32>
    %c101 = arith.constant 101 : index
    %515 = memref.load %arg1[%c101] : memref<144xf32, #tpu.memory_space<smem>>
    %516 = vector.broadcast %515 : f32 to vector<1x1xf32>
    %517 = arith.mulf %516, %506 : vector<1x1xf32>
    %518 = arith.addf %501, %517 : vector<1x1xf32>
    %c137 = arith.constant 137 : index
    %519 = memref.load %arg1[%c137] : memref<144xf32, #tpu.memory_space<smem>>
    %520 = vector.broadcast %519 : f32 to vector<1x1xf32>
    %521 = arith.mulf %520, %506 : vector<1x1xf32>
    %522 = arith.addf %505, %521 : vector<1x1xf32>
    %523 = vector.extract_strided_slice %488 {offsets = [1, 0], sizes = [1, 1], strides = [1, 1]} : vector<2x2xf32> to vector<1x1xf32>
    %c33 = arith.constant 33 : index
    %524 = memref.load %arg1[%c33] : memref<144xf32, #tpu.memory_space<smem>>
    %525 = vector.broadcast %524 : f32 to vector<1x1xf32>
    %526 = arith.mulf %525, %523 : vector<1x1xf32>
    %527 = arith.addf %510, %526 : vector<1x1xf32>
    %c69 = arith.constant 69 : index
    %528 = memref.load %arg1[%c69] : memref<144xf32, #tpu.memory_space<smem>>
    %529 = vector.broadcast %528 : f32 to vector<1x1xf32>
    %530 = arith.mulf %529, %523 : vector<1x1xf32>
    %531 = arith.addf %514, %530 : vector<1x1xf32>
    %c105 = arith.constant 105 : index
    %532 = memref.load %arg1[%c105] : memref<144xf32, #tpu.memory_space<smem>>
    %533 = vector.broadcast %532 : f32 to vector<1x1xf32>
    %534 = arith.mulf %533, %523 : vector<1x1xf32>
    %535 = arith.addf %518, %534 : vector<1x1xf32>
    %c141 = arith.constant 141 : index
    %536 = memref.load %arg1[%c141] : memref<144xf32, #tpu.memory_space<smem>>
    %537 = vector.broadcast %536 : f32 to vector<1x1xf32>
    %538 = arith.mulf %537, %523 : vector<1x1xf32>
    %539 = arith.addf %522, %538 : vector<1x1xf32>
    %540 = vector.extract_strided_slice %488 {offsets = [1, 1], sizes = [1, 1], strides = [1, 1]} : vector<2x2xf32> to vector<1x1xf32>
    %c35 = arith.constant 35 : index
    %541 = memref.load %arg1[%c35] : memref<144xf32, #tpu.memory_space<smem>>
    %542 = vector.broadcast %541 : f32 to vector<1x1xf32>
    %543 = arith.mulf %542, %540 : vector<1x1xf32>
    %544 = arith.addf %527, %543 : vector<1x1xf32>
    %c71 = arith.constant 71 : index
    %545 = memref.load %arg1[%c71] : memref<144xf32, #tpu.memory_space<smem>>
    %546 = vector.broadcast %545 : f32 to vector<1x1xf32>
    %547 = arith.mulf %546, %540 : vector<1x1xf32>
    %548 = arith.addf %531, %547 : vector<1x1xf32>
    %c107 = arith.constant 107 : index
    %549 = memref.load %arg1[%c107] : memref<144xf32, #tpu.memory_space<smem>>
    %550 = vector.broadcast %549 : f32 to vector<1x1xf32>
    %551 = arith.mulf %550, %540 : vector<1x1xf32>
    %552 = arith.addf %535, %551 : vector<1x1xf32>
    %c143 = arith.constant 143 : index
    %553 = memref.load %arg1[%c143] : memref<144xf32, #tpu.memory_space<smem>>
    %554 = vector.broadcast %553 : f32 to vector<1x1xf32>
    %555 = arith.mulf %554, %540 : vector<1x1xf32>
    %556 = arith.addf %539, %555 : vector<1x1xf32>
    %c0_55 = arith.constant 0 : index
    %c7_56 = arith.constant 7 : index
    %c0_57 = arith.constant 0 : index
    %c0_58 = arith.constant 0 : index
    %557 = vector.load %arg2[%c0_55, %c7_56, %c0_57, %c0_58] : memref<1x16x2x2xf32, #tpu.memory_space<vmem>>, vector<1x1x2x2xf32>
    %558 = vector.shape_cast %557 : vector<1x1x2x2xf32> to vector<2x2xf32>
    %559 = vector.extract_strided_slice %558 {offsets = [0, 0], sizes = [1, 1], strides = [1, 1]} : vector<2x2xf32> to vector<1x1xf32>
    %c28 = arith.constant 28 : index
    %560 = memref.load %arg1[%c28] : memref<144xf32, #tpu.memory_space<smem>>
    %561 = vector.broadcast %560 : f32 to vector<1x1xf32>
    %562 = arith.mulf %561, %559 : vector<1x1xf32>
    %563 = arith.addf %544, %562 : vector<1x1xf32>
    %c64 = arith.constant 64 : index
    %564 = memref.load %arg1[%c64] : memref<144xf32, #tpu.memory_space<smem>>
    %565 = vector.broadcast %564 : f32 to vector<1x1xf32>
    %566 = arith.mulf %565, %559 : vector<1x1xf32>
    %567 = arith.addf %548, %566 : vector<1x1xf32>
    %c100 = arith.constant 100 : index
    %568 = memref.load %arg1[%c100] : memref<144xf32, #tpu.memory_space<smem>>
    %569 = vector.broadcast %568 : f32 to vector<1x1xf32>
    %570 = arith.mulf %569, %559 : vector<1x1xf32>
    %571 = arith.addf %552, %570 : vector<1x1xf32>
    %c136 = arith.constant 136 : index
    %572 = memref.load %arg1[%c136] : memref<144xf32, #tpu.memory_space<smem>>
    %573 = vector.broadcast %572 : f32 to vector<1x1xf32>
    %574 = arith.mulf %573, %559 : vector<1x1xf32>
    %575 = arith.addf %556, %574 : vector<1x1xf32>
    %576 = vector.extract_strided_slice %558 {offsets = [1, 0], sizes = [1, 1], strides = [1, 1]} : vector<2x2xf32> to vector<1x1xf32>
    %c34 = arith.constant 34 : index
    %577 = memref.load %arg1[%c34] : memref<144xf32, #tpu.memory_space<smem>>
    %578 = vector.broadcast %577 : f32 to vector<1x1xf32>
    %579 = arith.mulf %578, %576 : vector<1x1xf32>
    %580 = arith.addf %563, %579 : vector<1x1xf32>
    %c70 = arith.constant 70 : index
    %581 = memref.load %arg1[%c70] : memref<144xf32, #tpu.memory_space<smem>>
    %582 = vector.broadcast %581 : f32 to vector<1x1xf32>
    %583 = arith.mulf %582, %576 : vector<1x1xf32>
    %584 = arith.addf %567, %583 : vector<1x1xf32>
    %c106 = arith.constant 106 : index
    %585 = memref.load %arg1[%c106] : memref<144xf32, #tpu.memory_space<smem>>
    %586 = vector.broadcast %585 : f32 to vector<1x1xf32>
    %587 = arith.mulf %586, %576 : vector<1x1xf32>
    %588 = arith.addf %571, %587 : vector<1x1xf32>
    %c142 = arith.constant 142 : index
    %589 = memref.load %arg1[%c142] : memref<144xf32, #tpu.memory_space<smem>>
    %590 = vector.broadcast %589 : f32 to vector<1x1xf32>
    %591 = arith.mulf %590, %576 : vector<1x1xf32>
    %592 = arith.addf %575, %591 : vector<1x1xf32>
    %c0_59 = arith.constant 0 : index
    %c11_60 = arith.constant 11 : index
    %c0_61 = arith.constant 0 : index
    %c0_62 = arith.constant 0 : index
    %593 = vector.load %arg2[%c0_59, %c11_60, %c0_61, %c0_62] : memref<1x16x2x2xf32, #tpu.memory_space<vmem>>, vector<1x1x2x2xf32>
    %594 = vector.shape_cast %593 : vector<1x1x2x2xf32> to vector<2x2xf32>
    %595 = vector.extract_strided_slice %594 {offsets = [0, 0], sizes = [1, 1], strides = [1, 1]} : vector<2x2xf32> to vector<1x1xf32>
    %c30 = arith.constant 30 : index
    %596 = memref.load %arg1[%c30] : memref<144xf32, #tpu.memory_space<smem>>
    %597 = vector.broadcast %596 : f32 to vector<1x1xf32>
    %598 = arith.mulf %597, %595 : vector<1x1xf32>
    %599 = arith.addf %580, %598 : vector<1x1xf32>
    %c66 = arith.constant 66 : index
    %600 = memref.load %arg1[%c66] : memref<144xf32, #tpu.memory_space<smem>>
    %601 = vector.broadcast %600 : f32 to vector<1x1xf32>
    %602 = arith.mulf %601, %595 : vector<1x1xf32>
    %603 = arith.addf %584, %602 : vector<1x1xf32>
    %c102 = arith.constant 102 : index
    %604 = memref.load %arg1[%c102] : memref<144xf32, #tpu.memory_space<smem>>
    %605 = vector.broadcast %604 : f32 to vector<1x1xf32>
    %606 = arith.mulf %605, %595 : vector<1x1xf32>
    %607 = arith.addf %588, %606 : vector<1x1xf32>
    %c138 = arith.constant 138 : index
    %608 = memref.load %arg1[%c138] : memref<144xf32, #tpu.memory_space<smem>>
    %609 = vector.broadcast %608 : f32 to vector<1x1xf32>
    %610 = arith.mulf %609, %595 : vector<1x1xf32>
    %611 = arith.addf %592, %610 : vector<1x1xf32>
    %612 = vector.extract_strided_slice %594 {offsets = [0, 1], sizes = [1, 1], strides = [1, 1]} : vector<2x2xf32> to vector<1x1xf32>
    %c32 = arith.constant 32 : index
    %613 = memref.load %arg1[%c32] : memref<144xf32, #tpu.memory_space<smem>>
    %614 = vector.broadcast %613 : f32 to vector<1x1xf32>
    %615 = arith.mulf %614, %612 : vector<1x1xf32>
    %616 = arith.addf %599, %615 : vector<1x1xf32>
    %c68 = arith.constant 68 : index
    %617 = memref.load %arg1[%c68] : memref<144xf32, #tpu.memory_space<smem>>
    %618 = vector.broadcast %617 : f32 to vector<1x1xf32>
    %619 = arith.mulf %618, %612 : vector<1x1xf32>
    %620 = arith.addf %603, %619 : vector<1x1xf32>
    %c104 = arith.constant 104 : index
    %621 = memref.load %arg1[%c104] : memref<144xf32, #tpu.memory_space<smem>>
    %622 = vector.broadcast %621 : f32 to vector<1x1xf32>
    %623 = arith.mulf %622, %612 : vector<1x1xf32>
    %624 = arith.addf %607, %623 : vector<1x1xf32>
    %c140 = arith.constant 140 : index
    %625 = memref.load %arg1[%c140] : memref<144xf32, #tpu.memory_space<smem>>
    %626 = vector.broadcast %625 : f32 to vector<1x1xf32>
    %627 = arith.mulf %626, %612 : vector<1x1xf32>
    %628 = arith.addf %611, %627 : vector<1x1xf32>
    %c0_63 = arith.constant 0 : index
    %c15_64 = arith.constant 15 : index
    %c0_65 = arith.constant 0 : index
    %c0_66 = arith.constant 0 : index
    %629 = vector.load %arg2[%c0_63, %c15_64, %c0_65, %c0_66] : memref<1x16x2x2xf32, #tpu.memory_space<vmem>>, vector<1x1x2x2xf32>
    %630 = vector.shape_cast %629 : vector<1x1x2x2xf32> to vector<2x2xf32>
    %631 = vector.extract_strided_slice %630 {offsets = [0, 0], sizes = [1, 1], strides = [1, 1]} : vector<2x2xf32> to vector<1x1xf32>
    %c31 = arith.constant 31 : index
    %632 = memref.load %arg1[%c31] : memref<144xf32, #tpu.memory_space<smem>>
    %633 = vector.broadcast %632 : f32 to vector<1x1xf32>
    %634 = arith.mulf %633, %631 : vector<1x1xf32>
    %635 = arith.addf %616, %634 : vector<1x1xf32>
    %c67 = arith.constant 67 : index
    %636 = memref.load %arg1[%c67] : memref<144xf32, #tpu.memory_space<smem>>
    %637 = vector.broadcast %636 : f32 to vector<1x1xf32>
    %638 = arith.mulf %637, %631 : vector<1x1xf32>
    %639 = arith.addf %620, %638 : vector<1x1xf32>
    %c103 = arith.constant 103 : index
    %640 = memref.load %arg1[%c103] : memref<144xf32, #tpu.memory_space<smem>>
    %641 = vector.broadcast %640 : f32 to vector<1x1xf32>
    %642 = arith.mulf %641, %631 : vector<1x1xf32>
    %643 = arith.addf %624, %642 : vector<1x1xf32>
    %c139 = arith.constant 139 : index
    %644 = memref.load %arg1[%c139] : memref<144xf32, #tpu.memory_space<smem>>
    %645 = vector.broadcast %644 : f32 to vector<1x1xf32>
    %646 = arith.mulf %645, %631 : vector<1x1xf32>
    %647 = arith.addf %628, %646 : vector<1x1xf32>
    %c0_67 = arith.constant 0 : index
    %c0_68 = arith.constant 0 : index
    %c0_69 = arith.constant 0 : index
    %c0_70 = arith.constant 0 : index
    %648 = vector.load %arg3[%c0_67, %c0_68, %c0_69, %c0_70] : memref<1x4x1x1xf32, #tpu.memory_space<vmem>>, vector<1x1x1x1xf32>
    %649 = vector.shape_cast %648 : vector<1x1x1x1xf32> to vector<1x1xf32>
    %650 = vector.shape_cast %635 : vector<1x1xf32> to vector<1x1x1x1xf32>
    tpu.vector_store %arg3[%c0_67, %c0_68, %c0_69, %c0_70], %650 {strides = array<i32>} : memref<1x4x1x1xf32, #tpu.memory_space<vmem>>, vector<1x1x1x1xf32>,
    %c0_71 = arith.constant 0 : index
    %c1_72 = arith.constant 1 : index
    %c0_73 = arith.constant 0 : index
    %c0_74 = arith.constant 0 : index
    %651 = vector.load %arg3[%c0_71, %c1_72, %c0_73, %c0_74] : memref<1x4x1x1xf32, #tpu.memory_space<vmem>>, vector<1x1x1x1xf32>
    %652 = vector.shape_cast %651 : vector<1x1x1x1xf32> to vector<1x1xf32>
    %653 = vector.shape_cast %639 : vector<1x1xf32> to vector<1x1x1x1xf32>
    tpu.vector_store %arg3[%c0_71, %c1_72, %c0_73, %c0_74], %653 {strides = array<i32>} : memref<1x4x1x1xf32, #tpu.memory_space<vmem>>, vector<1x1x1x1xf32>,
    %c0_75 = arith.constant 0 : index
    %c2_76 = arith.constant 2 : index
    %c0_77 = arith.constant 0 : index
    %c0_78 = arith.constant 0 : index
    %654 = vector.load %arg3[%c0_75, %c2_76, %c0_77, %c0_78] : memref<1x4x1x1xf32, #tpu.memory_space<vmem>>, vector<1x1x1x1xf32>
    %655 = vector.shape_cast %654 : vector<1x1x1x1xf32> to vector<1x1xf32>
    %656 = vector.shape_cast %643 : vector<1x1xf32> to vector<1x1x1x1xf32>
    tpu.vector_store %arg3[%c0_75, %c2_76, %c0_77, %c0_78], %656 {strides = array<i32>} : memref<1x4x1x1xf32, #tpu.memory_space<vmem>>, vector<1x1x1x1xf32>,
    %c0_79 = arith.constant 0 : index
    %c3_80 = arith.constant 3 : index
    %c0_81 = arith.constant 0 : index
    %c0_82 = arith.constant 0 : index
    %657 = vector.load %arg3[%c0_79, %c3_80, %c0_81, %c0_82] : memref<1x4x1x1xf32, #tpu.memory_space<vmem>>, vector<1x1x1x1xf32>
    %658 = vector.shape_cast %657 : vector<1x1x1x1xf32> to vector<1x1xf32>
    %659 = vector.shape_cast %647 : vector<1x1xf32> to vector<1x1x1x1xf32>
    tpu.vector_store %arg3[%c0_79, %c3_80, %c0_81, %c0_82], %659 {strides = array<i32>} : memref<1x4x1x1xf32, #tpu.memory_space<vmem>>, vector<1x1x1x1xf32>,
    return
  }
  func.func @transform_0(%arg0: i32) -> i32 {
    %c0_i32 = arith.constant 0 : i32
    %c0_i32_0 = arith.constant 0 : i32
    return %c0_i32 : i32
  }
  func.func @transform_1(%arg0: i32) -> (i32, i32, i32, i32) {
    %c0_i32 = arith.constant 0 : i32
    %c0_i32_0 = arith.constant 0 : i32
    %c0_i32_1 = arith.constant 0 : i32
    %c0_i32_2 = arith.constant 0 : i32
    return %arg0, %c0_i32, %c0_i32_0, %c0_i32_1 : i32, i32, i32, i32
  }
  func.func @transform_2(%arg0: i32) -> (i32, i32, i32, i32) {
    %c0_i32 = arith.constant 0 : i32
    %c0_i32_0 = arith.constant 0 : i32
    %c0_i32_1 = arith.constant 0 : i32
    %c0_i32_2 = arith.constant 0 : i32
    return %arg0, %c0_i32, %c0_i32_0, %c0_i32_1 : i32, i32, i32, i32
  }
}

</mosaic_0001>

<bundles_post_ra>
// kernel: gaussian_pyramid.4
= control target key start
LH: loop header
LB: loop body
LE: loop exit
PB: predicated region body
PF: predicated region fallthrough
CT: control target
= control target key end

     0   :  { %7 = vsyncpa [#allocation3], 0  ;;  %s1595_s9 = smov 0   ;;  %s2569_s0 = inlined_call_operand.vmem [shape: f32[144], index: 0, kind: input, shape index: {}]   ;;  %s2570_s1 = inlined_call_operand.vmem [shape: f32[2,16,9,9], index: 1, kind: input, shape index: {}]   ;;  %s2571_s2 = inlined_call_operand.vmem [shape: f32[2,4,8,8], index: 2, kind: output, shape index: {}]  }
   0x1 LB: > { %s1345_s10 = sadd.s32 4294967295, %s1576_s9   ;;  %p1347_p0 = scmp.ge.s32.totalorder %s1576_s9, 1  ;;  %s1576_s9 = sphi %s1595_s9, %s13_s9  }
   0x2   : > { %p91_p1 = scmp.lt.s32.totalorder %s1576_s9, 3  ;;  %s104_s13 = sshll.u32 %s2569_s0, 4  ;;  %s105_s13 = int_to_ptr.vmem [resolvable:$true] %s104_s13 }
   0x3   : > { %p1536_p3 = scmp.eq.s32.totalorder %s1345_s10, 0  ;;  %s1551_s15 = scalar_lea.vmem %s105_s13, 32 }
   0x4   : > { %p1606_p2 = pnand %p1347_p0, %p91_p1  ;;  %p1552_p6 = scmp.ne.s32.totalorder %s105_s13, %s1551_s15 }
   0x5   : > { %p1559_p10 = scmp.lt.s32.totalorder %s105_s13, %s105_s13  ;;  %p1560_p11 = scmp.lt.s32.totalorder %s1551_s15, %s1551_s15 }
   0x6   : > { %p1532_p4 = pneg %p1606_p2 }
   0x7   : > { %p1561_p12 = por %p1560_p11, %p1559_p10 }
   0x8   : > { %p1533_p5 = pnand %p1536_p3, %p1532_p4 }
   0xa   : > { %p1553_p7 = pneg %p1533_p5 }
   0xc   : > { %p1554_p8 = pnand %p1553_p7, %p1552_p6 }
   0xe   : > { %p1555_p9 = pneg %p1554_p8 }
  0x10   : > { %p1562_p13 = pnand %p1561_p12, %p1555_p9 }
  0x12   : > { %1565 = shalt.err (!%p1562_p13)
}
  0x13   : > { %s1578_s16 = smov [#allocation2]   ;;  %125 = sbr.rel (%p1606_p2) target bundleno = 251 (0xfb), region = 28 }
  0x14   : > { %1535 = dma.vmem_to_smem (!%p1533_p5), %s105_s13, 32, %s1578_s16, [#allocation3]  }
  0x1a   : > { %1571 = dma.done.wait (%p1536_p3), [#allocation3], 32  }
  0x1b   : > { %1573 = vsyncadd (%p1536_p3), [#allocation3], 4294967264 }
  0x1c   : > { %131 = sfence }
  0x1d   : > { %p148_p0 = scmp.lt.s32.totalorder %s1345_s10, 1  ;;  %s1361_s17 = sld [smem:[#allocation2 + $0x4a]]  ;;  %vm214_vm0 = vcmask 1046528   ;;  %vm1270_vm1 = vcmask 64512  }
  0x1e   : > { %s1359_s18 = sld [smem:[#allocation2 + $0x2]]  ;;  %s1362_s19 = sld [smem:[#allocation2 + $0x6e]] }
  0x1f   : > { %s2574_s10 = smov (!%p148_p0, %s1345_s10), 1  ;;  %s1360_s20 = sld [smem:[#allocation2 + $0x26]] }
  0x20   : > { %s1526_s21 = sshll.u32 %s2574_s10, 8  ;;  %s1368_s22 = sld [smem:[#allocation2 + $0x2c]] }
  0x21   : > { %s1623_s25 = scalar_lea.vmem %s2570_s1, %s1526_s21  ;;  %s1367_s26 = sld [smem:[#allocation2 + $0x8]] }
  0x22   : > { %v1626_v0 = vld [vmem:[%s1623_s25] sm:$0xff]  ;;  %s1370_s27 = sld [smem:[#allocation2 + $0x74]]  ;;  %s1628_s28 = sld [smem:[#allocation2 + $0x50]]  ;;  %v1633_v5 = vld [vmem:[%s1623_s25 + $0x8] sm:$0x1]  ;;  %v1684_v43 = vld [vmem:[%s1623_s25 + $0x10] sm:$0xff] }
  0x23   : > { %v193_v1 = vstv %s1361_s17  ;;  %s1579_s29 = smov 127   ;;  %s1641_s30 = sld [smem:[#allocation2 + $0x29]]  ;;  %v1660_v33 = vld [vmem:[%s1623_s25 + $0x80] sm:$0xff]  ;;  %v1688_v47 = vld [vmem:[%s1623_s25 + $0x18] sm:$0x1] }
  0x24   : > { %v177_v2 = vstv %s1359_s18  ;;  %v194_v3 = vmul.f32 %v193_v1, %v1626_v0  ;;  %v201_v6 = vstv %s1362_s19  ;;  %s1643_s3 = sld [smem:[#allocation2 + $0x5]]  ;;  %s1389_s4 = sld [smem:[#allocation2 + $0x71]] }
  0x25   : > { %v178_v4 = vmul.f32 %v177_v2, %v1626_v0  ;;  %v185_v7 = vstv %s1360_s20  ;;  %v202_v8 = vmul.f32 %v201_v6, %v1626_v0  ;;  %s1388_s5 = sld [smem:[#allocation2 + $0x4d]]  ;;  %s1402_s6 = sld [smem:[#allocation2 + $0x2f]] }
  0x26   : > { %196 = vrot.lane.b32.xlu1 %v194_v3, %s1579_s29  ;;  %v186_v9 = vmul.f32 %v185_v7, %v1626_v0  ;;  %v267_v10 = vstv %s1368_s22  ;;  %s1401_s7 = sld [smem:[#allocation2 + $0xb]]  ;;  %s1664_s8 = sld [smem:[#allocation2 + $0x35]] }
  0x27   : > { %180 = vrot.lane.b32.xlu0 %v178_v4, %s1579_s29  ;;  %v268_v11 = vmul.f32 %v267_v10, %v1626_v0  ;;  %v269_v12 = vmul.f32 %v267_v10, %v1633_v5  ;;  %v254_v13 = vstv %s1367_s26  ;;  %s1667_s11 = sld [smem:[#allocation2 + $0x11]]  ;;  %s1669_s12 = sld [smem:[#allocation2 + $0x77]] }
  0x28   : > { %v255_v14 = vmul.f32 %v254_v13, %v1626_v0  ;;  %v256_v15 = vmul.f32 %v254_v13, %v1633_v5  ;;  %v293_v16 = vstv %s1370_s27  ;;  %v280_v23 = vstv %s1628_s28  ;;  %s1403_s13 = sld [smem:[#allocation2 + $0x53]]  ;;  %s1675_s14 = sld [smem:[#allocation2 + $0x7d]] }
  0x29   : > { %v272_v17 = vrot.slane %v268_v11, 1  ;;  %v273_v18 = vrot.slane %v269_v12, 1  ;;  %v294_v19 = vmul.f32 %v293_v16, %v1626_v0  ;;  %v295_v20 = vmul.f32 %v293_v16, %v1633_v5  ;;  %s1677_s15 = sld [smem:[#allocation2 + $0x59]]  ;;  %s1709_s16 = sld [smem:[#allocation2 + $0x32]] }
  0x2a   : > { %204 = vrot.lane.b32.xlu1 %v202_v8, %s1579_s29  ;;  %v259_v21 = vrot.slane %v255_v14, 1  ;;  %v260_v22 = vrot.slane %v256_v15, 1  ;;  %v281_v27 = vmul.f32 %v280_v23, %v1626_v0  ;;  %v282_v29 = vmul.f32 %v280_v23, %v1633_v5  ;;  %s1712_s17 = sld [smem:[#allocation2 + $0xe]]  ;;  %s1714_s18 = sld [smem:[#allocation2 + $0x7a]]  ;;  %v1739_v15 = vld [vmem:[%s1623_s25 + $0x90] sm:$0xff] }
  0x2b   : > { %188 = vrot.lane.b32.xlu0 %v186_v9, %s1579_s29  ;;  %v274_v24 = vsel %vm214_vm0, %v272_v17, %v273_v18  ;;  %v298_v25 = vrot.slane %v294_v19, 1  ;;  %v299_v26 = vrot.slane %v295_v20, 1  ;;  %v395_v34 = vstv %s1641_s30  ;;  %s1718_s19 = sld [smem:[#allocation2 + $0x56]]  ;;  %s1720_s20 = sld [smem:[#allocation2 + $0x38]] }
  0x2c   : > { %v261_v28 = vsel %vm214_vm0, %v259_v21, %v260_v22  ;;  %v285_v30 = vrot.slane %v281_v27, 1  ;;  %v286_v31 = vrot.slane %v282_v29, 1  ;;  %v387_v35 = vstv %s1643_s3  ;;  %s1724_s21 = sld [smem:[#allocation2 + $0x14]]  ;;  %s1726_s22 = sld [smem:[#allocation2 + $0x3e]]  ;;  %v1760_v22 = vld [vmem:[%s1623_s25 + $0x20] sm:$0xff] }
  0x2d   : > { %v300_v32 = vsel %vm214_vm0, %v298_v25, %v299_v26  ;;  %v396_v37 = vmul.f32 %v1660_v33, %v395_v34  ;;  %v388_v38 = vmul.f32 %v1660_v33, %v387_v35  ;;  %v411_v39 = vstv %s1389_s4  ;;  %s1728_s23 = sld [smem:[#allocation2 + $0x80]]  ;;  %s1730_s24 = sld [smem:[#allocation2 + $0x5c]] }
  0x2e   : > { %275 = vrot.lane.b32.xlu1 %v274_v24, %s1579_s29  ;;  %v287_v36 = vsel %vm214_vm0, %v285_v30, %v286_v31  ;;  %v403_v40 = vstv %s1388_s5  ;;  %v412_v41 = vmul.f32 %v1660_v33, %v411_v39  ;;  %v464_v44 = vstv %s1402_s6  ;;  %s1732_s26 = sld [smem:[#allocation2 + $0x1a]]  ;;  %s1743_s27 = sld [smem:[#allocation2 + $0x86]] }
  0x2f   : > { %262 = vrot.lane.b32.xlu0 %v261_v28, %s1579_s29  ;;  %v404_v42 = vmul.f32 %v1660_v33, %v403_v40  ;;  %v456_v45 = vstv %s1401_s7  ;;  %v545_v46 = vstv %s1664_s8  ;;  %v532_v48 = vstv %s1667_s11  ;;  %s1745_s28 = sld [smem:[#allocation2 + $0x2a]]  ;;  %s1749_s3 = sld [smem:[#allocation2 + $0x6]] }
  0x30   : > { %v465_v49 = vmul.f32 %v1684_v43, %v464_v44  ;;  %v480_v50 = vstv %s1669_s12  ;;  %v457_v51 = vmul.f32 %v1684_v43, %v456_v45  ;;  %v472_v52 = vstv %s1403_s13  ;;  %s1747_s30 = sld [smem:[#allocation2 + $0x62]]  ;;  %v1768_v28 = vld [vmem:[%s1623_s25 + $0x28] sm:$0x1]  ;;  %s1772_s5 = sld [smem:[#allocation2 + $0x4e]] }
  0x31   : > { %v546_v53 = vmul.f32 %v1684_v43, %v545_v46  ;;  %v571_v54 = vstv %s1675_s14  ;;  %v547_v55 = vmul.f32 %v1688_v47, %v545_v46  ;;  %v533_v56 = vmul.f32 %v1684_v43, %v532_v48  ;;  %s1756_s4 = sld [smem:[#allocation2 + $0x72]]  ;;  %s1813_s6 = sld [smem:[#allocation2 + $0x3b]] }
  0x32   : > { %301 = vrot.lane.b32.xlu1 %v300_v32, %s1579_s29  ;;  %v534_v57 = vmul.f32 %v1688_v47, %v532_v48  ;;  %v558_v58 = vstv %s1677_s15  ;;  %v481_v59 = vmul.f32 %v1684_v43, %v480_v50  ;;  %v473_v60 = vmul.f32 %v1684_v43, %v472_v52  ;;  %s1815_s7 = sld [smem:[#allocation2 + $0x17]]  ;;  %s1817_s8 = sld [smem:[#allocation2 + $0x83]] }
  0x33   : > { %288 = vrot.lane.b32.xlu0 %v287_v36, %s1579_s29  ;;  %v550_v61 = vrot.slane %v546_v53, 1  ;;  %v572_v62 = vmul.f32 %v1684_v43, %v571_v54  ;;  %v573_v63 = vmul.f32 %v1688_v47, %v571_v54  ;;  %v559_v1 = vmul.f32 %v1684_v43, %v558_v58  ;;  %s1819_s11 = sld [smem:[#allocation2 + $0x5f]]  ;;  %s1824_s12 = sld [smem:[#allocation2 + $0x41]] }
  0x34   : > { %v551_v2 = vrot.slane %v547_v55, 1  ;;  %v537_v3 = vrot.slane %v533_v56, 1  ;;  %v538_v4 = vrot.slane %v534_v57, 1  ;;  %v560_v6 = vmul.f32 %v1688_v47, %v558_v58  ;;  %s1830_s13 = sld [smem:[#allocation2 + $0x1d]]  ;;  %s1832_s14 = sld [smem:[#allocation2 + $0x89]] }
  0x35   : > { %v576_v7 = vrot.slane %v572_v62, 1  ;;  %v577_v8 = vrot.slane %v573_v63, 1  ;;  %v563_v11 = vrot.slane %v559_v1, 1  ;;  %v673_v16 = vstv %s1709_s16  ;;  %s1837_s15 = sld [smem:[#allocation2 + $0x65]]  ;;  %s1839_s16 = sld [smem:[#allocation2 + $0x47]] }
  0x36   : > { %398 = vrot.lane.b32.xlu1 %v396_v37, %s1579_s29  ;;  %v552_v9 = vsel %vm214_vm0, %v550_v61, %v551_v2  ;;  %v539_v10 = vsel %vm214_vm0, %v537_v3, %v538_v4  ;;  %v564_v12 = vrot.slane %v560_v6, 1  ;;  %v665_v17 = vstv %s1712_s17  ;;  %s1841_s17 = sld [smem:[#allocation2 + $0x33]] }
  0x37   : > { %390 = vrot.lane.b32.xlu0 %v388_v38, %s1579_s29  ;;  %v578_v13 = vsel %vm214_vm0, %v576_v7, %v577_v8  ;;  %v674_v18 = vmul.f32 %v1739_v15, %v673_v16  ;;  %v666_v19 = vmul.f32 %v1739_v15, %v665_v17  ;;  %v689_v20 = vstv %s1714_s18  ;;  %s1843_s18 = sld [smem:[#allocation2 + $0xf]] }
  0x38   : > { %v565_v14 = vsel %vm214_vm0, %v563_v11, %v564_v12  ;;  %v681_v21 = vstv %s1718_s19  ;;  %v742_v23 = vstv %s1720_s20  ;;  %v823_v24 = vstv %s1726_s22  ;;  %s1847_s19 = sld [smem:[#allocation2 + $0x23]]  ;;  %s1873_s22 = sld [smem:[#allocation2 + $0x8f]] }
  0x39   : > { %v734_v25 = vstv %s1724_s21  ;;  %v758_v26 = vstv %s1728_s23  ;;  %v750_v27 = vstv %s1730_s24  ;;  %v690_v29 = vmul.f32 %v1739_v15, %v689_v20  ;;  %s1856_s20 = sld [smem:[#allocation2 + $0x7b]]  ;;  %s1860_s21 = sld [smem:[#allocation2 + $0x57]] }
  0x3a   : > { %414 = vrot.lane.b32.xlu1 %v412_v41, %s1579_s29  ;;  %v810_v30 = vstv %s1732_s26  ;;  %v682_v31 = vmul.f32 %v1739_v15, %v681_v21  ;;  %v743_v32 = vmul.f32 %v1760_v22, %v742_v23  ;;  %v824_v34 = vmul.f32 %v1760_v22, %v823_v24  ;;  %s1878_s23 = sld [smem:[#allocation2 + $0x6b]]  ;;  %s1513_s24 = sld [smem:[#allocation2 + $0x44]] }
  0x3b   : > { %406 = vrot.lane.b32.xlu0 %v404_v42, %s1579_s29  ;;  %v735_v35 = vmul.f32 %v1760_v22, %v734_v25  ;;  %v759_v36 = vmul.f32 %v1760_v22, %v758_v26  ;;  %v751_v37 = vmul.f32 %v1760_v22, %v750_v27  ;;  %v825_v38 = vmul.f32 %v1768_v28, %v823_v24  ;;  %v1852_v24 = vld [vmem:[%s1623_s25 + $0xa0] sm:$0xff]  ;;  %s1512_s26 = sld [smem:[#allocation2 + $0x20]] }
  0x3c   : > { %v811_v39 = vmul.f32 %v1760_v22, %v810_v30  ;;  %v812_v40 = vmul.f32 %v1768_v28, %v810_v30  ;;  %v849_v41 = vstv %s1743_s27  ;;  %v221_v42 = vstv %s1745_s28  ;;  %s1515_s27 = sld [smem:[#allocation2 + $0x8c]]  ;;  %s1514_s28 = sld [smem:[#allocation2 + $0x68]] }
  0x3d   : > { %v836_v44 = vstv %s1747_s30  ;;  %v222_v45 = vmul.f32 %v221_v42, %v1626_v0  ;;  %v223_v46 = vmul.f32 %v221_v42, %v1633_v5  ;;  %v209_v48 = vstv %s1749_s3  ;;  %s1357_s30 = sld [smem:[#allocation2 + $0x48]] }
  0x3e   : > { %467 = vrot.lane.b32.xlu1 %v465_v49, %s1579_s29  ;;  %v828_v49 = vrot.slane %v824_v34, 1  ;;  %v210_v50 = vmul.f32 %v209_v48, %v1626_v0  ;;  %v243_v52 = vstv %s1756_s4  ;;  %v829_v53 = vrot.slane %v825_v38, 1  ;;  %s160_s3 = sld [smem:[#allocation2]]  ;;  %s1949_s4 = sld [smem:[#allocation2 + $0x6c]] }
  0x3f   : > { %459 = vrot.lane.b32.xlu0 %v457_v51, %s1579_s29  ;;  %v211_v51 = vmul.f32 %v209_v48, %v1633_v5  ;;  %v226_v54 = vrot.slane %v222_v45, 1  ;;  %v227_v55 = vrot.slane %v223_v46, 1  ;;  %v244_v56 = vmul.f32 %v243_v52, %v1626_v0 }
  0x40   : > { %v815_v57 = vrot.slane %v811_v39, 1  ;;  %v215_v58 = vrot.slane %v210_v50, 1  ;;  %v816_v61 = vrot.slane %v812_v40, 1  ;;  %v232_v1 = vstv %s1772_s5  ;;  %s1951_s5 = sld [smem:[#allocation2 + $0x24]] }
  0x41   : > { %v1799_v62 = vsel %vm214_vm0, %v226_v54, %v227_v55  ;;  %v248_v63 = vrot.slane %v244_v56, 1  ;;  %v233_v4 = vmul.f32 %v232_v1, %v1626_v0  ;;  %v234_v6 = vmul.f32 %v232_v1, %v1633_v5 }
  0x42   : > { %483 = vrot.lane.b32.xlu1 %v481_v59, %s1579_s29  ;;  %v216_v59 = vrot.slane %v211_v51, 1  ;;  %v850_v7 = vmul.f32 %v1760_v22, %v849_v41  ;;  %v851_v8 = vmul.f32 %v1768_v28, %v849_v41  ;;  %v951_v25 = vstv %s1813_s6  ;;  %s1378_s6 = sld [smem:[#allocation2 + $0x2b]] }
  0x43   : > { %475 = vrot.lane.b32.xlu0 %v473_v60, %s1579_s29  ;;  %v245_v60 = vmul.f32 %v243_v52, %v1633_v5  ;;  %v237_v5 = vrot.slane %v233_v4, 1  ;;  %v238_v12 = vrot.slane %v234_v6, 1  ;;  %v943_v26 = vstv %s1815_s7  ;;  %s1953_s7 = sld [smem:[#allocation2 + $0x25]] }
  0x44   : > { %v1805_v2 = vsel %vm214_vm0, %v215_v58, %v216_v59  ;;  %v854_v17 = vrot.slane %v850_v7, 1  ;;  %v967_v27 = vstv %s1817_s8  ;;  %v952_v30 = vmul.f32 %v1852_v24, %v951_v25  ;;  %s1955_s8 = sld [smem:[#allocation2 + $0x7]] }
  0x45   : > { %v249_v3 = vrot.slane %v245_v60, 1  ;;  %v1835_v16 = vsel %vm214_vm0, %v237_v5, %v238_v12  ;;  %v1020_v34 = vstv %s1824_s12  ;;  %v1036_v38 = vstv %s1832_s14  ;;  %s1959_s12 = sld [smem:[#allocation2 + $0x6d]]  ;;  %s1965_s14 = sld [smem:[#allocation2 + $0x27]] }
  0x46   : > { %553 = vrot.lane.b32.xlu1 %v552_v9, %s1579_s29  ;;  %v837_v9 = vmul.f32 %v1760_v22, %v836_v44  ;;  %v1028_v39 = vstv %s1837_s15  ;;  %v1101_v40 = vstv %s1839_s16  ;;  %v499_v41 = vstv %s1841_s17  ;;  %s1967_s15 = sld [smem:[#allocation2 + $0x28]]  ;;  %s1970_s16 = sld [smem:[#allocation2 + $0x4f]] }
  0x47   : > { %540 = vrot.lane.b32.xlu0 %v539_v10, %s1579_s29  ;;  %v838_v10 = vmul.f32 %v1768_v28, %v836_v44  ;;  %v1822_v11 = vsel %vm214_vm0, %v248_v63, %v249_v3  ;;  %v500_v44 = vmul.f32 %v1684_v43, %v499_v41  ;;  %v501_v45 = vmul.f32 %v1688_v47, %v499_v41  ;;  %v1937_v41 = vld [vmem:[%s1623_s25 + $0xb0] sm:$0xff]  ;;  %s1973_s17 = sld [smem:[#allocation2 + $0x3]] }
  0x48   : > { %v488_v46 = vstv %s1843_s18  ;;  %v1088_v50 = vstv %s1847_s19  ;;  %v521_v56 = vstv %s1856_s20  ;;  %v510_v3 = vstv %s1860_s21  ;;  %s1975_s18 = sld [smem:[#allocation2 + $0x4]]  ;;  %s1982_s19 = sld [smem:[#allocation2 + $0x6f]] }
  0x49   : > { %v842_v20 = vrot.slane %v838_v10, 1  ;;  %v489_v51 = vmul.f32 %v1684_v43, %v488_v46  ;;  %v490_v52 = vmul.f32 %v1688_v47, %v488_v46  ;;  %v504_v54 = vrot.slane %v500_v44, 1  ;;  %s1984_s20 = sld [smem:[#allocation2 + $0x70]]  ;;  %s1992_s21 = sld [smem:[#allocation2 + $0x4b]] }
  0x4a   : > { %579 = vrot.lane.b32.xlu1 %v578_v13, %s1579_s29  ;;  %v830_v13 = vsel %vm214_vm0, %v828_v49, %v829_v53  ;;  %v1889_v49 = vld [vmem:[%s1623_s25 + $0x38] sm:$0x1]  ;;  %v505_v55 = vrot.slane %v501_v45, 1  ;;  %v522_v59 = vmul.f32 %v1684_v43, %v521_v56  ;;  %v523_v60 = vmul.f32 %v1688_v47, %v521_v56  ;;  %v1372_v56 = vld [vmem:[%s1623_s25 + $0x48] sm:$0x1] }
  0x4b   : > { %566 = vrot.lane.b32.xlu0 %v565_v14, %s1579_s29  ;;  %v817_v14 = vsel %vm214_vm0, %v815_v57, %v816_v61  ;;  %v493_v57 = vrot.slane %v489_v51, 1  ;;  %v494_v58 = vrot.slane %v490_v52, 1  ;;  %v1103_v61 = vmul.f32 %v1889_v49, %v1101_v40 }
  0x4c   : > { %v1901_v1 = vsel %vm214_vm0, %v504_v54, %v505_v55  ;;  %v1090_v4 = vmul.f32 %v1889_v49, %v1088_v50  ;;  %v526_v7 = vrot.slane %v522_v59, 1  ;;  %v511_v10 = vmul.f32 %v1684_v43, %v510_v3  ;;  %v1371_v54 = vld [vmem:[%s1623_s25 + $0x40] sm:$0xff] }
  0x4d   : > { %v1908_v6 = vsel %vm214_vm0, %v493_v57, %v494_v58  ;;  %v512_v5 = vmul.f32 %v1688_v47, %v510_v3  ;;  %v1221_v44 = vstv %s1512_s26  ;;  %v161_v55 = vstv %s160_s3  ;;  %s2019_s26 = sld [smem:[#allocation2 + $0x34]]  ;;  %s2036_s3 = sld [smem:[#allocation2 + $0xa]] }
  0x4e   : > { %676 = vrot.lane.b32.xlu1 %v674_v18, %s1579_s29  ;;  %v855_v18 = vrot.slane %v851_v8, 1  ;;  %v527_v8 = vrot.slane %v523_v60, 1  ;;  %v1094_v25 = vrot.slane %v1090_v4, 1  ;;  %v1222_v46 = vmul.f32 %v1937_v41, %v1221_v44 }
  0x4f   : > { %668 = vrot.lane.b32.xlu0 %v666_v19, %s1579_s29  ;;  %v841_v19 = vrot.slane %v837_v9, 1  ;;  %v1127_v9 = vstv %s1873_s22  ;;  %v336_v57 = vstv %s1378_s6  ;;  %v173_v59 = vstv %s1949_s4  ;;  %s1998_s22 = sld [smem:[#allocation2 + $0x4c]]  ;;  %s2038_s4 = sld [smem:[#allocation2 + $0x76]] }
  0x50   : > { %v856_v21 = vsel %vm214_vm0, %v854_v17, %v855_v18  ;;  %v325_v60 = vstv %s1955_s8  ;;  %v321_v4 = vstv %s1959_s12  ;;  %v433_v44 = vstv %s1984_s20  ;;  %s2060_s6 = sld [smem:[#allocation2 + $0x52]]  ;;  %s2084_s8 = sld [smem:[#allocation2 + $0x31]] }
  0x51   : > { %v843_v23 = vsel %vm214_vm0, %v841_v19, %v842_v20  ;;  %v515_v19 = vrot.slane %v511_v10, 1  ;;  %v516_v20 = vrot.slane %v512_v5, 1  ;;  %v1995_v5 = vmul.f32 %v173_v59, %v1626_v0  ;;  %s2096_s12 = sld [smem:[#allocation2 + $0xd]]  ;;  %s2181_s20 = sld [smem:[#allocation2 + $0x12]] }
  0x52   : > { %692 = vrot.lane.b32.xlu1 %v690_v29, %s1579_s29  ;;  %v959_v29 = vstv %s1819_s11  ;;  %s1957_s11 = sld [smem:[#allocation2 + $0x1]] }
  0x53   : > { %684 = vrot.lane.b32.xlu0 %v682_v31, %s1579_s29  ;;  %v944_v31 = vmul.f32 %v1852_v24, %v943_v26  ;;  %v1129_v26 = vmul.f32 %v1889_v49, %v1127_v9 }
  0x56   : > { %745 = vrot.lane.b32.xlu1 %v743_v32, %s1579_s29  ;;  %v1867_v32 = vld [vmem:[%s1623_s25 + $0x30] sm:$0xff] }
  0x57   : > { %737 = vrot.lane.b32.xlu0 %v735_v35, %s1579_s29  ;;  %v968_v35 = vmul.f32 %v1852_v24, %v967_v27  ;;  %v1021_v42 = vmul.f32 %v1867_v32, %v1020_v34  ;;  %v1102_v53 = vmul.f32 %v1867_v32, %v1101_v40  ;;  %v1089_v63 = vmul.f32 %v1867_v32, %v1088_v50 }
  0x58   : > { %v1037_v12 = vmul.f32 %v1867_v32, %v1036_v38  ;;  %v1029_v17 = vmul.f32 %v1867_v32, %v1028_v39  ;;  %v1128_v47 = vmul.f32 %v1867_v32, %v1127_v9  ;;  %v1237_v50 = vstv %s1514_s28  ;;  %s2025_s28 = sld [smem:[#allocation2 + $0x51]] }
  0x59   : > { %v1106_v18 = vrot.slane %v1102_v53, 1  ;;  %v1238_v52 = vmul.f32 %v1937_v41, %v1237_v50  ;;  %v169_v53 = vstv %s1357_s30  ;;  %v309_v3 = vstv %s1957_s11  ;;  %s2034_s30 = sld [smem:[#allocation2 + $0x2e]]  ;;  %s2086_s11 = sld [smem:[#allocation2 + $0xc]] }
  0x5a   : > { %761 = vrot.lane.b32.xlu1 %v759_v36, %s1579_s29  ;;  %v960_v36 = vmul.f32 %v1852_v24, %v959_v29  ;;  %v1978_v58 = vmul.f32 %v169_v53, %v1626_v0  ;;  %v338_v9 = vmul.f32 %v1372_v56, %v336_v57 }
  0x5b   : > { %753 = vrot.lane.b32.xlu0 %v751_v37, %s1579_s29  ;;  %v1012_v37 = vstv %s1830_s13  ;;  %s1961_s13 = sld [smem:[#allocation2 + $0x73]] }
  0x5c   : > { %v1013_v48 = vmul.f32 %v1867_v32, %v1012_v37 }
  0x5e   : > { %831 = vrot.lane.b32.xlu1 %v830_v13, %s1579_s29  ;;  %v1114_v13 = vstv %s1878_s23  ;;  %s2009_s23 = sld [smem:[#allocation2 + $0x2d]] }
  0x5f   : > { %818 = vrot.lane.b32.xlu0 %v817_v14, %s1579_s29  ;;  %v1916_v14 = vsel %vm214_vm0, %v526_v7, %v527_v8  ;;  %v1115_v27 = vmul.f32 %v1867_v32, %v1114_v13  ;;  %v1116_v29 = vmul.f32 %v1889_v49, %v1114_v13  ;;  %v162_v7 = vmul.f32 %v161_v55, %v1626_v0 }
  0x60   : > { %v337_v8 = vmul.f32 %v1371_v54, %v336_v57  ;;  %v326_v13 = vmul.f32 %v1371_v54, %v325_v60  ;;  %v379_v55 = vstv %s1992_s21  ;;  %s2183_s21 = sld [smem:[#allocation2 + $0x18]] }
  0x61   : > { %v1119_v37 = vrot.slane %v1115_v27, 1  ;;  %v1120_v38 = vrot.slane %v1116_v29, 1  ;;  %v358_v10 = vstv %s1961_s13  ;;  %s2098_s13 = sld [smem:[#allocation2 + $0x7c]] }
  0x62   : > { %857 = vrot.lane.b32.xlu1 %v856_v21, %s1579_s29  ;;  %v1107_v21 = vrot.slane %v1103_v61, 1  ;;  %v165_v61 = vstv %s1951_s5  ;;  %v341_v29 = vrot.slane %v337_v8, 1  ;;  %s2049_s5 = sld [smem:[#allocation2 + $0x10]] }
  0x63   : > { %844 = vrot.lane.b32.xlu0 %v843_v23, %s1579_s29  ;;  %v1093_v23 = vrot.slane %v1089_v63, 1  ;;  %v1121_v40 = vsel %vm214_vm0, %v1119_v37, %v1120_v38  ;;  %v313_v63 = vstv %s1953_s7  ;;  %v371_v37 = vstv %s1973_s17  ;;  %s2065_s7 = sld [smem:[#allocation2 + $0x30]]  ;;  %s2155_s17 = sld [smem:[#allocation2 + $0x55]] }
  0x64   : > { %v421_v38 = vstv %s1975_s18  ;;  %s2169_s18 = sld [smem:[#allocation2 + $0x36]] }
  0x65   : > { %v1095_v34 = vsel %vm214_vm0, %v1093_v23, %v1094_v25  ;;  %v375_v23 = vstv %s1965_s14  ;;  %v1390_v25 = vld [vmem:[%s1623_s25 + $0xc0] sm:$0xff]  ;;  %s2134_s14 = sld [smem:[#allocation2 + $0x79]] }
  0x66   : > { %954 = vrot.lane.b32.xlu1 %v952_v30, %s1579_s29  ;;  %v1926_v30 = vsel %vm214_vm0, %v515_v19, %v516_v20  ;;  %v2003_v19 = vmul.f32 %v1371_v54, %v313_v63  ;;  %v2005_v20 = vmul.f32 %v1371_v54, %v309_v3  ;;  %v2046_v53 = vmul.f32 %v1390_v25, %v421_v38 }
  0x67   : > { %946 = vrot.lane.b32.xlu0 %v944_v31, %s1579_s29  ;;  %v1108_v31 = vsel %vm214_vm0, %v1106_v18, %v1107_v21  ;;  %v2001_v18 = vmul.f32 %v165_v61, %v1626_v0  ;;  %v2007_v21 = vmul.f32 %v1371_v54, %v321_v4  ;;  %v360_v0 = vmul.f32 %v1372_v56, %v358_v10 }
  0x68   : > { %v429_v61 = vstv %s1998_s22  ;;  %v444_v4 = vstv %s2009_s23  ;;  %v599_v38 = vstv %s2038_s4  ;;  %s2202_s22 = sld [smem:[#allocation2 + $0x7e]]  ;;  %s2206_s23 = sld [smem:[#allocation2 + $0x5a]] }
  0x69   : > { %s2255_s4 = sld [smem:[#allocation2 + $0x5b]] }
  0x6a   : > { %970 = vrot.lane.b32.xlu1 %v968_v35, %s1579_s29  ;;  %v1132_v35 = vrot.slane %v1128_v47, 1  ;;  %v425_v47 = vstv %s1967_s15  ;;  %s2136_s15 = sld [smem:[#allocation2 + $0x58]] }
  0x6b   : > { %962 = vrot.lane.b32.xlu0 %v960_v36, %s1579_s29  ;;  %v1133_v36 = vrot.slane %v1129_v26, 1  ;;  %v359_v26 = vmul.f32 %v1371_v54, %v358_v10 }
  0x6d   : > { %v1134_v39 = vsel %vm214_vm0, %v1132_v35, %v1133_v36  ;;  %v330_v35 = vrot.slane %v326_v13, 1  ;;  %v2071_v13 = vmul.f32 %v1660_v33, %v379_v55 }
  0x6e   : > { %1023 = vrot.lane.b32.xlu1 %v1021_v42, %s1579_s29  ;;  %v1229_v42 = vstv %s1513_s24  ;;  %s2011_s24 = sld [smem:[#allocation2 + $0x9]] }
  0x6f   : > { %1015 = vrot.lane.b32.xlu0 %v1013_v48, %s1579_s29  ;;  %v1230_v45 = vmul.f32 %v1937_v41, %v1229_v42  ;;  %v1245_v48 = vstv %s1515_s27  ;;  %s2023_s27 = sld [smem:[#allocation2 + $0x75]]  ;;  %v383_v42 = vstv %s1982_s19  ;;  %s2171_s19 = sld [smem:[#allocation2 + $0x3c]] }
  0x70   : > { %v1246_v51 = vmul.f32 %v1937_v41, %v1245_v48 }
  0x72   : > { %1039 = vrot.lane.b32.xlu1 %v1037_v12, %s1579_s29 }
  0x73   : > { %1031 = vrot.lane.b32.xlu0 %v1029_v17, %s1579_s29  ;;  %v327_v17 = vmul.f32 %v1372_v56, %v325_v60  ;;  %v2057_v60 = vmul.f32 %v1390_v25, %v433_v44 }
  0x74   : > { %v440_v8 = vstv %s2011_s24  ;;  %s2208_s24 = sld [smem:[#allocation2 + $0x84]] }
  0x75   : > { %v331_v36 = vrot.slane %v327_v17, 1  ;;  %v2074_v17 = vld [vmem:[%s1623_s25 + $0x50] sm:$0xff] }
  0x76   : > { %1109 = vrot.lane.b32.xlu1 %v1108_v31, %s1579_s29  ;;  %v342_v31 = vrot.slane %v338_v9, 1 }
  0x77   : > { %1096 = vrot.lane.b32.xlu0 %v1095_v34, %s1579_s29  ;;  %v347_v34 = vstv %s1970_s16  ;;  %s2153_s16 = sld [smem:[#allocation2 + $0x54]] }
  0x78   : > { %v348_v48 = vmul.f32 %v1371_v54, %v347_v34  ;;  %v349_v50 = vmul.f32 %v1372_v56, %v347_v34  ;;  %v2055_v56 = vmul.f32 %v1660_v33, %v383_v42 }
  0x7a   : > { %1135 = vrot.lane.b32.xlu1 %v1134_v39, %s1579_s29  ;;  %v2028_v39 = vmul.f32 %v1660_v33, %v375_v23  ;;  %v352_v10 = vrot.slane %v348_v48, 1 }
  0x7b   : > { %1122 = vrot.lane.b32.xlu0 %v1121_v40, %s1579_s29  ;;  %v2030_v40 = vmul.f32 %v1390_v25, %v425_v47  ;;  %v2081_v47 = vld [vmem:[%s1623_s25 + $0x58] sm:$0x1] }
  0x7e   : > { %1232 = vrot.lane.b32.xlu1 %v1230_v45, %s1579_s29  ;;  %v363_v45 = vrot.slane %v359_v26, 1  ;;  %v614_v26 = vstv %s2019_s26  ;;  %s2215_s26 = sld [smem:[#allocation2 + $0x37]] }
  0x7f   : > { %1224 = vrot.lane.b32.xlu0 %v1222_v46, %s1579_s29  ;;  %v364_v46 = vrot.slane %v360_v0, 1  ;;  %v615_v42 = vmul.f32 %v2074_v17, %v614_v26  ;;  %v616_v44 = vmul.f32 %v2081_v47, %v614_v26 }
  0x81   : > { %v2068_v9 = vsel %vm214_vm0, %v363_v45, %v364_v46 }
  0x82   : > { %1248 = vrot.lane.b32.xlu1 %v1246_v51, %s1579_s29  ;;  %v2041_v51 = vsel %vm214_vm0, %v341_v29, %v342_v31  ;;  %v2089_v29 = vmul.f32 %v1684_v43, %v444_v4  ;;  %v620_v4 = vrot.slane %v616_v44, 1 }
  0x83   : > { %1240 = vrot.lane.b32.xlu0 %v1238_v52, %s1579_s29  ;;  %s1963_s29 = sld [smem:[#allocation2 + $0x49]]  ;;  %v2044_v52 = vmul.f32 %v1660_v33, %v371_v37 }
  0x89   : > { %v317_v12 = vstv %s1963_s29  ;;  %s2126_s29 = sld [smem:[#allocation2 + $0x78]] }
  0x8a   : > { %v2016_v27 = vmul.f32 %v1371_v54, %v317_v12  ;;  %v2052_v54 = vsel %vm214_vm0, %v330_v35, %v331_v36  ;;  %v353_v12 = vrot.slane %v349_v50, 1  ;;  %v591_v35 = vstv %s2034_s30  ;;  %s2235_s30 = sld [smem:[#allocation2 + $0x60]] }
  0x8b   : > { %v587_v36 = vstv %s2036_s3  ;;  %s2247_s3 = sld [smem:[#allocation2 + $0x3d]] }
  0x8c   : > { %v2105_v37 = vsel %vm214_vm0, %v352_v10, %v353_v12 }
  0x98   : > { %v197_v57 = vpop.permute.xlu1 %196 }
  0x99   : > { %v181_v59 = vpop.permute.xlu0 %180  ;;  %v199_v63 = vadd.f32 %v197_v57, %v1978_v58  ;;  %v2120_v57 = vmul.f32 %v2074_v17, %v591_v35  ;;  %v699_v35 = vstv %s2096_s12  ;;  %s2320_s12 = sld [smem:[#allocation2 + $0x16]] }
  0x9a   : > { %v183_v3 = vadd.f32 %v181_v59, %v162_v7  ;;  %v2078_v7 = vmul.f32 %v1390_v25, %v429_v61  ;;  %v448_v25 = vstv %s2025_s28  ;;  %v2123_v59 = vmul.f32 %v2074_v17, %v587_v36  ;;  %s2231_s28 = sld [smem:[#allocation2 + $0x7f]] }
  0x9b   : > { %v241_v58 = vadd.f32 %v1835_v16, %v199_v63  ;;  %v452_v16 = vstv %s2023_s27  ;;  %v2117_v55 = vmul.f32 %v1684_v43, %v448_v25  ;;  %v595_v61 = vstv %s2060_s6  ;;  %s2223_s27 = sld [smem:[#allocation2 + $0x13]]  ;;  %s2278_s6 = sld [smem:[#allocation2 + $0x19]] }
  0x9c   : > { %v219_v23 = vadd.f32 %v1805_v2, %v183_v3  ;;  %v205_v33 = vpop.permute.xlu1 %204  ;;  %v2092_v2 = vmul.f32 %v1684_v43, %v440_v8  ;;  %v2129_v63 = vmul.f32 %v2074_v17, %v599_v38  ;;  %v653_v3 = vstv %s2065_s7  ;;  %s2294_s7 = sld [smem:[#allocation2 + $0x3a]] }
  0x9d   : > { %v189_v0 = vpop.permute.xlu0 %188  ;;  %v207_v31 = vadd.f32 %v205_v33, %v1995_v5  ;;  %v2113_v5 = vmul.f32 %v1684_v43, %v452_v16  ;;  %v619_v43 = vrot.slane %v615_v42, 1  ;;  %v2141_v26 = vmul.f32 %v2074_v17, %v595_v61  ;;  %v2144_v33 = vld [vmem:[%s1623_s25 + $0xd0] sm:$0xff] }
  0x9e   : > { %v191_v34 = vadd.f32 %v189_v0, %v2001_v18  ;;  %v603_v18 = vstv %s2049_s5  ;;  %v703_v0 = vstv %s2084_s8  ;;  %v636_v36 = vstv %s2098_s13  ;;  %s2276_s5 = sld [smem:[#allocation2 + $0x39]]  ;;  %s2311_s8 = sld [smem:[#allocation2 + $0x15]] }
  0x9f   : > { %v252_v46 = vadd.f32 %v1822_v11, %v207_v31  ;;  %v604_v8 = vmul.f32 %v2074_v17, %v603_v18  ;;  %v605_v10 = vmul.f32 %v2081_v47, %v603_v18  ;;  %v2148_v31 = vmul.f32 %v1739_v15, %v653_v3  ;;  %s2326_s13 = sld [smem:[#allocation2 + $0x61]] }
  0xa0   : > { %v230_v45 = vadd.f32 %v1799_v62, %v191_v34  ;;  %v276_v48 = vpop.permute.xlu1 %275  ;;  %v649_v34 = vstv %s2086_s11  ;;  %v2160_v44 = vsel %vm214_vm0, %v619_v43, %v620_v4  ;;  %s2313_s11 = sld [smem:[#allocation2 + $0x85]] }
  0xa1   : > { %v263_v50 = vpop.permute.xlu0 %262  ;;  %v608_v18 = vrot.slane %v604_v8, 1  ;;  %v638_v8 = vmul.f32 %v2081_v47, %v636_v36 }
  0xa2   : > { %v278_v62 = vadd.f32 %v276_v48, %v230_v45  ;;  %v265_v11 = vadd.f32 %v263_v50, %v219_v23  ;;  %v2163_v45 = vmul.f32 %v2144_v33, %v703_v0  ;;  %v609_v48 = vrot.slane %v605_v10, 1 }
  0xa3   : > { %v711_v10 = vstv %s2134_s14  ;;  %s2335_s14 = sld [smem:[#allocation2 + $0x82]] }
  0xa4   : > { %v315_v12 = vadd.f32 %v2003_v19, %v278_v62  ;;  %v311_v23 = vadd.f32 %v2005_v20, %v265_v11  ;;  %v302_v16 = vpop.permute.xlu1 %301  ;;  %v2174_v62 = vmul.f32 %v1739_v15, %v649_v34  ;;  %v2177_v11 = vmul.f32 %v2144_v33, %v699_v35 }
  0xa5   : > { %v289_v25 = vpop.permute.xlu0 %288  ;;  %v304_v19 = vadd.f32 %v302_v16, %v252_v46  ;;  %v2188_v4 = vsel %vm214_vm0, %v608_v18, %v609_v48 }
  0xa6   : > { %v291_v20 = vadd.f32 %v289_v25, %v241_v58  ;;  %v345_v38 = vadd.f32 %v2041_v51, %v315_v12  ;;  %v334_v42 = vadd.f32 %v2052_v54, %v311_v23  ;;  %v625_v12 = vstv %s2136_s15  ;;  %s2340_s15 = sld [smem:[#allocation2 + $0x5d]] }
  0xa7   : > { %v323_v50 = vadd.f32 %v2007_v21, %v304_v19  ;;  %v637_v21 = vmul.f32 %v2074_v17, %v636_v36  ;;  %v657_v19 = vstv %s2153_s16  ;;  %v627_v18 = vmul.f32 %v2081_v47, %v625_v12  ;;  %s2357_s16 = sld [smem:[#allocation2 + $0x5e]] }
  0xa8   : > { %v319_v61 = vadd.f32 %v2016_v27, %v291_v20  ;;  %v377_v46 = vadd.f32 %v2028_v39, %v345_v38  ;;  %v373_v58 = vadd.f32 %v2044_v52, %v334_v42  ;;  %v399_v51 = vpop.permute.xlu1 %398  ;;  %v661_v27 = vstv %s2126_s29  ;;  %s2333_s29 = sld [smem:[#allocation2 + $0x81]] }
  0xa9   : > { %v391_v54 = vpop.permute.xlu0 %390  ;;  %v367_v3 = vadd.f32 %v2068_v9, %v323_v50  ;;  %v641_v9 = vrot.slane %v637_v21, 1  ;;  %v707_v20 = vstv %s2155_s17  ;;  %v626_v42 = vmul.f32 %v2074_v17, %v625_v12  ;;  %s2361_s17 = sld [smem:[#allocation2 + $0x3f]] }
  0xaa   : > { %v401_v39 = vadd.f32 %v399_v51, %v377_v46  ;;  %v393_v52 = vadd.f32 %v391_v54, %v373_v58  ;;  %v356_v43 = vadd.f32 %v2105_v37, %v319_v61  ;;  %v2198_v37 = vmul.f32 %v1739_v15, %v661_v27 }
  0xab   : > { %v385_v16 = vadd.f32 %v2055_v56, %v367_v3  ;;  %v642_v56 = vrot.slane %v638_v8, 1  ;;  %v2220_v48 = vmul.f32 %v1739_v15, %v657_v19  ;;  %v777_v50 = vstv %s2171_s19  ;;  %s2375_s19 = sld [smem:[#allocation2 + $0x87]] }
  0xac   : > { %v427_v23 = vadd.f32 %v2030_v40, %v401_v39  ;;  %v423_v0 = vadd.f32 %v2046_v53, %v393_v52  ;;  %v381_v25 = vadd.f32 %v2071_v13, %v356_v43  ;;  %v415_v34 = vpop.permute.xlu1 %414  ;;  %v2211_v13 = vmul.f32 %v2144_v33, %v711_v10 }
  0xad   : > { %v407_v35 = vpop.permute.xlu0 %406  ;;  %v417_v36 = vadd.f32 %v415_v34, %v385_v16  ;;  %v2226_v58 = vmul.f32 %v2144_v33, %v707_v20  ;;  %v722_v17 = vstv %s2169_s18  ;;  %v718_v51 = vstv %s2181_s20  ;;  %s2363_s18 = sld [smem:[#allocation2 + $0x1b]] }
  0xae   : > { %v409_v38 = vadd.f32 %v407_v35, %v381_v25  ;;  %v446_v40 = vadd.f32 %v2089_v29, %v427_v23  ;;  %v442_v53 = vadd.f32 %v2092_v2, %v423_v0  ;;  %v766_v47 = vstv %s2183_s21  ;;  %s2389_s20 = sld [smem:[#allocation2 + $0x63]]  ;;  %s2391_s21 = sld [smem:[#allocation2 + $0x45]] }
  0xaf   : > { %v435_v29 = vadd.f32 %v2057_v60, %v417_v36  ;;  %v630_v21 = vrot.slane %v626_v42, 1  ;;  %v631_v27 = vrot.slane %v627_v18, 1  ;;  %v778_v39 = vmul.f32 %v1760_v22, %v777_v50 }
  0xb0   : > { %v431_v2 = vadd.f32 %v2078_v7, %v409_v38  ;;  %v468_v61 = vpop.permute.xlu1 %467  ;;  %v779_v33 = vmul.f32 %v1768_v28, %v777_v50  ;;  %v2242_v43 = vsel %vm214_vm0, %v641_v9, %v642_v56  ;;  %v2250_v10 = vmul.f32 %v1760_v22, %v718_v51 }
  0xb1   : > { %v460_v46 = vpop.permute.xlu0 %459  ;;  %v470_v54 = vadd.f32 %v468_v61, %v446_v40  ;;  %v454_v7 = vadd.f32 %v2113_v5, %v435_v29  ;;  %v2245_v5 = vmul.f32 %v1760_v22, %v722_v17  ;;  %v730_v12 = vstv %s2202_s22  ;;  %v2269_v40 = vld [vmem:[%s1623_s25 + $0x60] sm:$0xff]  ;;  %s2399_s22 = sld [smem:[#allocation2 + $0x21]] }
  0xb2   : > { %v462_v60 = vadd.f32 %v460_v46, %v442_v53  ;;  %v450_v15 = vadd.f32 %v2117_v55, %v431_v2  ;;  %v726_v16 = vstv %s2206_s23  ;;  %v799_v25 = vstv %s2208_s24  ;;  %s2401_s23 = sld [smem:[#allocation2 + $0x8d]]  ;;  %s2411_s24 = sld [smem:[#allocation2 + $0x40]] }
  0xb3   : > { %v508_v52 = vadd.f32 %v1901_v1, %v470_v54  ;;  %v767_v1 = vmul.f32 %v1760_v22, %v766_v47  ;;  %v2260_v34 = vsel %vm214_vm0, %v630_v21, %v631_v27  ;;  %v782_v35 = vrot.slane %v778_v39, 1  ;;  %v2302_v21 = vld [vmem:[%s1623_s25 + $0x68] sm:$0x1] }
  0xb4   : > { %v497_v3 = vadd.f32 %v1908_v6, %v462_v60  ;;  %v484_v55 = vpop.permute.xlu1 %483  ;;  %v768_v6 = vmul.f32 %v1768_v28, %v766_v47  ;;  %v783_v9 = vrot.slane %v779_v33, 1  ;;  %v869_v19 = vstv %s2215_s26  ;;  %s2433_s26 = sld [smem:[#allocation2 + $0x1c]] }
  0xb5   : > { %v476_v8 = vpop.permute.xlu0 %475  ;;  %v486_v23 = vadd.f32 %v484_v55, %v454_v7  ;;  %v2266_v38 = vmul.f32 %v1760_v22, %v730_v12  ;;  %v865_v53 = vstv %s2223_s27  ;;  %v771_v18 = vrot.slane %v767_v1, 1  ;;  %s2443_s27 = sld [smem:[#allocation2 + $0x88]] }
  0xb6   : > { %v478_v0 = vadd.f32 %v476_v8, %v450_v15  ;;  %v772_v29 = vrot.slane %v768_v6, 1  ;;  %v2273_v2 = vmul.f32 %v1760_v22, %v799_v25  ;;  %v877_v50 = vstv %s2231_s28  ;;  %s2445_s28 = sld [smem:[#allocation2 + $0x69]] }
  0xb7   : > { %v530_v20 = vadd.f32 %v1916_v14, %v486_v23  ;;  %v2281_v61 = vmul.f32 %v1760_v22, %v726_v16  ;;  %v788_v46 = vstv %s2235_s30  ;;  %v2285_v17 = vsel %vm214_vm0, %v782_v35, %v783_v9  ;;  %s2451_s30 = sld [smem:[#allocation2 + $0x46]] }
  0xb8   : > { %v519_v36 = vadd.f32 %v1926_v30, %v478_v0  ;;  %v554_v56 = vpop.permute.xlu1 %553  ;;  %v2288_v51 = vmul.f32 %v2269_v40, %v869_v19  ;;  %v2291_v47 = vmul.f32 %v2269_v40, %v865_v53  ;;  %v801_v54 = vmul.f32 %v1768_v28, %v799_v25 }
  0xb9   : > { %v541_v42 = vpop.permute.xlu0 %540  ;;  %v556_v14 = vadd.f32 %v554_v56, %v508_v52  ;;  %v2299_v15 = vmul.f32 %v2269_v40, %v877_v50  ;;  %v892_v27 = vstv %s2247_s3  ;;  %v2306_v52 = vsel %vm214_vm0, %v771_v18, %v772_v29  ;;  %v2345_v50 = vld [vmem:[%s1623_s25 + $0xe0] sm:$0xff]  ;;  %s2459_s3 = sld [smem:[#allocation2 + $0x64]] }
  0xba   : > { %v543_v30 = vadd.f32 %v541_v42, %v497_v3  ;;  %v804_v3 = vrot.slane %v2273_v2, 1  ;;  %v789_v55 = vmul.f32 %v1760_v22, %v788_v46  ;;  %v873_v8 = vstv %s2255_s4  ;;  %s2461_s4 = sld [smem:[#allocation2 + $0x22]] }
  0xbb   : > { %v593_v60 = vadd.f32 %v2120_v57, %v556_v14  ;;  %v805_v6 = vrot.slane %v801_v54, 1  ;;  %v790_v23 = vmul.f32 %v1768_v28, %v788_v46  ;;  %v893_v0 = vmul.f32 %v2269_v40, %v892_v27 }
  0xbc   : > { %v589_v7 = vadd.f32 %v2123_v59, %v543_v30  ;;  %v580_v39 = vpop.permute.xlu1 %579  ;;  %v894_v22 = vmul.f32 %v2302_v21, %v892_v27  ;;  %v793_v28 = vrot.slane %v789_v55, 1  ;;  %v2329_v19 = vmul.f32 %v2269_v40, %v873_v8 }
  0xbd   : > { %v567_v33 = vpop.permute.xlu0 %566  ;;  %v582_v57 = vadd.f32 %v580_v39, %v530_v20  ;;  %v623_v12 = vadd.f32 %v2160_v44, %v593_v60  ;;  %v931_v20 = vstv %s2276_s5  ;;  %v794_v53 = vrot.slane %v790_v23, 1  ;;  %s2475_s5 = sld [smem:[#allocation2 + $0x42]] }
  0xbe   : > { %v569_v59 = vadd.f32 %v567_v33, %v519_v36  ;;  %v612_v1 = vadd.f32 %v2188_v4, %v589_v7  ;;  %v881_v36 = vstv %s2278_s6  ;;  %v897_v56 = vrot.slane %v893_v0, 1  ;;  %s2483_s6 = sld [smem:[#allocation2 + $0x8e]] }
  0xbf   : > { %v601_v16 = vadd.f32 %v2129_v63, %v582_v57  ;;  %v655_v35 = vadd.f32 %v2148_v31, %v623_v12  ;;  %v898_v42 = vrot.slane %v894_v22, 1  ;;  %v981_v18 = vstv %s2294_s7  ;;  %s2487_s7 = sld [smem:[#allocation2 + $0x43]] }
  0xc0   : > { %v597_v25 = vadd.f32 %v2141_v26, %v569_v59  ;;  %v651_v44 = vadd.f32 %v2174_v62, %v612_v1  ;;  %v677_v4 = vpop.permute.xlu1 %676  ;;  %v882_v14 = vmul.f32 %v2269_v40, %v881_v36  ;;  %v2350_v46 = vsel %vm214_vm0, %v804_v3, %v805_v6 }
  0xc1   : > { %v669_v9 = vpop.permute.xlu0 %668  ;;  %v679_v63 = vadd.f32 %v677_v4, %v655_v35  ;;  %v645_v31 = vadd.f32 %v2242_v43, %v601_v16  ;;  %v883_v43 = vmul.f32 %v2302_v21, %v881_v36  ;;  %v2353_v54 = vmul.f32 %v1852_v24, %v931_v20 }
  0xc2   : > { %v671_v26 = vadd.f32 %v669_v9, %v651_v44  ;;  %v634_v62 = vadd.f32 %v2260_v34, %v597_v25  ;;  %v927_v60 = vstv %s2311_s8  ;;  %v914_v7 = vstv %s2313_s11  ;;  %s2489_s8 = sld [smem:[#allocation2 + $0x6a]]  ;;  %s2500_s11 = sld [smem:[#allocation2 + $0x1e]] }
  0xc3   : > { %v663_v29 = vadd.f32 %v2198_v37, %v645_v31  ;;  %v705_v37 = vadd.f32 %v2163_v45, %v679_v63  ;;  %v2366_v33 = vsel %vm214_vm0, %v793_v28, %v794_v53  ;;  %v2369_v3 = vsel %vm214_vm0, %v897_v56, %v898_v42 }
  0xc4   : > { %v659_v2 = vadd.f32 %v2220_v48, %v634_v62  ;;  %v693_v30 = vpop.permute.xlu1 %692  ;;  %v701_v48 = vadd.f32 %v2177_v11, %v671_v26  ;;  %v2372_v55 = vmul.f32 %v2345_v50, %v981_v18  ;;  %v977_v45 = vstv %s2320_s12  ;;  %s2516_s12 = sld [smem:[#allocation2 + $0x1f]] }
  0xc5   : > { %v685_v34 = vpop.permute.xlu0 %684  ;;  %v695_v27 = vadd.f32 %v693_v30, %v663_v29  ;;  %v886_v11 = vrot.slane %v882_v14, 1  ;;  %v887_v8 = vrot.slane %v883_v43, 1  ;;  %v915_v57 = vmul.f32 %v2269_v40, %v914_v7 }
  0xc6   : > { %v687_v39 = vadd.f32 %v685_v34, %v659_v2  ;;  %v903_v59 = vstv %s2326_s13  ;;  %v2380_v6 = vmul.f32 %v1852_v24, %v927_v60  ;;  %v916_v23 = vmul.f32 %v2302_v21, %v914_v7  ;;  %s2522_s13 = sld [smem:[#allocation2 + $0x8a]] }
  0xc7   : > { %v939_v0 = vstv %s2333_s29  ;;  %v989_v22 = vstv %s2335_s14  ;;  %v713_v16 = vadd.f32 %v2211_v13, %v695_v27  ;;  %v724_v35 = vadd.f32 %v2245_v5, %v705_v37  ;;  %s2528_s29 = sld [smem:[#allocation2 + $0x66]]  ;;  %s2532_s14 = sld [smem:[#allocation2 + $0x8b]] }
  0xc8   : > { %v746_v12 = vpop.permute.xlu1 %745  ;;  %v709_v25 = vadd.f32 %v2226_v58, %v687_v39  ;;  %v720_v44 = vadd.f32 %v2250_v10, %v701_v48  ;;  %v2394_v4 = vmul.f32 %v2345_v50, %v977_v45  ;;  %v904_v9 = vmul.f32 %v2269_v40, %v903_v59 }
  0xc9   : > { %v738_v1 = vpop.permute.xlu0 %737  ;;  %v905_v28 = vmul.f32 %v2302_v21, %v903_v59  ;;  %v935_v20 = vstv %s2340_s15  ;;  %v748_v13 = vadd.f32 %v746_v12, %v724_v35  ;;  %v888_v5 = vsel %vm214_vm0, %v886_v11, %v887_v8  ;;  %s2540_s15 = sld [smem:[#allocation2 + $0x67]] }
  0xca   : > { %v740_v58 = vadd.f32 %v738_v1, %v720_v44  ;;  %v919_v10 = vrot.slane %v915_v57, 1  ;;  %v920_v26 = vrot.slane %v916_v23, 1  ;;  %v2405_v40 = vmul.f32 %v1852_v24, %v939_v0  ;;  %v2465_v44 = vld [vmem:[%s1623_s25 + $0x70] sm:$0xff] }
  0xcb   : > { %v2408_v21 = vmul.f32 %v2345_v50, %v989_v22  ;;  %v985_v31 = vstv %s2357_s16  ;;  %v732_v62 = vadd.f32 %v2266_v38, %v713_v16  ;;  %v728_v53 = vadd.f32 %v2281_v61, %v709_v25 }
  0xcc   : > { %v762_v36 = vpop.permute.xlu1 %761  ;;  %v1000_v56 = vstv %s2361_s17  ;;  %v996_v42 = vstv %s2363_s18  ;;  %v908_v18 = vrot.slane %v904_v9, 1  ;;  %v909_v29 = vrot.slane %v905_v28, 1 }
  0xcd   : > { %v754_v63 = vpop.permute.xlu0 %753  ;;  %v2418_v2 = vmul.f32 %v1852_v24, %v935_v20  ;;  %v1008_v14 = vstv %s2375_s19  ;;  %v764_v43 = vadd.f32 %v762_v36, %v732_v62  ;;  %v786_v34 = vadd.f32 %v2285_v17, %v748_v13 }
  0xce   : > { %v756_v30 = vadd.f32 %v754_v63, %v728_v53  ;;  %v775_v38 = vadd.f32 %v2306_v52, %v740_v58  ;;  %v921_v7 = vsel %vm214_vm0, %v919_v10, %v920_v26  ;;  %v2425_v37 = vmul.f32 %v2345_v50, %v985_v31 }
  0xcf   : > { %v2428_v24 = vmul.f32 %v1867_v32, %v1000_v56  ;;  %v2431_v48 = vmul.f32 %v1867_v32, %v996_v42  ;;  %v1004_v39 = vstv %s2389_s20  ;;  %v1055_v45 = vstv %s2391_s21 }
  0xd0   : > { %v832_v60 = vpop.permute.xlu1 %831  ;;  %v910_v52 = vsel %vm214_vm0, %v908_v18, %v909_v29  ;;  %v2439_v11 = vmul.f32 %v1867_v32, %v1008_v14  ;;  %v1044_v50 = vstv %s2399_s22  ;;  %v1077_v8 = vstv %s2401_s23 }
  0xd1   : > { %v819_v61 = vpop.permute.xlu0 %818  ;;  %v834_v27 = vadd.f32 %v832_v60, %v786_v34  ;;  %v808_v12 = vadd.f32 %v2350_v46, %v764_v43  ;;  %v797_v1 = vadd.f32 %v2366_v33, %v756_v30  ;;  %v2454_v22 = vmul.f32 %v1867_v32, %v1004_v39  ;;  %v1498_v39 = vld [vmem:[%s1623_s25 + $0x78] sm:$0x1] }
  0xd2   : > { %v821_v17 = vadd.f32 %v819_v61, %v775_v38  ;;  %v1056_v16 = vmul.f32 %v1867_v32, %v1055_v45  ;;  %v1057_v25 = vmul.f32 %v1889_v49, %v1055_v45  ;;  %v1147_v35 = vstv %s2411_s24 }
  0xd3   : > { %v871_v57 = vadd.f32 %v2288_v51, %v834_v27  ;;  %v1045_v9 = vmul.f32 %v1867_v32, %v1044_v50  ;;  %v1046_v28 = vmul.f32 %v1889_v49, %v1044_v50  ;;  %v1078_v20 = vmul.f32 %v1867_v32, %v1077_v8  ;;  %v1548_v50 = vld [vmem:[%s1623_s25 + $0x30] sm:$0xff] }
  0xd4   : > { %v867_v59 = vadd.f32 %v2291_v47, %v821_v17  ;;  %v858_v23 = vpop.permute.xlu1 %857  ;;  %v1079_v13 = vmul.f32 %v1889_v49, %v1077_v8  ;;  %v1060_v26 = vrot.slane %v1056_v16, 1  ;;  %v1061_v31 = vrot.slane %v1057_v25, 1 }
  0xd5   : > { %v845_v0 = vpop.permute.xlu0 %844  ;;  %v860_v51 = vadd.f32 %v858_v23, %v808_v12  ;;  %v901_v46 = vadd.f32 %v2369_v3, %v871_v57  ;;  %v2478_v32 = vmul.f32 %v2465_v44, %v1147_v35  ;;  %v1143_v49 = vstv %s2433_s26  ;;  %v1549_v57 = vld [vmem:[%s1623_s25 + $0x38] sm:$0x1] }
  0xd6   : > { %v847_v47 = vadd.f32 %v845_v0, %v797_v1  ;;  %v890_v33 = vadd.f32 %v888_v5, %v867_v59  ;;  %v1050_v56 = vrot.slane %v1046_v28, 1  ;;  %v1066_v42 = vstv %s2445_s28 }
  0xd7   : > { %v879_v58 = vadd.f32 %v2299_v15, %v860_v51  ;;  %v933_v36 = vadd.f32 %v2353_v54, %v901_v46  ;;  %v1049_v54 = vrot.slane %v1045_v9, 1  ;;  %v1082_v14 = vrot.slane %v1078_v20, 1 }
  0xd8   : > { %v875_v10 = vadd.f32 %v2329_v19, %v847_v47  ;;  %v929_v3 = vadd.f32 %v2380_v6, %v890_v33  ;;  %v955_v5 = vpop.permute.xlu1 %954  ;;  %v1155_v6 = vstv %s2443_s27  ;;  %v1083_v43 = vrot.slane %v1079_v13, 1 }
  0xd9   : > { %v947_v63 = vpop.permute.xlu0 %946  ;;  %v957_v62 = vadd.f32 %v955_v5, %v933_v36  ;;  %v923_v53 = vadd.f32 %v921_v7, %v879_v58  ;;  %v2492_v38 = vmul.f32 %v2465_v44, %v1143_v49  ;;  %v1151_v60 = vstv %s2459_s3 }
  0xda   : > { %v949_v15 = vadd.f32 %v947_v63, %v929_v3  ;;  %v912_v19 = vadd.f32 %v910_v52, %v875_v10  ;;  %v1170_v61 = vstv %s2451_s30  ;;  %v1159_v7 = vstv %s2461_s4 }
  0xdb   : > { %v941_v18 = vadd.f32 %v2405_v40, %v923_v53  ;;  %v983_v40 = vadd.f32 %v2372_v55, %v957_v62  ;;  %v1062_v45 = vsel %vm214_vm0, %v1060_v26, %v1061_v31  ;;  %v2504_v52 = vmul.f32 %v2465_v44, %v1155_v6 }
  0xdc   : > { %v937_v29 = vadd.f32 %v2418_v2, %v912_v19  ;;  %v971_v30 = vpop.permute.xlu1 %970  ;;  %v979_v2 = vadd.f32 %v2394_v4, %v949_v15  ;;  %v1067_v8 = vmul.f32 %v1548_v50, %v1066_v42  ;;  %v1068_v59 = vmul.f32 %v1549_v57, %v1066_v42 }
  0xdd   : > { %v963_v34 = vpop.permute.xlu0 %962  ;;  %v973_v27 = vadd.f32 %v971_v30, %v941_v18  ;;  %v1051_v12 = vsel %vm214_vm0, %v1049_v54, %v1050_v56  ;;  %v1084_v55 = vsel %vm214_vm0, %v1082_v14, %v1083_v43  ;;  %v2511_v4 = vmul.f32 %v2465_v44, %v1151_v60  ;;  %v1550_v43 = vld [vmem:[%s1623_s25 + $0xb0] sm:$0xff] }
  0xde   : > { %v965_v17 = vadd.f32 %v963_v34, %v937_v29  ;;  %v1209_v1 = vstv %s2475_s5  ;;  %v1171_v16 = vmul.f32 %v2465_v44, %v1170_v61  ;;  %v1172_v25 = vmul.f32 %v1498_v39, %v1170_v61  ;;  %v1516_v61 = vld [vmem:[%s1623_s25 + $0xf0] sm:$0xff]  ;;  %s1527_s25 = sshll.u32 %s2574_s10, 5 }
  0xdf   : > { %v1160_v35 = vmul.f32 %v2465_v44, %v1159_v7  ;;  %v1161_v51 = vmul.f32 %v1498_v39, %v1159_v7  ;;  %v991_v47 = vadd.f32 %v2408_v21, %v973_v27  ;;  %v1002_v33 = vadd.f32 %v2428_v24, %v983_v40  ;;  %s157_s18 = scalar_lea.vmem %s2571_s2, %s1527_s25 }
  0xe0   : > { %v1024_v23 = vpop.permute.xlu1 %1023  ;;  %v987_v46 = vadd.f32 %v2425_v37, %v965_v17  ;;  %v998_v9 = vadd.f32 %v2431_v48, %v979_v2  ;;  %v1071_v28 = vrot.slane %v1067_v8, 1  ;;  %v1072_v20 = vrot.slane %v1068_v59, 1 }
  0xe1   : > { %v1016_v0 = vpop.permute.xlu0 %1015  ;;  %v2525_v13 = vmul.f32 %v1937_v41, %v1209_v1  ;;  %v1192_v58 = vstv %s2483_s6  ;;  %v1026_v10 = vadd.f32 %v1024_v23, %v1002_v33  ;;  %v1259_v21 = vstv %s2487_s7 }
  0xe2   : > { %v1018_v36 = vadd.f32 %v1016_v0, %v998_v9  ;;  %v1181_v3 = vstv %s2489_s8  ;;  %v1175_v24 = vrot.slane %v1171_v16, 1  ;;  %v1176_v63 = vrot.slane %v1172_v25, 1 }
  0xe3   : > { %v1164_v48 = vrot.slane %v1160_v35, 1  ;;  %v1165_v26 = vrot.slane %v1161_v51, 1  ;;  %v1010_v31 = vadd.f32 %v2439_v11, %v991_v47  ;;  %v1006_v41 = vadd.f32 %v2454_v22, %v987_v46 }
  0xe4   : > { %v1040_v37 = vpop.permute.xlu1 %1039  ;;  %v1205_v49 = vstv %s2500_s11  ;;  %v1193_v62 = vmul.f32 %v2465_v44, %v1192_v58  ;;  %v1073_v15 = vsel %vm214_vm0, %v1071_v28, %v1072_v20  ;;  %v1194_v53 = vmul.f32 %v1498_v39, %v1192_v58 }
  0xe5   : > { %v1032_v5 = vpop.permute.xlu0 %1031  ;;  %v1182_v19 = vmul.f32 %v2465_v44, %v1181_v3  ;;  %v1183_v54 = vmul.f32 %v1498_v39, %v1181_v3  ;;  %v1042_v56 = vadd.f32 %v1040_v37, %v1010_v31  ;;  %v1064_v11 = vadd.f32 %v1062_v45, %v1026_v10 }
  0xe6   : > { %v1034_v6 = vadd.f32 %v1032_v5, %v1006_v41  ;;  %v1053_v42 = vadd.f32 %v1051_v12, %v1018_v36  ;;  %v1177_v29 = vsel %vm214_vm0, %v1175_v24, %v1176_v63  ;;  %v1166_v14 = vsel %vm214_vm0, %v1164_v48, %v1165_v26 }
  0xe7   : > { %v1206_v30 = vmul.f32 %v1550_v43, %v1205_v49  ;;  %v1255_v34 = vstv %s2516_s12  ;;  %v1197_v7 = vrot.slane %v1193_v62, 1  ;;  %v1217_v40 = vstv %s2522_s13 }
  0xe8   : > { %v1110_v22 = vpop.permute.xlu1 %1109  ;;  %v1198_v2 = vrot.slane %v1194_v53, 1  ;;  %v1186_v27 = vrot.slane %v1182_v19, 1  ;;  %v1187_v17 = vrot.slane %v1183_v54, 1  ;;  %v1213_v39 = vstv %s2528_s29 }
  0xe9   : > { %v1097_v18 = vpop.permute.xlu0 %1096  ;;  %v1112_v44 = vadd.f32 %v1110_v22, %v1064_v11  ;;  %v1086_v8 = vadd.f32 %v1084_v55, %v1042_v56  ;;  %v1075_v57 = vadd.f32 %v1073_v15, %v1034_v6  ;;  %v1260_v1 = vmul.f32 %v1516_v61, %v1259_v21 }
  0xea   : > { %v1099_v60 = vadd.f32 %v1097_v18, %v1053_v42  ;;  %v1256_v23 = vmul.f32 %v1516_v61, %v1255_v34  ;;  %v1218_v0 = vmul.f32 %v1550_v43, %v1217_v40  ;;  %v1267_v16 = vstv %s2532_s14 }
  0xeb   : > { %v1149_v45 = vadd.f32 %v2478_v32, %v1112_v44  ;;  %v1199_v46 = vsel %vm214_vm0, %v1197_v7, %v1198_v2  ;;  %v1188_v32 = vsel %vm214_vm0, %v1186_v27, %v1187_v17  ;;  %v1214_v33 = vmul.f32 %v1550_v43, %v1213_v39 }
  0xec   : > { %v1145_v50 = vadd.f32 %v2492_v38, %v1099_v60  ;;  %v1136_v59 = vpop.permute.xlu1 %1135  ;;  %v1263_v38 = vstv %s2540_s15  ;;  %v1268_v5 = vmul.f32 %v1516_v61, %v1267_v16 }
  0xed   : > { %v1123_v12 = vpop.permute.xlu0 %1122  ;;  %v1138_v25 = vadd.f32 %v1136_v59, %v1086_v8  ;;  %v1179_v51 = vadd.f32 %v1177_v29, %v1149_v45  ;;  %v1264_v24 = vmul.f32 %v1516_v61, %v1263_v38 }
  0xee   : > { %v1125_v35 = vadd.f32 %v1123_v12, %v1075_v57  ;;  %v1168_v47 = vadd.f32 %v1166_v14, %v1145_v50 }
  0xef   : > { %v1157_v55 = vadd.f32 %v2504_v52, %v1138_v25  ;;  %v1211_v28 = vadd.f32 %v2525_v13, %v1179_v51 }
  0xf0   : > { %v1153_v9 = vadd.f32 %v2511_v4, %v1125_v35  ;;  %v1207_v20 = vadd.f32 %v1206_v30, %v1168_v47  ;;  %v1233_v58 = vpop.permute.xlu1 %1232 }
  0xf1   : > { %v1225_v10 = vpop.permute.xlu0 %1224  ;;  %v1235_v36 = vadd.f32 %v1233_v58, %v1211_v28  ;;  %v1201_v3 = vadd.f32 %v1199_v46, %v1157_v55 }
  0xf2   : > { %v1227_v21 = vadd.f32 %v1225_v10, %v1207_v20  ;;  %v1190_v37 = vadd.f32 %v1188_v32, %v1153_v9 }
  0xf3   : > { %v1261_v52 = vadd.f32 %v1260_v1, %v1235_v36  ;;  %v1219_v4 = vadd.f32 %v1218_v0, %v1201_v3 }
  0xf4   : > { %v1257_v63 = vadd.f32 %v1256_v23, %v1227_v21  ;;  %v1215_v48 = vadd.f32 %v1214_v33, %v1190_v37  ;;  %v1249_v26 = vpop.permute.xlu1 %1248 }
  0xf5   : > { %v1241_v13 = vpop.permute.xlu0 %1240  ;;  %1521 = vst.msk [vmem:[%s157_s18 + $0x8] sm:$0xff] %vm1270_vm1, %v1261_v52  ;;  %v1251_v31 = vadd.f32 %v1249_v26, %v1219_v4 }
  0xf6   : > { %1271 = vst.msk [vmem:[%s157_s18] sm:$0xff] %vm1270_vm1, %v1257_v63  ;;  %v1243_v41 = vadd.f32 %v1241_v13, %v1215_v48 }
  0xf7   : > { %v1269_v49 = vadd.f32 %v1268_v5, %v1251_v31 }
  0xf8   : > { %v1265_v62 = vadd.f32 %v1264_v24, %v1243_v41 }
  0xf9   : > { %1523 = vst.msk [vmem:[%s157_s18 + $0x18] sm:$0xff] %vm1270_vm1, %v1269_v49 }
  0xfa   : > { %1522 = vst.msk [vmem:[%s157_s18 + $0x10] sm:$0xff] %vm1270_vm1, %v1265_v62 }
  0xfb PF: > { %s13_s9 = sadd.s32 1, %s1576_s9  }
  0xfc   : > { %p10_p1 = scmp.ge.s32.totalorder %s13_s9, 4  }
  0xfe   :  { %12 = sbr.rel (!%p10_p1) target bundleno = 1 (0x1), region = 81 }
 0x105   :  { %1299 = vsyncpa [#allocation3], 1 }
 0x106   :  { %1301 = vsyncpa [#allocation3 + $0x1], 1 }

// kernel: gaussian_pyramid.5
= control target key start
LH: loop header
LB: loop body
LE: loop exit
PB: predicated region body
PF: predicated region fallthrough
CT: control target
= control target key end

     0   :  { %7 = vsyncpa [#allocation3], 0  ;;  %s1384_s9 = smov 0   ;;  %s1895_s0 = inlined_call_operand.vmem [shape: f32[144], index: 0, kind: input, shape index: {}]   ;;  %s1896_s1 = inlined_call_operand.vmem [shape: f32[2,16,5,5], index: 1, kind: input, shape index: {}]   ;;  %s1897_s2 = inlined_call_operand.vmem [shape: f32[2,4,4,4], index: 2, kind: output, shape index: {}]  }
   0x1 LB: > { %s1144_s10 = sadd.s32 4294967295, %s1365_s9   ;;  %p1146_p0 = scmp.ge.s32.totalorder %s1365_s9, 1  ;;  %s1365_s9 = sphi %s1384_s9, %s13_s9  }
   0x2   : > { %p91_p1 = scmp.lt.s32.totalorder %s1365_s9, 3  ;;  %s104_s13 = sshll.u32 %s1895_s0, 4  ;;  %s105_s13 = int_to_ptr.vmem [resolvable:$true] %s104_s13 }
   0x3   : > { %p1328_p3 = scmp.eq.s32.totalorder %s1144_s10, 0  ;;  %s1340_s15 = scalar_lea.vmem %s105_s13, 32 }
   0x4   : > { %p1395_p2 = pnand %p1146_p0, %p91_p1  ;;  %p1341_p6 = scmp.ne.s32.totalorder %s105_s13, %s1340_s15 }
   0x5   : > { %p1348_p10 = scmp.lt.s32.totalorder %s105_s13, %s105_s13  ;;  %p1349_p11 = scmp.lt.s32.totalorder %s1340_s15, %s1340_s15 }
   0x6   : > { %p1324_p4 = pneg %p1395_p2 }
   0x7   : > { %p1350_p12 = por %p1349_p11, %p1348_p10 }
   0x8   : > { %p1325_p5 = pnand %p1328_p3, %p1324_p4 }
   0xa   : > { %p1342_p7 = pneg %p1325_p5 }
   0xc   : > { %p1343_p8 = pnand %p1342_p7, %p1341_p6 }
   0xe   : > { %p1344_p9 = pneg %p1343_p8 }
  0x10   : > { %p1351_p13 = pnand %p1350_p12, %p1344_p9 }
  0x12   : > { %1354 = shalt.err (!%p1351_p13)
}
  0x13   : > { %s1367_s16 = smov [#allocation2]   ;;  %125 = sbr.rel (%p1395_p2) target bundleno = 251 (0xfb), region = 28 }
  0x14   : > { %1327 = dma.vmem_to_smem (!%p1325_p5), %s105_s13, 32, %s1367_s16, [#allocation3]  }
  0x1a   : > { %1360 = dma.done.wait (%p1328_p3), [#allocation3], 32  }
  0x1b   : > { %1362 = vsyncadd (%p1328_p3), [#allocation3], 4294967264 }
  0x1c   : > { %131 = sfence }
  0x1d   : > { %p148_p0 = scmp.lt.s32.totalorder %s1144_s10, 1  ;;  %s1160_s17 = sld [smem:[#allocation2 + $0x4a]]  ;;  %vm1069_vm0 = vcmask 27648  }
  0x1e   : > { %s1158_s18 = sld [smem:[#allocation2 + $0x2]]  ;;  %s1161_s19 = sld [smem:[#allocation2 + $0x6e]] }
  0x1f   : > { %s1900_s10 = smov (!%p148_p0, %s1144_s10), 1  ;;  %s1159_s20 = sld [smem:[#allocation2 + $0x26]] }
  0x20   : > { %s1318_s21 = sshll.u32 %s1900_s10, 7  ;;  %s1167_s22 = sld [smem:[#allocation2 + $0x2c]] }
  0x21   : > { %s1412_s25 = scalar_lea.vmem %s1896_s1, %s1318_s21  ;;  %s1166_s26 = sld [smem:[#allocation2 + $0x8]] }
  0x22   : > { %v1415_v0 = vld [vmem:[%s1412_s25] sm:$0x1f]  ;;  %s1169_s27 = sld [smem:[#allocation2 + $0x74]]  ;;  %s1168_s28 = sld [smem:[#allocation2 + $0x50]]  ;;  %v1443_v30 = vld [vmem:[%s1412_s25 + $0x8] sm:$0x1f] }
  0x23   : > { %v192_v1 = vstv %s1160_s17  ;;  %s1368_s29 = smov 127   ;;  %s1185_s30 = sld [smem:[#allocation2 + $0x29]]  ;;  %v1432_v21 = vld [vmem:[%s1412_s25 + $0x40] sm:$0x1f]  ;;  %v1462_v51 = vld [vmem:[%s1412_s25 + $0x48] sm:$0x1f] }
  0x24   : > { %v176_v2 = vstv %s1158_s18  ;;  %v193_v3 = vmul.f32 %v192_v1, %v1415_v0  ;;  %v200_v5 = vstv %s1161_s19  ;;  %s1184_s3 = sld [smem:[#allocation2 + $0x5]]  ;;  %s1187_s4 = sld [smem:[#allocation2 + $0x71]]  ;;  %v1473_v60 = vld [vmem:[%s1412_s25 + $0x10] sm:$0x1f] }
  0x25   : > { %v177_v4 = vmul.f32 %v176_v2, %v1415_v0  ;;  %v184_v6 = vstv %s1159_s20  ;;  %v201_v7 = vmul.f32 %v200_v5, %v1415_v0  ;;  %s1186_s5 = sld [smem:[#allocation2 + $0x4d]]  ;;  %s1199_s6 = sld [smem:[#allocation2 + $0x2f]] }
  0x26   : > { %195 = vrot.lane.b32.xlu1 %v193_v3, %s1368_s29  ;;  %v185_v8 = vmul.f32 %v184_v6, %v1415_v0  ;;  %v245_v9 = vstv %s1167_s22  ;;  %s1198_s7 = sld [smem:[#allocation2 + $0xb]]  ;;  %s1201_s8 = sld [smem:[#allocation2 + $0x77]] }
  0x27   : > { %179 = vrot.lane.b32.xlu0 %v177_v4, %s1368_s29  ;;  %v246_v10 = vmul.f32 %v245_v9, %v1415_v0  ;;  %v236_v11 = vstv %s1166_s26  ;;  %s1200_s11 = sld [smem:[#allocation2 + $0x53]]  ;;  %s1207_s12 = sld [smem:[#allocation2 + $0x35]] }
  0x28   : > { %v237_v12 = vmul.f32 %v236_v11, %v1415_v0  ;;  %v263_v13 = vstv %s1169_s27  ;;  %v254_v14 = vstv %s1168_s28  ;;  %s1206_s13 = sld [smem:[#allocation2 + $0x11]]  ;;  %s1209_s14 = sld [smem:[#allocation2 + $0x7d]] }
  0x29   : > { %v248_v15 = vrot.slane %v246_v10, 1  ;;  %v264_v17 = vmul.f32 %v263_v13, %v1415_v0  ;;  %v255_v18 = vmul.f32 %v254_v14, %v1415_v0  ;;  %v344_v22 = vstv %s1185_s30  ;;  %s1208_s15 = sld [smem:[#allocation2 + $0x59]]  ;;  %s1225_s16 = sld [smem:[#allocation2 + $0x32]] }
  0x2a   : > { %203 = vrot.lane.b32.xlu1 %v201_v7, %s1368_s29  ;;  %v239_v16 = vrot.slane %v237_v12, 1  ;;  %v336_v23 = vstv %s1184_s3  ;;  %v345_v24 = vmul.f32 %v1432_v21, %v344_v22  ;;  %v360_v26 = vstv %s1187_s4  ;;  %s1224_s17 = sld [smem:[#allocation2 + $0xe]]  ;;  %s1227_s18 = sld [smem:[#allocation2 + $0x7a]] }
  0x2b   : > { %187 = vrot.lane.b32.xlu0 %v185_v8, %s1368_s29  ;;  %v266_v19 = vrot.slane %v264_v17, 1  ;;  %v257_v20 = vrot.slane %v255_v18, 1  ;;  %v337_v25 = vmul.f32 %v1432_v21, %v336_v23  ;;  %v352_v27 = vstv %s1186_s5  ;;  %s1226_s19 = sld [smem:[#allocation2 + $0x56]]  ;;  %s1239_s20 = sld [smem:[#allocation2 + $0x38]]  ;;  %v1492_v18 = vld [vmem:[%s1412_s25 + $0x50] sm:$0x1f] }
  0x2c   : > { %v361_v28 = vmul.f32 %v1432_v21, %v360_v26  ;;  %v353_v29 = vmul.f32 %v1432_v21, %v352_v27  ;;  %v412_v31 = vstv %s1199_s6  ;;  %v404_v32 = vstv %s1198_s7  ;;  %s1238_s21 = sld [smem:[#allocation2 + $0x14]]  ;;  %s1241_s22 = sld [smem:[#allocation2 + $0x80]] }
  0x2d   : > { %v413_v33 = vmul.f32 %v1443_v30, %v412_v31  ;;  %v405_v34 = vmul.f32 %v1443_v30, %v404_v32  ;;  %v428_v35 = vstv %s1201_s8  ;;  %v420_v36 = vstv %s1200_s11  ;;  %s1240_s23 = sld [smem:[#allocation2 + $0x5c]]  ;;  %s1247_s24 = sld [smem:[#allocation2 + $0x3e]] }
  0x2e   : > { %249 = vrot.lane.b32.xlu1 %v248_v15, %s1368_s29  ;;  %v473_v37 = vstv %s1207_s12  ;;  %v464_v38 = vstv %s1206_s13  ;;  %v429_v39 = vmul.f32 %v1443_v30, %v428_v35  ;;  %v421_v40 = vmul.f32 %v1443_v30, %v420_v36  ;;  %s1246_s26 = sld [smem:[#allocation2 + $0x1a]]  ;;  %s1249_s27 = sld [smem:[#allocation2 + $0x86]] }
  0x2f   : > { %240 = vrot.lane.b32.xlu0 %v239_v16, %s1368_s29  ;;  %v474_v41 = vmul.f32 %v1443_v30, %v473_v37  ;;  %v465_v42 = vmul.f32 %v1443_v30, %v464_v38  ;;  %v491_v43 = vstv %s1209_s14  ;;  %v482_v44 = vstv %s1208_s15  ;;  %s1248_s28 = sld [smem:[#allocation2 + $0x62]]  ;;  %s1265_s30 = sld [smem:[#allocation2 + $0x3b]] }
  0x30   : > { %v492_v47 = vmul.f32 %v1443_v30, %v491_v43  ;;  %v483_v48 = vmul.f32 %v1443_v30, %v482_v44  ;;  %v572_v52 = vstv %s1225_s16  ;;  %v564_v53 = vstv %s1224_s17  ;;  %s1264_s3 = sld [smem:[#allocation2 + $0x17]]  ;;  %s1267_s4 = sld [smem:[#allocation2 + $0x83]] }
  0x31   : > { %v476_v45 = vrot.slane %v474_v41, 1  ;;  %v467_v46 = vrot.slane %v465_v42, 1  ;;  %v573_v54 = vmul.f32 %v1462_v51, %v572_v52  ;;  %v565_v55 = vmul.f32 %v1462_v51, %v564_v53  ;;  %s1266_s5 = sld [smem:[#allocation2 + $0x5f]]  ;;  %s1279_s6 = sld [smem:[#allocation2 + $0x41]] }
  0x32   : > { %267 = vrot.lane.b32.xlu1 %v266_v19, %s1368_s29  ;;  %v494_v49 = vrot.slane %v492_v47, 1  ;;  %v485_v50 = vrot.slane %v483_v48, 1  ;;  %v588_v56 = vstv %s1227_s18  ;;  %v580_v57 = vstv %s1226_s19  ;;  %s1278_s7 = sld [smem:[#allocation2 + $0x1d]]  ;;  %s1281_s8 = sld [smem:[#allocation2 + $0x89]] }
  0x33   : > { %258 = vrot.lane.b32.xlu0 %v257_v20, %s1368_s29  ;;  %v589_v58 = vmul.f32 %v1462_v51, %v588_v56  ;;  %v581_v59 = vmul.f32 %v1462_v51, %v580_v57  ;;  %v640_v61 = vstv %s1239_s20  ;;  %v632_v62 = vstv %s1238_s21  ;;  %s1280_s11 = sld [smem:[#allocation2 + $0x65]]  ;;  %s1287_s12 = sld [smem:[#allocation2 + $0x47]] }
  0x34   : > { %v641_v63 = vmul.f32 %v1473_v60, %v640_v61  ;;  %v633_v1 = vmul.f32 %v1473_v60, %v632_v62  ;;  %v656_v2 = vstv %s1241_s22  ;;  %v648_v3 = vstv %s1240_s23  ;;  %s1286_s13 = sld [smem:[#allocation2 + $0x23]]  ;;  %s1289_s14 = sld [smem:[#allocation2 + $0x8f]] }
  0x35   : > { %v701_v4 = vstv %s1247_s24  ;;  %v692_v5 = vstv %s1246_s26  ;;  %v657_v6 = vmul.f32 %v1473_v60, %v656_v2  ;;  %v649_v7 = vmul.f32 %v1473_v60, %v648_v3  ;;  %s1288_s15 = sld [smem:[#allocation2 + $0x6b]]  ;;  %s1305_s16 = sld [smem:[#allocation2 + $0x44]] }
  0x36   : > { %347 = vrot.lane.b32.xlu1 %v345_v24, %s1368_s29  ;;  %v702_v8 = vmul.f32 %v1473_v60, %v701_v4  ;;  %v693_v9 = vmul.f32 %v1473_v60, %v692_v5  ;;  %v719_v10 = vstv %s1249_s27  ;;  %v710_v11 = vstv %s1248_s28  ;;  %s1304_s17 = sld [smem:[#allocation2 + $0x20]]  ;;  %s1307_s18 = sld [smem:[#allocation2 + $0x8c]]  ;;  %v1170_v5 = vld [vmem:[%s1412_s25 + $0x20] sm:$0x1f] }
  0x37   : > { %339 = vrot.lane.b32.xlu0 %v337_v25, %s1368_s29  ;;  %v720_v14 = vmul.f32 %v1473_v60, %v719_v10  ;;  %v711_v15 = vmul.f32 %v1473_v60, %v710_v11  ;;  %v800_v19 = vstv %s1265_s30  ;;  %v792_v20 = vstv %s1264_s3  ;;  %s1306_s19 = sld [smem:[#allocation2 + $0x68]]  ;;  %s1163_s22 = sld [smem:[#allocation2 + $0x2a]] }
  0x38   : > { %v704_v12 = vrot.slane %v702_v8, 1  ;;  %v695_v13 = vrot.slane %v693_v9, 1  ;;  %v801_v22 = vmul.f32 %v1492_v18, %v800_v19  ;;  %v793_v23 = vmul.f32 %v1492_v18, %v792_v20  ;;  %s1534_s20 = sld [smem:[#allocation2 + $0x48]]  ;;  %s1162_s23 = sld [smem:[#allocation2 + $0x6]] }
  0x39   : > { %v722_v16 = vrot.slane %v720_v14, 1  ;;  %v713_v17 = vrot.slane %v711_v15, 1  ;;  %v816_v24 = vstv %s1267_s4  ;;  %v808_v25 = vstv %s1266_s5  ;;  %s1536_s21 = sld [smem:[#allocation2]]  ;;  %s1538_s24 = sld [smem:[#allocation2 + $0x6c]] }
  0x3a   : > { %363 = vrot.lane.b32.xlu1 %v361_v28, %s1368_s29  ;;  %v817_v26 = vmul.f32 %v1492_v18, %v816_v24  ;;  %v809_v27 = vmul.f32 %v1492_v18, %v808_v25  ;;  %v1503_v28 = vld [vmem:[%s1412_s25 + $0x18] sm:$0x1f]  ;;  %v860_v31 = vstv %s1278_s7  ;;  %v876_v35 = vstv %s1280_s11  ;;  %s1540_s26 = sld [smem:[#allocation2 + $0x72]]  ;;  %s1542_s27 = sld [smem:[#allocation2 + $0x24]] }
  0x3b   : > { %355 = vrot.lane.b32.xlu0 %v353_v29, %s1368_s29  ;;  %v868_v29 = vstv %s1279_s6  ;;  %v929_v36 = vstv %s1287_s12  ;;  %v920_v37 = vstv %s1286_s13  ;;  %s1544_s28 = sld [smem:[#allocation2 + $0x25]]  ;;  %s1548_s30 = sld [smem:[#allocation2 + $0x1]] }
  0x3c   : > { %v869_v32 = vmul.f32 %v1503_v28, %v868_v29  ;;  %v921_v41 = vmul.f32 %v1503_v28, %v920_v37  ;;  %v947_v42 = vstv %s1289_s14  ;;  %v938_v43 = vstv %s1288_s15  ;;  %s1550_s3 = sld [smem:[#allocation2 + $0x6d]]  ;;  %s1552_s4 = sld [smem:[#allocation2 + $0x49]] }
  0x3d   : > { %v939_v47 = vmul.f32 %v1503_v28, %v938_v43  ;;  %v1028_v52 = vstv %s1305_s16  ;;  %v1020_v53 = vstv %s1304_s17  ;;  %v1044_v56 = vstv %s1307_s18  ;;  %s1554_s5 = sld [smem:[#allocation2 + $0x2b]]  ;;  %s1556_s6 = sld [smem:[#allocation2 + $0x7]] }
  0x3e   : > { %415 = vrot.lane.b32.xlu1 %v413_v33, %s1368_s29  ;;  %v861_v33 = vmul.f32 %v1503_v28, %v860_v31  ;;  %v1036_v57 = vstv %s1306_s19  ;;  %s1558_s7 = sld [smem:[#allocation2 + $0x27]]  ;;  %v215_v61 = vstv %s1163_s22  ;;  %v208_v62 = vstv %s1162_s23  ;;  %s1565_s11 = sld [smem:[#allocation2 + $0x28]] }
  0x3f   : > { %407 = vrot.lane.b32.xlu0 %v405_v34, %s1368_s29  ;;  %v884_v34 = vstv %s1281_s8  ;;  %s1560_s8 = sld [smem:[#allocation2 + $0x73]]  ;;  %v172_v3 = vstv %s1538_s24  ;;  %s1573_s13 = sld [smem:[#allocation2 + $0x4f]]  ;;  %v209_v8 = vmul.f32 %v208_v62, %v1415_v0 }
  0x40   : > { %v885_v38 = vmul.f32 %v1503_v28, %v884_v34  ;;  %v229_v2 = vstv %s1540_s26  ;;  %v164_v4 = vstv %s1542_s27  ;;  %s1571_s12 = sld [smem:[#allocation2 + $0x3]]  ;;  %s1578_s14 = sld [smem:[#allocation2 + $0x4]] }
  0x41   : > { %s1580_s15 = sld [smem:[#allocation2 + $0x6f]]  ;;  %s1595_s16 = sld [smem:[#allocation2 + $0x70]] }
  0x42   : > { %431 = vrot.lane.b32.xlu1 %v429_v39, %s1368_s29  ;;  %v877_v39 = vmul.f32 %v1503_v28, %v876_v35  ;;  %v286_v20 = vstv %s1550_s3  ;;  %s1598_s17 = sld [smem:[#allocation2 + $0x4b]]  ;;  %s1605_s18 = sld [smem:[#allocation2 + $0x2d]] }
  0x43   : > { %423 = vrot.lane.b32.xlu0 %v421_v40, %s1368_s29  ;;  %v930_v40 = vmul.f32 %v1503_v28, %v929_v36  ;;  %v297_v24 = vstv %s1554_s5  ;;  %v290_v25 = vstv %s1556_s6  ;;  %v1601_v34 = vmul.f32 %v1170_v5, %v286_v20  ;;  %s1607_s19 = sld [smem:[#allocation2 + $0x9]]  ;;  %s1621_s22 = sld [smem:[#allocation2 + $0xf]] }
  0x44   : > { %v324_v31 = vstv %s1558_s7  ;;  %s1624_s23 = sld [smem:[#allocation2 + $0x75]]  ;;  %s1626_s24 = sld [smem:[#allocation2 + $0x51]] }
  0x45   : > { %v932_v44 = vrot.slane %v930_v40, 1  ;;  %v291_v40 = vmul.f32 %v1170_v5, %v290_v25  ;;  %v325_v43 = vmul.f32 %v1432_v21, %v324_v31  ;;  %s1633_s26 = sld [smem:[#allocation2 + $0x7b]]  ;;  %s1638_s27 = sld [smem:[#allocation2 + $0x57]] }
  0x46   : > { %477 = vrot.lane.b32.xlu1 %v476_v45, %s1368_s29  ;;  %v923_v45 = vrot.slane %v921_v41, 1  ;;  %s1655_s3 = sld [smem:[#allocation2 + $0x76]]  ;;  %s1663_s5 = sld [smem:[#allocation2 + $0x10]] }
  0x47   : > { %468 = vrot.lane.b32.xlu0 %v467_v46, %s1368_s29  ;;  %v948_v46 = vmul.f32 %v1503_v28, %v947_v42  ;;  %s1668_s6 = sld [smem:[#allocation2 + $0x30]]  ;;  %s1670_s7 = sld [smem:[#allocation2 + $0x7c]] }
  0x49   : > { %v950_v48 = vrot.slane %v948_v46, 1  ;;  %v320_v46 = vstv %s1571_s12  ;;  %s1678_s12 = sld [smem:[#allocation2 + $0xc]] }
  0x4a   : > { %495 = vrot.lane.b32.xlu1 %v494_v49, %s1368_s29  ;;  %v941_v49 = vrot.slane %v939_v47, 1  ;;  %v370_v47 = vstv %s1578_s14  ;;  %s1686_s14 = sld [smem:[#allocation2 + $0x78]] }
  0x4b   : > { %486 = vrot.lane.b32.xlu0 %v485_v50, %s1368_s29  ;;  %v1522_v50 = vld [vmem:[%s1412_s25 + $0x58] sm:$0x1f] }
  0x4e   : > { %575 = vrot.lane.b32.xlu1 %v573_v54, %s1368_s29  ;;  %v1029_v54 = vmul.f32 %v1522_v50, %v1028_v52 }
  0x4f   : > { %567 = vrot.lane.b32.xlu0 %v565_v55, %s1368_s29  ;;  %v1021_v55 = vmul.f32 %v1522_v50, %v1020_v53 }
  0x52   : > { %591 = vrot.lane.b32.xlu1 %v589_v58, %s1368_s29  ;;  %v1045_v58 = vmul.f32 %v1522_v50, %v1044_v56 }
  0x53   : > { %583 = vrot.lane.b32.xlu0 %v581_v59, %s1368_s29  ;;  %v1037_v59 = vmul.f32 %v1522_v50, %v1036_v57 }
  0x56   : > { %643 = vrot.lane.b32.xlu1 %v641_v63, %s1368_s29  ;;  %v168_v63 = vstv %s1534_s20  ;;  %s1614_s20 = sld [smem:[#allocation2 + $0x4c]] }
  0x57   : > { %635 = vrot.lane.b32.xlu0 %v633_v1, %s1368_s29  ;;  %v160_v1 = vstv %s1536_s21  ;;  %v169_v10 = vmul.f32 %v168_v63, %v1415_v0  ;;  %s1619_s21 = sld [smem:[#allocation2 + $0x33]] }
  0x58   : > { %v161_v11 = vmul.f32 %v160_v1, %v1415_v0 }
  0x5a   : > { %659 = vrot.lane.b32.xlu1 %v657_v6, %s1368_s29  ;;  %v278_v6 = vstv %s1544_s28  ;;  %s1643_s28 = sld [smem:[#allocation2 + $0x2e]] }
  0x5b   : > { %651 = vrot.lane.b32.xlu0 %v649_v7, %s1368_s29  ;;  %v216_v7 = vmul.f32 %v215_v61, %v1415_v0  ;;  %v279_v19 = vmul.f32 %v1170_v5, %v278_v6  ;;  %v293_v61 = vrot.slane %v291_v40, 1  ;;  %v396_v40 = vstv %s1626_s24  ;;  %s1721_s24 = sld [smem:[#allocation2 + $0x84]] }
  0x5c   : > { %v378_v25 = vstv %s1614_s20  ;;  %s1706_s20 = sld [smem:[#allocation2 + $0x3c]] }
  0x5e   : > { %705 = vrot.lane.b32.xlu1 %v704_v12, %s1368_s29  ;;  %v274_v12 = vstv %s1548_s30  ;;  %s1653_s30 = sld [smem:[#allocation2 + $0x34]] }
  0x5f   : > { %696 = vrot.lane.b32.xlu0 %v695_v13, %s1368_s29  ;;  %v1586_v13 = vmul.f32 %v229_v2, %v1415_v0  ;;  %v275_v29 = vmul.f32 %v1170_v5, %v274_v12  ;;  %v321_v2 = vmul.f32 %v1432_v21, %v320_v46  ;;  %v457_v46 = vstv %s1633_s26  ;;  %s1726_s26 = sld [smem:[#allocation2 + $0x60]] }
  0x62   : > { %723 = vrot.lane.b32.xlu1 %v722_v16, %s1368_s29  ;;  %v173_v16 = vmul.f32 %v172_v3, %v1415_v0  ;;  %v382_v3 = vstv %s1595_s16  ;;  %s1693_s16 = sld [smem:[#allocation2 + $0x54]] }
  0x63   : > { %714 = vrot.lane.b32.xlu0 %v713_v17, %s1368_s29  ;;  %v165_v17 = vmul.f32 %v164_v4, %v1415_v0 }
  0x66   : > { %803 = vrot.lane.b32.xlu1 %v801_v22, %s1368_s29 }
  0x67   : > { %795 = vrot.lane.b32.xlu0 %v793_v23, %s1368_s29  ;;  %v282_v23 = vstv %s1552_s4  ;;  %s1661_s4 = sld [smem:[#allocation2 + $0x52]] }
  0x68   : > { %v283_v37 = vmul.f32 %v1170_v5, %v282_v23 }
  0x6a   : > { %819 = vrot.lane.b32.xlu1 %v817_v26, %s1368_s29  ;;  %v218_v26 = vrot.slane %v216_v7, 1 }
  0x6b   : > { %811 = vrot.lane.b32.xlu0 %v809_v27, %s1368_s29  ;;  %v211_v27 = vrot.slane %v209_v8, 1  ;;  %v328_v8 = vstv %s1598_s17  ;;  %s1697_s17 = sld [smem:[#allocation2 + $0x36]] }
  0x6e   : > { %871 = vrot.lane.b32.xlu1 %v869_v32, %s1368_s29 }
  0x6f   : > { %863 = vrot.lane.b32.xlu0 %v861_v33, %s1368_s29  ;;  %v232_v33 = vrot.slane %v1586_v13, 1 }
  0x72   : > { %887 = vrot.lane.b32.xlu1 %v885_v38, %s1368_s29  ;;  %v298_v38 = vmul.f32 %v1170_v5, %v297_v24  ;;  %v329_v24 = vmul.f32 %v1432_v21, %v328_v8 }
  0x73   : > { %879 = vrot.lane.b32.xlu0 %v877_v39, %s1368_s29  ;;  %v374_v39 = vstv %s1565_s11  ;;  %s1676_s11 = sld [smem:[#allocation2 + $0x31]] }
  0x76   : > { %933 = vrot.lane.b32.xlu1 %v932_v44, %s1368_s29  ;;  %v1611_v44 = vld [vmem:[%s1412_s25 + $0x60] sm:$0x1f] }
  0x77   : > { %924 = vrot.lane.b32.xlu0 %v923_v45, %s1368_s29  ;;  %v304_v45 = vstv %s1573_s13  ;;  %v371_v4 = vmul.f32 %v1611_v44, %v370_v47  ;;  %s1682_s13 = sld [smem:[#allocation2 + $0xd]] }
  0x78   : > { %v305_v62 = vmul.f32 %v1170_v5, %v304_v45 }
  0x7a   : > { %951 = vrot.lane.b32.xlu1 %v950_v48, %s1368_s29 }
  0x7b   : > { %942 = vrot.lane.b32.xlu0 %v941_v49, %s1368_s29  ;;  %v332_v49 = vstv %s1580_s15  ;;  %s1688_s15 = sld [smem:[#allocation2 + $0x79]] }
  0x7c   : > { %v333_v7 = vmul.f32 %v1432_v21, %v332_v49 }
  0x7e   : > { %1031 = vrot.lane.b32.xlu1 %v1029_v54, %s1368_s29 }
  0x7f   : > { %1023 = vrot.lane.b32.xlu0 %v1021_v55, %s1368_s29 }
  0x82   : > { %1047 = vrot.lane.b32.xlu1 %v1045_v58, %s1368_s29  ;;  %v300_v58 = vrot.slane %v298_v38, 1 }
  0x83   : > { %1039 = vrot.lane.b32.xlu0 %v1037_v59, %s1368_s29  ;;  %s1546_s29 = sld [smem:[#allocation2 + $0x4e]]  ;;  %v375_v59 = vmul.f32 %v1611_v44, %v374_v39  ;;  %v400_v39 = vstv %s1624_s23  ;;  %s1716_s23 = sld [smem:[#allocation2 + $0x5a]] }
  0x89   : > { %v222_v9 = vstv %s1546_s29  ;;  %s1651_s29 = sld [smem:[#allocation2 + $0xa]] }
  0x8a   : > { %v223_v22 = vmul.f32 %v222_v9, %v1415_v0  ;;  %v311_v0 = vstv %s1560_s8  ;;  %s1672_s8 = sld [smem:[#allocation2 + $0x58]] }
  0x8b   : > { %v312_v48 = vmul.f32 %v1170_v5, %v311_v0 }
  0x8c   : > { %v225_v42 = vrot.slane %v223_v22, 1 }
  0x8d   : > { %v314_v6 = vrot.slane %v312_v48, 1 }
  0x98   : > { %v196_v14 = vpop.permute.xlu1 %195 }
  0x99   : > { %v180_v15 = vpop.permute.xlu0 %179  ;;  %v198_v52 = vadd.f32 %v196_v14, %v169_v10  ;;  %v383_v14 = vmul.f32 %v1611_v44, %v382_v3 }
  0x9a   : > { %v182_v32 = vadd.f32 %v180_v15, %v161_v11  ;;  %v307_v15 = vrot.slane %v305_v62, 1 }
  0x9b   : > { %v227_v11 = vadd.f32 %v225_v42, %v198_v52 }
  0x9c   : > { %v204_v35 = vpop.permute.xlu1 %203  ;;  %v213_v55 = vadd.f32 %v211_v27, %v182_v32  ;;  %v436_v27 = vstv %s1621_s22  ;;  %s1714_s22 = sld [smem:[#allocation2 + $0x7e]] }
  0x9d   : > { %v188_v36 = vpop.permute.xlu0 %187  ;;  %v206_v53 = vadd.f32 %v204_v35, %v173_v16  ;;  %v392_v16 = vstv %s1605_s18  ;;  %v437_v45 = vmul.f32 %v1443_v30, %v436_v27  ;;  %s1699_s18 = sld [smem:[#allocation2 + $0x12]] }
  0x9e   : > { %v190_v41 = vadd.f32 %v188_v36, %v165_v17  ;;  %v388_v17 = vstv %s1607_s19  ;;  %v393_v36 = vmul.f32 %v1443_v30, %v392_v16  ;;  %v514_v16 = vstv %s1655_s3  ;;  %s1702_s19 = sld [smem:[#allocation2 + $0x55]]  ;;  %s1747_s3 = sld [smem:[#allocation2 + $0x5b]] }
  0x9f   : > { %v234_v10 = vadd.f32 %v232_v33, %v206_v53  ;;  %v389_v38 = vmul.f32 %v1443_v30, %v388_v17  ;;  %v510_v17 = vstv %s1661_s4  ;;  %s1749_s4 = sld [smem:[#allocation2 + $0x19]] }
  0xa0   : > { %v220_v54 = vadd.f32 %v218_v26, %v190_v41  ;;  %v250_v56 = vpop.permute.xlu1 %249  ;;  %v443_v26 = vstv %s1619_s21  ;;  %s1708_s21 = sld [smem:[#allocation2 + $0x18]] }
  0xa1   : > { %v241_v57 = vpop.permute.xlu0 %240 }
  0xa2   : > { %v252_v63 = vadd.f32 %v250_v56, %v220_v54  ;;  %v243_v1 = vadd.f32 %v241_v57, %v213_v55  ;;  %v401_v55 = vmul.f32 %v1443_v30, %v400_v39  ;;  %v450_v56 = vstv %s1638_s27  ;;  %s1731_s27 = sld [smem:[#allocation2 + $0x37]] }
  0xa3   : > { %v602_v39 = vstv %s1676_s11  ;;  %s1764_s11 = sld [smem:[#allocation2 + $0x15]] }
  0xa4   : > { %v280_v5 = vadd.f32 %v279_v19, %v252_v63  ;;  %v276_v9 = vadd.f32 %v275_v29, %v243_v1  ;;  %v268_v12 = vpop.permute.xlu1 %267  ;;  %v506_v63 = vstv %s1643_s28  ;;  %v458_v1 = vmul.f32 %v1443_v30, %v457_v46  ;;  %s1738_s28 = sld [smem:[#allocation2 + $0x13]] }
  0xa5   : > { %v259_v13 = vpop.permute.xlu0 %258  ;;  %v270_v20 = vadd.f32 %v268_v12, %v234_v10  ;;  %v525_v10 = vstv %s1653_s30  ;;  %s1742_s30 = sld [smem:[#allocation2 + $0x7f]] }
  0xa6   : > { %v261_v22 = vadd.f32 %v259_v13, %v227_v11  ;;  %v302_v23 = vadd.f32 %v300_v58, %v280_v5  ;;  %v295_v19 = vadd.f32 %v293_v61, %v276_v9  ;;  %v502_v9 = vstv %s1651_s29  ;;  %s1740_s29 = sld [smem:[#allocation2 + $0x3d]] }
  0xa7   : > { %v288_v29 = vadd.f32 %v1601_v34, %v270_v20 }
  0xa8   : > { %v284_v31 = vadd.f32 %v283_v37, %v261_v22  ;;  %v326_v32 = vadd.f32 %v325_v43, %v302_v23  ;;  %v322_v33 = vadd.f32 %v321_v2, %v295_v19  ;;  %v348_v0 = vpop.permute.xlu1 %347  ;;  %v379_v37 = vmul.f32 %v1611_v44, %v378_v25 }
  0xa9   : > { %v340_v35 = vpop.permute.xlu0 %339  ;;  %v316_v42 = vadd.f32 %v314_v6, %v288_v29  ;;  %v444_v43 = vmul.f32 %v1443_v30, %v443_v26  ;;  %v397_v44 = vmul.f32 %v1443_v30, %v396_v40  ;;  %v439_v6 = vrot.slane %v437_v45, 1 }
  0xaa   : > { %v350_v21 = vadd.f32 %v348_v0, %v326_v32  ;;  %v342_v41 = vadd.f32 %v340_v35, %v322_v33  ;;  %v309_v34 = vadd.f32 %v307_v15, %v284_v31  ;;  %v460_v23 = vrot.slane %v458_v1, 1 }
  0xab   : > { %v334_v49 = vadd.f32 %v333_v7, %v316_v42  ;;  %v446_v62 = vrot.slane %v444_v43, 1  ;;  %v451_v7 = vmul.f32 %v1443_v30, %v450_v56  ;;  %v518_v30 = vstv %s1663_s5  ;;  %v1228_v42 = vld [vmem:[%s1412_s25 + $0x68] sm:$0x1f]  ;;  %s1754_s5 = sld [smem:[#allocation2 + $0x39]] }
  0xac   : > { %v376_v47 = vadd.f32 %v375_v59, %v350_v21  ;;  %v372_v48 = vadd.f32 %v371_v4, %v342_v41  ;;  %v330_v52 = vadd.f32 %v329_v24, %v309_v34  ;;  %v364_v53 = vpop.permute.xlu1 %363  ;;  %v1210_v4 = vld [vmem:[%s1412_s25 + $0x28] sm:$0x1f]  ;;  %v552_v29 = vstv %s1668_s6  ;;  %s1756_s6 = sld [smem:[#allocation2 + $0x85]] }
  0xad   : > { %v356_v54 = vpop.permute.xlu0 %355  ;;  %v366_v57 = vadd.f32 %v364_v53, %v334_v49  ;;  %v507_v15 = vmul.f32 %v1210_v4, %v506_v63  ;;  %v453_v19 = vrot.slane %v451_v7, 1  ;;  %v503_v26 = vmul.f32 %v1210_v4, %v502_v9 }
  0xae   : > { %v358_v58 = vadd.f32 %v356_v54, %v330_v52  ;;  %v394_v61 = vadd.f32 %v393_v36, %v376_v47  ;;  %v390_v59 = vadd.f32 %v389_v38, %v372_v48  ;;  %v526_v27 = vmul.f32 %v1210_v4, %v525_v10 }
  0xaf   : > { %v384_v2 = vadd.f32 %v383_v14, %v366_v57  ;;  %v539_v31 = vstv %s1670_s7  ;;  %v519_v0 = vmul.f32 %v1210_v4, %v518_v30  ;;  %v532_v35 = vstv %s1672_s8  ;;  %s1758_s7 = sld [smem:[#allocation2 + $0x61]]  ;;  %s1762_s8 = sld [smem:[#allocation2 + $0x3a]] }
  0xb0   : > { %v380_v3 = vadd.f32 %v379_v37, %v358_v58  ;;  %v416_v8 = vpop.permute.xlu1 %415  ;;  %v515_v36 = vmul.f32 %v1210_v4, %v514_v16  ;;  %v511_v38 = vmul.f32 %v1210_v4, %v510_v17  ;;  %v548_v40 = vstv %s1678_s12  ;;  %s1768_s12 = sld [smem:[#allocation2 + $0x16]] }
  0xb1   : > { %v408_v5 = vpop.permute.xlu0 %407  ;;  %v418_v11 = vadd.f32 %v416_v8, %v394_v61  ;;  %v402_v13 = vadd.f32 %v401_v55, %v384_v2  ;;  %v598_v34 = vstv %s1682_s13  ;;  %v540_v37 = vmul.f32 %v1210_v4, %v539_v31  ;;  %s1772_s13 = sld [smem:[#allocation2 + $0x81]] }
  0xb2   : > { %v410_v12 = vadd.f32 %v408_v5, %v390_v59  ;;  %v398_v14 = vadd.f32 %v397_v44, %v380_v3  ;;  %v528_v46 = vrot.slane %v526_v27, 1  ;;  %v553_v47 = vmul.f32 %v1462_v51, %v552_v29 }
  0xb3   : > { %v448_v20 = vadd.f32 %v446_v62, %v418_v11  ;;  %v560_v48 = vstv %s1686_s14  ;;  %v533_v49 = vmul.f32 %v1210_v4, %v532_v35  ;;  %v521_v54 = vrot.slane %v519_v0, 1  ;;  %s1774_s14 = sld [smem:[#allocation2 + $0x82]] }
  0xb4   : > { %v441_v22 = vadd.f32 %v439_v6, %v410_v12  ;;  %v432_v24 = vpop.permute.xlu1 %431  ;;  %v610_v55 = vstv %s1688_s15  ;;  %v603_v44 = vmul.f32 %v1228_v42, %v602_v39  ;;  %v549_v56 = vmul.f32 %v1462_v51, %v548_v40  ;;  %s1779_s15 = sld [smem:[#allocation2 + $0x5d]] }
  0xb5   : > { %v424_v25 = vpop.permute.xlu0 %423  ;;  %v434_v32 = vadd.f32 %v432_v24, %v402_v13  ;;  %v599_v57 = vmul.f32 %v1228_v42, %v598_v34  ;;  %v556_v58 = vstv %s1693_s16  ;;  %v542_v62 = vrot.slane %v540_v37, 1  ;;  %s1783_s16 = sld [smem:[#allocation2 + $0x3f]] }
  0xb6   : > { %v426_v33 = vadd.f32 %v424_v25, %v398_v14  ;;  %v561_v63 = vmul.f32 %v1462_v51, %v560_v48  ;;  %v611_v3 = vmul.f32 %v1228_v42, %v610_v55  ;;  %v535_v4 = vrot.slane %v533_v49, 1 }
  0xb7   : > { %v462_v21 = vadd.f32 %v460_v23, %v434_v32  ;;  %v620_v6 = vstv %s1697_s17  ;;  %v616_v7 = vstv %s1699_s18  ;;  %v557_v11 = vmul.f32 %v1462_v51, %v556_v58  ;;  %s1785_s17 = sld [smem:[#allocation2 + $0x1b]]  ;;  %s1788_s18 = sld [smem:[#allocation2 + $0x5e]] }
  0xb8   : > { %v455_v41 = vadd.f32 %v453_v19, %v426_v33  ;;  %v478_v43 = vpop.permute.xlu1 %477  ;;  %v606_v12 = vstv %s1702_s19  ;;  %v671_v13 = vstv %s1706_s20  ;;  %v664_v14 = vstv %s1708_s21  ;;  %s1792_s19 = sld [smem:[#allocation2 + $0x45]]  ;;  %s1794_s20 = sld [smem:[#allocation2 + $0x21]] }
  0xb9   : > { %v469_v45 = vpop.permute.xlu0 %468  ;;  %v480_v52 = vadd.f32 %v478_v43, %v448_v20  ;;  %v621_v23 = vmul.f32 %v1473_v60, %v620_v6  ;;  %v617_v19 = vmul.f32 %v1473_v60, %v616_v7  ;;  %v628_v24 = vstv %s1714_s22  ;;  %s1800_s21 = sld [smem:[#allocation2 + $0x87]]  ;;  %s1802_s22 = sld [smem:[#allocation2 + $0x63]] }
  0xba   : > { %v471_v53 = vadd.f32 %v469_v45, %v441_v22  ;;  %v624_v25 = vstv %s1716_s23  ;;  %v607_v31 = vmul.f32 %v1228_v42, %v606_v12  ;;  %v672_v32 = vmul.f32 %v1473_v60, %v671_v13  ;;  %s1807_s23 = sld [smem:[#allocation2 + $0x8d]] }
  0xbb   : > { %v508_v61 = vadd.f32 %v507_v15, %v480_v52  ;;  %v665_v33 = vmul.f32 %v1473_v60, %v664_v14  ;;  %v685_v0 = vstv %s1721_s24  ;;  %v625_v42 = vmul.f32 %v1473_v60, %v624_v25  ;;  %s1812_s24 = sld [smem:[#allocation2 + $0x69]] }
  0xbc   : > { %v504_v59 = vadd.f32 %v503_v26, %v471_v53  ;;  %v496_v1 = vpop.permute.xlu1 %495  ;;  %v678_v34 = vstv %s1726_s26  ;;  %v734_v48 = vstv %s1731_s27  ;;  %v686_v49 = vmul.f32 %v1473_v60, %v685_v0  ;;  %s1822_s26 = sld [smem:[#allocation2 + $0x46]]  ;;  %s1824_s27 = sld [smem:[#allocation2 + $0x22]] }
  0xbd   : > { %v487_v2 = vpop.permute.xlu0 %486  ;;  %v498_v8 = vadd.f32 %v496_v1, %v462_v21  ;;  %v530_v9 = vadd.f32 %v528_v46, %v508_v61  ;;  %v667_v55 = vrot.slane %v665_v33, 1  ;;  %v730_v58 = vstv %s1738_s28  ;;  %s1827_s28 = sld [smem:[#allocation2 + $0x40]] }
  0xbe   : > { %v489_v5 = vadd.f32 %v487_v2, %v455_v41  ;;  %v523_v10 = vadd.f32 %v521_v54, %v504_v59  ;;  %v629_v41 = vmul.f32 %v1473_v60, %v628_v24  ;;  %v1250_v54 = vld [vmem:[%s1412_s25 + $0x30] sm:$0x1f]  ;;  %v753_v61 = vstv %s1740_s29  ;;  %s1830_s29 = sld [smem:[#allocation2 + $0x1c]] }
  0xbf   : > { %v516_v15 = vadd.f32 %v515_v36, %v498_v8  ;;  %v554_v17 = vadd.f32 %v553_v47, %v530_v9  ;;  %v674_v47 = vrot.slane %v672_v32, 1  ;;  %v735_v2 = vmul.f32 %v1250_v54, %v734_v48 }
  0xc0   : > { %v512_v16 = vadd.f32 %v511_v38, %v489_v5  ;;  %v550_v30 = vadd.f32 %v549_v56, %v523_v10  ;;  %v576_v20 = vpop.permute.xlu1 %575  ;;  %v688_v8 = vrot.slane %v686_v49, 1  ;;  %v754_v12 = vmul.f32 %v1250_v54, %v753_v61 }
  0xc1   : > { %v568_v22 = vpop.permute.xlu0 %567  ;;  %v578_v51 = vadd.f32 %v576_v20, %v554_v17  ;;  %v544_v27 = vadd.f32 %v542_v62, %v516_v15  ;;  %v780_v13 = vstv %s1754_s5  ;;  %v767_v14 = vstv %s1756_s6  ;;  %s1843_s5 = sld [smem:[#allocation2 + $0x64]]  ;;  %s1846_s6 = sld [smem:[#allocation2 + $0x42]] }
  0xc2   : > { %v570_v26 = vadd.f32 %v568_v22, %v550_v30  ;;  %v537_v29 = vadd.f32 %v535_v4, %v512_v16  ;;  %v738_v4 = vstv %s1747_s3  ;;  %v760_v30 = vstv %s1758_s7  ;;  %s1838_s3 = sld [smem:[#allocation2 + $0x6a]]  ;;  %s1848_s7 = sld [smem:[#allocation2 + $0x1e]] }
  0xc3   : > { %v604_v35 = vadd.f32 %v603_v44, %v578_v51  ;;  %v562_v38 = vadd.f32 %v561_v63, %v544_v27  ;;  %v679_v44 = vmul.f32 %v1473_v60, %v678_v34  ;;  %v746_v60 = vstv %s1749_s4  ;;  %v1268_v51 = vld [vmem:[%s1412_s25 + $0x70] sm:$0x1f]  ;;  %s1841_s4 = sld [smem:[#allocation2 + $0x88]] }
  0xc4   : > { %v600_v36 = vadd.f32 %v599_v57, %v570_v26  ;;  %v558_v39 = vadd.f32 %v557_v11, %v537_v29  ;;  %v592_v40 = vpop.permute.xlu1 %591  ;;  %v731_v11 = vmul.f32 %v1250_v54, %v730_v58  ;;  %v747_v17 = vmul.f32 %v1250_v54, %v746_v60 }
  0xc5   : > { %v584_v21 = vpop.permute.xlu0 %583  ;;  %v594_v37 = vadd.f32 %v592_v40, %v562_v38  ;;  %v622_v45 = vadd.f32 %v621_v23, %v604_v35  ;;  %v681_v5 = vrot.slane %v679_v44, 1  ;;  %v739_v22 = vmul.f32 %v1250_v54, %v738_v4 }
  0xc6   : > { %v586_v43 = vadd.f32 %v584_v21, %v558_v39  ;;  %v618_v46 = vadd.f32 %v617_v19, %v600_v36  ;;  %v830_v23 = vstv %s1762_s8  ;;  %v776_v19 = vstv %s1764_s11  ;;  %s1851_s8 = sld [smem:[#allocation2 + $0x43]]  ;;  %s1855_s11 = sld [smem:[#allocation2 + $0x1f]] }
  0xc7   : > { %v612_v52 = vadd.f32 %v611_v3, %v594_v37  ;;  %v742_v3 = vstv %s1742_s30  ;;  %v826_v26 = vstv %s1768_s12  ;;  %v768_v27 = vmul.f32 %v1250_v54, %v767_v14  ;;  %s1836_s30 = sld [smem:[#allocation2 + $0x8e]]  ;;  %s1859_s12 = sld [smem:[#allocation2 + $0x8a]] }
  0xc8   : > { %v608_v53 = vadd.f32 %v607_v31, %v586_v43  ;;  %v644_v56 = vpop.permute.xlu1 %643  ;;  %v743_v20 = vmul.f32 %v1250_v54, %v742_v3  ;;  %v756_v32 = vrot.slane %v754_v12, 1  ;;  %v781_v33 = vmul.f32 %v1492_v18, %v780_v13 }
  0xc9   : > { %v636_v57 = vpop.permute.xlu0 %635  ;;  %v646_v59 = vadd.f32 %v644_v56, %v622_v45  ;;  %v630_v63 = vadd.f32 %v629_v41, %v612_v52  ;;  %v788_v0 = vstv %s1772_s13  ;;  %v761_v35 = vmul.f32 %v1250_v54, %v760_v30  ;;  %s1861_s13 = sld [smem:[#allocation2 + $0x66]] }
  0xca   : > { %v638_v62 = vadd.f32 %v636_v57, %v618_v46  ;;  %v626_v1 = vadd.f32 %v625_v42, %v608_v53  ;;  %v749_v39 = vrot.slane %v747_v17, 1  ;;  %v838_v40 = vstv %s1774_s14  ;;  %s1867_s14 = sld [smem:[#allocation2 + $0x8b]] }
  0xcb   : > { %v676_v6 = vadd.f32 %v674_v47, %v646_v59  ;;  %v831_v21 = vmul.f32 %v1268_v51, %v830_v23  ;;  %v777_v41 = vmul.f32 %v1492_v18, %v776_v19  ;;  %v827_v42 = vmul.f32 %v1268_v51, %v826_v26 }
  0xcc   : > { %v669_v7 = vadd.f32 %v667_v55, %v638_v62  ;;  %v660_v9 = vpop.permute.xlu1 %659  ;;  %v784_v34 = vstv %s1779_s15  ;;  %v770_v45 = vrot.slane %v768_v27, 1  ;;  %v789_v46 = vmul.f32 %v1492_v18, %v788_v0  ;;  %s1869_s15 = sld [smem:[#allocation2 + $0x67]] }
  0xcd   : > { %v652_v10 = vpop.permute.xlu0 %651  ;;  %v662_v15 = vadd.f32 %v660_v9, %v630_v63  ;;  %v839_v49 = vmul.f32 %v1268_v51, %v838_v40  ;;  %v763_v52 = vrot.slane %v761_v35, 1  ;;  %v848_v53 = vstv %s1783_s16 }
  0xce   : > { %v654_v16 = vadd.f32 %v652_v10, %v626_v1  ;;  %v844_v54 = vstv %s1785_s17  ;;  %v785_v58 = vmul.f32 %v1492_v18, %v784_v34  ;;  %v834_v61 = vstv %s1788_s18 }
  0xcf   : > { %v690_v24 = vadd.f32 %v688_v8, %v662_v15  ;;  %v899_v59 = vstv %s1792_s19  ;;  %v892_v62 = vstv %s1794_s20  ;;  %v856_v8 = vstv %s1800_s21 }
  0xd0   : > { %v683_v25 = vadd.f32 %v681_v5, %v654_v16  ;;  %v706_v29 = vpop.permute.xlu1 %705  ;;  %v852_v5 = vstv %s1802_s22  ;;  %v835_v12 = vmul.f32 %v1268_v51, %v834_v61  ;;  %v900_v13 = vmul.f32 %v1503_v28, %v899_v59 }
  0xd1   : > { %v697_v31 = vpop.permute.xlu0 %696  ;;  %v708_v36 = vadd.f32 %v706_v29, %v676_v6  ;;  %v849_v6 = vmul.f32 %v1503_v28, %v848_v53  ;;  %v893_v14 = vmul.f32 %v1503_v28, %v892_v62  ;;  %v913_v15 = vstv %s1807_s23 }
  0xd2   : > { %v699_v38 = vadd.f32 %v697_v31, %v669_v7  ;;  %v845_v7 = vmul.f32 %v1503_v28, %v844_v54  ;;  %v857_v19 = vmul.f32 %v1503_v28, %v856_v8  ;;  %v902_v31 = vrot.slane %v900_v13, 1 }
  0xd3   : > { %v736_v37 = vadd.f32 %v735_v2, %v708_v36  ;;  %v895_v35 = vrot.slane %v893_v14, 1  ;;  %v981_v40 = vstv %s1822_s26  ;;  %v970_v62 = vstv %s1841_s4 }
  0xd4   : > { %v732_v43 = vadd.f32 %v731_v11, %v699_v38  ;;  %v724_v47 = vpop.permute.xlu1 %723  ;;  %v1058_v8 = vstv %s1851_s8  ;;  %v1054_v13 = vstv %s1855_s11 }
  0xd5   : > { %v715_v48 = vpop.permute.xlu0 %714  ;;  %v726_v55 = vadd.f32 %v724_v47, %v690_v24  ;;  %v758_v56 = vadd.f32 %v756_v32, %v736_v37  ;;  %v853_v24 = vmul.f32 %v1503_v28, %v852_v5  ;;  %v914_v32 = vmul.f32 %v1503_v28, %v913_v15 }
  0xd6   : > { %v717_v44 = vadd.f32 %v715_v48, %v683_v25  ;;  %v751_v57 = vadd.f32 %v749_v39, %v732_v43  ;;  %v906_v25 = vstv %s1812_s24  ;;  %v1290_v43 = vld [vmem:[%s1412_s25 + $0x38] sm:$0x1f] }
  0xd7   : > { %v744_v63 = vadd.f32 %v743_v20, %v726_v55  ;;  %v782_v2 = vadd.f32 %v781_v33, %v758_v56  ;;  %v907_v36 = vmul.f32 %v1503_v28, %v906_v25  ;;  %v962_v28 = vstv %s1827_s28 }
  0xd8   : > { %v740_v1 = vadd.f32 %v739_v22, %v717_v44  ;;  %v778_v3 = vadd.f32 %v777_v41, %v751_v57  ;;  %v804_v4 = vpop.permute.xlu1 %803  ;;  %v916_v48 = vrot.slane %v914_v32, 1  ;;  %v982_v54 = vmul.f32 %v1290_v43, %v981_v40 }
  0xd9   : > { %v796_v60 = vpop.permute.xlu0 %795  ;;  %v806_v18 = vadd.f32 %v804_v4, %v782_v2  ;;  %v772_v10 = vadd.f32 %v770_v45, %v744_v63  ;;  %v958_v45 = vstv %s1830_s29  ;;  %v995_v57 = vstv %s1836_s30 }
  0xda   : > { %v798_v9 = vadd.f32 %v796_v60, %v778_v3  ;;  %v765_v11 = vadd.f32 %v763_v52, %v740_v1  ;;  %v963_v61 = vmul.f32 %v1290_v43, %v962_v28  ;;  %v959_v59 = vmul.f32 %v1290_v43, %v958_v45 }
  0xdb   : > { %v832_v16 = vadd.f32 %v831_v21, %v806_v18  ;;  %v790_v30 = vadd.f32 %v789_v46, %v772_v10  ;;  %v974_v21 = vstv %s1824_s27  ;;  %v966_v63 = vstv %s1843_s5 }
  0xdc   : > { %v828_v17 = vadd.f32 %v827_v42, %v798_v9  ;;  %v786_v20 = vadd.f32 %v785_v58, %v765_v11  ;;  %v820_v22 = vpop.permute.xlu1 %819  ;;  %v975_v55 = vmul.f32 %v1290_v43, %v974_v21  ;;  %v988_v58 = vstv %s1838_s3  ;;  %v1308_v11 = vld [vmem:[%s1412_s25 + $0x78] sm:$0x1f]  ;;  %s1319_s25 = sshll.u32 %s1900_s10, 4 }
  0xdd   : > { %v812_v23 = vpop.permute.xlu0 %811  ;;  %v822_v51 = vadd.f32 %v820_v22, %v790_v30  ;;  %v850_v27 = vadd.f32 %v849_v6, %v832_v16  ;;  %v1008_v3 = vstv %s1846_s6  ;;  %v1004_v4 = vstv %s1848_s7  ;;  %s157_s18 = scalar_lea.vmem %s1897_s2, %s1319_s25 }
  0xde   : > { %v814_v26 = vadd.f32 %v812_v23, %v786_v20  ;;  %v846_v29 = vadd.f32 %v845_v7, %v828_v17  ;;  %v984_v7 = vrot.slane %v982_v54, 1  ;;  %v996_v5 = vmul.f32 %v1290_v43, %v995_v57 }
  0xdf   : > { %v840_v33 = vadd.f32 %v839_v49, %v822_v51  ;;  %v909_v49 = vrot.slane %v907_v36, 1  ;;  %v989_v18 = vmul.f32 %v1290_v43, %v988_v58  ;;  %v971_v14 = vmul.f32 %v1290_v43, %v970_v62 }
  0xe0   : > { %v836_v0 = vadd.f32 %v835_v12, %v814_v26  ;;  %v872_v38 = vpop.permute.xlu1 %871  ;;  %v977_v12 = vrot.slane %v975_v55, 1  ;;  %v967_v15 = vmul.f32 %v1290_v43, %v966_v63  ;;  %v1009_v16 = vmul.f32 %v1522_v50, %v1008_v3 }
  0xe1   : > { %v864_v39 = vpop.permute.xlu0 %863  ;;  %v874_v41 = vadd.f32 %v872_v38, %v850_v27  ;;  %v858_v34 = vadd.f32 %v857_v19, %v840_v33  ;;  %v1005_v17 = vmul.f32 %v1522_v50, %v1004_v4  ;;  %v1016_v22 = vstv %s1859_s12 }
  0xe2   : > { %v866_v42 = vadd.f32 %v864_v39, %v846_v29  ;;  %v854_v37 = vadd.f32 %v853_v24, %v836_v0  ;;  %v1012_v23 = vstv %s1861_s13  ;;  %v1059_v25 = vmul.f32 %v1308_v11, %v1058_v8 }
  0xe3   : > { %v904_v46 = vadd.f32 %v902_v31, %v874_v41  ;;  %v1055_v51 = vmul.f32 %v1308_v11, %v1054_v13  ;;  %v998_v26 = vrot.slane %v996_v5, 1  ;;  %v991_v27 = vrot.slane %v989_v18, 1 }
  0xe4   : > { %v897_v47 = vadd.f32 %v895_v35, %v866_v42  ;;  %v888_v52 = vpop.permute.xlu1 %887  ;;  %v1017_v0 = vmul.f32 %v1522_v50, %v1016_v22  ;;  %v1066_v35 = vstv %s1867_s14  ;;  %v1013_v36 = vmul.f32 %v1522_v50, %v1012_v23 }
  0xe5   : > { %v880_v53 = vpop.permute.xlu0 %879  ;;  %v890_v44 = vadd.f32 %v888_v52, %v858_v34  ;;  %v1062_v38 = vstv %s1869_s15 }
  0xe6   : > { %v882_v56 = vadd.f32 %v880_v53, %v854_v37 }
  0xe7   : > { %v918_v1 = vadd.f32 %v916_v48, %v890_v44 }
  0xe8   : > { %v911_v2 = vadd.f32 %v909_v49, %v882_v56  ;;  %v934_v60 = vpop.permute.xlu1 %933 }
  0xe9   : > { %v925_v6 = vpop.permute.xlu0 %924  ;;  %v936_v9 = vadd.f32 %v934_v60, %v904_v46  ;;  %v1067_v46 = vmul.f32 %v1308_v11, %v1066_v35 }
  0xea   : > { %v927_v10 = vadd.f32 %v925_v6, %v897_v47  ;;  %v1063_v47 = vmul.f32 %v1308_v11, %v1062_v38 }
  0xeb   : > { %v964_v30 = vadd.f32 %v963_v61, %v936_v9 }
  0xec   : > { %v960_v20 = vadd.f32 %v959_v59, %v927_v10  ;;  %v952_v19 = vpop.permute.xlu1 %951 }
  0xed   : > { %v943_v24 = vpop.permute.xlu0 %942  ;;  %v954_v29 = vadd.f32 %v952_v19, %v918_v1  ;;  %v986_v32 = vadd.f32 %v984_v7, %v964_v30 }
  0xee   : > { %v945_v31 = vadd.f32 %v943_v24, %v911_v2  ;;  %v979_v33 = vadd.f32 %v977_v12, %v960_v20 }
  0xef   : > { %v972_v39 = vadd.f32 %v971_v14, %v954_v29  ;;  %v1010_v21 = vadd.f32 %v1009_v16, %v986_v32 }
  0xf0   : > { %v968_v40 = vadd.f32 %v967_v15, %v945_v31  ;;  %v1006_v41 = vadd.f32 %v1005_v17, %v979_v33  ;;  %v1032_v42 = vpop.permute.xlu1 %1031 }
  0xf1   : > { %v1024_v34 = vpop.permute.xlu0 %1023  ;;  %v1034_v37 = vadd.f32 %v1032_v42, %v1010_v21  ;;  %v1000_v28 = vadd.f32 %v998_v26, %v972_v39 }
  0xf2   : > { %v1026_v43 = vadd.f32 %v1024_v34, %v1006_v41  ;;  %v993_v45 = vadd.f32 %v991_v27, %v968_v40 }
  0xf3   : > { %v1060_v50 = vadd.f32 %v1059_v25, %v1034_v37  ;;  %v1018_v49 = vadd.f32 %v1017_v0, %v1000_v28 }
  0xf4   : > { %v1056_v48 = vadd.f32 %v1055_v51, %v1026_v43  ;;  %v1014_v52 = vadd.f32 %v1013_v36, %v993_v45  ;;  %v1048_v53 = vpop.permute.xlu1 %1047 }
  0xf5   : > { %v1040_v54 = vpop.permute.xlu0 %1039  ;;  %1313 = vst.msk [vmem:[%s157_s18 + $0x4] sm:$0xf] %vm1069_vm0, %v1060_v50  ;;  %v1050_v55 = vadd.f32 %v1048_v53, %v1018_v49 }
  0xf6   : > { %1070 = vst.msk [vmem:[%s157_s18] sm:$0xf] %vm1069_vm0, %v1056_v48  ;;  %v1042_v44 = vadd.f32 %v1040_v54, %v1014_v52 }
  0xf7   : > { %v1068_v56 = vadd.f32 %v1067_v46, %v1050_v55 }
  0xf8   : > { %v1064_v57 = vadd.f32 %v1063_v47, %v1042_v44 }
  0xf9   : > { %1315 = vst.msk [vmem:[%s157_s18 + $0xc] sm:$0xf] %vm1069_vm0, %v1068_v56 }
  0xfa   : > { %1314 = vst.msk [vmem:[%s157_s18 + $0x8] sm:$0xf] %vm1069_vm0, %v1064_v57 }
  0xfb PF: > { %s13_s9 = sadd.s32 1, %s1365_s9  }
  0xfc   : > { %p10_p1 = scmp.ge.s32.totalorder %s13_s9, 4  }
  0xfe   :  { %12 = sbr.rel (!%p10_p1) target bundleno = 1 (0x1), region = 81 }
 0x105   :  { %1098 = vsyncpa [#allocation3], 1 }
 0x106   :  { %1100 = vsyncpa [#allocation3 + $0x1], 1 }

// kernel: gaussian_pyramid.6
= control target key start
LH: loop header
LB: loop body
LE: loop exit
PB: predicated region body
PF: predicated region fallthrough
CT: control target
= control target key end

     0   :  { %7 = vsyncpa [#allocation3], 0  ;;  %s1384_s9 = smov 0   ;;  %s1895_s0 = inlined_call_operand.vmem [shape: f32[144], index: 0, kind: input, shape index: {}]   ;;  %s1896_s1 = inlined_call_operand.vmem [shape: f32[2,16,3,3], index: 1, kind: input, shape index: {}]   ;;  %s1897_s2 = inlined_call_operand.vmem [shape: f32[2,4,2,2], index: 2, kind: output, shape index: {}]  }
   0x1 LB: > { %s1144_s10 = sadd.s32 4294967295, %s1365_s9   ;;  %p1146_p0 = scmp.ge.s32.totalorder %s1365_s9, 1  ;;  %s1365_s9 = sphi %s1384_s9, %s13_s9  }
   0x2   : > { %p91_p1 = scmp.lt.s32.totalorder %s1365_s9, 3  ;;  %s104_s13 = sshll.u32 %s1895_s0, 4  ;;  %s105_s13 = int_to_ptr.vmem [resolvable:$true] %s104_s13 }
   0x3   : > { %p1328_p3 = scmp.eq.s32.totalorder %s1144_s10, 0  ;;  %s1340_s15 = scalar_lea.vmem %s105_s13, 32 }
   0x4   : > { %p1395_p2 = pnand %p1146_p0, %p91_p1  ;;  %p1341_p6 = scmp.ne.s32.totalorder %s105_s13, %s1340_s15 }
   0x5   : > { %p1348_p10 = scmp.lt.s32.totalorder %s105_s13, %s105_s13  ;;  %p1349_p11 = scmp.lt.s32.totalorder %s1340_s15, %s1340_s15 }
   0x6   : > { %p1324_p4 = pneg %p1395_p2 }
   0x7   : > { %p1350_p12 = por %p1349_p11, %p1348_p10 }
   0x8   : > { %p1325_p5 = pnand %p1328_p3, %p1324_p4 }
   0xa   : > { %p1342_p7 = pneg %p1325_p5 }
   0xc   : > { %p1343_p8 = pnand %p1342_p7, %p1341_p6 }
   0xe   : > { %p1344_p9 = pneg %p1343_p8 }
  0x10   : > { %p1351_p13 = pnand %p1350_p12, %p1344_p9 }
  0x12   : > { %1354 = shalt.err (!%p1351_p13)
}
  0x13   : > { %s1367_s16 = smov [#allocation2]   ;;  %125 = sbr.rel (%p1395_p2) target bundleno = 251 (0xfb), region = 28 }
  0x14   : > { %1327 = dma.vmem_to_smem (!%p1325_p5), %s105_s13, 32, %s1367_s16, [#allocation3]  }
  0x1a   : > { %1360 = dma.done.wait (%p1328_p3), [#allocation3], 32  }
  0x1b   : > { %1362 = vsyncadd (%p1328_p3), [#allocation3], 4294967264 }
  0x1c   : > { %131 = sfence }
  0x1d   : > { %p148_p0 = scmp.lt.s32.totalorder %s1144_s10, 1  ;;  %s1160_s17 = sld [smem:[#allocation2 + $0x4a]]  ;;  %vm1069_vm0 = vcmask 9216  }
  0x1e   : > { %s1158_s18 = sld [smem:[#allocation2 + $0x2]]  ;;  %s1161_s19 = sld [smem:[#allocation2 + $0x6e]] }
  0x1f   : > { %s1900_s10 = smov (!%p148_p0, %s1144_s10), 1  ;;  %s1159_s20 = sld [smem:[#allocation2 + $0x26]] }
  0x20   : > { %s1318_s21 = sshll.u32 %s1900_s10, 6  ;;  %s1167_s22 = sld [smem:[#allocation2 + $0x2c]] }
  0x21   : > { %s1412_s25 = scalar_lea.vmem %s1896_s1, %s1318_s21  ;;  %s1166_s26 = sld [smem:[#allocation2 + $0x8]] }
  0x22   : > { %v1415_v0 = vld [vmem:[%s1412_s25] sm:$0x7]  ;;  %s1169_s27 = sld [smem:[#allocation2 + $0x74]]  ;;  %s1168_s28 = sld [smem:[#allocation2 + $0x50]]  ;;  %v1443_v30 = vld [vmem:[%s1412_s25 + $0x4] sm:$0x7] }
  0x23   : > { %v192_v1 = vstv %s1160_s17  ;;  %s1368_s29 = smov 127   ;;  %s1185_s30 = sld [smem:[#allocation2 + $0x29]]  ;;  %v1432_v21 = vld [vmem:[%s1412_s25 + $0x20] sm:$0x7]  ;;  %v1462_v51 = vld [vmem:[%s1412_s25 + $0x24] sm:$0x7] }
  0x24   : > { %v176_v2 = vstv %s1158_s18  ;;  %v193_v3 = vmul.f32 %v192_v1, %v1415_v0  ;;  %v200_v5 = vstv %s1161_s19  ;;  %s1184_s3 = sld [smem:[#allocation2 + $0x5]]  ;;  %s1187_s4 = sld [smem:[#allocation2 + $0x71]]  ;;  %v1473_v60 = vld [vmem:[%s1412_s25 + $0x8] sm:$0x7] }
  0x25   : > { %v177_v4 = vmul.f32 %v176_v2, %v1415_v0  ;;  %v184_v6 = vstv %s1159_s20  ;;  %v201_v7 = vmul.f32 %v200_v5, %v1415_v0  ;;  %s1186_s5 = sld [smem:[#allocation2 + $0x4d]]  ;;  %s1199_s6 = sld [smem:[#allocation2 + $0x2f]] }
  0x26   : > { %195 = vrot.lane.b32.xlu1 %v193_v3, %s1368_s29  ;;  %v185_v8 = vmul.f32 %v184_v6, %v1415_v0  ;;  %v245_v9 = vstv %s1167_s22  ;;  %s1198_s7 = sld [smem:[#allocation2 + $0xb]]  ;;  %s1201_s8 = sld [smem:[#allocation2 + $0x77]] }
  0x27   : > { %179 = vrot.lane.b32.xlu0 %v177_v4, %s1368_s29  ;;  %v246_v10 = vmul.f32 %v245_v9, %v1415_v0  ;;  %v236_v11 = vstv %s1166_s26  ;;  %s1200_s11 = sld [smem:[#allocation2 + $0x53]]  ;;  %s1207_s12 = sld [smem:[#allocation2 + $0x35]] }
  0x28   : > { %v237_v12 = vmul.f32 %v236_v11, %v1415_v0  ;;  %v263_v13 = vstv %s1169_s27  ;;  %v254_v14 = vstv %s1168_s28  ;;  %s1206_s13 = sld [smem:[#allocation2 + $0x11]]  ;;  %s1209_s14 = sld [smem:[#allocation2 + $0x7d]] }
  0x29   : > { %v248_v15 = vrot.slane %v246_v10, 1  ;;  %v264_v17 = vmul.f32 %v263_v13, %v1415_v0  ;;  %v255_v18 = vmul.f32 %v254_v14, %v1415_v0  ;;  %v344_v22 = vstv %s1185_s30  ;;  %s1208_s15 = sld [smem:[#allocation2 + $0x59]]  ;;  %s1225_s16 = sld [smem:[#allocation2 + $0x32]] }
  0x2a   : > { %203 = vrot.lane.b32.xlu1 %v201_v7, %s1368_s29  ;;  %v239_v16 = vrot.slane %v237_v12, 1  ;;  %v336_v23 = vstv %s1184_s3  ;;  %v345_v24 = vmul.f32 %v1432_v21, %v344_v22  ;;  %v360_v26 = vstv %s1187_s4  ;;  %s1224_s17 = sld [smem:[#allocation2 + $0xe]]  ;;  %s1227_s18 = sld [smem:[#allocation2 + $0x7a]] }
  0x2b   : > { %187 = vrot.lane.b32.xlu0 %v185_v8, %s1368_s29  ;;  %v266_v19 = vrot.slane %v264_v17, 1  ;;  %v257_v20 = vrot.slane %v255_v18, 1  ;;  %v337_v25 = vmul.f32 %v1432_v21, %v336_v23  ;;  %v352_v27 = vstv %s1186_s5  ;;  %s1226_s19 = sld [smem:[#allocation2 + $0x56]]  ;;  %s1239_s20 = sld [smem:[#allocation2 + $0x38]]  ;;  %v1492_v18 = vld [vmem:[%s1412_s25 + $0x28] sm:$0x7] }
  0x2c   : > { %v361_v28 = vmul.f32 %v1432_v21, %v360_v26  ;;  %v353_v29 = vmul.f32 %v1432_v21, %v352_v27  ;;  %v412_v31 = vstv %s1199_s6  ;;  %v404_v32 = vstv %s1198_s7  ;;  %s1238_s21 = sld [smem:[#allocation2 + $0x14]]  ;;  %s1241_s22 = sld [smem:[#allocation2 + $0x80]] }
  0x2d   : > { %v413_v33 = vmul.f32 %v1443_v30, %v412_v31  ;;  %v405_v34 = vmul.f32 %v1443_v30, %v404_v32  ;;  %v428_v35 = vstv %s1201_s8  ;;  %v420_v36 = vstv %s1200_s11  ;;  %s1240_s23 = sld [smem:[#allocation2 + $0x5c]]  ;;  %s1247_s24 = sld [smem:[#allocation2 + $0x3e]] }
  0x2e   : > { %249 = vrot.lane.b32.xlu1 %v248_v15, %s1368_s29  ;;  %v473_v37 = vstv %s1207_s12  ;;  %v464_v38 = vstv %s1206_s13  ;;  %v429_v39 = vmul.f32 %v1443_v30, %v428_v35  ;;  %v421_v40 = vmul.f32 %v1443_v30, %v420_v36  ;;  %s1246_s26 = sld [smem:[#allocation2 + $0x1a]]  ;;  %s1249_s27 = sld [smem:[#allocation2 + $0x86]] }
  0x2f   : > { %240 = vrot.lane.b32.xlu0 %v239_v16, %s1368_s29  ;;  %v474_v41 = vmul.f32 %v1443_v30, %v473_v37  ;;  %v465_v42 = vmul.f32 %v1443_v30, %v464_v38  ;;  %v491_v43 = vstv %s1209_s14  ;;  %v482_v44 = vstv %s1208_s15  ;;  %s1248_s28 = sld [smem:[#allocation2 + $0x62]]  ;;  %s1265_s30 = sld [smem:[#allocation2 + $0x3b]] }
  0x30   : > { %v492_v47 = vmul.f32 %v1443_v30, %v491_v43  ;;  %v483_v48 = vmul.f32 %v1443_v30, %v482_v44  ;;  %v572_v52 = vstv %s1225_s16  ;;  %v564_v53 = vstv %s1224_s17  ;;  %s1264_s3 = sld [smem:[#allocation2 + $0x17]]  ;;  %s1267_s4 = sld [smem:[#allocation2 + $0x83]] }
  0x31   : > { %v476_v45 = vrot.slane %v474_v41, 1  ;;  %v467_v46 = vrot.slane %v465_v42, 1  ;;  %v573_v54 = vmul.f32 %v1462_v51, %v572_v52  ;;  %v565_v55 = vmul.f32 %v1462_v51, %v564_v53  ;;  %s1266_s5 = sld [smem:[#allocation2 + $0x5f]]  ;;  %s1279_s6 = sld [smem:[#allocation2 + $0x41]] }
  0x32   : > { %267 = vrot.lane.b32.xlu1 %v266_v19, %s1368_s29  ;;  %v494_v49 = vrot.slane %v492_v47, 1  ;;  %v485_v50 = vrot.slane %v483_v48, 1  ;;  %v588_v56 = vstv %s1227_s18  ;;  %v580_v57 = vstv %s1226_s19  ;;  %s1278_s7 = sld [smem:[#allocation2 + $0x1d]]  ;;  %s1281_s8 = sld [smem:[#allocation2 + $0x89]] }
  0x33   : > { %258 = vrot.lane.b32.xlu0 %v257_v20, %s1368_s29  ;;  %v589_v58 = vmul.f32 %v1462_v51, %v588_v56  ;;  %v581_v59 = vmul.f32 %v1462_v51, %v580_v57  ;;  %v640_v61 = vstv %s1239_s20  ;;  %v632_v62 = vstv %s1238_s21  ;;  %s1280_s11 = sld [smem:[#allocation2 + $0x65]]  ;;  %s1287_s12 = sld [smem:[#allocation2 + $0x47]] }
  0x34   : > { %v641_v63 = vmul.f32 %v1473_v60, %v640_v61  ;;  %v633_v1 = vmul.f32 %v1473_v60, %v632_v62  ;;  %v656_v2 = vstv %s1241_s22  ;;  %v648_v3 = vstv %s1240_s23  ;;  %s1286_s13 = sld [smem:[#allocation2 + $0x23]]  ;;  %s1289_s14 = sld [smem:[#allocation2 + $0x8f]] }
  0x35   : > { %v701_v4 = vstv %s1247_s24  ;;  %v692_v5 = vstv %s1246_s26  ;;  %v657_v6 = vmul.f32 %v1473_v60, %v656_v2  ;;  %v649_v7 = vmul.f32 %v1473_v60, %v648_v3  ;;  %s1288_s15 = sld [smem:[#allocation2 + $0x6b]]  ;;  %s1305_s16 = sld [smem:[#allocation2 + $0x44]] }
  0x36   : > { %347 = vrot.lane.b32.xlu1 %v345_v24, %s1368_s29  ;;  %v702_v8 = vmul.f32 %v1473_v60, %v701_v4  ;;  %v693_v9 = vmul.f32 %v1473_v60, %v692_v5  ;;  %v719_v10 = vstv %s1249_s27  ;;  %v710_v11 = vstv %s1248_s28  ;;  %s1304_s17 = sld [smem:[#allocation2 + $0x20]]  ;;  %s1307_s18 = sld [smem:[#allocation2 + $0x8c]]  ;;  %v1170_v5 = vld [vmem:[%s1412_s25 + $0x10] sm:$0x7] }
  0x37   : > { %339 = vrot.lane.b32.xlu0 %v337_v25, %s1368_s29  ;;  %v720_v14 = vmul.f32 %v1473_v60, %v719_v10  ;;  %v711_v15 = vmul.f32 %v1473_v60, %v710_v11  ;;  %v800_v19 = vstv %s1265_s30  ;;  %v792_v20 = vstv %s1264_s3  ;;  %s1306_s19 = sld [smem:[#allocation2 + $0x68]]  ;;  %s1163_s22 = sld [smem:[#allocation2 + $0x2a]] }
  0x38   : > { %v704_v12 = vrot.slane %v702_v8, 1  ;;  %v695_v13 = vrot.slane %v693_v9, 1  ;;  %v801_v22 = vmul.f32 %v1492_v18, %v800_v19  ;;  %v793_v23 = vmul.f32 %v1492_v18, %v792_v20  ;;  %s1534_s20 = sld [smem:[#allocation2 + $0x48]]  ;;  %s1162_s23 = sld [smem:[#allocation2 + $0x6]] }
  0x39   : > { %v722_v16 = vrot.slane %v720_v14, 1  ;;  %v713_v17 = vrot.slane %v711_v15, 1  ;;  %v816_v24 = vstv %s1267_s4  ;;  %v808_v25 = vstv %s1266_s5  ;;  %s1536_s21 = sld [smem:[#allocation2]]  ;;  %s1538_s24 = sld [smem:[#allocation2 + $0x6c]] }
  0x3a   : > { %363 = vrot.lane.b32.xlu1 %v361_v28, %s1368_s29  ;;  %v817_v26 = vmul.f32 %v1492_v18, %v816_v24  ;;  %v809_v27 = vmul.f32 %v1492_v18, %v808_v25  ;;  %v1503_v28 = vld [vmem:[%s1412_s25 + $0xc] sm:$0x7]  ;;  %v860_v31 = vstv %s1278_s7  ;;  %v876_v35 = vstv %s1280_s11  ;;  %s1540_s26 = sld [smem:[#allocation2 + $0x72]]  ;;  %s1542_s27 = sld [smem:[#allocation2 + $0x24]] }
  0x3b   : > { %355 = vrot.lane.b32.xlu0 %v353_v29, %s1368_s29  ;;  %v868_v29 = vstv %s1279_s6  ;;  %v929_v36 = vstv %s1287_s12  ;;  %v920_v37 = vstv %s1286_s13  ;;  %s1544_s28 = sld [smem:[#allocation2 + $0x25]]  ;;  %s1548_s30 = sld [smem:[#allocation2 + $0x1]] }
  0x3c   : > { %v869_v32 = vmul.f32 %v1503_v28, %v868_v29  ;;  %v921_v41 = vmul.f32 %v1503_v28, %v920_v37  ;;  %v947_v42 = vstv %s1289_s14  ;;  %v938_v43 = vstv %s1288_s15  ;;  %s1550_s3 = sld [smem:[#allocation2 + $0x6d]]  ;;  %s1552_s4 = sld [smem:[#allocation2 + $0x49]] }
  0x3d   : > { %v939_v47 = vmul.f32 %v1503_v28, %v938_v43  ;;  %v1028_v52 = vstv %s1305_s16  ;;  %v1020_v53 = vstv %s1304_s17  ;;  %v1044_v56 = vstv %s1307_s18  ;;  %s1554_s5 = sld [smem:[#allocation2 + $0x2b]]  ;;  %s1556_s6 = sld [smem:[#allocation2 + $0x7]] }
  0x3e   : > { %415 = vrot.lane.b32.xlu1 %v413_v33, %s1368_s29  ;;  %v861_v33 = vmul.f32 %v1503_v28, %v860_v31  ;;  %v1036_v57 = vstv %s1306_s19  ;;  %s1558_s7 = sld [smem:[#allocation2 + $0x27]]  ;;  %v215_v61 = vstv %s1163_s22  ;;  %v208_v62 = vstv %s1162_s23  ;;  %s1565_s11 = sld [smem:[#allocation2 + $0x28]] }
  0x3f   : > { %407 = vrot.lane.b32.xlu0 %v405_v34, %s1368_s29  ;;  %v884_v34 = vstv %s1281_s8  ;;  %s1560_s8 = sld [smem:[#allocation2 + $0x73]]  ;;  %v172_v3 = vstv %s1538_s24  ;;  %s1573_s13 = sld [smem:[#allocation2 + $0x4f]]  ;;  %v209_v8 = vmul.f32 %v208_v62, %v1415_v0 }
  0x40   : > { %v885_v38 = vmul.f32 %v1503_v28, %v884_v34  ;;  %v229_v2 = vstv %s1540_s26  ;;  %v164_v4 = vstv %s1542_s27  ;;  %s1571_s12 = sld [smem:[#allocation2 + $0x3]]  ;;  %s1578_s14 = sld [smem:[#allocation2 + $0x4]] }
  0x41   : > { %s1580_s15 = sld [smem:[#allocation2 + $0x6f]]  ;;  %s1595_s16 = sld [smem:[#allocation2 + $0x70]] }
  0x42   : > { %431 = vrot.lane.b32.xlu1 %v429_v39, %s1368_s29  ;;  %v877_v39 = vmul.f32 %v1503_v28, %v876_v35  ;;  %v286_v20 = vstv %s1550_s3  ;;  %s1598_s17 = sld [smem:[#allocation2 + $0x4b]]  ;;  %s1605_s18 = sld [smem:[#allocation2 + $0x2d]] }
  0x43   : > { %423 = vrot.lane.b32.xlu0 %v421_v40, %s1368_s29  ;;  %v930_v40 = vmul.f32 %v1503_v28, %v929_v36  ;;  %v297_v24 = vstv %s1554_s5  ;;  %v290_v25 = vstv %s1556_s6  ;;  %v1601_v34 = vmul.f32 %v1170_v5, %v286_v20  ;;  %s1607_s19 = sld [smem:[#allocation2 + $0x9]]  ;;  %s1621_s22 = sld [smem:[#allocation2 + $0xf]] }
  0x44   : > { %v324_v31 = vstv %s1558_s7  ;;  %s1624_s23 = sld [smem:[#allocation2 + $0x75]]  ;;  %s1626_s24 = sld [smem:[#allocation2 + $0x51]] }
  0x45   : > { %v932_v44 = vrot.slane %v930_v40, 1  ;;  %v291_v40 = vmul.f32 %v1170_v5, %v290_v25  ;;  %v325_v43 = vmul.f32 %v1432_v21, %v324_v31  ;;  %s1633_s26 = sld [smem:[#allocation2 + $0x7b]]  ;;  %s1638_s27 = sld [smem:[#allocation2 + $0x57]] }
  0x46   : > { %477 = vrot.lane.b32.xlu1 %v476_v45, %s1368_s29  ;;  %v923_v45 = vrot.slane %v921_v41, 1  ;;  %s1655_s3 = sld [smem:[#allocation2 + $0x76]]  ;;  %s1663_s5 = sld [smem:[#allocation2 + $0x10]] }
  0x47   : > { %468 = vrot.lane.b32.xlu0 %v467_v46, %s1368_s29  ;;  %v948_v46 = vmul.f32 %v1503_v28, %v947_v42  ;;  %s1668_s6 = sld [smem:[#allocation2 + $0x30]]  ;;  %s1670_s7 = sld [smem:[#allocation2 + $0x7c]] }
  0x49   : > { %v950_v48 = vrot.slane %v948_v46, 1  ;;  %v320_v46 = vstv %s1571_s12  ;;  %s1678_s12 = sld [smem:[#allocation2 + $0xc]] }
  0x4a   : > { %495 = vrot.lane.b32.xlu1 %v494_v49, %s1368_s29  ;;  %v941_v49 = vrot.slane %v939_v47, 1  ;;  %v370_v47 = vstv %s1578_s14  ;;  %s1686_s14 = sld [smem:[#allocation2 + $0x78]] }
  0x4b   : > { %486 = vrot.lane.b32.xlu0 %v485_v50, %s1368_s29  ;;  %v1522_v50 = vld [vmem:[%s1412_s25 + $0x2c] sm:$0x7] }
  0x4e   : > { %575 = vrot.lane.b32.xlu1 %v573_v54, %s1368_s29  ;;  %v1029_v54 = vmul.f32 %v1522_v50, %v1028_v52 }
  0x4f   : > { %567 = vrot.lane.b32.xlu0 %v565_v55, %s1368_s29  ;;  %v1021_v55 = vmul.f32 %v1522_v50, %v1020_v53 }
  0x52   : > { %591 = vrot.lane.b32.xlu1 %v589_v58, %s1368_s29  ;;  %v1045_v58 = vmul.f32 %v1522_v50, %v1044_v56 }
  0x53   : > { %583 = vrot.lane.b32.xlu0 %v581_v59, %s1368_s29  ;;  %v1037_v59 = vmul.f32 %v1522_v50, %v1036_v57 }
  0x56   : > { %643 = vrot.lane.b32.xlu1 %v641_v63, %s1368_s29  ;;  %v168_v63 = vstv %s1534_s20  ;;  %s1614_s20 = sld [smem:[#allocation2 + $0x4c]] }
  0x57   : > { %635 = vrot.lane.b32.xlu0 %v633_v1, %s1368_s29  ;;  %v160_v1 = vstv %s1536_s21  ;;  %v169_v10 = vmul.f32 %v168_v63, %v1415_v0  ;;  %s1619_s21 = sld [smem:[#allocation2 + $0x33]] }
  0x58   : > { %v161_v11 = vmul.f32 %v160_v1, %v1415_v0 }
  0x5a   : > { %659 = vrot.lane.b32.xlu1 %v657_v6, %s1368_s29  ;;  %v278_v6 = vstv %s1544_s28  ;;  %s1643_s28 = sld [smem:[#allocation2 + $0x2e]] }
  0x5b   : > { %651 = vrot.lane.b32.xlu0 %v649_v7, %s1368_s29  ;;  %v216_v7 = vmul.f32 %v215_v61, %v1415_v0  ;;  %v279_v19 = vmul.f32 %v1170_v5, %v278_v6  ;;  %v293_v61 = vrot.slane %v291_v40, 1  ;;  %v396_v40 = vstv %s1626_s24  ;;  %s1721_s24 = sld [smem:[#allocation2 + $0x84]] }
  0x5c   : > { %v378_v25 = vstv %s1614_s20  ;;  %s1706_s20 = sld [smem:[#allocation2 + $0x3c]] }
  0x5e   : > { %705 = vrot.lane.b32.xlu1 %v704_v12, %s1368_s29  ;;  %v274_v12 = vstv %s1548_s30  ;;  %s1653_s30 = sld [smem:[#allocation2 + $0x34]] }
  0x5f   : > { %696 = vrot.lane.b32.xlu0 %v695_v13, %s1368_s29  ;;  %v1586_v13 = vmul.f32 %v229_v2, %v1415_v0  ;;  %v275_v29 = vmul.f32 %v1170_v5, %v274_v12  ;;  %v321_v2 = vmul.f32 %v1432_v21, %v320_v46  ;;  %v457_v46 = vstv %s1633_s26  ;;  %s1726_s26 = sld [smem:[#allocation2 + $0x60]] }
  0x62   : > { %723 = vrot.lane.b32.xlu1 %v722_v16, %s1368_s29  ;;  %v173_v16 = vmul.f32 %v172_v3, %v1415_v0  ;;  %v382_v3 = vstv %s1595_s16  ;;  %s1693_s16 = sld [smem:[#allocation2 + $0x54]] }
  0x63   : > { %714 = vrot.lane.b32.xlu0 %v713_v17, %s1368_s29  ;;  %v165_v17 = vmul.f32 %v164_v4, %v1415_v0 }
  0x66   : > { %803 = vrot.lane.b32.xlu1 %v801_v22, %s1368_s29 }
  0x67   : > { %795 = vrot.lane.b32.xlu0 %v793_v23, %s1368_s29  ;;  %v282_v23 = vstv %s1552_s4  ;;  %s1661_s4 = sld [smem:[#allocation2 + $0x52]] }
  0x68   : > { %v283_v37 = vmul.f32 %v1170_v5, %v282_v23 }
  0x6a   : > { %819 = vrot.lane.b32.xlu1 %v817_v26, %s1368_s29  ;;  %v218_v26 = vrot.slane %v216_v7, 1 }
  0x6b   : > { %811 = vrot.lane.b32.xlu0 %v809_v27, %s1368_s29  ;;  %v211_v27 = vrot.slane %v209_v8, 1  ;;  %v328_v8 = vstv %s1598_s17  ;;  %s1697_s17 = sld [smem:[#allocation2 + $0x36]] }
  0x6e   : > { %871 = vrot.lane.b32.xlu1 %v869_v32, %s1368_s29 }
  0x6f   : > { %863 = vrot.lane.b32.xlu0 %v861_v33, %s1368_s29  ;;  %v232_v33 = vrot.slane %v1586_v13, 1 }
  0x72   : > { %887 = vrot.lane.b32.xlu1 %v885_v38, %s1368_s29  ;;  %v298_v38 = vmul.f32 %v1170_v5, %v297_v24  ;;  %v329_v24 = vmul.f32 %v1432_v21, %v328_v8 }
  0x73   : > { %879 = vrot.lane.b32.xlu0 %v877_v39, %s1368_s29  ;;  %v374_v39 = vstv %s1565_s11  ;;  %s1676_s11 = sld [smem:[#allocation2 + $0x31]] }
  0x76   : > { %933 = vrot.lane.b32.xlu1 %v932_v44, %s1368_s29  ;;  %v1611_v44 = vld [vmem:[%s1412_s25 + $0x30] sm:$0x7] }
  0x77   : > { %924 = vrot.lane.b32.xlu0 %v923_v45, %s1368_s29  ;;  %v304_v45 = vstv %s1573_s13  ;;  %v371_v4 = vmul.f32 %v1611_v44, %v370_v47  ;;  %s1682_s13 = sld [smem:[#allocation2 + $0xd]] }
  0x78   : > { %v305_v62 = vmul.f32 %v1170_v5, %v304_v45 }
  0x7a   : > { %951 = vrot.lane.b32.xlu1 %v950_v48, %s1368_s29 }
  0x7b   : > { %942 = vrot.lane.b32.xlu0 %v941_v49, %s1368_s29  ;;  %v332_v49 = vstv %s1580_s15  ;;  %s1688_s15 = sld [smem:[#allocation2 + $0x79]] }
  0x7c   : > { %v333_v7 = vmul.f32 %v1432_v21, %v332_v49 }
  0x7e   : > { %1031 = vrot.lane.b32.xlu1 %v1029_v54, %s1368_s29 }
  0x7f   : > { %1023 = vrot.lane.b32.xlu0 %v1021_v55, %s1368_s29 }
  0x82   : > { %1047 = vrot.lane.b32.xlu1 %v1045_v58, %s1368_s29  ;;  %v300_v58 = vrot.slane %v298_v38, 1 }
  0x83   : > { %1039 = vrot.lane.b32.xlu0 %v1037_v59, %s1368_s29  ;;  %s1546_s29 = sld [smem:[#allocation2 + $0x4e]]  ;;  %v375_v59 = vmul.f32 %v1611_v44, %v374_v39  ;;  %v400_v39 = vstv %s1624_s23  ;;  %s1716_s23 = sld [smem:[#allocation2 + $0x5a]] }
  0x89   : > { %v222_v9 = vstv %s1546_s29  ;;  %s1651_s29 = sld [smem:[#allocation2 + $0xa]] }
  0x8a   : > { %v223_v22 = vmul.f32 %v222_v9, %v1415_v0  ;;  %v311_v0 = vstv %s1560_s8  ;;  %s1672_s8 = sld [smem:[#allocation2 + $0x58]] }
  0x8b   : > { %v312_v48 = vmul.f32 %v1170_v5, %v311_v0 }
  0x8c   : > { %v225_v42 = vrot.slane %v223_v22, 1 }
  0x8d   : > { %v314_v6 = vrot.slane %v312_v48, 1 }
  0x98   : > { %v196_v14 = vpop.permute.xlu1 %195 }
  0x99   : > { %v180_v15 = vpop.permute.xlu0 %179  ;;  %v198_v52 = vadd.f32 %v196_v14, %v169_v10  ;;  %v383_v14 = vmul.f32 %v1611_v44, %v382_v3 }
  0x9a   : > { %v182_v32 = vadd.f32 %v180_v15, %v161_v11  ;;  %v307_v15 = vrot.slane %v305_v62, 1 }
  0x9b   : > { %v227_v11 = vadd.f32 %v225_v42, %v198_v52 }
  0x9c   : > { %v204_v35 = vpop.permute.xlu1 %203  ;;  %v213_v55 = vadd.f32 %v211_v27, %v182_v32  ;;  %v436_v27 = vstv %s1621_s22  ;;  %s1714_s22 = sld [smem:[#allocation2 + $0x7e]] }
  0x9d   : > { %v188_v36 = vpop.permute.xlu0 %187  ;;  %v206_v53 = vadd.f32 %v204_v35, %v173_v16  ;;  %v392_v16 = vstv %s1605_s18  ;;  %v437_v45 = vmul.f32 %v1443_v30, %v436_v27  ;;  %s1699_s18 = sld [smem:[#allocation2 + $0x12]] }
  0x9e   : > { %v190_v41 = vadd.f32 %v188_v36, %v165_v17  ;;  %v388_v17 = vstv %s1607_s19  ;;  %v393_v36 = vmul.f32 %v1443_v30, %v392_v16  ;;  %v514_v16 = vstv %s1655_s3  ;;  %s1702_s19 = sld [smem:[#allocation2 + $0x55]]  ;;  %s1747_s3 = sld [smem:[#allocation2 + $0x5b]] }
  0x9f   : > { %v234_v10 = vadd.f32 %v232_v33, %v206_v53  ;;  %v389_v38 = vmul.f32 %v1443_v30, %v388_v17  ;;  %v510_v17 = vstv %s1661_s4  ;;  %s1749_s4 = sld [smem:[#allocation2 + $0x19]] }
  0xa0   : > { %v220_v54 = vadd.f32 %v218_v26, %v190_v41  ;;  %v250_v56 = vpop.permute.xlu1 %249  ;;  %v443_v26 = vstv %s1619_s21  ;;  %s1708_s21 = sld [smem:[#allocation2 + $0x18]] }
  0xa1   : > { %v241_v57 = vpop.permute.xlu0 %240 }
  0xa2   : > { %v252_v63 = vadd.f32 %v250_v56, %v220_v54  ;;  %v243_v1 = vadd.f32 %v241_v57, %v213_v55  ;;  %v401_v55 = vmul.f32 %v1443_v30, %v400_v39  ;;  %v450_v56 = vstv %s1638_s27  ;;  %s1731_s27 = sld [smem:[#allocation2 + $0x37]] }
  0xa3   : > { %v602_v39 = vstv %s1676_s11  ;;  %s1764_s11 = sld [smem:[#allocation2 + $0x15]] }
  0xa4   : > { %v280_v5 = vadd.f32 %v279_v19, %v252_v63  ;;  %v276_v9 = vadd.f32 %v275_v29, %v243_v1  ;;  %v268_v12 = vpop.permute.xlu1 %267  ;;  %v506_v63 = vstv %s1643_s28  ;;  %v458_v1 = vmul.f32 %v1443_v30, %v457_v46  ;;  %s1738_s28 = sld [smem:[#allocation2 + $0x13]] }
  0xa5   : > { %v259_v13 = vpop.permute.xlu0 %258  ;;  %v270_v20 = vadd.f32 %v268_v12, %v234_v10  ;;  %v525_v10 = vstv %s1653_s30  ;;  %s1742_s30 = sld [smem:[#allocation2 + $0x7f]] }
  0xa6   : > { %v261_v22 = vadd.f32 %v259_v13, %v227_v11  ;;  %v302_v23 = vadd.f32 %v300_v58, %v280_v5  ;;  %v295_v19 = vadd.f32 %v293_v61, %v276_v9  ;;  %v502_v9 = vstv %s1651_s29  ;;  %s1740_s29 = sld [smem:[#allocation2 + $0x3d]] }
  0xa7   : > { %v288_v29 = vadd.f32 %v1601_v34, %v270_v20 }
  0xa8   : > { %v284_v31 = vadd.f32 %v283_v37, %v261_v22  ;;  %v326_v32 = vadd.f32 %v325_v43, %v302_v23  ;;  %v322_v33 = vadd.f32 %v321_v2, %v295_v19  ;;  %v348_v0 = vpop.permute.xlu1 %347  ;;  %v379_v37 = vmul.f32 %v1611_v44, %v378_v25 }
  0xa9   : > { %v340_v35 = vpop.permute.xlu0 %339  ;;  %v316_v42 = vadd.f32 %v314_v6, %v288_v29  ;;  %v444_v43 = vmul.f32 %v1443_v30, %v443_v26  ;;  %v397_v44 = vmul.f32 %v1443_v30, %v396_v40  ;;  %v439_v6 = vrot.slane %v437_v45, 1 }
  0xaa   : > { %v350_v21 = vadd.f32 %v348_v0, %v326_v32  ;;  %v342_v41 = vadd.f32 %v340_v35, %v322_v33  ;;  %v309_v34 = vadd.f32 %v307_v15, %v284_v31  ;;  %v460_v23 = vrot.slane %v458_v1, 1 }
  0xab   : > { %v334_v49 = vadd.f32 %v333_v7, %v316_v42  ;;  %v446_v62 = vrot.slane %v444_v43, 1  ;;  %v451_v7 = vmul.f32 %v1443_v30, %v450_v56  ;;  %v518_v30 = vstv %s1663_s5  ;;  %v1228_v42 = vld [vmem:[%s1412_s25 + $0x34] sm:$0x7]  ;;  %s1754_s5 = sld [smem:[#allocation2 + $0x39]] }
  0xac   : > { %v376_v47 = vadd.f32 %v375_v59, %v350_v21  ;;  %v372_v48 = vadd.f32 %v371_v4, %v342_v41  ;;  %v330_v52 = vadd.f32 %v329_v24, %v309_v34  ;;  %v364_v53 = vpop.permute.xlu1 %363  ;;  %v1210_v4 = vld [vmem:[%s1412_s25 + $0x14] sm:$0x7]  ;;  %v552_v29 = vstv %s1668_s6  ;;  %s1756_s6 = sld [smem:[#allocation2 + $0x85]] }
  0xad   : > { %v356_v54 = vpop.permute.xlu0 %355  ;;  %v366_v57 = vadd.f32 %v364_v53, %v334_v49  ;;  %v507_v15 = vmul.f32 %v1210_v4, %v506_v63  ;;  %v453_v19 = vrot.slane %v451_v7, 1  ;;  %v503_v26 = vmul.f32 %v1210_v4, %v502_v9 }
  0xae   : > { %v358_v58 = vadd.f32 %v356_v54, %v330_v52  ;;  %v394_v61 = vadd.f32 %v393_v36, %v376_v47  ;;  %v390_v59 = vadd.f32 %v389_v38, %v372_v48  ;;  %v526_v27 = vmul.f32 %v1210_v4, %v525_v10 }
  0xaf   : > { %v384_v2 = vadd.f32 %v383_v14, %v366_v57  ;;  %v539_v31 = vstv %s1670_s7  ;;  %v519_v0 = vmul.f32 %v1210_v4, %v518_v30  ;;  %v532_v35 = vstv %s1672_s8  ;;  %s1758_s7 = sld [smem:[#allocation2 + $0x61]]  ;;  %s1762_s8 = sld [smem:[#allocation2 + $0x3a]] }
  0xb0   : > { %v380_v3 = vadd.f32 %v379_v37, %v358_v58  ;;  %v416_v8 = vpop.permute.xlu1 %415  ;;  %v515_v36 = vmul.f32 %v1210_v4, %v514_v16  ;;  %v511_v38 = vmul.f32 %v1210_v4, %v510_v17  ;;  %v548_v40 = vstv %s1678_s12  ;;  %s1768_s12 = sld [smem:[#allocation2 + $0x16]] }
  0xb1   : > { %v408_v5 = vpop.permute.xlu0 %407  ;;  %v418_v11 = vadd.f32 %v416_v8, %v394_v61  ;;  %v402_v13 = vadd.f32 %v401_v55, %v384_v2  ;;  %v598_v34 = vstv %s1682_s13  ;;  %v540_v37 = vmul.f32 %v1210_v4, %v539_v31  ;;  %s1772_s13 = sld [smem:[#allocation2 + $0x81]] }
  0xb2   : > { %v410_v12 = vadd.f32 %v408_v5, %v390_v59  ;;  %v398_v14 = vadd.f32 %v397_v44, %v380_v3  ;;  %v528_v46 = vrot.slane %v526_v27, 1  ;;  %v553_v47 = vmul.f32 %v1462_v51, %v552_v29 }
  0xb3   : > { %v448_v20 = vadd.f32 %v446_v62, %v418_v11  ;;  %v560_v48 = vstv %s1686_s14  ;;  %v533_v49 = vmul.f32 %v1210_v4, %v532_v35  ;;  %v521_v54 = vrot.slane %v519_v0, 1  ;;  %s1774_s14 = sld [smem:[#allocation2 + $0x82]] }
  0xb4   : > { %v441_v22 = vadd.f32 %v439_v6, %v410_v12  ;;  %v432_v24 = vpop.permute.xlu1 %431  ;;  %v610_v55 = vstv %s1688_s15  ;;  %v603_v44 = vmul.f32 %v1228_v42, %v602_v39  ;;  %v549_v56 = vmul.f32 %v1462_v51, %v548_v40  ;;  %s1779_s15 = sld [smem:[#allocation2 + $0x5d]] }
  0xb5   : > { %v424_v25 = vpop.permute.xlu0 %423  ;;  %v434_v32 = vadd.f32 %v432_v24, %v402_v13  ;;  %v599_v57 = vmul.f32 %v1228_v42, %v598_v34  ;;  %v556_v58 = vstv %s1693_s16  ;;  %v542_v62 = vrot.slane %v540_v37, 1  ;;  %s1783_s16 = sld [smem:[#allocation2 + $0x3f]] }
  0xb6   : > { %v426_v33 = vadd.f32 %v424_v25, %v398_v14  ;;  %v561_v63 = vmul.f32 %v1462_v51, %v560_v48  ;;  %v611_v3 = vmul.f32 %v1228_v42, %v610_v55  ;;  %v535_v4 = vrot.slane %v533_v49, 1 }
  0xb7   : > { %v462_v21 = vadd.f32 %v460_v23, %v434_v32  ;;  %v620_v6 = vstv %s1697_s17  ;;  %v616_v7 = vstv %s1699_s18  ;;  %v557_v11 = vmul.f32 %v1462_v51, %v556_v58  ;;  %s1785_s17 = sld [smem:[#allocation2 + $0x1b]]  ;;  %s1788_s18 = sld [smem:[#allocation2 + $0x5e]] }
  0xb8   : > { %v455_v41 = vadd.f32 %v453_v19, %v426_v33  ;;  %v478_v43 = vpop.permute.xlu1 %477  ;;  %v606_v12 = vstv %s1702_s19  ;;  %v671_v13 = vstv %s1706_s20  ;;  %v664_v14 = vstv %s1708_s21  ;;  %s1792_s19 = sld [smem:[#allocation2 + $0x45]]  ;;  %s1794_s20 = sld [smem:[#allocation2 + $0x21]] }
  0xb9   : > { %v469_v45 = vpop.permute.xlu0 %468  ;;  %v480_v52 = vadd.f32 %v478_v43, %v448_v20  ;;  %v621_v23 = vmul.f32 %v1473_v60, %v620_v6  ;;  %v617_v19 = vmul.f32 %v1473_v60, %v616_v7  ;;  %v628_v24 = vstv %s1714_s22  ;;  %s1800_s21 = sld [smem:[#allocation2 + $0x87]]  ;;  %s1802_s22 = sld [smem:[#allocation2 + $0x63]] }
  0xba   : > { %v471_v53 = vadd.f32 %v469_v45, %v441_v22  ;;  %v624_v25 = vstv %s1716_s23  ;;  %v607_v31 = vmul.f32 %v1228_v42, %v606_v12  ;;  %v672_v32 = vmul.f32 %v1473_v60, %v671_v13  ;;  %s1807_s23 = sld [smem:[#allocation2 + $0x8d]] }
  0xbb   : > { %v508_v61 = vadd.f32 %v507_v15, %v480_v52  ;;  %v665_v33 = vmul.f32 %v1473_v60, %v664_v14  ;;  %v685_v0 = vstv %s1721_s24  ;;  %v625_v42 = vmul.f32 %v1473_v60, %v624_v25  ;;  %s1812_s24 = sld [smem:[#allocation2 + $0x69]] }
  0xbc   : > { %v504_v59 = vadd.f32 %v503_v26, %v471_v53  ;;  %v496_v1 = vpop.permute.xlu1 %495  ;;  %v678_v34 = vstv %s1726_s26  ;;  %v734_v48 = vstv %s1731_s27  ;;  %v686_v49 = vmul.f32 %v1473_v60, %v685_v0  ;;  %s1822_s26 = sld [smem:[#allocation2 + $0x46]]  ;;  %s1824_s27 = sld [smem:[#allocation2 + $0x22]] }
  0xbd   : > { %v487_v2 = vpop.permute.xlu0 %486  ;;  %v498_v8 = vadd.f32 %v496_v1, %v462_v21  ;;  %v530_v9 = vadd.f32 %v528_v46, %v508_v61  ;;  %v667_v55 = vrot.slane %v665_v33, 1  ;;  %v730_v58 = vstv %s1738_s28  ;;  %s1827_s28 = sld [smem:[#allocation2 + $0x40]] }
  0xbe   : > { %v489_v5 = vadd.f32 %v487_v2, %v455_v41  ;;  %v523_v10 = vadd.f32 %v521_v54, %v504_v59  ;;  %v629_v41 = vmul.f32 %v1473_v60, %v628_v24  ;;  %v1250_v54 = vld [vmem:[%s1412_s25 + $0x18] sm:$0x7]  ;;  %v753_v61 = vstv %s1740_s29  ;;  %s1830_s29 = sld [smem:[#allocation2 + $0x1c]] }
  0xbf   : > { %v516_v15 = vadd.f32 %v515_v36, %v498_v8  ;;  %v554_v17 = vadd.f32 %v553_v47, %v530_v9  ;;  %v674_v47 = vrot.slane %v672_v32, 1  ;;  %v735_v2 = vmul.f32 %v1250_v54, %v734_v48 }
  0xc0   : > { %v512_v16 = vadd.f32 %v511_v38, %v489_v5  ;;  %v550_v30 = vadd.f32 %v549_v56, %v523_v10  ;;  %v576_v20 = vpop.permute.xlu1 %575  ;;  %v688_v8 = vrot.slane %v686_v49, 1  ;;  %v754_v12 = vmul.f32 %v1250_v54, %v753_v61 }
  0xc1   : > { %v568_v22 = vpop.permute.xlu0 %567  ;;  %v578_v51 = vadd.f32 %v576_v20, %v554_v17  ;;  %v544_v27 = vadd.f32 %v542_v62, %v516_v15  ;;  %v780_v13 = vstv %s1754_s5  ;;  %v767_v14 = vstv %s1756_s6  ;;  %s1843_s5 = sld [smem:[#allocation2 + $0x64]]  ;;  %s1846_s6 = sld [smem:[#allocation2 + $0x42]] }
  0xc2   : > { %v570_v26 = vadd.f32 %v568_v22, %v550_v30  ;;  %v537_v29 = vadd.f32 %v535_v4, %v512_v16  ;;  %v738_v4 = vstv %s1747_s3  ;;  %v760_v30 = vstv %s1758_s7  ;;  %s1838_s3 = sld [smem:[#allocation2 + $0x6a]]  ;;  %s1848_s7 = sld [smem:[#allocation2 + $0x1e]] }
  0xc3   : > { %v604_v35 = vadd.f32 %v603_v44, %v578_v51  ;;  %v562_v38 = vadd.f32 %v561_v63, %v544_v27  ;;  %v679_v44 = vmul.f32 %v1473_v60, %v678_v34  ;;  %v746_v60 = vstv %s1749_s4  ;;  %v1268_v51 = vld [vmem:[%s1412_s25 + $0x38] sm:$0x7]  ;;  %s1841_s4 = sld [smem:[#allocation2 + $0x88]] }
  0xc4   : > { %v600_v36 = vadd.f32 %v599_v57, %v570_v26  ;;  %v558_v39 = vadd.f32 %v557_v11, %v537_v29  ;;  %v592_v40 = vpop.permute.xlu1 %591  ;;  %v731_v11 = vmul.f32 %v1250_v54, %v730_v58  ;;  %v747_v17 = vmul.f32 %v1250_v54, %v746_v60 }
  0xc5   : > { %v584_v21 = vpop.permute.xlu0 %583  ;;  %v594_v37 = vadd.f32 %v592_v40, %v562_v38  ;;  %v622_v45 = vadd.f32 %v621_v23, %v604_v35  ;;  %v681_v5 = vrot.slane %v679_v44, 1  ;;  %v739_v22 = vmul.f32 %v1250_v54, %v738_v4 }
  0xc6   : > { %v586_v43 = vadd.f32 %v584_v21, %v558_v39  ;;  %v618_v46 = vadd.f32 %v617_v19, %v600_v36  ;;  %v830_v23 = vstv %s1762_s8  ;;  %v776_v19 = vstv %s1764_s11  ;;  %s1851_s8 = sld [smem:[#allocation2 + $0x43]]  ;;  %s1855_s11 = sld [smem:[#allocation2 + $0x1f]] }
  0xc7   : > { %v612_v52 = vadd.f32 %v611_v3, %v594_v37  ;;  %v742_v3 = vstv %s1742_s30  ;;  %v826_v26 = vstv %s1768_s12  ;;  %v768_v27 = vmul.f32 %v1250_v54, %v767_v14  ;;  %s1836_s30 = sld [smem:[#allocation2 + $0x8e]]  ;;  %s1859_s12 = sld [smem:[#allocation2 + $0x8a]] }
  0xc8   : > { %v608_v53 = vadd.f32 %v607_v31, %v586_v43  ;;  %v644_v56 = vpop.permute.xlu1 %643  ;;  %v743_v20 = vmul.f32 %v1250_v54, %v742_v3  ;;  %v756_v32 = vrot.slane %v754_v12, 1  ;;  %v781_v33 = vmul.f32 %v1492_v18, %v780_v13 }
  0xc9   : > { %v636_v57 = vpop.permute.xlu0 %635  ;;  %v646_v59 = vadd.f32 %v644_v56, %v622_v45  ;;  %v630_v63 = vadd.f32 %v629_v41, %v612_v52  ;;  %v788_v0 = vstv %s1772_s13  ;;  %v761_v35 = vmul.f32 %v1250_v54, %v760_v30  ;;  %s1861_s13 = sld [smem:[#allocation2 + $0x66]] }
  0xca   : > { %v638_v62 = vadd.f32 %v636_v57, %v618_v46  ;;  %v626_v1 = vadd.f32 %v625_v42, %v608_v53  ;;  %v749_v39 = vrot.slane %v747_v17, 1  ;;  %v838_v40 = vstv %s1774_s14  ;;  %s1867_s14 = sld [smem:[#allocation2 + $0x8b]] }
  0xcb   : > { %v676_v6 = vadd.f32 %v674_v47, %v646_v59  ;;  %v831_v21 = vmul.f32 %v1268_v51, %v830_v23  ;;  %v777_v41 = vmul.f32 %v1492_v18, %v776_v19  ;;  %v827_v42 = vmul.f32 %v1268_v51, %v826_v26 }
  0xcc   : > { %v669_v7 = vadd.f32 %v667_v55, %v638_v62  ;;  %v660_v9 = vpop.permute.xlu1 %659  ;;  %v784_v34 = vstv %s1779_s15  ;;  %v770_v45 = vrot.slane %v768_v27, 1  ;;  %v789_v46 = vmul.f32 %v1492_v18, %v788_v0  ;;  %s1869_s15 = sld [smem:[#allocation2 + $0x67]] }
  0xcd   : > { %v652_v10 = vpop.permute.xlu0 %651  ;;  %v662_v15 = vadd.f32 %v660_v9, %v630_v63  ;;  %v839_v49 = vmul.f32 %v1268_v51, %v838_v40  ;;  %v763_v52 = vrot.slane %v761_v35, 1  ;;  %v848_v53 = vstv %s1783_s16 }
  0xce   : > { %v654_v16 = vadd.f32 %v652_v10, %v626_v1  ;;  %v844_v54 = vstv %s1785_s17  ;;  %v785_v58 = vmul.f32 %v1492_v18, %v784_v34  ;;  %v834_v61 = vstv %s1788_s18 }
  0xcf   : > { %v690_v24 = vadd.f32 %v688_v8, %v662_v15  ;;  %v899_v59 = vstv %s1792_s19  ;;  %v892_v62 = vstv %s1794_s20  ;;  %v856_v8 = vstv %s1800_s21 }
  0xd0   : > { %v683_v25 = vadd.f32 %v681_v5, %v654_v16  ;;  %v706_v29 = vpop.permute.xlu1 %705  ;;  %v852_v5 = vstv %s1802_s22  ;;  %v835_v12 = vmul.f32 %v1268_v51, %v834_v61  ;;  %v900_v13 = vmul.f32 %v1503_v28, %v899_v59 }
  0xd1   : > { %v697_v31 = vpop.permute.xlu0 %696  ;;  %v708_v36 = vadd.f32 %v706_v29, %v676_v6  ;;  %v849_v6 = vmul.f32 %v1503_v28, %v848_v53  ;;  %v893_v14 = vmul.f32 %v1503_v28, %v892_v62  ;;  %v913_v15 = vstv %s1807_s23 }
  0xd2   : > { %v699_v38 = vadd.f32 %v697_v31, %v669_v7  ;;  %v845_v7 = vmul.f32 %v1503_v28, %v844_v54  ;;  %v857_v19 = vmul.f32 %v1503_v28, %v856_v8  ;;  %v902_v31 = vrot.slane %v900_v13, 1 }
  0xd3   : > { %v736_v37 = vadd.f32 %v735_v2, %v708_v36  ;;  %v895_v35 = vrot.slane %v893_v14, 1  ;;  %v981_v40 = vstv %s1822_s26  ;;  %v970_v62 = vstv %s1841_s4 }
  0xd4   : > { %v732_v43 = vadd.f32 %v731_v11, %v699_v38  ;;  %v724_v47 = vpop.permute.xlu1 %723  ;;  %v1058_v8 = vstv %s1851_s8  ;;  %v1054_v13 = vstv %s1855_s11 }
  0xd5   : > { %v715_v48 = vpop.permute.xlu0 %714  ;;  %v726_v55 = vadd.f32 %v724_v47, %v690_v24  ;;  %v758_v56 = vadd.f32 %v756_v32, %v736_v37  ;;  %v853_v24 = vmul.f32 %v1503_v28, %v852_v5  ;;  %v914_v32 = vmul.f32 %v1503_v28, %v913_v15 }
  0xd6   : > { %v717_v44 = vadd.f32 %v715_v48, %v683_v25  ;;  %v751_v57 = vadd.f32 %v749_v39, %v732_v43  ;;  %v906_v25 = vstv %s1812_s24  ;;  %v1290_v43 = vld [vmem:[%s1412_s25 + $0x1c] sm:$0x7] }
  0xd7   : > { %v744_v63 = vadd.f32 %v743_v20, %v726_v55  ;;  %v782_v2 = vadd.f32 %v781_v33, %v758_v56  ;;  %v907_v36 = vmul.f32 %v1503_v28, %v906_v25  ;;  %v962_v28 = vstv %s1827_s28 }
  0xd8   : > { %v740_v1 = vadd.f32 %v739_v22, %v717_v44  ;;  %v778_v3 = vadd.f32 %v777_v41, %v751_v57  ;;  %v804_v4 = vpop.permute.xlu1 %803  ;;  %v916_v48 = vrot.slane %v914_v32, 1  ;;  %v982_v54 = vmul.f32 %v1290_v43, %v981_v40 }
  0xd9   : > { %v796_v60 = vpop.permute.xlu0 %795  ;;  %v806_v18 = vadd.f32 %v804_v4, %v782_v2  ;;  %v772_v10 = vadd.f32 %v770_v45, %v744_v63  ;;  %v958_v45 = vstv %s1830_s29  ;;  %v995_v57 = vstv %s1836_s30 }
  0xda   : > { %v798_v9 = vadd.f32 %v796_v60, %v778_v3  ;;  %v765_v11 = vadd.f32 %v763_v52, %v740_v1  ;;  %v963_v61 = vmul.f32 %v1290_v43, %v962_v28  ;;  %v959_v59 = vmul.f32 %v1290_v43, %v958_v45 }
  0xdb   : > { %v832_v16 = vadd.f32 %v831_v21, %v806_v18  ;;  %v790_v30 = vadd.f32 %v789_v46, %v772_v10  ;;  %v974_v21 = vstv %s1824_s27  ;;  %v966_v63 = vstv %s1843_s5 }
  0xdc   : > { %v828_v17 = vadd.f32 %v827_v42, %v798_v9  ;;  %v786_v20 = vadd.f32 %v785_v58, %v765_v11  ;;  %v820_v22 = vpop.permute.xlu1 %819  ;;  %v975_v55 = vmul.f32 %v1290_v43, %v974_v21  ;;  %v988_v58 = vstv %s1838_s3  ;;  %v1308_v11 = vld [vmem:[%s1412_s25 + $0x3c] sm:$0x7]  ;;  %s1319_s25 = sshll.u32 %s1900_s10, 3 }
  0xdd   : > { %v812_v23 = vpop.permute.xlu0 %811  ;;  %v822_v51 = vadd.f32 %v820_v22, %v790_v30  ;;  %v850_v27 = vadd.f32 %v849_v6, %v832_v16  ;;  %v1008_v3 = vstv %s1846_s6  ;;  %v1004_v4 = vstv %s1848_s7  ;;  %s157_s18 = scalar_lea.vmem %s1897_s2, %s1319_s25 }
  0xde   : > { %v814_v26 = vadd.f32 %v812_v23, %v786_v20  ;;  %v846_v29 = vadd.f32 %v845_v7, %v828_v17  ;;  %v984_v7 = vrot.slane %v982_v54, 1  ;;  %v996_v5 = vmul.f32 %v1290_v43, %v995_v57 }
  0xdf   : > { %v840_v33 = vadd.f32 %v839_v49, %v822_v51  ;;  %v909_v49 = vrot.slane %v907_v36, 1  ;;  %v989_v18 = vmul.f32 %v1290_v43, %v988_v58  ;;  %v971_v14 = vmul.f32 %v1290_v43, %v970_v62 }
  0xe0   : > { %v836_v0 = vadd.f32 %v835_v12, %v814_v26  ;;  %v872_v38 = vpop.permute.xlu1 %871  ;;  %v977_v12 = vrot.slane %v975_v55, 1  ;;  %v967_v15 = vmul.f32 %v1290_v43, %v966_v63  ;;  %v1009_v16 = vmul.f32 %v1522_v50, %v1008_v3 }
  0xe1   : > { %v864_v39 = vpop.permute.xlu0 %863  ;;  %v874_v41 = vadd.f32 %v872_v38, %v850_v27  ;;  %v858_v34 = vadd.f32 %v857_v19, %v840_v33  ;;  %v1005_v17 = vmul.f32 %v1522_v50, %v1004_v4  ;;  %v1016_v22 = vstv %s1859_s12 }
  0xe2   : > { %v866_v42 = vadd.f32 %v864_v39, %v846_v29  ;;  %v854_v37 = vadd.f32 %v853_v24, %v836_v0  ;;  %v1012_v23 = vstv %s1861_s13  ;;  %v1059_v25 = vmul.f32 %v1308_v11, %v1058_v8 }
  0xe3   : > { %v904_v46 = vadd.f32 %v902_v31, %v874_v41  ;;  %v1055_v51 = vmul.f32 %v1308_v11, %v1054_v13  ;;  %v998_v26 = vrot.slane %v996_v5, 1  ;;  %v991_v27 = vrot.slane %v989_v18, 1 }
  0xe4   : > { %v897_v47 = vadd.f32 %v895_v35, %v866_v42  ;;  %v888_v52 = vpop.permute.xlu1 %887  ;;  %v1017_v0 = vmul.f32 %v1522_v50, %v1016_v22  ;;  %v1066_v35 = vstv %s1867_s14  ;;  %v1013_v36 = vmul.f32 %v1522_v50, %v1012_v23 }
  0xe5   : > { %v880_v53 = vpop.permute.xlu0 %879  ;;  %v890_v44 = vadd.f32 %v888_v52, %v858_v34  ;;  %v1062_v38 = vstv %s1869_s15 }
  0xe6   : > { %v882_v56 = vadd.f32 %v880_v53, %v854_v37 }
  0xe7   : > { %v918_v1 = vadd.f32 %v916_v48, %v890_v44 }
  0xe8   : > { %v911_v2 = vadd.f32 %v909_v49, %v882_v56  ;;  %v934_v60 = vpop.permute.xlu1 %933 }
  0xe9   : > { %v925_v6 = vpop.permute.xlu0 %924  ;;  %v936_v9 = vadd.f32 %v934_v60, %v904_v46  ;;  %v1067_v46 = vmul.f32 %v1308_v11, %v1066_v35 }
  0xea   : > { %v927_v10 = vadd.f32 %v925_v6, %v897_v47  ;;  %v1063_v47 = vmul.f32 %v1308_v11, %v1062_v38 }
  0xeb   : > { %v964_v30 = vadd.f32 %v963_v61, %v936_v9 }
  0xec   : > { %v960_v20 = vadd.f32 %v959_v59, %v927_v10  ;;  %v952_v19 = vpop.permute.xlu1 %951 }
  0xed   : > { %v943_v24 = vpop.permute.xlu0 %942  ;;  %v954_v29 = vadd.f32 %v952_v19, %v918_v1  ;;  %v986_v32 = vadd.f32 %v984_v7, %v964_v30 }
  0xee   : > { %v945_v31 = vadd.f32 %v943_v24, %v911_v2  ;;  %v979_v33 = vadd.f32 %v977_v12, %v960_v20 }
  0xef   : > { %v972_v39 = vadd.f32 %v971_v14, %v954_v29  ;;  %v1010_v21 = vadd.f32 %v1009_v16, %v986_v32 }
  0xf0   : > { %v968_v40 = vadd.f32 %v967_v15, %v945_v31  ;;  %v1006_v41 = vadd.f32 %v1005_v17, %v979_v33  ;;  %v1032_v42 = vpop.permute.xlu1 %1031 }
  0xf1   : > { %v1024_v34 = vpop.permute.xlu0 %1023  ;;  %v1034_v37 = vadd.f32 %v1032_v42, %v1010_v21  ;;  %v1000_v28 = vadd.f32 %v998_v26, %v972_v39 }
  0xf2   : > { %v1026_v43 = vadd.f32 %v1024_v34, %v1006_v41  ;;  %v993_v45 = vadd.f32 %v991_v27, %v968_v40 }
  0xf3   : > { %v1060_v50 = vadd.f32 %v1059_v25, %v1034_v37  ;;  %v1018_v49 = vadd.f32 %v1017_v0, %v1000_v28 }
  0xf4   : > { %v1056_v48 = vadd.f32 %v1055_v51, %v1026_v43  ;;  %v1014_v52 = vadd.f32 %v1013_v36, %v993_v45  ;;  %v1048_v53 = vpop.permute.xlu1 %1047 }
  0xf5   : > { %v1040_v54 = vpop.permute.xlu0 %1039  ;;  %1313 = vst.msk [vmem:[%s157_s18 + $0x2] sm:$0x3] %vm1069_vm0, %v1060_v50  ;;  %v1050_v55 = vadd.f32 %v1048_v53, %v1018_v49 }
  0xf6   : > { %1070 = vst.msk [vmem:[%s157_s18] sm:$0x3] %vm1069_vm0, %v1056_v48  ;;  %v1042_v44 = vadd.f32 %v1040_v54, %v1014_v52 }
  0xf7   : > { %v1068_v56 = vadd.f32 %v1067_v46, %v1050_v55 }
  0xf8   : > { %v1064_v57 = vadd.f32 %v1063_v47, %v1042_v44 }
  0xf9   : > { %1315 = vst.msk [vmem:[%s157_s18 + $0x6] sm:$0x3] %vm1069_vm0, %v1068_v56 }
  0xfa   : > { %1314 = vst.msk [vmem:[%s157_s18 + $0x4] sm:$0x3] %vm1069_vm0, %v1064_v57 }
  0xfb PF: > { %s13_s9 = sadd.s32 1, %s1365_s9  }
  0xfc   : > { %p10_p1 = scmp.ge.s32.totalorder %s13_s9, 4  }
  0xfe   :  { %12 = sbr.rel (!%p10_p1) target bundleno = 1 (0x1), region = 81 }
 0x105   :  { %1098 = vsyncpa [#allocation3], 1 }
 0x106   :  { %1100 = vsyncpa [#allocation3 + $0x1], 1 }

// kernel: gaussian_pyramid.7
= control target key start
LH: loop header
LB: loop body
LE: loop exit
PB: predicated region body
PF: predicated region fallthrough
CT: control target
= control target key end

     0   :  { %7 = vsyncpa [#allocation3], 0  ;;  %s1378_s9 = smov 0   ;;  %s1889_s0 = inlined_call_operand.vmem [shape: f32[144], index: 0, kind: input, shape index: {}]   ;;  %s1890_s1 = inlined_call_operand.vmem [shape: f32[2,16,2,2], index: 1, kind: input, shape index: {}]   ;;  %s1891_s2 = inlined_call_operand.vmem [shape: f32[2,4,1,1], index: 2, kind: output, shape index: {}]  }
   0x1 LB: > { %s1140_s10 = sadd.s32 4294967295, %s1359_s9   ;;  %p1142_p0 = scmp.ge.s32.totalorder %s1359_s9, 1  ;;  %s1359_s9 = sphi %s1378_s9, %s13_s9  }
   0x2   : > { %p91_p1 = scmp.lt.s32.totalorder %s1359_s9, 3  ;;  %s104_s13 = sshll.u32 %s1889_s0, 4  ;;  %s105_s13 = int_to_ptr.vmem [resolvable:$true] %s104_s13 }
   0x3   : > { %p1322_p3 = scmp.eq.s32.totalorder %s1140_s10, 0  ;;  %s1334_s15 = scalar_lea.vmem %s105_s13, 32 }
   0x4   : > { %p1389_p2 = pnand %p1142_p0, %p91_p1  ;;  %p1335_p6 = scmp.ne.s32.totalorder %s105_s13, %s1334_s15 }
   0x5   : > { %p1342_p10 = scmp.lt.s32.totalorder %s105_s13, %s105_s13  ;;  %p1343_p11 = scmp.lt.s32.totalorder %s1334_s15, %s1334_s15 }
   0x6   : > { %p1318_p4 = pneg %p1389_p2 }
   0x7   : > { %p1344_p12 = por %p1343_p11, %p1342_p10 }
   0x8   : > { %p1319_p5 = pnand %p1322_p3, %p1318_p4 }
   0xa   : > { %p1336_p7 = pneg %p1319_p5 }
   0xc   : > { %p1337_p8 = pnand %p1336_p7, %p1335_p6 }
   0xe   : > { %p1338_p9 = pneg %p1337_p8 }
  0x10   : > { %p1345_p13 = pnand %p1344_p12, %p1338_p9 }
  0x12   : > { %1348 = shalt.err (!%p1345_p13)
}
  0x13   : > { %s1361_s16 = smov [#allocation2]   ;;  %125 = sbr.rel (%p1389_p2) target bundleno = 251 (0xfb), region = 28 }
  0x14   : > { %1321 = dma.vmem_to_smem (!%p1319_p5), %s105_s13, 32, %s1361_s16, [#allocation3]  }
  0x1a   : > { %1354 = dma.done.wait (%p1322_p3), [#allocation3], 32  }
  0x1b   : > { %1356 = vsyncadd (%p1322_p3), [#allocation3], 4294967264 }
  0x1c   : > { %131 = sfence }
  0x1d   : > { %p147_p0 = scmp.lt.s32.totalorder %s1140_s10, 1  ;;  %s1155_s17 = sld [smem:[#allocation2 + $0x4a]]  ;;  %vm1067_vm0 = vcmask 0  }
  0x1e   : > { %s1153_s18 = sld [smem:[#allocation2 + $0x2]]  ;;  %s1156_s19 = sld [smem:[#allocation2 + $0x6e]] }
  0x1f   : > { %s1894_s10 = smov (!%p147_p0, %s1140_s10), 1  ;;  %s1154_s20 = sld [smem:[#allocation2 + $0x26]] }
  0x20   : > { %s1313_s21 = sshll.u32 %s1894_s10, 5  ;;  %s1162_s22 = sld [smem:[#allocation2 + $0x2c]] }
  0x21   : > { %s1406_s25 = scalar_lea.vmem %s1890_s1, %s1313_s21  ;;  %s1161_s26 = sld [smem:[#allocation2 + $0x8]] }
  0x22   : > { %v1409_v0 = vld [vmem:[%s1406_s25] sm:$0x3]  ;;  %s1164_s27 = sld [smem:[#allocation2 + $0x74]]  ;;  %s1163_s28 = sld [smem:[#allocation2 + $0x50]]  ;;  %v1426_v21 = vld [vmem:[%s1406_s25 + $0x10] sm:$0x3] }
  0x23   : > { %v190_v1 = vstv %s1155_s17  ;;  %s1362_s29 = smov 127   ;;  %s1180_s30 = sld [smem:[#allocation2 + $0x29]]  ;;  %v1437_v30 = vld [vmem:[%s1406_s25 + $0x2] sm:$0x3]  ;;  %v1456_v51 = vld [vmem:[%s1406_s25 + $0x12] sm:$0x3] }
  0x24   : > { %v174_v2 = vstv %s1153_s18  ;;  %v191_v3 = vmul.f32 %v190_v1, %v1409_v0  ;;  %v198_v5 = vstv %s1156_s19  ;;  %s1179_s3 = sld [smem:[#allocation2 + $0x5]]  ;;  %s1182_s4 = sld [smem:[#allocation2 + $0x71]]  ;;  %v1467_v60 = vld [vmem:[%s1406_s25 + $0x4] sm:$0x3] }
  0x25   : > { %v175_v4 = vmul.f32 %v174_v2, %v1409_v0  ;;  %v182_v6 = vstv %s1154_s20  ;;  %v199_v7 = vmul.f32 %v198_v5, %v1409_v0  ;;  %s1181_s5 = sld [smem:[#allocation2 + $0x4d]]  ;;  %s1194_s6 = sld [smem:[#allocation2 + $0x2f]] }
  0x26   : > { %193 = vrot.lane.b32.xlu1 %v191_v3, %s1362_s29  ;;  %v183_v8 = vmul.f32 %v182_v6, %v1409_v0  ;;  %v243_v9 = vstv %s1162_s22  ;;  %s1193_s7 = sld [smem:[#allocation2 + $0xb]]  ;;  %s1196_s8 = sld [smem:[#allocation2 + $0x77]] }
  0x27   : > { %177 = vrot.lane.b32.xlu0 %v175_v4, %s1362_s29  ;;  %v244_v10 = vmul.f32 %v243_v9, %v1409_v0  ;;  %v234_v11 = vstv %s1161_s26  ;;  %s1195_s11 = sld [smem:[#allocation2 + $0x53]]  ;;  %s1202_s12 = sld [smem:[#allocation2 + $0x35]] }
  0x28   : > { %v235_v12 = vmul.f32 %v234_v11, %v1409_v0  ;;  %v261_v13 = vstv %s1164_s27  ;;  %v252_v14 = vstv %s1163_s28  ;;  %s1201_s13 = sld [smem:[#allocation2 + $0x11]]  ;;  %s1204_s14 = sld [smem:[#allocation2 + $0x7d]] }
  0x29   : > { %v246_v15 = vrot.slane %v244_v10, 1  ;;  %v262_v17 = vmul.f32 %v261_v13, %v1409_v0  ;;  %v253_v18 = vmul.f32 %v252_v14, %v1409_v0  ;;  %v342_v22 = vstv %s1180_s30  ;;  %s1203_s15 = sld [smem:[#allocation2 + $0x59]]  ;;  %s1220_s16 = sld [smem:[#allocation2 + $0x32]] }
  0x2a   : > { %201 = vrot.lane.b32.xlu1 %v199_v7, %s1362_s29  ;;  %v237_v16 = vrot.slane %v235_v12, 1  ;;  %v334_v23 = vstv %s1179_s3  ;;  %v343_v24 = vmul.f32 %v1426_v21, %v342_v22  ;;  %v358_v26 = vstv %s1182_s4  ;;  %s1219_s17 = sld [smem:[#allocation2 + $0xe]]  ;;  %s1222_s18 = sld [smem:[#allocation2 + $0x7a]] }
  0x2b   : > { %185 = vrot.lane.b32.xlu0 %v183_v8, %s1362_s29  ;;  %v264_v19 = vrot.slane %v262_v17, 1  ;;  %v255_v20 = vrot.slane %v253_v18, 1  ;;  %v335_v25 = vmul.f32 %v1426_v21, %v334_v23  ;;  %v350_v27 = vstv %s1181_s5  ;;  %s1221_s19 = sld [smem:[#allocation2 + $0x56]]  ;;  %s1234_s20 = sld [smem:[#allocation2 + $0x38]]  ;;  %v1486_v18 = vld [vmem:[%s1406_s25 + $0x14] sm:$0x3] }
  0x2c   : > { %v359_v28 = vmul.f32 %v1426_v21, %v358_v26  ;;  %v351_v29 = vmul.f32 %v1426_v21, %v350_v27  ;;  %v410_v31 = vstv %s1194_s6  ;;  %v402_v32 = vstv %s1193_s7  ;;  %s1233_s21 = sld [smem:[#allocation2 + $0x14]]  ;;  %s1236_s22 = sld [smem:[#allocation2 + $0x80]] }
  0x2d   : > { %v411_v33 = vmul.f32 %v1437_v30, %v410_v31  ;;  %v403_v34 = vmul.f32 %v1437_v30, %v402_v32  ;;  %v426_v35 = vstv %s1196_s8  ;;  %v418_v36 = vstv %s1195_s11  ;;  %s1235_s23 = sld [smem:[#allocation2 + $0x5c]]  ;;  %s1242_s24 = sld [smem:[#allocation2 + $0x3e]] }
  0x2e   : > { %247 = vrot.lane.b32.xlu1 %v246_v15, %s1362_s29  ;;  %v471_v37 = vstv %s1202_s12  ;;  %v462_v38 = vstv %s1201_s13  ;;  %v427_v39 = vmul.f32 %v1437_v30, %v426_v35  ;;  %v419_v40 = vmul.f32 %v1437_v30, %v418_v36  ;;  %s1241_s26 = sld [smem:[#allocation2 + $0x1a]]  ;;  %s1244_s27 = sld [smem:[#allocation2 + $0x86]] }
  0x2f   : > { %238 = vrot.lane.b32.xlu0 %v237_v16, %s1362_s29  ;;  %v472_v41 = vmul.f32 %v1437_v30, %v471_v37  ;;  %v463_v42 = vmul.f32 %v1437_v30, %v462_v38  ;;  %v489_v43 = vstv %s1204_s14  ;;  %v480_v44 = vstv %s1203_s15  ;;  %s1243_s28 = sld [smem:[#allocation2 + $0x62]]  ;;  %s1260_s30 = sld [smem:[#allocation2 + $0x3b]] }
  0x30   : > { %v490_v47 = vmul.f32 %v1437_v30, %v489_v43  ;;  %v481_v48 = vmul.f32 %v1437_v30, %v480_v44  ;;  %v570_v52 = vstv %s1220_s16  ;;  %v562_v53 = vstv %s1219_s17  ;;  %s1259_s3 = sld [smem:[#allocation2 + $0x17]]  ;;  %s1262_s4 = sld [smem:[#allocation2 + $0x83]] }
  0x31   : > { %v474_v45 = vrot.slane %v472_v41, 1  ;;  %v465_v46 = vrot.slane %v463_v42, 1  ;;  %v571_v54 = vmul.f32 %v1456_v51, %v570_v52  ;;  %v563_v55 = vmul.f32 %v1456_v51, %v562_v53  ;;  %s1261_s5 = sld [smem:[#allocation2 + $0x5f]]  ;;  %s1274_s6 = sld [smem:[#allocation2 + $0x41]] }
  0x32   : > { %265 = vrot.lane.b32.xlu1 %v264_v19, %s1362_s29  ;;  %v492_v49 = vrot.slane %v490_v47, 1  ;;  %v483_v50 = vrot.slane %v481_v48, 1  ;;  %v586_v56 = vstv %s1222_s18  ;;  %v578_v57 = vstv %s1221_s19  ;;  %s1273_s7 = sld [smem:[#allocation2 + $0x1d]]  ;;  %s1276_s8 = sld [smem:[#allocation2 + $0x89]] }
  0x33   : > { %256 = vrot.lane.b32.xlu0 %v255_v20, %s1362_s29  ;;  %v587_v58 = vmul.f32 %v1456_v51, %v586_v56  ;;  %v579_v59 = vmul.f32 %v1456_v51, %v578_v57  ;;  %v638_v61 = vstv %s1234_s20  ;;  %v630_v62 = vstv %s1233_s21  ;;  %s1275_s11 = sld [smem:[#allocation2 + $0x65]]  ;;  %s1282_s12 = sld [smem:[#allocation2 + $0x47]] }
  0x34   : > { %v639_v63 = vmul.f32 %v1467_v60, %v638_v61  ;;  %v631_v1 = vmul.f32 %v1467_v60, %v630_v62  ;;  %v654_v2 = vstv %s1236_s22  ;;  %v646_v3 = vstv %s1235_s23  ;;  %s1281_s13 = sld [smem:[#allocation2 + $0x23]]  ;;  %s1284_s14 = sld [smem:[#allocation2 + $0x8f]] }
  0x35   : > { %v699_v4 = vstv %s1242_s24  ;;  %v690_v5 = vstv %s1241_s26  ;;  %v655_v6 = vmul.f32 %v1467_v60, %v654_v2  ;;  %v647_v7 = vmul.f32 %v1467_v60, %v646_v3  ;;  %s1283_s15 = sld [smem:[#allocation2 + $0x6b]]  ;;  %s1300_s16 = sld [smem:[#allocation2 + $0x44]] }
  0x36   : > { %345 = vrot.lane.b32.xlu1 %v343_v24, %s1362_s29  ;;  %v700_v8 = vmul.f32 %v1467_v60, %v699_v4  ;;  %v691_v9 = vmul.f32 %v1467_v60, %v690_v5  ;;  %v717_v10 = vstv %s1244_s27  ;;  %v708_v11 = vstv %s1243_s28  ;;  %s1299_s17 = sld [smem:[#allocation2 + $0x20]]  ;;  %s1302_s18 = sld [smem:[#allocation2 + $0x8c]]  ;;  %v1165_v5 = vld [vmem:[%s1406_s25 + $0x8] sm:$0x3] }
  0x37   : > { %337 = vrot.lane.b32.xlu0 %v335_v25, %s1362_s29  ;;  %v718_v14 = vmul.f32 %v1467_v60, %v717_v10  ;;  %v709_v15 = vmul.f32 %v1467_v60, %v708_v11  ;;  %v798_v19 = vstv %s1260_s30  ;;  %v790_v20 = vstv %s1259_s3  ;;  %s1301_s19 = sld [smem:[#allocation2 + $0x68]]  ;;  %s1158_s22 = sld [smem:[#allocation2 + $0x2a]] }
  0x38   : > { %v702_v12 = vrot.slane %v700_v8, 1  ;;  %v693_v13 = vrot.slane %v691_v9, 1  ;;  %v799_v22 = vmul.f32 %v1486_v18, %v798_v19  ;;  %v791_v23 = vmul.f32 %v1486_v18, %v790_v20  ;;  %s1528_s20 = sld [smem:[#allocation2 + $0x48]]  ;;  %s1157_s23 = sld [smem:[#allocation2 + $0x6]] }
  0x39   : > { %v720_v16 = vrot.slane %v718_v14, 1  ;;  %v711_v17 = vrot.slane %v709_v15, 1  ;;  %v814_v24 = vstv %s1262_s4  ;;  %v806_v25 = vstv %s1261_s5  ;;  %s1530_s21 = sld [smem:[#allocation2]]  ;;  %s1532_s24 = sld [smem:[#allocation2 + $0x6c]] }
  0x3a   : > { %361 = vrot.lane.b32.xlu1 %v359_v28, %s1362_s29  ;;  %v815_v26 = vmul.f32 %v1486_v18, %v814_v24  ;;  %v807_v27 = vmul.f32 %v1486_v18, %v806_v25  ;;  %v1497_v28 = vld [vmem:[%s1406_s25 + $0x6] sm:$0x3]  ;;  %v858_v31 = vstv %s1273_s7  ;;  %v874_v35 = vstv %s1275_s11  ;;  %s1534_s26 = sld [smem:[#allocation2 + $0x72]]  ;;  %s1536_s27 = sld [smem:[#allocation2 + $0x24]] }
  0x3b   : > { %353 = vrot.lane.b32.xlu0 %v351_v29, %s1362_s29  ;;  %v866_v29 = vstv %s1274_s6  ;;  %v927_v36 = vstv %s1282_s12  ;;  %v918_v37 = vstv %s1281_s13  ;;  %s1538_s28 = sld [smem:[#allocation2 + $0x25]]  ;;  %s1542_s30 = sld [smem:[#allocation2 + $0x1]] }
  0x3c   : > { %v867_v32 = vmul.f32 %v1497_v28, %v866_v29  ;;  %v919_v41 = vmul.f32 %v1497_v28, %v918_v37  ;;  %v945_v42 = vstv %s1284_s14  ;;  %v936_v43 = vstv %s1283_s15  ;;  %s1544_s3 = sld [smem:[#allocation2 + $0x6d]]  ;;  %s1546_s4 = sld [smem:[#allocation2 + $0x49]] }
  0x3d   : > { %v937_v47 = vmul.f32 %v1497_v28, %v936_v43  ;;  %v1026_v52 = vstv %s1300_s16  ;;  %v1018_v53 = vstv %s1299_s17  ;;  %v1042_v56 = vstv %s1302_s18  ;;  %s1548_s5 = sld [smem:[#allocation2 + $0x2b]]  ;;  %s1550_s6 = sld [smem:[#allocation2 + $0x7]] }
  0x3e   : > { %413 = vrot.lane.b32.xlu1 %v411_v33, %s1362_s29  ;;  %v859_v33 = vmul.f32 %v1497_v28, %v858_v31  ;;  %v1034_v57 = vstv %s1301_s19  ;;  %s1552_s7 = sld [smem:[#allocation2 + $0x27]]  ;;  %v213_v61 = vstv %s1158_s22  ;;  %v206_v62 = vstv %s1157_s23  ;;  %s1559_s11 = sld [smem:[#allocation2 + $0x28]] }
  0x3f   : > { %405 = vrot.lane.b32.xlu0 %v403_v34, %s1362_s29  ;;  %v882_v34 = vstv %s1276_s8  ;;  %s1554_s8 = sld [smem:[#allocation2 + $0x73]]  ;;  %v170_v3 = vstv %s1532_s24  ;;  %s1567_s13 = sld [smem:[#allocation2 + $0x4f]]  ;;  %v207_v8 = vmul.f32 %v206_v62, %v1409_v0 }
  0x40   : > { %v883_v38 = vmul.f32 %v1497_v28, %v882_v34  ;;  %v227_v2 = vstv %s1534_s26  ;;  %v162_v4 = vstv %s1536_s27  ;;  %s1565_s12 = sld [smem:[#allocation2 + $0x3]]  ;;  %s1572_s14 = sld [smem:[#allocation2 + $0x4]] }
  0x41   : > { %s1574_s15 = sld [smem:[#allocation2 + $0x6f]]  ;;  %s1589_s16 = sld [smem:[#allocation2 + $0x70]] }
  0x42   : > { %429 = vrot.lane.b32.xlu1 %v427_v39, %s1362_s29  ;;  %v875_v39 = vmul.f32 %v1497_v28, %v874_v35  ;;  %v284_v20 = vstv %s1544_s3  ;;  %s1592_s17 = sld [smem:[#allocation2 + $0x4b]]  ;;  %s1599_s18 = sld [smem:[#allocation2 + $0x2d]] }
  0x43   : > { %421 = vrot.lane.b32.xlu0 %v419_v40, %s1362_s29  ;;  %v928_v40 = vmul.f32 %v1497_v28, %v927_v36  ;;  %v295_v24 = vstv %s1548_s5  ;;  %v288_v25 = vstv %s1550_s6  ;;  %v1595_v34 = vmul.f32 %v1165_v5, %v284_v20  ;;  %s1601_s19 = sld [smem:[#allocation2 + $0x9]]  ;;  %s1615_s22 = sld [smem:[#allocation2 + $0xf]] }
  0x44   : > { %v322_v31 = vstv %s1552_s7  ;;  %s1618_s23 = sld [smem:[#allocation2 + $0x75]]  ;;  %s1620_s24 = sld [smem:[#allocation2 + $0x51]] }
  0x45   : > { %v930_v44 = vrot.slane %v928_v40, 1  ;;  %v289_v40 = vmul.f32 %v1165_v5, %v288_v25  ;;  %v323_v43 = vmul.f32 %v1426_v21, %v322_v31  ;;  %s1627_s26 = sld [smem:[#allocation2 + $0x7b]]  ;;  %s1632_s27 = sld [smem:[#allocation2 + $0x57]] }
  0x46   : > { %475 = vrot.lane.b32.xlu1 %v474_v45, %s1362_s29  ;;  %v921_v45 = vrot.slane %v919_v41, 1  ;;  %s1649_s3 = sld [smem:[#allocation2 + $0x76]]  ;;  %s1657_s5 = sld [smem:[#allocation2 + $0x10]] }
  0x47   : > { %466 = vrot.lane.b32.xlu0 %v465_v46, %s1362_s29  ;;  %v946_v46 = vmul.f32 %v1497_v28, %v945_v42  ;;  %s1662_s6 = sld [smem:[#allocation2 + $0x30]]  ;;  %s1664_s7 = sld [smem:[#allocation2 + $0x7c]] }
  0x49   : > { %v948_v48 = vrot.slane %v946_v46, 1  ;;  %v318_v46 = vstv %s1565_s12  ;;  %s1672_s12 = sld [smem:[#allocation2 + $0xc]] }
  0x4a   : > { %493 = vrot.lane.b32.xlu1 %v492_v49, %s1362_s29  ;;  %v939_v49 = vrot.slane %v937_v47, 1  ;;  %v368_v47 = vstv %s1572_s14  ;;  %s1680_s14 = sld [smem:[#allocation2 + $0x78]] }
  0x4b   : > { %484 = vrot.lane.b32.xlu0 %v483_v50, %s1362_s29  ;;  %v1516_v50 = vld [vmem:[%s1406_s25 + $0x16] sm:$0x3] }
  0x4e   : > { %573 = vrot.lane.b32.xlu1 %v571_v54, %s1362_s29  ;;  %v1027_v54 = vmul.f32 %v1516_v50, %v1026_v52 }
  0x4f   : > { %565 = vrot.lane.b32.xlu0 %v563_v55, %s1362_s29  ;;  %v1019_v55 = vmul.f32 %v1516_v50, %v1018_v53 }
  0x52   : > { %589 = vrot.lane.b32.xlu1 %v587_v58, %s1362_s29  ;;  %v1043_v58 = vmul.f32 %v1516_v50, %v1042_v56 }
  0x53   : > { %581 = vrot.lane.b32.xlu0 %v579_v59, %s1362_s29  ;;  %v1035_v59 = vmul.f32 %v1516_v50, %v1034_v57 }
  0x56   : > { %641 = vrot.lane.b32.xlu1 %v639_v63, %s1362_s29  ;;  %v166_v63 = vstv %s1528_s20  ;;  %s1608_s20 = sld [smem:[#allocation2 + $0x4c]] }
  0x57   : > { %633 = vrot.lane.b32.xlu0 %v631_v1, %s1362_s29  ;;  %v158_v1 = vstv %s1530_s21  ;;  %v167_v10 = vmul.f32 %v166_v63, %v1409_v0  ;;  %s1613_s21 = sld [smem:[#allocation2 + $0x33]] }
  0x58   : > { %v159_v11 = vmul.f32 %v158_v1, %v1409_v0 }
  0x5a   : > { %657 = vrot.lane.b32.xlu1 %v655_v6, %s1362_s29  ;;  %v276_v6 = vstv %s1538_s28  ;;  %s1637_s28 = sld [smem:[#allocation2 + $0x2e]] }
  0x5b   : > { %649 = vrot.lane.b32.xlu0 %v647_v7, %s1362_s29  ;;  %v214_v7 = vmul.f32 %v213_v61, %v1409_v0  ;;  %v277_v19 = vmul.f32 %v1165_v5, %v276_v6  ;;  %v291_v61 = vrot.slane %v289_v40, 1  ;;  %v394_v40 = vstv %s1620_s24  ;;  %s1715_s24 = sld [smem:[#allocation2 + $0x84]] }
  0x5c   : > { %v376_v25 = vstv %s1608_s20  ;;  %s1700_s20 = sld [smem:[#allocation2 + $0x3c]] }
  0x5e   : > { %703 = vrot.lane.b32.xlu1 %v702_v12, %s1362_s29  ;;  %v272_v12 = vstv %s1542_s30  ;;  %s1647_s30 = sld [smem:[#allocation2 + $0x34]] }
  0x5f   : > { %694 = vrot.lane.b32.xlu0 %v693_v13, %s1362_s29  ;;  %v1580_v13 = vmul.f32 %v227_v2, %v1409_v0  ;;  %v273_v29 = vmul.f32 %v1165_v5, %v272_v12  ;;  %v319_v2 = vmul.f32 %v1426_v21, %v318_v46  ;;  %v455_v46 = vstv %s1627_s26  ;;  %s1720_s26 = sld [smem:[#allocation2 + $0x60]] }
  0x62   : > { %721 = vrot.lane.b32.xlu1 %v720_v16, %s1362_s29  ;;  %v171_v16 = vmul.f32 %v170_v3, %v1409_v0  ;;  %v380_v3 = vstv %s1589_s16  ;;  %s1687_s16 = sld [smem:[#allocation2 + $0x54]] }
  0x63   : > { %712 = vrot.lane.b32.xlu0 %v711_v17, %s1362_s29  ;;  %v163_v17 = vmul.f32 %v162_v4, %v1409_v0 }
  0x66   : > { %801 = vrot.lane.b32.xlu1 %v799_v22, %s1362_s29 }
  0x67   : > { %793 = vrot.lane.b32.xlu0 %v791_v23, %s1362_s29  ;;  %v280_v23 = vstv %s1546_s4  ;;  %s1655_s4 = sld [smem:[#allocation2 + $0x52]] }
  0x68   : > { %v281_v37 = vmul.f32 %v1165_v5, %v280_v23 }
  0x6a   : > { %817 = vrot.lane.b32.xlu1 %v815_v26, %s1362_s29  ;;  %v216_v26 = vrot.slane %v214_v7, 1 }
  0x6b   : > { %809 = vrot.lane.b32.xlu0 %v807_v27, %s1362_s29  ;;  %v209_v27 = vrot.slane %v207_v8, 1  ;;  %v326_v8 = vstv %s1592_s17  ;;  %s1691_s17 = sld [smem:[#allocation2 + $0x36]] }
  0x6e   : > { %869 = vrot.lane.b32.xlu1 %v867_v32, %s1362_s29 }
  0x6f   : > { %861 = vrot.lane.b32.xlu0 %v859_v33, %s1362_s29  ;;  %v230_v33 = vrot.slane %v1580_v13, 1 }
  0x72   : > { %885 = vrot.lane.b32.xlu1 %v883_v38, %s1362_s29  ;;  %v296_v38 = vmul.f32 %v1165_v5, %v295_v24  ;;  %v327_v24 = vmul.f32 %v1426_v21, %v326_v8 }
  0x73   : > { %877 = vrot.lane.b32.xlu0 %v875_v39, %s1362_s29  ;;  %v372_v39 = vstv %s1559_s11  ;;  %s1670_s11 = sld [smem:[#allocation2 + $0x31]] }
  0x76   : > { %931 = vrot.lane.b32.xlu1 %v930_v44, %s1362_s29  ;;  %v1605_v44 = vld [vmem:[%s1406_s25 + $0x18] sm:$0x3] }
  0x77   : > { %922 = vrot.lane.b32.xlu0 %v921_v45, %s1362_s29  ;;  %v302_v45 = vstv %s1567_s13  ;;  %v369_v4 = vmul.f32 %v1605_v44, %v368_v47  ;;  %s1676_s13 = sld [smem:[#allocation2 + $0xd]] }
  0x78   : > { %v303_v62 = vmul.f32 %v1165_v5, %v302_v45 }
  0x7a   : > { %949 = vrot.lane.b32.xlu1 %v948_v48, %s1362_s29 }
  0x7b   : > { %940 = vrot.lane.b32.xlu0 %v939_v49, %s1362_s29  ;;  %v330_v49 = vstv %s1574_s15  ;;  %s1682_s15 = sld [smem:[#allocation2 + $0x79]] }
  0x7c   : > { %v331_v7 = vmul.f32 %v1426_v21, %v330_v49 }
  0x7e   : > { %1029 = vrot.lane.b32.xlu1 %v1027_v54, %s1362_s29 }
  0x7f   : > { %1021 = vrot.lane.b32.xlu0 %v1019_v55, %s1362_s29 }
  0x82   : > { %1045 = vrot.lane.b32.xlu1 %v1043_v58, %s1362_s29  ;;  %v298_v58 = vrot.slane %v296_v38, 1 }
  0x83   : > { %1037 = vrot.lane.b32.xlu0 %v1035_v59, %s1362_s29  ;;  %s1540_s29 = sld [smem:[#allocation2 + $0x4e]]  ;;  %v373_v59 = vmul.f32 %v1605_v44, %v372_v39  ;;  %v398_v39 = vstv %s1618_s23  ;;  %s1710_s23 = sld [smem:[#allocation2 + $0x5a]] }
  0x89   : > { %v220_v9 = vstv %s1540_s29  ;;  %s1645_s29 = sld [smem:[#allocation2 + $0xa]] }
  0x8a   : > { %v221_v22 = vmul.f32 %v220_v9, %v1409_v0  ;;  %v309_v0 = vstv %s1554_s8  ;;  %s1666_s8 = sld [smem:[#allocation2 + $0x58]] }
  0x8b   : > { %v310_v48 = vmul.f32 %v1165_v5, %v309_v0 }
  0x8c   : > { %v223_v42 = vrot.slane %v221_v22, 1 }
  0x8d   : > { %v312_v6 = vrot.slane %v310_v48, 1 }
  0x98   : > { %v194_v14 = vpop.permute.xlu1 %193 }
  0x99   : > { %v178_v15 = vpop.permute.xlu0 %177  ;;  %v196_v52 = vadd.f32 %v194_v14, %v167_v10  ;;  %v381_v14 = vmul.f32 %v1605_v44, %v380_v3 }
  0x9a   : > { %v180_v32 = vadd.f32 %v178_v15, %v159_v11  ;;  %v305_v15 = vrot.slane %v303_v62, 1 }
  0x9b   : > { %v225_v11 = vadd.f32 %v223_v42, %v196_v52 }
  0x9c   : > { %v202_v35 = vpop.permute.xlu1 %201  ;;  %v211_v55 = vadd.f32 %v209_v27, %v180_v32  ;;  %v434_v27 = vstv %s1615_s22  ;;  %s1708_s22 = sld [smem:[#allocation2 + $0x7e]] }
  0x9d   : > { %v186_v36 = vpop.permute.xlu0 %185  ;;  %v204_v53 = vadd.f32 %v202_v35, %v171_v16  ;;  %v390_v16 = vstv %s1599_s18  ;;  %v435_v45 = vmul.f32 %v1437_v30, %v434_v27  ;;  %s1693_s18 = sld [smem:[#allocation2 + $0x12]] }
  0x9e   : > { %v188_v41 = vadd.f32 %v186_v36, %v163_v17  ;;  %v386_v17 = vstv %s1601_s19  ;;  %v391_v36 = vmul.f32 %v1437_v30, %v390_v16  ;;  %v512_v16 = vstv %s1649_s3  ;;  %s1696_s19 = sld [smem:[#allocation2 + $0x55]]  ;;  %s1741_s3 = sld [smem:[#allocation2 + $0x5b]] }
  0x9f   : > { %v232_v10 = vadd.f32 %v230_v33, %v204_v53  ;;  %v387_v38 = vmul.f32 %v1437_v30, %v386_v17  ;;  %v508_v17 = vstv %s1655_s4  ;;  %s1743_s4 = sld [smem:[#allocation2 + $0x19]] }
  0xa0   : > { %v218_v54 = vadd.f32 %v216_v26, %v188_v41  ;;  %v248_v56 = vpop.permute.xlu1 %247  ;;  %v441_v26 = vstv %s1613_s21  ;;  %s1702_s21 = sld [smem:[#allocation2 + $0x18]] }
  0xa1   : > { %v239_v57 = vpop.permute.xlu0 %238 }
  0xa2   : > { %v250_v63 = vadd.f32 %v248_v56, %v218_v54  ;;  %v241_v1 = vadd.f32 %v239_v57, %v211_v55  ;;  %v399_v55 = vmul.f32 %v1437_v30, %v398_v39  ;;  %v448_v56 = vstv %s1632_s27  ;;  %s1725_s27 = sld [smem:[#allocation2 + $0x37]] }
  0xa3   : > { %v600_v39 = vstv %s1670_s11  ;;  %s1758_s11 = sld [smem:[#allocation2 + $0x15]] }
  0xa4   : > { %v278_v5 = vadd.f32 %v277_v19, %v250_v63  ;;  %v274_v9 = vadd.f32 %v273_v29, %v241_v1  ;;  %v266_v12 = vpop.permute.xlu1 %265  ;;  %v504_v63 = vstv %s1637_s28  ;;  %v456_v1 = vmul.f32 %v1437_v30, %v455_v46  ;;  %s1732_s28 = sld [smem:[#allocation2 + $0x13]] }
  0xa5   : > { %v257_v13 = vpop.permute.xlu0 %256  ;;  %v268_v20 = vadd.f32 %v266_v12, %v232_v10  ;;  %v523_v10 = vstv %s1647_s30  ;;  %s1736_s30 = sld [smem:[#allocation2 + $0x7f]] }
  0xa6   : > { %v259_v22 = vadd.f32 %v257_v13, %v225_v11  ;;  %v300_v23 = vadd.f32 %v298_v58, %v278_v5  ;;  %v293_v19 = vadd.f32 %v291_v61, %v274_v9  ;;  %v500_v9 = vstv %s1645_s29  ;;  %s1734_s29 = sld [smem:[#allocation2 + $0x3d]] }
  0xa7   : > { %v286_v29 = vadd.f32 %v1595_v34, %v268_v20 }
  0xa8   : > { %v282_v31 = vadd.f32 %v281_v37, %v259_v22  ;;  %v324_v32 = vadd.f32 %v323_v43, %v300_v23  ;;  %v320_v33 = vadd.f32 %v319_v2, %v293_v19  ;;  %v346_v0 = vpop.permute.xlu1 %345  ;;  %v377_v37 = vmul.f32 %v1605_v44, %v376_v25 }
  0xa9   : > { %v338_v35 = vpop.permute.xlu0 %337  ;;  %v314_v42 = vadd.f32 %v312_v6, %v286_v29  ;;  %v442_v43 = vmul.f32 %v1437_v30, %v441_v26  ;;  %v395_v44 = vmul.f32 %v1437_v30, %v394_v40  ;;  %v437_v6 = vrot.slane %v435_v45, 1 }
  0xaa   : > { %v348_v21 = vadd.f32 %v346_v0, %v324_v32  ;;  %v340_v41 = vadd.f32 %v338_v35, %v320_v33  ;;  %v307_v34 = vadd.f32 %v305_v15, %v282_v31  ;;  %v458_v23 = vrot.slane %v456_v1, 1 }
  0xab   : > { %v332_v49 = vadd.f32 %v331_v7, %v314_v42  ;;  %v444_v62 = vrot.slane %v442_v43, 1  ;;  %v449_v7 = vmul.f32 %v1437_v30, %v448_v56  ;;  %v516_v30 = vstv %s1657_s5  ;;  %v1223_v42 = vld [vmem:[%s1406_s25 + $0x1a] sm:$0x3]  ;;  %s1748_s5 = sld [smem:[#allocation2 + $0x39]] }
  0xac   : > { %v374_v47 = vadd.f32 %v373_v59, %v348_v21  ;;  %v370_v48 = vadd.f32 %v369_v4, %v340_v41  ;;  %v328_v52 = vadd.f32 %v327_v24, %v307_v34  ;;  %v362_v53 = vpop.permute.xlu1 %361  ;;  %v1205_v4 = vld [vmem:[%s1406_s25 + $0xa] sm:$0x3]  ;;  %v550_v29 = vstv %s1662_s6  ;;  %s1750_s6 = sld [smem:[#allocation2 + $0x85]] }
  0xad   : > { %v354_v54 = vpop.permute.xlu0 %353  ;;  %v364_v57 = vadd.f32 %v362_v53, %v332_v49  ;;  %v505_v15 = vmul.f32 %v1205_v4, %v504_v63  ;;  %v451_v19 = vrot.slane %v449_v7, 1  ;;  %v501_v26 = vmul.f32 %v1205_v4, %v500_v9 }
  0xae   : > { %v356_v58 = vadd.f32 %v354_v54, %v328_v52  ;;  %v392_v61 = vadd.f32 %v391_v36, %v374_v47  ;;  %v388_v59 = vadd.f32 %v387_v38, %v370_v48  ;;  %v524_v27 = vmul.f32 %v1205_v4, %v523_v10 }
  0xaf   : > { %v382_v2 = vadd.f32 %v381_v14, %v364_v57  ;;  %v537_v31 = vstv %s1664_s7  ;;  %v517_v0 = vmul.f32 %v1205_v4, %v516_v30  ;;  %v530_v35 = vstv %s1666_s8  ;;  %s1752_s7 = sld [smem:[#allocation2 + $0x61]]  ;;  %s1756_s8 = sld [smem:[#allocation2 + $0x3a]] }
  0xb0   : > { %v378_v3 = vadd.f32 %v377_v37, %v356_v58  ;;  %v414_v8 = vpop.permute.xlu1 %413  ;;  %v513_v36 = vmul.f32 %v1205_v4, %v512_v16  ;;  %v509_v38 = vmul.f32 %v1205_v4, %v508_v17  ;;  %v546_v40 = vstv %s1672_s12  ;;  %s1762_s12 = sld [smem:[#allocation2 + $0x16]] }
  0xb1   : > { %v406_v5 = vpop.permute.xlu0 %405  ;;  %v416_v11 = vadd.f32 %v414_v8, %v392_v61  ;;  %v400_v13 = vadd.f32 %v399_v55, %v382_v2  ;;  %v596_v34 = vstv %s1676_s13  ;;  %v538_v37 = vmul.f32 %v1205_v4, %v537_v31  ;;  %s1766_s13 = sld [smem:[#allocation2 + $0x81]] }
  0xb2   : > { %v408_v12 = vadd.f32 %v406_v5, %v388_v59  ;;  %v396_v14 = vadd.f32 %v395_v44, %v378_v3  ;;  %v526_v46 = vrot.slane %v524_v27, 1  ;;  %v551_v47 = vmul.f32 %v1456_v51, %v550_v29 }
  0xb3   : > { %v446_v20 = vadd.f32 %v444_v62, %v416_v11  ;;  %v558_v48 = vstv %s1680_s14  ;;  %v531_v49 = vmul.f32 %v1205_v4, %v530_v35  ;;  %v519_v54 = vrot.slane %v517_v0, 1  ;;  %s1768_s14 = sld [smem:[#allocation2 + $0x82]] }
  0xb4   : > { %v439_v22 = vadd.f32 %v437_v6, %v408_v12  ;;  %v430_v24 = vpop.permute.xlu1 %429  ;;  %v608_v55 = vstv %s1682_s15  ;;  %v601_v44 = vmul.f32 %v1223_v42, %v600_v39  ;;  %v547_v56 = vmul.f32 %v1456_v51, %v546_v40  ;;  %s1773_s15 = sld [smem:[#allocation2 + $0x5d]] }
  0xb5   : > { %v422_v25 = vpop.permute.xlu0 %421  ;;  %v432_v32 = vadd.f32 %v430_v24, %v400_v13  ;;  %v597_v57 = vmul.f32 %v1223_v42, %v596_v34  ;;  %v554_v58 = vstv %s1687_s16  ;;  %v540_v62 = vrot.slane %v538_v37, 1  ;;  %s1777_s16 = sld [smem:[#allocation2 + $0x3f]] }
  0xb6   : > { %v424_v33 = vadd.f32 %v422_v25, %v396_v14  ;;  %v559_v63 = vmul.f32 %v1456_v51, %v558_v48  ;;  %v609_v3 = vmul.f32 %v1223_v42, %v608_v55  ;;  %v533_v4 = vrot.slane %v531_v49, 1 }
  0xb7   : > { %v460_v21 = vadd.f32 %v458_v23, %v432_v32  ;;  %v618_v6 = vstv %s1691_s17  ;;  %v614_v7 = vstv %s1693_s18  ;;  %v555_v11 = vmul.f32 %v1456_v51, %v554_v58  ;;  %s1779_s17 = sld [smem:[#allocation2 + $0x1b]]  ;;  %s1782_s18 = sld [smem:[#allocation2 + $0x5e]] }
  0xb8   : > { %v453_v41 = vadd.f32 %v451_v19, %v424_v33  ;;  %v476_v43 = vpop.permute.xlu1 %475  ;;  %v604_v12 = vstv %s1696_s19  ;;  %v669_v13 = vstv %s1700_s20  ;;  %v662_v14 = vstv %s1702_s21  ;;  %s1786_s19 = sld [smem:[#allocation2 + $0x45]]  ;;  %s1788_s20 = sld [smem:[#allocation2 + $0x21]] }
  0xb9   : > { %v467_v45 = vpop.permute.xlu0 %466  ;;  %v478_v52 = vadd.f32 %v476_v43, %v446_v20  ;;  %v619_v23 = vmul.f32 %v1467_v60, %v618_v6  ;;  %v615_v19 = vmul.f32 %v1467_v60, %v614_v7  ;;  %v626_v24 = vstv %s1708_s22  ;;  %s1794_s21 = sld [smem:[#allocation2 + $0x87]]  ;;  %s1796_s22 = sld [smem:[#allocation2 + $0x63]] }
  0xba   : > { %v469_v53 = vadd.f32 %v467_v45, %v439_v22  ;;  %v622_v25 = vstv %s1710_s23  ;;  %v605_v31 = vmul.f32 %v1223_v42, %v604_v12  ;;  %v670_v32 = vmul.f32 %v1467_v60, %v669_v13  ;;  %s1801_s23 = sld [smem:[#allocation2 + $0x8d]] }
  0xbb   : > { %v506_v61 = vadd.f32 %v505_v15, %v478_v52  ;;  %v663_v33 = vmul.f32 %v1467_v60, %v662_v14  ;;  %v683_v0 = vstv %s1715_s24  ;;  %v623_v42 = vmul.f32 %v1467_v60, %v622_v25  ;;  %s1806_s24 = sld [smem:[#allocation2 + $0x69]] }
  0xbc   : > { %v502_v59 = vadd.f32 %v501_v26, %v469_v53  ;;  %v494_v1 = vpop.permute.xlu1 %493  ;;  %v676_v34 = vstv %s1720_s26  ;;  %v732_v48 = vstv %s1725_s27  ;;  %v684_v49 = vmul.f32 %v1467_v60, %v683_v0  ;;  %s1816_s26 = sld [smem:[#allocation2 + $0x46]]  ;;  %s1818_s27 = sld [smem:[#allocation2 + $0x22]] }
  0xbd   : > { %v485_v2 = vpop.permute.xlu0 %484  ;;  %v496_v8 = vadd.f32 %v494_v1, %v460_v21  ;;  %v528_v9 = vadd.f32 %v526_v46, %v506_v61  ;;  %v665_v55 = vrot.slane %v663_v33, 1  ;;  %v728_v58 = vstv %s1732_s28  ;;  %s1821_s28 = sld [smem:[#allocation2 + $0x40]] }
  0xbe   : > { %v487_v5 = vadd.f32 %v485_v2, %v453_v41  ;;  %v521_v10 = vadd.f32 %v519_v54, %v502_v59  ;;  %v627_v41 = vmul.f32 %v1467_v60, %v626_v24  ;;  %v1245_v54 = vld [vmem:[%s1406_s25 + $0xc] sm:$0x3]  ;;  %v751_v61 = vstv %s1734_s29  ;;  %s1824_s29 = sld [smem:[#allocation2 + $0x1c]] }
  0xbf   : > { %v514_v15 = vadd.f32 %v513_v36, %v496_v8  ;;  %v552_v17 = vadd.f32 %v551_v47, %v528_v9  ;;  %v672_v47 = vrot.slane %v670_v32, 1  ;;  %v733_v2 = vmul.f32 %v1245_v54, %v732_v48 }
  0xc0   : > { %v510_v16 = vadd.f32 %v509_v38, %v487_v5  ;;  %v548_v30 = vadd.f32 %v547_v56, %v521_v10  ;;  %v574_v20 = vpop.permute.xlu1 %573  ;;  %v686_v8 = vrot.slane %v684_v49, 1  ;;  %v752_v12 = vmul.f32 %v1245_v54, %v751_v61 }
  0xc1   : > { %v566_v22 = vpop.permute.xlu0 %565  ;;  %v576_v51 = vadd.f32 %v574_v20, %v552_v17  ;;  %v542_v27 = vadd.f32 %v540_v62, %v514_v15  ;;  %v778_v13 = vstv %s1748_s5  ;;  %v765_v14 = vstv %s1750_s6  ;;  %s1837_s5 = sld [smem:[#allocation2 + $0x64]]  ;;  %s1840_s6 = sld [smem:[#allocation2 + $0x42]] }
  0xc2   : > { %v568_v26 = vadd.f32 %v566_v22, %v548_v30  ;;  %v535_v29 = vadd.f32 %v533_v4, %v510_v16  ;;  %v736_v4 = vstv %s1741_s3  ;;  %v758_v30 = vstv %s1752_s7  ;;  %s1832_s3 = sld [smem:[#allocation2 + $0x6a]]  ;;  %s1842_s7 = sld [smem:[#allocation2 + $0x1e]] }
  0xc3   : > { %v602_v35 = vadd.f32 %v601_v44, %v576_v51  ;;  %v560_v38 = vadd.f32 %v559_v63, %v542_v27  ;;  %v677_v44 = vmul.f32 %v1467_v60, %v676_v34  ;;  %v744_v60 = vstv %s1743_s4  ;;  %v1263_v51 = vld [vmem:[%s1406_s25 + $0x1c] sm:$0x3]  ;;  %s1835_s4 = sld [smem:[#allocation2 + $0x88]] }
  0xc4   : > { %v598_v36 = vadd.f32 %v597_v57, %v568_v26  ;;  %v556_v39 = vadd.f32 %v555_v11, %v535_v29  ;;  %v590_v40 = vpop.permute.xlu1 %589  ;;  %v729_v11 = vmul.f32 %v1245_v54, %v728_v58  ;;  %v745_v17 = vmul.f32 %v1245_v54, %v744_v60 }
  0xc5   : > { %v582_v21 = vpop.permute.xlu0 %581  ;;  %v592_v37 = vadd.f32 %v590_v40, %v560_v38  ;;  %v620_v45 = vadd.f32 %v619_v23, %v602_v35  ;;  %v679_v5 = vrot.slane %v677_v44, 1  ;;  %v737_v22 = vmul.f32 %v1245_v54, %v736_v4 }
  0xc6   : > { %v584_v43 = vadd.f32 %v582_v21, %v556_v39  ;;  %v616_v46 = vadd.f32 %v615_v19, %v598_v36  ;;  %v828_v23 = vstv %s1756_s8  ;;  %v774_v19 = vstv %s1758_s11  ;;  %s1845_s8 = sld [smem:[#allocation2 + $0x43]]  ;;  %s1849_s11 = sld [smem:[#allocation2 + $0x1f]] }
  0xc7   : > { %v610_v52 = vadd.f32 %v609_v3, %v592_v37  ;;  %v740_v3 = vstv %s1736_s30  ;;  %v824_v26 = vstv %s1762_s12  ;;  %v766_v27 = vmul.f32 %v1245_v54, %v765_v14  ;;  %s1830_s30 = sld [smem:[#allocation2 + $0x8e]]  ;;  %s1853_s12 = sld [smem:[#allocation2 + $0x8a]] }
  0xc8   : > { %v606_v53 = vadd.f32 %v605_v31, %v584_v43  ;;  %v642_v56 = vpop.permute.xlu1 %641  ;;  %v741_v20 = vmul.f32 %v1245_v54, %v740_v3  ;;  %v754_v32 = vrot.slane %v752_v12, 1  ;;  %v779_v33 = vmul.f32 %v1486_v18, %v778_v13 }
  0xc9   : > { %v634_v57 = vpop.permute.xlu0 %633  ;;  %v644_v59 = vadd.f32 %v642_v56, %v620_v45  ;;  %v628_v63 = vadd.f32 %v627_v41, %v610_v52  ;;  %v786_v0 = vstv %s1766_s13  ;;  %v759_v35 = vmul.f32 %v1245_v54, %v758_v30  ;;  %s1855_s13 = sld [smem:[#allocation2 + $0x66]] }
  0xca   : > { %v636_v62 = vadd.f32 %v634_v57, %v616_v46  ;;  %v624_v1 = vadd.f32 %v623_v42, %v606_v53  ;;  %v747_v39 = vrot.slane %v745_v17, 1  ;;  %v836_v40 = vstv %s1768_s14  ;;  %s1861_s14 = sld [smem:[#allocation2 + $0x8b]] }
  0xcb   : > { %v674_v6 = vadd.f32 %v672_v47, %v644_v59  ;;  %v829_v21 = vmul.f32 %v1263_v51, %v828_v23  ;;  %v775_v41 = vmul.f32 %v1486_v18, %v774_v19  ;;  %v825_v42 = vmul.f32 %v1263_v51, %v824_v26 }
  0xcc   : > { %v667_v7 = vadd.f32 %v665_v55, %v636_v62  ;;  %v658_v9 = vpop.permute.xlu1 %657  ;;  %v782_v34 = vstv %s1773_s15  ;;  %v768_v45 = vrot.slane %v766_v27, 1  ;;  %v787_v46 = vmul.f32 %v1486_v18, %v786_v0  ;;  %s1863_s15 = sld [smem:[#allocation2 + $0x67]] }
  0xcd   : > { %v650_v10 = vpop.permute.xlu0 %649  ;;  %v660_v15 = vadd.f32 %v658_v9, %v628_v63  ;;  %v837_v49 = vmul.f32 %v1263_v51, %v836_v40  ;;  %v761_v52 = vrot.slane %v759_v35, 1  ;;  %v846_v53 = vstv %s1777_s16 }
  0xce   : > { %v652_v16 = vadd.f32 %v650_v10, %v624_v1  ;;  %v842_v54 = vstv %s1779_s17  ;;  %v783_v58 = vmul.f32 %v1486_v18, %v782_v34  ;;  %v832_v61 = vstv %s1782_s18 }
  0xcf   : > { %v688_v24 = vadd.f32 %v686_v8, %v660_v15  ;;  %v897_v59 = vstv %s1786_s19  ;;  %v890_v62 = vstv %s1788_s20  ;;  %v854_v8 = vstv %s1794_s21 }
  0xd0   : > { %v681_v25 = vadd.f32 %v679_v5, %v652_v16  ;;  %v704_v29 = vpop.permute.xlu1 %703  ;;  %v850_v5 = vstv %s1796_s22  ;;  %v833_v12 = vmul.f32 %v1263_v51, %v832_v61  ;;  %v898_v13 = vmul.f32 %v1497_v28, %v897_v59 }
  0xd1   : > { %v695_v31 = vpop.permute.xlu0 %694  ;;  %v706_v36 = vadd.f32 %v704_v29, %v674_v6  ;;  %v847_v6 = vmul.f32 %v1497_v28, %v846_v53  ;;  %v891_v14 = vmul.f32 %v1497_v28, %v890_v62  ;;  %v911_v15 = vstv %s1801_s23 }
  0xd2   : > { %v697_v38 = vadd.f32 %v695_v31, %v667_v7  ;;  %v843_v7 = vmul.f32 %v1497_v28, %v842_v54  ;;  %v855_v19 = vmul.f32 %v1497_v28, %v854_v8  ;;  %v900_v31 = vrot.slane %v898_v13, 1 }
  0xd3   : > { %v734_v37 = vadd.f32 %v733_v2, %v706_v36  ;;  %v893_v35 = vrot.slane %v891_v14, 1  ;;  %v979_v40 = vstv %s1816_s26  ;;  %v968_v62 = vstv %s1835_s4 }
  0xd4   : > { %v730_v43 = vadd.f32 %v729_v11, %v697_v38  ;;  %v722_v47 = vpop.permute.xlu1 %721  ;;  %v1056_v8 = vstv %s1845_s8  ;;  %v1052_v13 = vstv %s1849_s11 }
  0xd5   : > { %v713_v48 = vpop.permute.xlu0 %712  ;;  %v724_v55 = vadd.f32 %v722_v47, %v688_v24  ;;  %v756_v56 = vadd.f32 %v754_v32, %v734_v37  ;;  %v851_v24 = vmul.f32 %v1497_v28, %v850_v5  ;;  %v912_v32 = vmul.f32 %v1497_v28, %v911_v15 }
  0xd6   : > { %v715_v44 = vadd.f32 %v713_v48, %v681_v25  ;;  %v749_v57 = vadd.f32 %v747_v39, %v730_v43  ;;  %v904_v25 = vstv %s1806_s24  ;;  %v1285_v43 = vld [vmem:[%s1406_s25 + $0xe] sm:$0x3] }
  0xd7   : > { %v742_v63 = vadd.f32 %v741_v20, %v724_v55  ;;  %v780_v2 = vadd.f32 %v779_v33, %v756_v56  ;;  %v905_v36 = vmul.f32 %v1497_v28, %v904_v25  ;;  %v960_v28 = vstv %s1821_s28 }
  0xd8   : > { %v738_v1 = vadd.f32 %v737_v22, %v715_v44  ;;  %v776_v3 = vadd.f32 %v775_v41, %v749_v57  ;;  %v802_v4 = vpop.permute.xlu1 %801  ;;  %v914_v48 = vrot.slane %v912_v32, 1  ;;  %v980_v54 = vmul.f32 %v1285_v43, %v979_v40 }
  0xd9   : > { %v794_v60 = vpop.permute.xlu0 %793  ;;  %v804_v18 = vadd.f32 %v802_v4, %v780_v2  ;;  %v770_v10 = vadd.f32 %v768_v45, %v742_v63  ;;  %v956_v45 = vstv %s1824_s29  ;;  %v993_v57 = vstv %s1830_s30 }
  0xda   : > { %v796_v9 = vadd.f32 %v794_v60, %v776_v3  ;;  %v763_v11 = vadd.f32 %v761_v52, %v738_v1  ;;  %v961_v61 = vmul.f32 %v1285_v43, %v960_v28  ;;  %v957_v59 = vmul.f32 %v1285_v43, %v956_v45 }
  0xdb   : > { %v830_v16 = vadd.f32 %v829_v21, %v804_v18  ;;  %v788_v30 = vadd.f32 %v787_v46, %v770_v10  ;;  %v972_v21 = vstv %s1818_s27  ;;  %v964_v63 = vstv %s1837_s5 }
  0xdc   : > { %v826_v17 = vadd.f32 %v825_v42, %v796_v9  ;;  %v784_v20 = vadd.f32 %v783_v58, %v763_v11  ;;  %v818_v22 = vpop.permute.xlu1 %817  ;;  %v973_v55 = vmul.f32 %v1285_v43, %v972_v21  ;;  %v986_v58 = vstv %s1832_s3  ;;  %v1303_v11 = vld [vmem:[%s1406_s25 + $0x1e] sm:$0x3]  ;;  %s1149_s25 = sshll.u32 %s1894_s10, 2 }
  0xdd   : > { %v810_v23 = vpop.permute.xlu0 %809  ;;  %v820_v51 = vadd.f32 %v818_v22, %v788_v30  ;;  %v848_v27 = vadd.f32 %v847_v6, %v830_v16  ;;  %v1006_v3 = vstv %s1840_s6  ;;  %v1002_v4 = vstv %s1842_s7  ;;  %s155_s18 = scalar_lea.vmem %s1891_s2, %s1149_s25 }
  0xde   : > { %v812_v26 = vadd.f32 %v810_v23, %v784_v20  ;;  %v844_v29 = vadd.f32 %v843_v7, %v826_v17  ;;  %v982_v7 = vrot.slane %v980_v54, 1  ;;  %v994_v5 = vmul.f32 %v1285_v43, %v993_v57 }
  0xdf   : > { %v838_v33 = vadd.f32 %v837_v49, %v820_v51  ;;  %v907_v49 = vrot.slane %v905_v36, 1  ;;  %v987_v18 = vmul.f32 %v1285_v43, %v986_v58  ;;  %v969_v14 = vmul.f32 %v1285_v43, %v968_v62 }
  0xe0   : > { %v834_v0 = vadd.f32 %v833_v12, %v812_v26  ;;  %v870_v38 = vpop.permute.xlu1 %869  ;;  %v975_v12 = vrot.slane %v973_v55, 1  ;;  %v965_v15 = vmul.f32 %v1285_v43, %v964_v63  ;;  %v1007_v16 = vmul.f32 %v1516_v50, %v1006_v3 }
  0xe1   : > { %v862_v39 = vpop.permute.xlu0 %861  ;;  %v872_v41 = vadd.f32 %v870_v38, %v848_v27  ;;  %v856_v34 = vadd.f32 %v855_v19, %v838_v33  ;;  %v1003_v17 = vmul.f32 %v1516_v50, %v1002_v4  ;;  %v1014_v22 = vstv %s1853_s12 }
  0xe2   : > { %v864_v42 = vadd.f32 %v862_v39, %v844_v29  ;;  %v852_v37 = vadd.f32 %v851_v24, %v834_v0  ;;  %v1010_v23 = vstv %s1855_s13  ;;  %v1057_v25 = vmul.f32 %v1303_v11, %v1056_v8 }
  0xe3   : > { %v902_v46 = vadd.f32 %v900_v31, %v872_v41  ;;  %v1053_v51 = vmul.f32 %v1303_v11, %v1052_v13  ;;  %v996_v26 = vrot.slane %v994_v5, 1  ;;  %v989_v27 = vrot.slane %v987_v18, 1 }
  0xe4   : > { %v895_v47 = vadd.f32 %v893_v35, %v864_v42  ;;  %v886_v52 = vpop.permute.xlu1 %885  ;;  %v1015_v0 = vmul.f32 %v1516_v50, %v1014_v22  ;;  %v1064_v35 = vstv %s1861_s14  ;;  %v1011_v36 = vmul.f32 %v1516_v50, %v1010_v23 }
  0xe5   : > { %v878_v53 = vpop.permute.xlu0 %877  ;;  %v888_v44 = vadd.f32 %v886_v52, %v856_v34  ;;  %v1060_v38 = vstv %s1863_s15 }
  0xe6   : > { %v880_v56 = vadd.f32 %v878_v53, %v852_v37 }
  0xe7   : > { %v916_v1 = vadd.f32 %v914_v48, %v888_v44 }
  0xe8   : > { %v909_v2 = vadd.f32 %v907_v49, %v880_v56  ;;  %v932_v60 = vpop.permute.xlu1 %931 }
  0xe9   : > { %v923_v6 = vpop.permute.xlu0 %922  ;;  %v934_v9 = vadd.f32 %v932_v60, %v902_v46  ;;  %v1065_v46 = vmul.f32 %v1303_v11, %v1064_v35 }
  0xea   : > { %v925_v10 = vadd.f32 %v923_v6, %v895_v47  ;;  %v1061_v47 = vmul.f32 %v1303_v11, %v1060_v38 }
  0xeb   : > { %v962_v30 = vadd.f32 %v961_v61, %v934_v9 }
  0xec   : > { %v958_v20 = vadd.f32 %v957_v59, %v925_v10  ;;  %v950_v19 = vpop.permute.xlu1 %949 }
  0xed   : > { %v941_v24 = vpop.permute.xlu0 %940  ;;  %v952_v29 = vadd.f32 %v950_v19, %v916_v1  ;;  %v984_v32 = vadd.f32 %v982_v7, %v962_v30 }
  0xee   : > { %v943_v31 = vadd.f32 %v941_v24, %v909_v2  ;;  %v977_v33 = vadd.f32 %v975_v12, %v958_v20 }
  0xef   : > { %v970_v39 = vadd.f32 %v969_v14, %v952_v29  ;;  %v1008_v21 = vadd.f32 %v1007_v16, %v984_v32 }
  0xf0   : > { %v966_v40 = vadd.f32 %v965_v15, %v943_v31  ;;  %v1004_v41 = vadd.f32 %v1003_v17, %v977_v33  ;;  %v1030_v42 = vpop.permute.xlu1 %1029 }
  0xf1   : > { %v1022_v34 = vpop.permute.xlu0 %1021  ;;  %v1032_v37 = vadd.f32 %v1030_v42, %v1008_v21  ;;  %v998_v28 = vadd.f32 %v996_v26, %v970_v39 }
  0xf2   : > { %v1024_v43 = vadd.f32 %v1022_v34, %v1004_v41  ;;  %v991_v45 = vadd.f32 %v989_v27, %v966_v40 }
  0xf3   : > { %v1058_v50 = vadd.f32 %v1057_v25, %v1032_v37  ;;  %v1016_v49 = vadd.f32 %v1015_v0, %v998_v28 }
  0xf4   : > { %v1054_v48 = vadd.f32 %v1053_v51, %v1024_v43  ;;  %v1012_v52 = vadd.f32 %v1011_v36, %v991_v45  ;;  %v1046_v53 = vpop.permute.xlu1 %1045 }
  0xf5   : > { %v1038_v54 = vpop.permute.xlu0 %1037  ;;  %1308 = vst.msk [vmem:[%s155_s18 + $0x1] sm:$0x1] %vm1067_vm0, %v1058_v50  ;;  %v1048_v55 = vadd.f32 %v1046_v53, %v1016_v49 }
  0xf6   : > { %1068 = vst.msk [vmem:[%s155_s18] sm:$0x1] %vm1067_vm0, %v1054_v48  ;;  %v1040_v44 = vadd.f32 %v1038_v54, %v1012_v52 }
  0xf7   : > { %v1066_v56 = vadd.f32 %v1065_v46, %v1048_v55 }
  0xf8   : > { %v1062_v57 = vadd.f32 %v1061_v47, %v1040_v44 }
  0xf9   : > { %1310 = vst.msk [vmem:[%s155_s18 + $0x3] sm:$0x1] %vm1067_vm0, %v1066_v56 }
  0xfa   : > { %1309 = vst.msk [vmem:[%s155_s18 + $0x2] sm:$0x1] %vm1067_vm0, %v1062_v57 }
  0xfb PF: > { %s13_s9 = sadd.s32 1, %s1359_s9  }
  0xfc   : > { %p10_p1 = scmp.ge.s32.totalorder %s13_s9, 4  }
  0xfe   :  { %12 = sbr.rel (!%p10_p1) target bundleno = 1 (0x1), region = 81 }
 0x105   :  { %1094 = vsyncpa [#allocation3], 1 }
 0x106   :  { %1096 = vsyncpa [#allocation3 + $0x1], 1 }

</bundles_post_ra>
